<compile_context>
chip_gen: v7x
topology: tpu7x:2x2x1
jax: 0.10.0
libtpu: 0.0.40
codegen_flags: <defaults>
</compile_context>

<pallas_src>
import jax
import jax.numpy as jnp
from jax.experimental import pallas as pl
from jax.experimental.pallas import tpu as pltpu


# ----------------------------- Pallas kernel --------------------------------

def make_dense_block_kernel(num_layers, C0, growth, H, W, cb, pad_off):
    m_pix = H * W
    taps = [(dy - 1, dx - 1) for dy in range(3) for dx in range(3)]  # (oy, ox)

    def kernel(*refs):
        x_ref, ml_ref, mr_ref = refs[0], refs[1], refs[2]
        layer_refs = refs[3:3 + 6 * num_layers]
        out_ref = refs[3 + 6 * num_layers]          # (m_pix, c_total) f32 block
        pad_ref = refs[4 + 6 * num_layers]          # VMEM scratch (m_pix+2*pad_off, cb)

        pad_ref[...] = jnp.zeros_like(pad_ref)      # borders stay zero for all layers
        mask_l = ml_ref[...]                        # (m_pix, 1) f32: valid when ox=-1
        mask_r = mr_ref[...]                        # (m_pix, 1) f32: valid when ox=+1

        # The output block doubles as the on-chip concat slab: copy the input channels
        # in once; each layer appends its growth-wide slice below.
        out_ref[:, :C0] = x_ref[...]

        for l in range(num_layers):
            cin = C0 + l * growth
            s1, b1, w1, s2, b2, w2 = layer_refs[6 * l:6 * l + 6]

            # BN1 + ReLU (f32) over exactly the channels produced so far.
            feat = out_ref[:, :cin]                                  # (m_pix, cin)
            h = jnp.maximum(feat * s1[...] + b1[...], 0.0)
            # 1x1 conv on the MXU, K = cin exactly (bf16 x bf16 -> f32 accumulate).
            b = jnp.dot(h.astype(jnp.bfloat16), w1[...],
                        preferred_element_type=jnp.float32)          # (m_pix, cb)
            # BN2 + ReLU (f32).
            b = jnp.maximum(b * s2[...] + b2[...], 0.0)

            # 3x3 conv (padding=1): write the bottleneck into a zero-padded flat buffer
            # and accumulate 9 shifted matmuls with NARROW output width = growth.
            pad_ref[pad_off:pad_off + m_pix, :] = b
            acc = jnp.zeros((m_pix, growth), jnp.float32)
            for t, (oy, ox) in enumerate(taps):
                start = pad_off + oy * W + ox                        # static per tap
                win = pad_ref[start:start + m_pix, :]                # (m_pix, cb) f32
                if ox == -1:
                    win = win * mask_l
                elif ox == 1:
                    win = win * mask_r
                acc = acc + jnp.dot(win.astype(jnp.bfloat16), w2[t],
                                    preferred_element_type=jnp.float32)
            # Append this layer's new features into the concat slab.
            out_ref[:, cin:cin + growth] = acc

    return kernel


def _const_spec(shape):
    # Full-array block, constant across the grid -> DMA'd once, stays VMEM-resident.
    rank = len(shape)
    return pl.BlockSpec(shape, lambda n, _r=rank: (0,) * _r)


# ------------------------------ Model wrapper --------------------------------

def dense_block_apply(x_nchw, layer_params):
    """_DenseBlock forward (eval mode). Input/output are NCHW like PyTorch."""
    N, C0, H, W = x_nchw.shape
    num_layers = len(layer_params)
    cb = layer_params[0]["w1"].shape[1]              # bn_size * growth_rate
    growth = layer_params[0]["w2"].shape[-1]
    c_total = C0 + num_layers * growth
    m_pix = H * W
    pad_off = ((W + 1 + 7) // 8) * 8                 # sublane-aligned pad >= W+1

    # NCHW -> flat (N*H*W, C0); NO padding to c_total (the kernel fills the slab).
    x_flat = jnp.transpose(x_nchw, (0, 2, 3, 1)).reshape(N * m_pix, C0)

    # Column-edge masks for the 3x3 taps (hoisted out of the kernel body).
    xs = jnp.arange(m_pix, dtype=jnp.int32) % W
    mask_l = (xs >= 1).astype(jnp.float32).reshape(m_pix, 1)       # valid when ox == -1
    mask_r = (xs <= W - 2).astype(jnp.float32).reshape(m_pix, 1)   # valid when ox == +1

    inputs = [x_flat, mask_l, mask_r]
    in_specs = [
        pl.BlockSpec((m_pix, C0), lambda n: (n, 0)),
        _const_spec((m_pix, 1)),
        _const_spec((m_pix, 1)),
    ]

    for p in layer_params:
        # Exact per-layer shapes: no padding of BN params / weights to the slab width.
        w1 = p["w1"].astype(jnp.bfloat16)                          # (cin, cb)
        w2 = p["w2"].reshape(9, cb, growth).astype(jnp.bfloat16)   # (9, cb, growth)
        layer_in = [p["s1"], p["b1"], w1, p["s2"], p["b2"], w2]
        inputs += layer_in
        in_specs += [_const_spec(a.shape) for a in layer_in]

    # VMEM budget from the actual tile math (double-buffered blocks + resident weights
    # + pad scratch + margin), clamped to a generation-safe range.
    block_bytes = 2 * (m_pix * C0 * 4) + 2 * (m_pix * c_total * 4)
    weight_bytes = 2 * sum(int(a.size) * a.dtype.itemsize for a in inputs[1:])
    scratch_bytes = (m_pix + 2 * pad_off) * cb * 4
    vmem_limit = int(min(112 * 2**20,
                         max(32 * 2**20,
                             2 * (block_bytes + weight_bytes + scratch_bytes))))

    kernel = make_dense_block_kernel(num_layers, C0, growth, H, W, cb, pad_off)
    out_flat = pl.pallas_call(
        kernel,
        out_shape=jax.ShapeDtypeStruct((N * m_pix, c_total), jnp.float32),
        grid=(N,),
        in_specs=in_specs,
        out_specs=pl.BlockSpec((m_pix, c_total), lambda n: (n, 0)),
        scratch_shapes=[pltpu.VMEM((m_pix + 2 * pad_off, cb), jnp.float32)],
        compiler_params=pltpu.CompilerParams(
            dimension_semantics=("parallel",),
            vmem_limit_bytes=vmem_limit),
    )(*inputs)

    out = out_flat.reshape(N, H, W, c_total)
    return jnp.transpose(out, (0, 3, 1, 2))          # NHWC -> NCHW


# --------------------------- Reference (pure JAX) ----------------------------

def dense_block_reference(x_nchw, layer_params):
    """Pure-JAX reference at matched precision (bf16 MXU operands, f32 accumulate)."""
    x = jnp.transpose(x_nchw, (0, 2, 3, 1))
    feats = [x]
    for p in layer_params:
        cat = jnp.concatenate(feats, axis=-1)
        h = jnp.maximum(cat * p["s1"][0] + p["b1"][0], 0.0)
        b = jnp.einsum("nhwc,cd->nhwd", h.astype(jnp.bfloat16),
                       p["w1"].astype(jnp.bfloat16),
                       preferred_element_type=jnp.float32)
        b = jnp.maximum(b * p["s2"][0] + p["b2"][0], 0.0)
        o = jax.lax.conv_general_dilated(
            b.astype(jnp.bfloat16), p["w2"].astype(jnp.bfloat16),
            window_strides=(1, 1), padding="SAME",
            dimension_numbers=("NHWC", "HWIO", "NHWC"),
            preferred_element_type=jnp.float32)
        feats.append(o)
    return jnp.transpose(jnp.concatenate(feats, axis=-1), (0, 3, 1, 2))


# ---------------------------- Parameter init --------------------------------

def init_params(key, num_layers, c0, bn_size, growth, eps=1e-5):
    """Deterministic synthetic params; BatchNorm folded to scale/bias (eval mode)."""
    params = []
    for i in range(num_layers):
        cin = c0 + i * growth
        cb = bn_size * growth
        ks = jax.random.split(jax.random.fold_in(key, i), 10)
        g1 = jax.random.uniform(ks[0], (cin,), minval=0.5, maxval=1.5)
        be1 = 0.1 * jax.random.normal(ks[1], (cin,))
        m1 = 0.1 * jax.random.normal(ks[2], (cin,))
        v1 = jax.random.uniform(ks[3], (cin,), minval=0.5, maxval=1.5)
        w1 = jax.random.normal(ks[4], (cin, cb)) / jnp.sqrt(cin)
        g2 = jax.random.uniform(ks[5], (cb,), minval=0.5, maxval=1.5)
        be2 = 0.1 * jax.random.normal(ks[6], (cb,))
        m2 = 0.1 * jax.random.normal(ks[7], (cb,))
        v2 = jax.random.uniform(ks[8], (cb,), minval=0.5, maxval=1.5)
        w2 = jax.random.normal(ks[9], (3, 3, cb, growth)) / jnp.sqrt(9 * cb)
        s1 = g1 / jnp.sqrt(v1 + eps)
        b1 = be1 - m1 * s1
        s2 = g2 / jnp.sqrt(v2 + eps)
        b2 = be2 - m2 * s2
        params.append(dict(
            s1=s1[None].astype(jnp.float32), b1=b1[None].astype(jnp.float32),
            w1=w1.astype(jnp.float32),
            s2=s2[None].astype(jnp.float32), b2=b2[None].astype(jnp.float32),
            w2=w2.astype(jnp.float32)))
    return params


# ---------------------------------- Main -------------------------------------

if __name__ == "__main__":
    # _DenseBlock(num_layers=3, num_input_features=4, bn_size=2, growth_rate=4,
    #             drop_rate=0.0), eval mode; small shapes.
    # NOTE: this toy config is far below MXU/vreg widths; it validates correctness,
    # not MXU/VMEM tuning (see review item on representative DenseNet shapes).
    N, C0, H, W = 2, 4, 16, 16
    num_layers, bn_size, growth = 3, 2, 4

    key = jax.random.PRNGKey(0)
    x = jax.random.normal(jax.random.fold_in(key, 123), (N, C0, H, W),
                          dtype=jnp.float32)
    params = init_params(jax.random.fold_in(key, 7), num_layers, C0,
                         bn_size, growth)

    apply_fn = jax.jit(dense_block_apply)
    out = jax.block_until_ready(apply_fn(x, params))

    assert out.shape == (N, C0 + num_layers * growth, H, W), out.shape
    ref = dense_block_reference(x, params)
    max_err = float(jnp.max(jnp.abs(out - ref)))
    # Tolerance reflects bf16 MXU operands (reference uses matched precision).
    assert jnp.allclose(out, ref, atol=2e-2, rtol=2e-2), max_err

    print("KERNEL_OK")
</pallas_src>

<mosaic_0001>
module attributes {stable_mosaic.version = 11 : i64} {
  func.func @kernel(%arg0: i32, %arg1: memref<256x4xf32, #tpu.memory_space<vmem>>, %arg2: memref<256x1xf32, #tpu.memory_space<vmem>>, %arg3: memref<256x1xf32, #tpu.memory_space<vmem>>, %arg4: memref<1x4xf32, #tpu.memory_space<vmem>>, %arg5: memref<1x4xf32, #tpu.memory_space<vmem>>, %arg6: memref<4x8xbf16, #tpu.memory_space<vmem>>, %arg7: memref<1x8xf32, #tpu.memory_space<vmem>>, %arg8: memref<1x8xf32, #tpu.memory_space<vmem>>, %arg9: memref<9x8x4xbf16, #tpu.memory_space<vmem>>, %arg10: memref<1x8xf32, #tpu.memory_space<vmem>>, %arg11: memref<1x8xf32, #tpu.memory_space<vmem>>, %arg12: memref<8x8xbf16, #tpu.memory_space<vmem>>, %arg13: memref<1x8xf32, #tpu.memory_space<vmem>>, %arg14: memref<1x8xf32, #tpu.memory_space<vmem>>, %arg15: memref<9x8x4xbf16, #tpu.memory_space<vmem>>, %arg16: memref<1x12xf32, #tpu.memory_space<vmem>>, %arg17: memref<1x12xf32, #tpu.memory_space<vmem>>, %arg18: memref<12x8xbf16, #tpu.memory_space<vmem>>, %arg19: memref<1x8xf32, #tpu.memory_space<vmem>>, %arg20: memref<1x8xf32, #tpu.memory_space<vmem>>, %arg21: memref<9x8x4xbf16, #tpu.memory_space<vmem>>, %arg22: memref<256x16xf32, #tpu.memory_space<vmem>>, %arg23: memref<304x8xf32, #tpu.memory_space<vmem>>) attributes {dimension_semantics = [#tpu.dimension_semantics<parallel>], iteration_bounds = array<i64: 2>, scalar_prefetch = 0 : i64, scratch_operands = 1 : i64, tpu.core_type = #tpu.core_type<tc>, window_params = [{transform_indices = @transform_0, window_bounds = array<i64: 256, 4>}, {pipeline_mode = #tpu.pipeline_mode<synchronous>, transform_indices = @transform_1, window_bounds = array<i64: 256, 1>}, {pipeline_mode = #tpu.pipeline_mode<synchronous>, transform_indices = @transform_2, window_bounds = array<i64: 256, 1>}, {pipeline_mode = #tpu.pipeline_mode<synchronous>, transform_indices = @transform_3, window_bounds = array<i64: 1, 4>}, {pipeline_mode = #tpu.pipeline_mode<synchronous>, transform_indices = @transform_4, window_bounds = array<i64: 1, 4>}, {pipeline_mode = #tpu.pipeline_mode<synchronous>, transform_indices = @transform_5, window_bounds = array<i64: 4, 8>}, {pipeline_mode = #tpu.pipeline_mode<synchronous>, transform_indices = @transform_6, window_bounds = array<i64: 1, 8>}, {pipeline_mode = #tpu.pipeline_mode<synchronous>, transform_indices = @transform_7, window_bounds = array<i64: 1, 8>}, {pipeline_mode = #tpu.pipeline_mode<synchronous>, transform_indices = @transform_8, window_bounds = array<i64: 9, 8, 4>}, {pipeline_mode = #tpu.pipeline_mode<synchronous>, transform_indices = @transform_9, window_bounds = array<i64: 1, 8>}, {pipeline_mode = #tpu.pipeline_mode<synchronous>, transform_indices = @transform_10, window_bounds = array<i64: 1, 8>}, {pipeline_mode = #tpu.pipeline_mode<synchronous>, transform_indices = @transform_11, window_bounds = array<i64: 8, 8>}, {pipeline_mode = #tpu.pipeline_mode<synchronous>, transform_indices = @transform_12, window_bounds = array<i64: 1, 8>}, {pipeline_mode = #tpu.pipeline_mode<synchronous>, transform_indices = @transform_13, window_bounds = array<i64: 1, 8>}, {pipeline_mode = #tpu.pipeline_mode<synchronous>, transform_indices = @transform_14, window_bounds = array<i64: 9, 8, 4>}, {pipeline_mode = #tpu.pipeline_mode<synchronous>, transform_indices = @transform_15, window_bounds = array<i64: 1, 12>}, {pipeline_mode = #tpu.pipeline_mode<synchronous>, transform_indices = @transform_16, window_bounds = array<i64: 1, 12>}, {pipeline_mode = #tpu.pipeline_mode<synchronous>, transform_indices = @transform_17, window_bounds = array<i64: 12, 8>}, {pipeline_mode = #tpu.pipeline_mode<synchronous>, transform_indices = @transform_18, window_bounds = array<i64: 1, 8>}, {pipeline_mode = #tpu.pipeline_mode<synchronous>, transform_indices = @transform_19, window_bounds = array<i64: 1, 8>}, {pipeline_mode = #tpu.pipeline_mode<synchronous>, transform_indices = @transform_20, window_bounds = array<i64: 9, 8, 4>}, {transform_indices = @transform_21, window_bounds = array<i64: 256, 16>}]} {
    %cst = arith.constant 0.000000e+00 : f32
    %0 = vector.broadcast %cst : f32 to vector<304x8xf32>
    %c0 = arith.constant 0 : index
    %c0_0 = arith.constant 0 : index
    %1 = vector.load %arg23[%c0, %c0_0] : memref<304x8xf32, #tpu.memory_space<vmem>>, vector<304x8xf32>
    tpu.vector_store %arg23[%c0, %c0_0], %0 {strides = array<i32>} : memref<304x8xf32, #tpu.memory_space<vmem>>, vector<304x8xf32>,
    %c0_1 = arith.constant 0 : index
    %c0_2 = arith.constant 0 : index
    %2 = vector.load %arg2[%c0_1, %c0_2] : memref<256x1xf32, #tpu.memory_space<vmem>>, vector<256x1xf32>
    %c0_3 = arith.constant 0 : index
    %c0_4 = arith.constant 0 : index
    %3 = vector.load %arg3[%c0_3, %c0_4] : memref<256x1xf32, #tpu.memory_space<vmem>>, vector<256x1xf32>
    %c0_5 = arith.constant 0 : index
    %c0_6 = arith.constant 0 : index
    %4 = vector.load %arg1[%c0_5, %c0_6] : memref<256x4xf32, #tpu.memory_space<vmem>>, vector<256x4xf32>
    %c0_7 = arith.constant 0 : index
    %c0_8 = arith.constant 0 : index
    %5 = vector.load %arg22[%c0_7, %c0_8] : memref<256x16xf32, #tpu.memory_space<vmem>>, vector<256x4xf32>
    tpu.vector_store %arg22[%c0_7, %c0_8], %4 {strides = array<i32>} : memref<256x16xf32, #tpu.memory_space<vmem>>, vector<256x4xf32>,
    %c0_9 = arith.constant 0 : index
    %c0_10 = arith.constant 0 : index
    %6 = vector.load %arg22[%c0_9, %c0_10] : memref<256x16xf32, #tpu.memory_space<vmem>>, vector<256x4xf32>
    %c0_11 = arith.constant 0 : index
    %c0_12 = arith.constant 0 : index
    %7 = vector.load %arg4[%c0_11, %c0_12] : memref<1x4xf32, #tpu.memory_space<vmem>>, vector<1x4xf32>
    %8 = vector.broadcast %7 : vector<1x4xf32> to vector<256x4xf32>
    %9 = arith.mulf %6, %8 : vector<256x4xf32>
    %c0_13 = arith.constant 0 : index
    %c0_14 = arith.constant 0 : index
    %10 = vector.load %arg5[%c0_13, %c0_14] : memref<1x4xf32, #tpu.memory_space<vmem>>, vector<1x4xf32>
    %11 = vector.broadcast %10 : vector<1x4xf32> to vector<256x4xf32>
    %12 = arith.addf %9, %11 : vector<256x4xf32>
    %cst_15 = arith.constant 0.000000e+00 : f32
    %13 = vector.broadcast %cst_15 : f32 to vector<256x4xf32>
    %14 = arith.maximumf %12, %13 : vector<256x4xf32>
    %15 = arith.truncf %14 : vector<256x4xf32> to vector<256x4xbf16>
    %c0_16 = arith.constant 0 : index
    %c0_17 = arith.constant 0 : index
    %16 = vector.load %arg6[%c0_16, %c0_17] : memref<4x8xbf16, #tpu.memory_space<vmem>>, vector<4x8xbf16>
    %cst_18 = arith.constant dense<0.000000e+00> : vector<256x8xf32>
    %17 = tpu.matmul %15, %16, %cst_18 {dimension_numbers = #tpu.dot_dimension_numbers<[1], [0], [0], [1], [0, 0, 1, 1], [], []>} : vector<256x4xbf16>, vector<4x8xbf16>, vector<256x8xf32> -> vector<256x8xf32>
    %c0_19 = arith.constant 0 : index
    %c0_20 = arith.constant 0 : index
    %18 = vector.load %arg7[%c0_19, %c0_20] : memref<1x8xf32, #tpu.memory_space<vmem>>, vector<1x8xf32>
    %19 = vector.broadcast %18 : vector<1x8xf32> to vector<256x8xf32>
    %20 = arith.mulf %17, %19 : vector<256x8xf32>
    %c0_21 = arith.constant 0 : index
    %c0_22 = arith.constant 0 : index
    %21 = vector.load %arg8[%c0_21, %c0_22] : memref<1x8xf32, #tpu.memory_space<vmem>>, vector<1x8xf32>
    %22 = vector.broadcast %21 : vector<1x8xf32> to vector<256x8xf32>
    %23 = arith.addf %20, %22 : vector<256x8xf32>
    %cst_23 = arith.constant 0.000000e+00 : f32
    %24 = vector.broadcast %cst_23 : f32 to vector<256x8xf32>
    %25 = arith.maximumf %23, %24 : vector<256x8xf32>
    %c24 = arith.constant 24 : index
    %c0_24 = arith.constant 0 : index
    %26 = vector.load %arg23[%c24, %c0_24] : memref<304x8xf32, #tpu.memory_space<vmem>>, vector<256x8xf32>
    tpu.vector_store %arg23[%c24, %c0_24], %25 {strides = array<i32>} : memref<304x8xf32, #tpu.memory_space<vmem>>, vector<256x8xf32>,
    %cst_25 = arith.constant 0.000000e+00 : f32
    %27 = vector.broadcast %cst_25 : f32 to vector<256x4xf32>
    %c7 = arith.constant 7 : index
    %c0_26 = arith.constant 0 : index
    %28 = vector.load %arg23[%c7, %c0_26] : memref<304x8xf32, #tpu.memory_space<vmem>>, vector<256x8xf32>
    %29 = vector.broadcast %2 : vector<256x1xf32> to vector<256x8xf32>
    %30 = arith.mulf %28, %29 : vector<256x8xf32>
    %31 = arith.truncf %30 : vector<256x8xf32> to vector<256x8xbf16>
    %c0_27 = arith.constant 0 : index
    %c0_28 = arith.constant 0 : index
    %c0_29 = arith.constant 0 : index
    %32 = vector.load %arg9[%c0_27, %c0_28, %c0_29] : memref<9x8x4xbf16, #tpu.memory_space<vmem>>, vector<1x8x4xbf16>
    %33 = vector.shape_cast %32 : vector<1x8x4xbf16> to vector<8x4xbf16>
    %cst_30 = arith.constant dense<0.000000e+00> : vector<256x4xf32>
    %34 = tpu.matmul %31, %33, %cst_30 {dimension_numbers = #tpu.dot_dimension_numbers<[1], [0], [0], [1], [0, 0, 1, 1], [], []>} : vector<256x8xbf16>, vector<8x4xbf16>, vector<256x4xf32> -> vector<256x4xf32>
    %35 = arith.addf %27, %34 : vector<256x4xf32>
    %c8 = arith.constant 8 : index
    %c0_31 = arith.constant 0 : index
    %36 = vector.load %arg23[%c8, %c0_31] : memref<304x8xf32, #tpu.memory_space<vmem>>, vector<256x8xf32>
    %37 = arith.truncf %36 : vector<256x8xf32> to vector<256x8xbf16>
    %c1 = arith.constant 1 : index
    %c0_32 = arith.constant 0 : index
    %c0_33 = arith.constant 0 : index
    %38 = vector.load %arg9[%c1, %c0_32, %c0_33] : memref<9x8x4xbf16, #tpu.memory_space<vmem>>, vector<1x8x4xbf16>
    %39 = vector.shape_cast %38 : vector<1x8x4xbf16> to vector<8x4xbf16>
    %cst_34 = arith.constant dense<0.000000e+00> : vector<256x4xf32>
    %40 = tpu.matmul %37, %39, %cst_34 {dimension_numbers = #tpu.dot_dimension_numbers<[1], [0], [0], [1], [0, 0, 1, 1], [], []>} : vector<256x8xbf16>, vector<8x4xbf16>, vector<256x4xf32> -> vector<256x4xf32>
    %41 = arith.addf %35, %40 : vector<256x4xf32>
    %c9 = arith.constant 9 : index
    %c0_35 = arith.constant 0 : index
    %42 = vector.load %arg23[%c9, %c0_35] : memref<304x8xf32, #tpu.memory_space<vmem>>, vector<256x8xf32>
    %43 = vector.broadcast %3 : vector<256x1xf32> to vector<256x8xf32>
    %44 = arith.mulf %42, %43 : vector<256x8xf32>
    %45 = arith.truncf %44 : vector<256x8xf32> to vector<256x8xbf16>
    %c2 = arith.constant 2 : index
    %c0_36 = arith.constant 0 : index
    %c0_37 = arith.constant 0 : index
    %46 = vector.load %arg9[%c2, %c0_36, %c0_37] : memref<9x8x4xbf16, #tpu.memory_space<vmem>>, vector<1x8x4xbf16>
    %47 = vector.shape_cast %46 : vector<1x8x4xbf16> to vector<8x4xbf16>
    %cst_38 = arith.constant dense<0.000000e+00> : vector<256x4xf32>
    %48 = tpu.matmul %45, %47, %cst_38 {dimension_numbers = #tpu.dot_dimension_numbers<[1], [0], [0], [1], [0, 0, 1, 1], [], []>} : vector<256x8xbf16>, vector<8x4xbf16>, vector<256x4xf32> -> vector<256x4xf32>
    %49 = arith.addf %41, %48 : vector<256x4xf32>
    %c23 = arith.constant 23 : index
    %c0_39 = arith.constant 0 : index
    %50 = vector.load %arg23[%c23, %c0_39] : memref<304x8xf32, #tpu.memory_space<vmem>>, vector<256x8xf32>
    %51 = vector.broadcast %2 : vector<256x1xf32> to vector<256x8xf32>
    %52 = arith.mulf %50, %51 : vector<256x8xf32>
    %53 = arith.truncf %52 : vector<256x8xf32> to vector<256x8xbf16>
    %c3 = arith.constant 3 : index
    %c0_40 = arith.constant 0 : index
    %c0_41 = arith.constant 0 : index
    %54 = vector.load %arg9[%c3, %c0_40, %c0_41] : memref<9x8x4xbf16, #tpu.memory_space<vmem>>, vector<1x8x4xbf16>
    %55 = vector.shape_cast %54 : vector<1x8x4xbf16> to vector<8x4xbf16>
    %cst_42 = arith.constant dense<0.000000e+00> : vector<256x4xf32>
    %56 = tpu.matmul %53, %55, %cst_42 {dimension_numbers = #tpu.dot_dimension_numbers<[1], [0], [0], [1], [0, 0, 1, 1], [], []>} : vector<256x8xbf16>, vector<8x4xbf16>, vector<256x4xf32> -> vector<256x4xf32>
    %57 = arith.addf %49, %56 : vector<256x4xf32>
    %c24_43 = arith.constant 24 : index
    %c0_44 = arith.constant 0 : index
    %58 = vector.load %arg23[%c24_43, %c0_44] : memref<304x8xf32, #tpu.memory_space<vmem>>, vector<256x8xf32>
    %59 = arith.truncf %58 : vector<256x8xf32> to vector<256x8xbf16>
    %c4 = arith.constant 4 : index
    %c0_45 = arith.constant 0 : index
    %c0_46 = arith.constant 0 : index
    %60 = vector.load %arg9[%c4, %c0_45, %c0_46] : memref<9x8x4xbf16, #tpu.memory_space<vmem>>, vector<1x8x4xbf16>
    %61 = vector.shape_cast %60 : vector<1x8x4xbf16> to vector<8x4xbf16>
    %cst_47 = arith.constant dense<0.000000e+00> : vector<256x4xf32>
    %62 = tpu.matmul %59, %61, %cst_47 {dimension_numbers = #tpu.dot_dimension_numbers<[1], [0], [0], [1], [0, 0, 1, 1], [], []>} : vector<256x8xbf16>, vector<8x4xbf16>, vector<256x4xf32> -> vector<256x4xf32>
    %63 = arith.addf %57, %62 : vector<256x4xf32>
    %c25 = arith.constant 25 : index
    %c0_48 = arith.constant 0 : index
    %64 = vector.load %arg23[%c25, %c0_48] : memref<304x8xf32, #tpu.memory_space<vmem>>, vector<256x8xf32>
    %65 = vector.broadcast %3 : vector<256x1xf32> to vector<256x8xf32>
    %66 = arith.mulf %64, %65 : vector<256x8xf32>
    %67 = arith.truncf %66 : vector<256x8xf32> to vector<256x8xbf16>
    %c5 = arith.constant 5 : index
    %c0_49 = arith.constant 0 : index
    %c0_50 = arith.constant 0 : index
    %68 = vector.load %arg9[%c5, %c0_49, %c0_50] : memref<9x8x4xbf16, #tpu.memory_space<vmem>>, vector<1x8x4xbf16>
    %69 = vector.shape_cast %68 : vector<1x8x4xbf16> to vector<8x4xbf16>
    %cst_51 = arith.constant dense<0.000000e+00> : vector<256x4xf32>
    %70 = tpu.matmul %67, %69, %cst_51 {dimension_numbers = #tpu.dot_dimension_numbers<[1], [0], [0], [1], [0, 0, 1, 1], [], []>} : vector<256x8xbf16>, vector<8x4xbf16>, vector<256x4xf32> -> vector<256x4xf32>
    %71 = arith.addf %63, %70 : vector<256x4xf32>
    %c39 = arith.constant 39 : index
    %c0_52 = arith.constant 0 : index
    %72 = vector.load %arg23[%c39, %c0_52] : memref<304x8xf32, #tpu.memory_space<vmem>>, vector<256x8xf32>
    %73 = vector.broadcast %2 : vector<256x1xf32> to vector<256x8xf32>
    %74 = arith.mulf %72, %73 : vector<256x8xf32>
    %75 = arith.truncf %74 : vector<256x8xf32> to vector<256x8xbf16>
    %c6 = arith.constant 6 : index
    %c0_53 = arith.constant 0 : index
    %c0_54 = arith.constant 0 : index
    %76 = vector.load %arg9[%c6, %c0_53, %c0_54] : memref<9x8x4xbf16, #tpu.memory_space<vmem>>, vector<1x8x4xbf16>
    %77 = vector.shape_cast %76 : vector<1x8x4xbf16> to vector<8x4xbf16>
    %cst_55 = arith.constant dense<0.000000e+00> : vector<256x4xf32>
    %78 = tpu.matmul %75, %77, %cst_55 {dimension_numbers = #tpu.dot_dimension_numbers<[1], [0], [0], [1], [0, 0, 1, 1], [], []>} : vector<256x8xbf16>, vector<8x4xbf16>, vector<256x4xf32> -> vector<256x4xf32>
    %79 = arith.addf %71, %78 : vector<256x4xf32>
    %c40 = arith.constant 40 : index
    %c0_56 = arith.constant 0 : index
    %80 = vector.load %arg23[%c40, %c0_56] : memref<304x8xf32, #tpu.memory_space<vmem>>, vector<256x8xf32>
    %81 = arith.truncf %80 : vector<256x8xf32> to vector<256x8xbf16>
    %c7_57 = arith.constant 7 : index
    %c0_58 = arith.constant 0 : index
    %c0_59 = arith.constant 0 : index
    %82 = vector.load %arg9[%c7_57, %c0_58, %c0_59] : memref<9x8x4xbf16, #tpu.memory_space<vmem>>, vector<1x8x4xbf16>
    %83 = vector.shape_cast %82 : vector<1x8x4xbf16> to vector<8x4xbf16>
    %cst_60 = arith.constant dense<0.000000e+00> : vector<256x4xf32>
    %84 = tpu.matmul %81, %83, %cst_60 {dimension_numbers = #tpu.dot_dimension_numbers<[1], [0], [0], [1], [0, 0, 1, 1], [], []>} : vector<256x8xbf16>, vector<8x4xbf16>, vector<256x4xf32> -> vector<256x4xf32>
    %85 = arith.addf %79, %84 : vector<256x4xf32>
    %c41 = arith.constant 41 : index
    %c0_61 = arith.constant 0 : index
    %86 = vector.load %arg23[%c41, %c0_61] : memref<304x8xf32, #tpu.memory_space<vmem>>, vector<256x8xf32>
    %87 = vector.broadcast %3 : vector<256x1xf32> to vector<256x8xf32>
    %88 = arith.mulf %86, %87 : vector<256x8xf32>
    %89 = arith.truncf %88 : vector<256x8xf32> to vector<256x8xbf16>
    %c8_62 = arith.constant 8 : index
    %c0_63 = arith.constant 0 : index
    %c0_64 = arith.constant 0 : index
    %90 = vector.load %arg9[%c8_62, %c0_63, %c0_64] : memref<9x8x4xbf16, #tpu.memory_space<vmem>>, vector<1x8x4xbf16>
    %91 = vector.shape_cast %90 : vector<1x8x4xbf16> to vector<8x4xbf16>
    %cst_65 = arith.constant dense<0.000000e+00> : vector<256x4xf32>
    %92 = tpu.matmul %89, %91, %cst_65 {dimension_numbers = #tpu.dot_dimension_numbers<[1], [0], [0], [1], [0, 0, 1, 1], [], []>} : vector<256x8xbf16>, vector<8x4xbf16>, vector<256x4xf32> -> vector<256x4xf32>
    %93 = arith.addf %85, %92 : vector<256x4xf32>
    %c0_66 = arith.constant 0 : index
    %c4_67 = arith.constant 4 : index
    %94 = vector.load %arg22[%c0_66, %c4_67] : memref<256x16xf32, #tpu.memory_space<vmem>>, vector<256x4xf32>
    tpu.vector_store %arg22[%c0_66, %c4_67], %93 {strides = array<i32>} : memref<256x16xf32, #tpu.memory_space<vmem>>, vector<256x4xf32>,
    %c0_68 = arith.constant 0 : index
    %c0_69 = arith.constant 0 : index
    %95 = vector.load %arg22[%c0_68, %c0_69] : memref<256x16xf32, #tpu.memory_space<vmem>>, vector<256x8xf32>
    %c0_70 = arith.constant 0 : index
    %c0_71 = arith.constant 0 : index
    %96 = vector.load %arg10[%c0_70, %c0_71] : memref<1x8xf32, #tpu.memory_space<vmem>>, vector<1x8xf32>
    %97 = vector.broadcast %96 : vector<1x8xf32> to vector<256x8xf32>
    %98 = arith.mulf %95, %97 : vector<256x8xf32>
    %c0_72 = arith.constant 0 : index
    %c0_73 = arith.constant 0 : index
    %99 = vector.load %arg11[%c0_72, %c0_73] : memref<1x8xf32, #tpu.memory_space<vmem>>, vector<1x8xf32>
    %100 = vector.broadcast %99 : vector<1x8xf32> to vector<256x8xf32>
    %101 = arith.addf %98, %100 : vector<256x8xf32>
    %cst_74 = arith.constant 0.000000e+00 : f32
    %102 = vector.broadcast %cst_74 : f32 to vector<256x8xf32>
    %103 = arith.maximumf %101, %102 : vector<256x8xf32>
    %104 = arith.truncf %103 : vector<256x8xf32> to vector<256x8xbf16>
    %c0_75 = arith.constant 0 : index
    %c0_76 = arith.constant 0 : index
    %105 = vector.load %arg12[%c0_75, %c0_76] : memref<8x8xbf16, #tpu.memory_space<vmem>>, vector<8x8xbf16>
    %cst_77 = arith.constant dense<0.000000e+00> : vector<256x8xf32>
    %106 = tpu.matmul %104, %105, %cst_77 {dimension_numbers = #tpu.dot_dimension_numbers<[1], [0], [0], [1], [0, 0, 1, 1], [], []>} : vector<256x8xbf16>, vector<8x8xbf16>, vector<256x8xf32> -> vector<256x8xf32>
    %c0_78 = arith.constant 0 : index
    %c0_79 = arith.constant 0 : index
    %107 = vector.load %arg13[%c0_78, %c0_79] : memref<1x8xf32, #tpu.memory_space<vmem>>, vector<1x8xf32>
    %108 = vector.broadcast %107 : vector<1x8xf32> to vector<256x8xf32>
    %109 = arith.mulf %106, %108 : vector<256x8xf32>
    %c0_80 = arith.constant 0 : index
    %c0_81 = arith.constant 0 : index
    %110 = vector.load %arg14[%c0_80, %c0_81] : memref<1x8xf32, #tpu.memory_space<vmem>>, vector<1x8xf32>
    %111 = vector.broadcast %110 : vector<1x8xf32> to vector<256x8xf32>
    %112 = arith.addf %109, %111 : vector<256x8xf32>
    %cst_82 = arith.constant 0.000000e+00 : f32
    %113 = vector.broadcast %cst_82 : f32 to vector<256x8xf32>
    %114 = arith.maximumf %112, %113 : vector<256x8xf32>
    %c24_83 = arith.constant 24 : index
    %c0_84 = arith.constant 0 : index
    %115 = vector.load %arg23[%c24_83, %c0_84] : memref<304x8xf32, #tpu.memory_space<vmem>>, vector<256x8xf32>
    tpu.vector_store %arg23[%c24_83, %c0_84], %114 {strides = array<i32>} : memref<304x8xf32, #tpu.memory_space<vmem>>, vector<256x8xf32>,
    %cst_85 = arith.constant 0.000000e+00 : f32
    %116 = vector.broadcast %cst_85 : f32 to vector<256x4xf32>
    %c7_86 = arith.constant 7 : index
    %c0_87 = arith.constant 0 : index
    %117 = vector.load %arg23[%c7_86, %c0_87] : memref<304x8xf32, #tpu.memory_space<vmem>>, vector<256x8xf32>
    %118 = vector.broadcast %2 : vector<256x1xf32> to vector<256x8xf32>
    %119 = arith.mulf %117, %118 : vector<256x8xf32>
    %120 = arith.truncf %119 : vector<256x8xf32> to vector<256x8xbf16>
    %c0_88 = arith.constant 0 : index
    %c0_89 = arith.constant 0 : index
    %c0_90 = arith.constant 0 : index
    %121 = vector.load %arg15[%c0_88, %c0_89, %c0_90] : memref<9x8x4xbf16, #tpu.memory_space<vmem>>, vector<1x8x4xbf16>
    %122 = vector.shape_cast %121 : vector<1x8x4xbf16> to vector<8x4xbf16>
    %cst_91 = arith.constant dense<0.000000e+00> : vector<256x4xf32>
    %123 = tpu.matmul %120, %122, %cst_91 {dimension_numbers = #tpu.dot_dimension_numbers<[1], [0], [0], [1], [0, 0, 1, 1], [], []>} : vector<256x8xbf16>, vector<8x4xbf16>, vector<256x4xf32> -> vector<256x4xf32>
    %124 = arith.addf %116, %123 : vector<256x4xf32>
    %c8_92 = arith.constant 8 : index
    %c0_93 = arith.constant 0 : index
    %125 = vector.load %arg23[%c8_92, %c0_93] : memref<304x8xf32, #tpu.memory_space<vmem>>, vector<256x8xf32>
    %126 = arith.truncf %125 : vector<256x8xf32> to vector<256x8xbf16>
    %c1_94 = arith.constant 1 : index
    %c0_95 = arith.constant 0 : index
    %c0_96 = arith.constant 0 : index
    %127 = vector.load %arg15[%c1_94, %c0_95, %c0_96] : memref<9x8x4xbf16, #tpu.memory_space<vmem>>, vector<1x8x4xbf16>
    %128 = vector.shape_cast %127 : vector<1x8x4xbf16> to vector<8x4xbf16>
    %cst_97 = arith.constant dense<0.000000e+00> : vector<256x4xf32>
    %129 = tpu.matmul %126, %128, %cst_97 {dimension_numbers = #tpu.dot_dimension_numbers<[1], [0], [0], [1], [0, 0, 1, 1], [], []>} : vector<256x8xbf16>, vector<8x4xbf16>, vector<256x4xf32> -> vector<256x4xf32>
    %130 = arith.addf %124, %129 : vector<256x4xf32>
    %c9_98 = arith.constant 9 : index
    %c0_99 = arith.constant 0 : index
    %131 = vector.load %arg23[%c9_98, %c0_99] : memref<304x8xf32, #tpu.memory_space<vmem>>, vector<256x8xf32>
    %132 = vector.broadcast %3 : vector<256x1xf32> to vector<256x8xf32>
    %133 = arith.mulf %131, %132 : vector<256x8xf32>
    %134 = arith.truncf %133 : vector<256x8xf32> to vector<256x8xbf16>
    %c2_100 = arith.constant 2 : index
    %c0_101 = arith.constant 0 : index
    %c0_102 = arith.constant 0 : index
    %135 = vector.load %arg15[%c2_100, %c0_101, %c0_102] : memref<9x8x4xbf16, #tpu.memory_space<vmem>>, vector<1x8x4xbf16>
    %136 = vector.shape_cast %135 : vector<1x8x4xbf16> to vector<8x4xbf16>
    %cst_103 = arith.constant dense<0.000000e+00> : vector<256x4xf32>
    %137 = tpu.matmul %134, %136, %cst_103 {dimension_numbers = #tpu.dot_dimension_numbers<[1], [0], [0], [1], [0, 0, 1, 1], [], []>} : vector<256x8xbf16>, vector<8x4xbf16>, vector<256x4xf32> -> vector<256x4xf32>
    %138 = arith.addf %130, %137 : vector<256x4xf32>
    %c23_104 = arith.constant 23 : index
    %c0_105 = arith.constant 0 : index
    %139 = vector.load %arg23[%c23_104, %c0_105] : memref<304x8xf32, #tpu.memory_space<vmem>>, vector<256x8xf32>
    %140 = vector.broadcast %2 : vector<256x1xf32> to vector<256x8xf32>
    %141 = arith.mulf %139, %140 : vector<256x8xf32>
    %142 = arith.truncf %141 : vector<256x8xf32> to vector<256x8xbf16>
    %c3_106 = arith.constant 3 : index
    %c0_107 = arith.constant 0 : index
    %c0_108 = arith.constant 0 : index
    %143 = vector.load %arg15[%c3_106, %c0_107, %c0_108] : memref<9x8x4xbf16, #tpu.memory_space<vmem>>, vector<1x8x4xbf16>
    %144 = vector.shape_cast %143 : vector<1x8x4xbf16> to vector<8x4xbf16>
    %cst_109 = arith.constant dense<0.000000e+00> : vector<256x4xf32>
    %145 = tpu.matmul %142, %144, %cst_109 {dimension_numbers = #tpu.dot_dimension_numbers<[1], [0], [0], [1], [0, 0, 1, 1], [], []>} : vector<256x8xbf16>, vector<8x4xbf16>, vector<256x4xf32> -> vector<256x4xf32>
    %146 = arith.addf %138, %145 : vector<256x4xf32>
    %c24_110 = arith.constant 24 : index
    %c0_111 = arith.constant 0 : index
    %147 = vector.load %arg23[%c24_110, %c0_111] : memref<304x8xf32, #tpu.memory_space<vmem>>, vector<256x8xf32>
    %148 = arith.truncf %147 : vector<256x8xf32> to vector<256x8xbf16>
    %c4_112 = arith.constant 4 : index
    %c0_113 = arith.constant 0 : index
    %c0_114 = arith.constant 0 : index
    %149 = vector.load %arg15[%c4_112, %c0_113, %c0_114] : memref<9x8x4xbf16, #tpu.memory_space<vmem>>, vector<1x8x4xbf16>
    %150 = vector.shape_cast %149 : vector<1x8x4xbf16> to vector<8x4xbf16>
    %cst_115 = arith.constant dense<0.000000e+00> : vector<256x4xf32>
    %151 = tpu.matmul %148, %150, %cst_115 {dimension_numbers = #tpu.dot_dimension_numbers<[1], [0], [0], [1], [0, 0, 1, 1], [], []>} : vector<256x8xbf16>, vector<8x4xbf16>, vector<256x4xf32> -> vector<256x4xf32>
    %152 = arith.addf %146, %151 : vector<256x4xf32>
    %c25_116 = arith.constant 25 : index
    %c0_117 = arith.constant 0 : index
    %153 = vector.load %arg23[%c25_116, %c0_117] : memref<304x8xf32, #tpu.memory_space<vmem>>, vector<256x8xf32>
    %154 = vector.broadcast %3 : vector<256x1xf32> to vector<256x8xf32>
    %155 = arith.mulf %153, %154 : vector<256x8xf32>
    %156 = arith.truncf %155 : vector<256x8xf32> to vector<256x8xbf16>
    %c5_118 = arith.constant 5 : index
    %c0_119 = arith.constant 0 : index
    %c0_120 = arith.constant 0 : index
    %157 = vector.load %arg15[%c5_118, %c0_119, %c0_120] : memref<9x8x4xbf16, #tpu.memory_space<vmem>>, vector<1x8x4xbf16>
    %158 = vector.shape_cast %157 : vector<1x8x4xbf16> to vector<8x4xbf16>
    %cst_121 = arith.constant dense<0.000000e+00> : vector<256x4xf32>
    %159 = tpu.matmul %156, %158, %cst_121 {dimension_numbers = #tpu.dot_dimension_numbers<[1], [0], [0], [1], [0, 0, 1, 1], [], []>} : vector<256x8xbf16>, vector<8x4xbf16>, vector<256x4xf32> -> vector<256x4xf32>
    %160 = arith.addf %152, %159 : vector<256x4xf32>
    %c39_122 = arith.constant 39 : index
    %c0_123 = arith.constant 0 : index
    %161 = vector.load %arg23[%c39_122, %c0_123] : memref<304x8xf32, #tpu.memory_space<vmem>>, vector<256x8xf32>
    %162 = vector.broadcast %2 : vector<256x1xf32> to vector<256x8xf32>
    %163 = arith.mulf %161, %162 : vector<256x8xf32>
    %164 = arith.truncf %163 : vector<256x8xf32> to vector<256x8xbf16>
    %c6_124 = arith.constant 6 : index
    %c0_125 = arith.constant 0 : index
    %c0_126 = arith.constant 0 : index
    %165 = vector.load %arg15[%c6_124, %c0_125, %c0_126] : memref<9x8x4xbf16, #tpu.memory_space<vmem>>, vector<1x8x4xbf16>
    %166 = vector.shape_cast %165 : vector<1x8x4xbf16> to vector<8x4xbf16>
    %cst_127 = arith.constant dense<0.000000e+00> : vector<256x4xf32>
    %167 = tpu.matmul %164, %166, %cst_127 {dimension_numbers = #tpu.dot_dimension_numbers<[1], [0], [0], [1], [0, 0, 1, 1], [], []>} : vector<256x8xbf16>, vector<8x4xbf16>, vector<256x4xf32> -> vector<256x4xf32>
    %168 = arith.addf %160, %167 : vector<256x4xf32>
    %c40_128 = arith.constant 40 : index
    %c0_129 = arith.constant 0 : index
    %169 = vector.load %arg23[%c40_128, %c0_129] : memref<304x8xf32, #tpu.memory_space<vmem>>, vector<256x8xf32>
    %170 = arith.truncf %169 : vector<256x8xf32> to vector<256x8xbf16>
    %c7_130 = arith.constant 7 : index
    %c0_131 = arith.constant 0 : index
    %c0_132 = arith.constant 0 : index
    %171 = vector.load %arg15[%c7_130, %c0_131, %c0_132] : memref<9x8x4xbf16, #tpu.memory_space<vmem>>, vector<1x8x4xbf16>
    %172 = vector.shape_cast %171 : vector<1x8x4xbf16> to vector<8x4xbf16>
    %cst_133 = arith.constant dense<0.000000e+00> : vector<256x4xf32>
    %173 = tpu.matmul %170, %172, %cst_133 {dimension_numbers = #tpu.dot_dimension_numbers<[1], [0], [0], [1], [0, 0, 1, 1], [], []>} : vector<256x8xbf16>, vector<8x4xbf16>, vector<256x4xf32> -> vector<256x4xf32>
    %174 = arith.addf %168, %173 : vector<256x4xf32>
    %c41_134 = arith.constant 41 : index
    %c0_135 = arith.constant 0 : index
    %175 = vector.load %arg23[%c41_134, %c0_135] : memref<304x8xf32, #tpu.memory_space<vmem>>, vector<256x8xf32>
    %176 = vector.broadcast %3 : vector<256x1xf32> to vector<256x8xf32>
    %177 = arith.mulf %175, %176 : vector<256x8xf32>
    %178 = arith.truncf %177 : vector<256x8xf32> to vector<256x8xbf16>
    %c8_136 = arith.constant 8 : index
    %c0_137 = arith.constant 0 : index
    %c0_138 = arith.constant 0 : index
    %179 = vector.load %arg15[%c8_136, %c0_137, %c0_138] : memref<9x8x4xbf16, #tpu.memory_space<vmem>>, vector<1x8x4xbf16>
    %180 = vector.shape_cast %179 : vector<1x8x4xbf16> to vector<8x4xbf16>
    %cst_139 = arith.constant dense<0.000000e+00> : vector<256x4xf32>
    %181 = tpu.matmul %178, %180, %cst_139 {dimension_numbers = #tpu.dot_dimension_numbers<[1], [0], [0], [1], [0, 0, 1, 1], [], []>} : vector<256x8xbf16>, vector<8x4xbf16>, vector<256x4xf32> -> vector<256x4xf32>
    %182 = arith.addf %174, %181 : vector<256x4xf32>
    %c0_140 = arith.constant 0 : index
    %c8_141 = arith.constant 8 : index
    %183 = vector.load %arg22[%c0_140, %c8_141] : memref<256x16xf32, #tpu.memory_space<vmem>>, vector<256x4xf32>
    tpu.vector_store %arg22[%c0_140, %c8_141], %182 {strides = array<i32>} : memref<256x16xf32, #tpu.memory_space<vmem>>, vector<256x4xf32>,
    %c0_142 = arith.constant 0 : index
    %c0_143 = arith.constant 0 : index
    %184 = vector.load %arg22[%c0_142, %c0_143] : memref<256x16xf32, #tpu.memory_space<vmem>>, vector<256x12xf32>
    %c0_144 = arith.constant 0 : index
    %c0_145 = arith.constant 0 : index
    %185 = vector.load %arg16[%c0_144, %c0_145] : memref<1x12xf32, #tpu.memory_space<vmem>>, vector<1x12xf32>
    %186 = vector.broadcast %185 : vector<1x12xf32> to vector<256x12xf32>
    %187 = arith.mulf %184, %186 : vector<256x12xf32>
    %c0_146 = arith.constant 0 : index
    %c0_147 = arith.constant 0 : index
    %188 = vector.load %arg17[%c0_146, %c0_147] : memref<1x12xf32, #tpu.memory_space<vmem>>, vector<1x12xf32>
    %189 = vector.broadcast %188 : vector<1x12xf32> to vector<256x12xf32>
    %190 = arith.addf %187, %189 : vector<256x12xf32>
    %cst_148 = arith.constant 0.000000e+00 : f32
    %191 = vector.broadcast %cst_148 : f32 to vector<256x12xf32>
    %192 = arith.maximumf %190, %191 : vector<256x12xf32>
    %193 = arith.truncf %192 : vector<256x12xf32> to vector<256x12xbf16>
    %c0_149 = arith.constant 0 : index
    %c0_150 = arith.constant 0 : index
    %194 = vector.load %arg18[%c0_149, %c0_150] : memref<12x8xbf16, #tpu.memory_space<vmem>>, vector<12x8xbf16>
    %cst_151 = arith.constant dense<0.000000e+00> : vector<256x8xf32>
    %195 = tpu.matmul %193, %194, %cst_151 {dimension_numbers = #tpu.dot_dimension_numbers<[1], [0], [0], [1], [0, 0, 1, 1], [], []>} : vector<256x12xbf16>, vector<12x8xbf16>, vector<256x8xf32> -> vector<256x8xf32>
    %c0_152 = arith.constant 0 : index
    %c0_153 = arith.constant 0 : index
    %196 = vector.load %arg19[%c0_152, %c0_153] : memref<1x8xf32, #tpu.memory_space<vmem>>, vector<1x8xf32>
    %197 = vector.broadcast %196 : vector<1x8xf32> to vector<256x8xf32>
    %198 = arith.mulf %195, %197 : vector<256x8xf32>
    %c0_154 = arith.constant 0 : index
    %c0_155 = arith.constant 0 : index
    %199 = vector.load %arg20[%c0_154, %c0_155] : memref<1x8xf32, #tpu.memory_space<vmem>>, vector<1x8xf32>
    %200 = vector.broadcast %199 : vector<1x8xf32> to vector<256x8xf32>
    %201 = arith.addf %198, %200 : vector<256x8xf32>
    %cst_156 = arith.constant 0.000000e+00 : f32
    %202 = vector.broadcast %cst_156 : f32 to vector<256x8xf32>
    %203 = arith.maximumf %201, %202 : vector<256x8xf32>
    %c24_157 = arith.constant 24 : index
    %c0_158 = arith.constant 0 : index
    %204 = vector.load %arg23[%c24_157, %c0_158] : memref<304x8xf32, #tpu.memory_space<vmem>>, vector<256x8xf32>
    tpu.vector_store %arg23[%c24_157, %c0_158], %203 {strides = array<i32>} : memref<304x8xf32, #tpu.memory_space<vmem>>, vector<256x8xf32>,
    %cst_159 = arith.constant 0.000000e+00 : f32
    %205 = vector.broadcast %cst_159 : f32 to vector<256x4xf32>
    %c7_160 = arith.constant 7 : index
    %c0_161 = arith.constant 0 : index
    %206 = vector.load %arg23[%c7_160, %c0_161] : memref<304x8xf32, #tpu.memory_space<vmem>>, vector<256x8xf32>
    %207 = vector.broadcast %2 : vector<256x1xf32> to vector<256x8xf32>
    %208 = arith.mulf %206, %207 : vector<256x8xf32>
    %209 = arith.truncf %208 : vector<256x8xf32> to vector<256x8xbf16>
    %c0_162 = arith.constant 0 : index
    %c0_163 = arith.constant 0 : index
    %c0_164 = arith.constant 0 : index
    %210 = vector.load %arg21[%c0_162, %c0_163, %c0_164] : memref<9x8x4xbf16, #tpu.memory_space<vmem>>, vector<1x8x4xbf16>
    %211 = vector.shape_cast %210 : vector<1x8x4xbf16> to vector<8x4xbf16>
    %cst_165 = arith.constant dense<0.000000e+00> : vector<256x4xf32>
    %212 = tpu.matmul %209, %211, %cst_165 {dimension_numbers = #tpu.dot_dimension_numbers<[1], [0], [0], [1], [0, 0, 1, 1], [], []>} : vector<256x8xbf16>, vector<8x4xbf16>, vector<256x4xf32> -> vector<256x4xf32>
    %213 = arith.addf %205, %212 : vector<256x4xf32>
    %c8_166 = arith.constant 8 : index
    %c0_167 = arith.constant 0 : index
    %214 = vector.load %arg23[%c8_166, %c0_167] : memref<304x8xf32, #tpu.memory_space<vmem>>, vector<256x8xf32>
    %215 = arith.truncf %214 : vector<256x8xf32> to vector<256x8xbf16>
    %c1_168 = arith.constant 1 : index
    %c0_169 = arith.constant 0 : index
    %c0_170 = arith.constant 0 : index
    %216 = vector.load %arg21[%c1_168, %c0_169, %c0_170] : memref<9x8x4xbf16, #tpu.memory_space<vmem>>, vector<1x8x4xbf16>
    %217 = vector.shape_cast %216 : vector<1x8x4xbf16> to vector<8x4xbf16>
    %cst_171 = arith.constant dense<0.000000e+00> : vector<256x4xf32>
    %218 = tpu.matmul %215, %217, %cst_171 {dimension_numbers = #tpu.dot_dimension_numbers<[1], [0], [0], [1], [0, 0, 1, 1], [], []>} : vector<256x8xbf16>, vector<8x4xbf16>, vector<256x4xf32> -> vector<256x4xf32>
    %219 = arith.addf %213, %218 : vector<256x4xf32>
    %c9_172 = arith.constant 9 : index
    %c0_173 = arith.constant 0 : index
    %220 = vector.load %arg23[%c9_172, %c0_173] : memref<304x8xf32, #tpu.memory_space<vmem>>, vector<256x8xf32>
    %221 = vector.broadcast %3 : vector<256x1xf32> to vector<256x8xf32>
    %222 = arith.mulf %220, %221 : vector<256x8xf32>
    %223 = arith.truncf %222 : vector<256x8xf32> to vector<256x8xbf16>
    %c2_174 = arith.constant 2 : index
    %c0_175 = arith.constant 0 : index
    %c0_176 = arith.constant 0 : index
    %224 = vector.load %arg21[%c2_174, %c0_175, %c0_176] : memref<9x8x4xbf16, #tpu.memory_space<vmem>>, vector<1x8x4xbf16>
    %225 = vector.shape_cast %224 : vector<1x8x4xbf16> to vector<8x4xbf16>
    %cst_177 = arith.constant dense<0.000000e+00> : vector<256x4xf32>
    %226 = tpu.matmul %223, %225, %cst_177 {dimension_numbers = #tpu.dot_dimension_numbers<[1], [0], [0], [1], [0, 0, 1, 1], [], []>} : vector<256x8xbf16>, vector<8x4xbf16>, vector<256x4xf32> -> vector<256x4xf32>
    %227 = arith.addf %219, %226 : vector<256x4xf32>
    %c23_178 = arith.constant 23 : index
    %c0_179 = arith.constant 0 : index
    %228 = vector.load %arg23[%c23_178, %c0_179] : memref<304x8xf32, #tpu.memory_space<vmem>>, vector<256x8xf32>
    %229 = vector.broadcast %2 : vector<256x1xf32> to vector<256x8xf32>
    %230 = arith.mulf %228, %229 : vector<256x8xf32>
    %231 = arith.truncf %230 : vector<256x8xf32> to vector<256x8xbf16>
    %c3_180 = arith.constant 3 : index
    %c0_181 = arith.constant 0 : index
    %c0_182 = arith.constant 0 : index
    %232 = vector.load %arg21[%c3_180, %c0_181, %c0_182] : memref<9x8x4xbf16, #tpu.memory_space<vmem>>, vector<1x8x4xbf16>
    %233 = vector.shape_cast %232 : vector<1x8x4xbf16> to vector<8x4xbf16>
    %cst_183 = arith.constant dense<0.000000e+00> : vector<256x4xf32>
    %234 = tpu.matmul %231, %233, %cst_183 {dimension_numbers = #tpu.dot_dimension_numbers<[1], [0], [0], [1], [0, 0, 1, 1], [], []>} : vector<256x8xbf16>, vector<8x4xbf16>, vector<256x4xf32> -> vector<256x4xf32>
    %235 = arith.addf %227, %234 : vector<256x4xf32>
    %c24_184 = arith.constant 24 : index
    %c0_185 = arith.constant 0 : index
    %236 = vector.load %arg23[%c24_184, %c0_185] : memref<304x8xf32, #tpu.memory_space<vmem>>, vector<256x8xf32>
    %237 = arith.truncf %236 : vector<256x8xf32> to vector<256x8xbf16>
    %c4_186 = arith.constant 4 : index
    %c0_187 = arith.constant 0 : index
    %c0_188 = arith.constant 0 : index
    %238 = vector.load %arg21[%c4_186, %c0_187, %c0_188] : memref<9x8x4xbf16, #tpu.memory_space<vmem>>, vector<1x8x4xbf16>
    %239 = vector.shape_cast %238 : vector<1x8x4xbf16> to vector<8x4xbf16>
    %cst_189 = arith.constant dense<0.000000e+00> : vector<256x4xf32>
    %240 = tpu.matmul %237, %239, %cst_189 {dimension_numbers = #tpu.dot_dimension_numbers<[1], [0], [0], [1], [0, 0, 1, 1], [], []>} : vector<256x8xbf16>, vector<8x4xbf16>, vector<256x4xf32> -> vector<256x4xf32>
    %241 = arith.addf %235, %240 : vector<256x4xf32>
    %c25_190 = arith.constant 25 : index
    %c0_191 = arith.constant 0 : index
    %242 = vector.load %arg23[%c25_190, %c0_191] : memref<304x8xf32, #tpu.memory_space<vmem>>, vector<256x8xf32>
    %243 = vector.broadcast %3 : vector<256x1xf32> to vector<256x8xf32>
    %244 = arith.mulf %242, %243 : vector<256x8xf32>
    %245 = arith.truncf %244 : vector<256x8xf32> to vector<256x8xbf16>
    %c5_192 = arith.constant 5 : index
    %c0_193 = arith.constant 0 : index
    %c0_194 = arith.constant 0 : index
    %246 = vector.load %arg21[%c5_192, %c0_193, %c0_194] : memref<9x8x4xbf16, #tpu.memory_space<vmem>>, vector<1x8x4xbf16>
    %247 = vector.shape_cast %246 : vector<1x8x4xbf16> to vector<8x4xbf16>
    %cst_195 = arith.constant dense<0.000000e+00> : vector<256x4xf32>
    %248 = tpu.matmul %245, %247, %cst_195 {dimension_numbers = #tpu.dot_dimension_numbers<[1], [0], [0], [1], [0, 0, 1, 1], [], []>} : vector<256x8xbf16>, vector<8x4xbf16>, vector<256x4xf32> -> vector<256x4xf32>
    %249 = arith.addf %241, %248 : vector<256x4xf32>
    %c39_196 = arith.constant 39 : index
    %c0_197 = arith.constant 0 : index
    %250 = vector.load %arg23[%c39_196, %c0_197] : memref<304x8xf32, #tpu.memory_space<vmem>>, vector<256x8xf32>
    %251 = vector.broadcast %2 : vector<256x1xf32> to vector<256x8xf32>
    %252 = arith.mulf %250, %251 : vector<256x8xf32>
    %253 = arith.truncf %252 : vector<256x8xf32> to vector<256x8xbf16>
    %c6_198 = arith.constant 6 : index
    %c0_199 = arith.constant 0 : index
    %c0_200 = arith.constant 0 : index
    %254 = vector.load %arg21[%c6_198, %c0_199, %c0_200] : memref<9x8x4xbf16, #tpu.memory_space<vmem>>, vector<1x8x4xbf16>
    %255 = vector.shape_cast %254 : vector<1x8x4xbf16> to vector<8x4xbf16>
    %cst_201 = arith.constant dense<0.000000e+00> : vector<256x4xf32>
    %256 = tpu.matmul %253, %255, %cst_201 {dimension_numbers = #tpu.dot_dimension_numbers<[1], [0], [0], [1], [0, 0, 1, 1], [], []>} : vector<256x8xbf16>, vector<8x4xbf16>, vector<256x4xf32> -> vector<256x4xf32>
    %257 = arith.addf %249, %256 : vector<256x4xf32>
    %c40_202 = arith.constant 40 : index
    %c0_203 = arith.constant 0 : index
    %258 = vector.load %arg23[%c40_202, %c0_203] : memref<304x8xf32, #tpu.memory_space<vmem>>, vector<256x8xf32>
    %259 = arith.truncf %258 : vector<256x8xf32> to vector<256x8xbf16>
    %c7_204 = arith.constant 7 : index
    %c0_205 = arith.constant 0 : index
    %c0_206 = arith.constant 0 : index
    %260 = vector.load %arg21[%c7_204, %c0_205, %c0_206] : memref<9x8x4xbf16, #tpu.memory_space<vmem>>, vector<1x8x4xbf16>
    %261 = vector.shape_cast %260 : vector<1x8x4xbf16> to vector<8x4xbf16>
    %cst_207 = arith.constant dense<0.000000e+00> : vector<256x4xf32>
    %262 = tpu.matmul %259, %261, %cst_207 {dimension_numbers = #tpu.dot_dimension_numbers<[1], [0], [0], [1], [0, 0, 1, 1], [], []>} : vector<256x8xbf16>, vector<8x4xbf16>, vector<256x4xf32> -> vector<256x4xf32>
    %263 = arith.addf %257, %262 : vector<256x4xf32>
    %c41_208 = arith.constant 41 : index
    %c0_209 = arith.constant 0 : index
    %264 = vector.load %arg23[%c41_208, %c0_209] : memref<304x8xf32, #tpu.memory_space<vmem>>, vector<256x8xf32>
    %265 = vector.broadcast %3 : vector<256x1xf32> to vector<256x8xf32>
    %266 = arith.mulf %264, %265 : vector<256x8xf32>
    %267 = arith.truncf %266 : vector<256x8xf32> to vector<256x8xbf16>
    %c8_210 = arith.constant 8 : index
    %c0_211 = arith.constant 0 : index
    %c0_212 = arith.constant 0 : index
    %268 = vector.load %arg21[%c8_210, %c0_211, %c0_212] : memref<9x8x4xbf16, #tpu.memory_space<vmem>>, vector<1x8x4xbf16>
    %269 = vector.shape_cast %268 : vector<1x8x4xbf16> to vector<8x4xbf16>
    %cst_213 = arith.constant dense<0.000000e+00> : vector<256x4xf32>
    %270 = tpu.matmul %267, %269, %cst_213 {dimension_numbers = #tpu.dot_dimension_numbers<[1], [0], [0], [1], [0, 0, 1, 1], [], []>} : vector<256x8xbf16>, vector<8x4xbf16>, vector<256x4xf32> -> vector<256x4xf32>
    %271 = arith.addf %263, %270 : vector<256x4xf32>
    %c0_214 = arith.constant 0 : index
    %c12 = arith.constant 12 : index
    %272 = vector.load %arg22[%c0_214, %c12] : memref<256x16xf32, #tpu.memory_space<vmem>>, vector<256x4xf32>
    tpu.vector_store %arg22[%c0_214, %c12], %271 {strides = array<i32>} : memref<256x16xf32, #tpu.memory_space<vmem>>, vector<256x4xf32>,
    return
  }
  func.func @transform_0(%arg0: i32) -> (i32, i32) {
    %c0_i32 = arith.constant 0 : i32
    %c0_i32_0 = arith.constant 0 : i32
    return %arg0, %c0_i32 : i32, i32
  }
  func.func @transform_1(%arg0: i32) -> (i32, i32) {
    %c0_i32 = arith.constant 0 : i32
    %c0_i32_0 = arith.constant 0 : i32
    %c0_i32_1 = arith.constant 0 : i32
    return %c0_i32, %c0_i32_0 : i32, i32
  }
  func.func @transform_2(%arg0: i32) -> (i32, i32) {
    %c0_i32 = arith.constant 0 : i32
    %c0_i32_0 = arith.constant 0 : i32
    %c0_i32_1 = arith.constant 0 : i32
    return %c0_i32, %c0_i32_0 : i32, i32
  }
  func.func @transform_3(%arg0: i32) -> (i32, i32) {
    %c0_i32 = arith.constant 0 : i32
    %c0_i32_0 = arith.constant 0 : i32
    %c0_i32_1 = arith.constant 0 : i32
    return %c0_i32, %c0_i32_0 : i32, i32
  }
  func.func @transform_4(%arg0: i32) -> (i32, i32) {
    %c0_i32 = arith.constant 0 : i32
    %c0_i32_0 = arith.constant 0 : i32
    %c0_i32_1 = arith.constant 0 : i32
    return %c0_i32, %c0_i32_0 : i32, i32
  }
  func.func @transform_5(%arg0: i32) -> (i32, i32) {
    %c0_i32 = arith.constant 0 : i32
    %c0_i32_0 = arith.constant 0 : i32
    %c0_i32_1 = arith.constant 0 : i32
    return %c0_i32, %c0_i32_0 : i32, i32
  }
  func.func @transform_6(%arg0: i32) -> (i32, i32) {
    %c0_i32 = arith.constant 0 : i32
    %c0_i32_0 = arith.constant 0 : i32
    %c0_i32_1 = arith.constant 0 : i32
    return %c0_i32, %c0_i32_0 : i32, i32
  }
  func.func @transform_7(%arg0: i32) -> (i32, i32) {
    %c0_i32 = arith.constant 0 : i32
    %c0_i32_0 = arith.constant 0 : i32
    %c0_i32_1 = arith.constant 0 : i32
    return %c0_i32, %c0_i32_0 : i32, i32
  }
  func.func @transform_8(%arg0: i32) -> (i32, i32, i32) {
    %c0_i32 = arith.constant 0 : i32
    %c0_i32_0 = arith.constant 0 : i32
    %c0_i32_1 = arith.constant 0 : i32
    %c0_i32_2 = arith.constant 0 : i32
    return %c0_i32, %c0_i32_0, %c0_i32_1 : i32, i32, i32
  }
  func.func @transform_9(%arg0: i32) -> (i32, i32) {
    %c0_i32 = arith.constant 0 : i32
    %c0_i32_0 = arith.constant 0 : i32
    %c0_i32_1 = arith.constant 0 : i32
    return %c0_i32, %c0_i32_0 : i32, i32
  }
  func.func @transform_10(%arg0: i32) -> (i32, i32) {
    %c0_i32 = arith.constant 0 : i32
    %c0_i32_0 = arith.constant 0 : i32
    %c0_i32_1 = arith.constant 0 : i32
    return %c0_i32, %c0_i32_0 : i32, i32
  }
  func.func @transform_11(%arg0: i32) -> (i32, i32) {
    %c0_i32 = arith.constant 0 : i32
    %c0_i32_0 = arith.constant 0 : i32
    %c0_i32_1 = arith.constant 0 : i32
    return %c0_i32, %c0_i32_0 : i32, i32
  }
  func.func @transform_12(%arg0: i32) -> (i32, i32) {
    %c0_i32 = arith.constant 0 : i32
    %c0_i32_0 = arith.constant 0 : i32
    %c0_i32_1 = arith.constant 0 : i32
    return %c0_i32, %c0_i32_0 : i32, i32
  }
  func.func @transform_13(%arg0: i32) -> (i32, i32) {
    %c0_i32 = arith.constant 0 : i32
    %c0_i32_0 = arith.constant 0 : i32
    %c0_i32_1 = arith.constant 0 : i32
    return %c0_i32, %c0_i32_0 : i32, i32
  }
  func.func @transform_14(%arg0: i32) -> (i32, i32, i32) {
    %c0_i32 = arith.constant 0 : i32
    %c0_i32_0 = arith.constant 0 : i32
    %c0_i32_1 = arith.constant 0 : i32
    %c0_i32_2 = arith.constant 0 : i32
    return %c0_i32, %c0_i32_0, %c0_i32_1 : i32, i32, i32
  }
  func.func @transform_15(%arg0: i32) -> (i32, i32) {
    %c0_i32 = arith.constant 0 : i32
    %c0_i32_0 = arith.constant 0 : i32
    %c0_i32_1 = arith.constant 0 : i32
    return %c0_i32, %c0_i32_0 : i32, i32
  }
  func.func @transform_16(%arg0: i32) -> (i32, i32) {
    %c0_i32 = arith.constant 0 : i32
    %c0_i32_0 = arith.constant 0 : i32
    %c0_i32_1 = arith.constant 0 : i32
    return %c0_i32, %c0_i32_0 : i32, i32
  }
  func.func @transform_17(%arg0: i32) -> (i32, i32) {
    %c0_i32 = arith.constant 0 : i32
    %c0_i32_0 = arith.constant 0 : i32
    %c0_i32_1 = arith.constant 0 : i32
    return %c0_i32, %c0_i32_0 : i32, i32
  }
  func.func @transform_18(%arg0: i32) -> (i32, i32) {
    %c0_i32 = arith.constant 0 : i32
    %c0_i32_0 = arith.constant 0 : i32
    %c0_i32_1 = arith.constant 0 : i32
    return %c0_i32, %c0_i32_0 : i32, i32
  }
  func.func @transform_19(%arg0: i32) -> (i32, i32) {
    %c0_i32 = arith.constant 0 : i32
    %c0_i32_0 = arith.constant 0 : i32
    %c0_i32_1 = arith.constant 0 : i32
    return %c0_i32, %c0_i32_0 : i32, i32
  }
  func.func @transform_20(%arg0: i32) -> (i32, i32, i32) {
    %c0_i32 = arith.constant 0 : i32
    %c0_i32_0 = arith.constant 0 : i32
    %c0_i32_1 = arith.constant 0 : i32
    %c0_i32_2 = arith.constant 0 : i32
    return %c0_i32, %c0_i32_0, %c0_i32_1 : i32, i32, i32
  }
  func.func @transform_21(%arg0: i32) -> (i32, i32) {
    %c0_i32 = arith.constant 0 : i32
    %c0_i32_0 = arith.constant 0 : i32
    return %arg0, %c0_i32 : i32, i32
  }
}

</mosaic_0001>

<bundles_post_ra>
// kernel: dense_block_apply.1
= control target key start
LH: loop header
LB: loop body
LE: loop exit
PB: predicated region body
PF: predicated region fallthrough
CT: control target
= control target key end

     0   :  { %s18694_s0 = inlined_call_operand.vmem [shape: f32[512,4], index: 0, kind: input, shape index: {}]   ;;  %s18695_s1 = inlined_call_operand.vmem [shape: f32[256,1], index: 1, kind: input, shape index: {}]   ;;  %s18696_s2 = inlined_call_operand.vmem [shape: f32[256,1], index: 2, kind: input, shape index: {}]   ;;  %s18697_s3 = inlined_call_operand.vmem [shape: f32[1,4], index: 3, kind: input, shape index: {}]   ;;  %s18698_s4 = inlined_call_operand.vmem [shape: f32[1,4], index: 4, kind: input, shape index: {}]   ;;  %s18699_s5 = inlined_call_operand.vmem [shape: bf16[4,8], index: 5, kind: input, shape index: {}]   ;;  %s18700_s6 = inlined_call_operand.vmem [shape: f32[1,8], index: 6, kind: input, shape index: {}]   ;;  %s18701_s7 = inlined_call_operand.vmem [shape: f32[1,8], index: 7, kind: input, shape index: {}]   ;;  %s18702_s8 = inlined_call_operand.vmem [shape: bf16[9,8,4], index: 8, kind: input, shape index: {}]   ;;  %s18703_s9 = inlined_call_operand.vmem [shape: f32[1,8], index: 9, kind: input, shape index: {}]   ;;  %s18704_s10 = inlined_call_operand.vmem [shape: f32[1,8], index: 10, kind: input, shape index: {}]   ;;  %s18705_s11 = inlined_call_operand.vmem [shape: bf16[8,8], index: 11, kind: input, shape index: {}]   ;;  %s18706_s12 = inlined_call_operand.vmem [shape: f32[1,8], index: 12, kind: input, shape index: {}]   ;;  %s18707_s13 = inlined_call_operand.vmem [shape: f32[1,8], index: 13, kind: input, shape index: {}]   ;;  %s18708_s14 = inlined_call_operand.vmem [shape: bf16[9,8,4], index: 14, kind: input, shape index: {}]   ;;  %s18709_s15 = inlined_call_operand.vmem [shape: f32[1,12], index: 15, kind: input, shape index: {}]   ;;  %s18710_s16 = inlined_call_operand.vmem [shape: f32[1,12], index: 16, kind: input, shape index: {}]   ;;  %s18711_s17 = inlined_call_operand.vmem [shape: bf16[12,8], index: 17, kind: input, shape index: {}]   ;;  %s18712_s18 = inlined_call_operand.vmem [shape: f32[1,8], index: 18, kind: input, shape index: {}]   ;;  %s18713_s19 = inlined_call_operand.vmem [shape: f32[1,8], index: 19, kind: input, shape index: {}]   ;;  %s18714_s20 = inlined_call_operand.vmem [shape: bf16[9,8,4], index: 20, kind: input, shape index: {}]   ;;  %s18715_s21 = inlined_call_operand.vmem [shape: f32[512,16], index: 21, kind: output, shape index: {}]  }
   0x1   :  { %19190 = sst [smem:[#allocation173_spill]] %s18694_s0 }
   0x2   :  { %19191 = sst [smem:[#allocation174_spill]] %s18695_s1 }
   0x3   :  { %19192 = sst [smem:[#allocation175_spill]] %s18696_s2  ;;  %s14551_s2 = smov 0  }
   0x4   :  { %19193 = sst [smem:[#allocation176_spill]] %s18697_s3 }
   0x5   :  { %19194 = sst [smem:[#allocation177_spill]] %s18698_s4 }
   0x6   :  { %19195 = sst [smem:[#allocation178_spill]] %s18699_s5 }
   0x7 LB: > { %s11556_s25 = sadd.s32 4294967295, %s14434_s2   ;;  %p11560_p0 = scmp.ge.s32.totalorder %s14434_s2, 1  ;;  %s14434_s2 = sphi %s14551_s2, %s31_s2  }
   0x8   : > { %p588_p1 = scmp.lt.s32.totalorder %s14434_s2, 3 }
   0xa   : > { %p589_p2 = pnand %p11560_p0, %p588_p1 }
   0xc   : > { %592 = sbr.rel (%p589_p2) target bundleno = 3125 (0xc35), region = 104 }
  0x13   : > { %s19196_s3 = sld [smem:[#allocation178_spill]]  ;;  %vm1036_vm0 = vcmask 1041408   ;;  %s11561_s28 = sshll.u32 %s11556_s25, 5  ;;  %v14436_v2 = vmov 0   ;;  %vm796_vm1 = vcmask 31744   ;;  %vm661_vm2 = vcmask 64512  }
  0x14   : > { %p649_p3 = scmp.lt.s32.totalorder %s11561_s28, 63  ;;  %14426 = vset.pattern.permute.xlu1 %v14436_v2  ;;  %14425 = vset.pattern.permute.xlu0 %v14436_v2  ;;  %s19197_s4 = sld [smem:[#allocation175_spill]]  ;;  %vm1682_vm3 = vcmask 1043456   ;;  %vm4565_vm4 = vcmask 64544   ;;  %vm8259_vm5 = vcmask 1045504   ;;  %vm8012_vm6 = vcmask 97344  }
  0x15   : > { %s19199_s30 = sld [smem:[#allocation176_spill]]  ;;  %s14438_s1 = smov 4   ;;  %vm8210_vm7 = vcmask 97280   ;;  %vm11467_vm8 = vcmask 130144  }
  0x16   : > { %s20089_s28 = smov (!%p649_p3, %s11561_s28), 63  ;;  %s14439_s22 = smov 8  }
  0x17   : > { %s11562_s25 = sshll.u32 %s20089_s28, 3  ;;  %s19200_s28 = sld [smem:[#allocation177_spill]] }
  0x18   : > { %s14582_s5 = scalar_lea.vmem %s18715_s21, %s11562_s25  ;;  %s14440_s24 = smov 12  }
  0x19   : > { %v987_v0 = vld [vmem:[%s19196_s3] sm:$0x3]  ;;  %s19198_s3 = sld [smem:[#allocation173_spill]] }
  0x1a   : > { %14382 = vmatprep.subr.msk.bf16.mxu0 %vm1036_vm0, %v987_v0  ;;  %v1038_v1 = vsel %vm1036_vm0, %v987_v0, 0  ;;  %v734_v3 = vld [vmem:[%s19197_s4 + $0x10] sm:$0xff]  ;;  %v732_v4 = vld [vmem:[%s19197_s4] sm:$0xff]  ;;  %v735_v5 = vld [vmem:[%s19197_s4 + $0x18] sm:$0xff] }
  0x1b   : > { %12595 = vmatpush3.bf16.msra.mxu0 %v1038_v1  ;;  %2103 = vperm.xlu1 %14426, %v734_v3   ;;  %v733_v6 = vld [vmem:[%s19197_s4 + $0x8] sm:$0xff]  ;;  %v736_v8 = vld [vmem:[%s19197_s4 + $0x20] sm:$0xff]  ;;  %v739_v21 = vld [vmem:[%s19197_s4 + $0x38] sm:$0xff] }
  0x1c   : > { %2093 = vperm.xlu0 %14425, %v732_v4   ;;  %v737_v7 = vld [vmem:[%s19197_s4 + $0x28] sm:$0xff]  ;;  %v738_v22 = vld [vmem:[%s19197_s4 + $0x30] sm:$0xff]  ;;  %v14629_v23 = vld [vmem:[%s19199_s30] ss:$0 sm:$0xff] }
  0x1d   : > { %v14652_v30 = vld [vmem:[%s19200_s28] ss:$0 sm:$0xff]  ;;  %v741_v37 = vld [vmem:[%s19197_s4 + $0x48] sm:$0xff]  ;;  %v743_v3 = vld [vmem:[%s19197_s4 + $0x58] sm:$0xff] }
  0x1e   : > { %v740_v52 = vld [vmem:[%s19197_s4 + $0x40] sm:$0xff] }
  0x1f   : > { %s14577_s29 = scalar_lea.vmem %s19198_s3, %s11562_s25  ;;  %2108 = vperm.xlu1 %14426, %v735_v5   ;;  %s19201_s25 = sld [smem:[#allocation174_spill]] }
  0x20   : > { %v764_v9 = vld [vmem:[%s14577_s29] sm:$0xff]  ;;  %v765_v10 = vld [vmem:[%s14577_s29 + $0x8] sm:$0xff]  ;;  %v766_v11 = vld [vmem:[%s14577_s29 + $0x10] sm:$0xff]  ;;  %2098 = vperm.xlu0 %14425, %v733_v6  }
  0x21   : > { %797 = vst.msk [vmem:[%s14582_s5] sm:$0xff] %vm796_vm1, %v764_v9  ;;  %798 = vst.msk [vmem:[%s14582_s5 + $0x8] sm:$0xff] %vm796_vm1, %v765_v10  ;;  %v767_v12 = vld [vmem:[%s14577_s29 + $0x18] sm:$0xff]  ;;  %v768_v13 = vld [vmem:[%s14577_s29 + $0x20] sm:$0xff] }
  0x22   : > { %799 = vst.msk [vmem:[%s14582_s5 + $0x10] sm:$0xff] %vm796_vm1, %v766_v11  ;;  %v769_v14 = vld [vmem:[%s14577_s29 + $0x28] sm:$0xff]  ;;  %800 = vst.msk [vmem:[%s14582_s5 + $0x18] sm:$0xff] %vm796_vm1, %v767_v12  ;;  %v770_v15 = vld [vmem:[%s14577_s29 + $0x30] sm:$0xff] }
  0x23   : > { %801 = vst.msk [vmem:[%s14582_s5 + $0x20] sm:$0xff] %vm796_vm1, %v768_v13  ;;  %802 = vst.msk [vmem:[%s14582_s5 + $0x28] sm:$0xff] %vm796_vm1, %v769_v14  ;;  %v771_v16 = vld [vmem:[%s14577_s29 + $0x38] sm:$0xff]  ;;  %v772_v17 = vld [vmem:[%s14577_s29 + $0x40] sm:$0xff]  ;;  %2118 = vperm.xlu1 %14426, %v737_v7  }
  0x24   : > { %803 = vst.msk [vmem:[%s14582_s5 + $0x30] sm:$0xff] %vm796_vm1, %v770_v15  ;;  %804 = vst.msk [vmem:[%s14582_s5 + $0x38] sm:$0xff] %vm796_vm1, %v771_v16  ;;  %v773_v18 = vld [vmem:[%s14577_s29 + $0x48] sm:$0xff]  ;;  %v774_v19 = vld [vmem:[%s14577_s29 + $0x50] sm:$0xff]  ;;  %2113 = vperm.xlu0 %14425, %v736_v8  }
  0x25   : > { %805 = vst.msk [vmem:[%s14582_s5 + $0x40] sm:$0xff] %vm796_vm1, %v772_v17  ;;  %v775_v20 = vld [vmem:[%s14577_s29 + $0x58] sm:$0xff]  ;;  %806 = vst.msk [vmem:[%s14582_s5 + $0x48] sm:$0xff] %vm796_vm1, %v773_v18  ;;  %v776_v24 = vld [vmem:[%s14577_s29 + $0x60] sm:$0xff] }
  0x26   : > { %807 = vst.msk [vmem:[%s14582_s5 + $0x50] sm:$0xff] %vm796_vm1, %v774_v19  ;;  %808 = vst.msk [vmem:[%s14582_s5 + $0x58] sm:$0xff] %vm796_vm1, %v775_v20  ;;  %v777_v25 = vld [vmem:[%s14577_s29 + $0x68] sm:$0xff]  ;;  %v778_v26 = vld [vmem:[%s14577_s29 + $0x70] sm:$0xff] }
  0x27   : > { %809 = vst.msk [vmem:[%s14582_s5 + $0x60] sm:$0xff] %vm796_vm1, %v776_v24  ;;  %810 = vst.msk [vmem:[%s14582_s5 + $0x68] sm:$0xff] %vm796_vm1, %v777_v25  ;;  %v779_v27 = vld [vmem:[%s14577_s29 + $0x78] sm:$0xff]  ;;  %v780_v28 = vld [vmem:[%s14577_s29 + $0x80] sm:$0xff]  ;;  %2128 = vperm.xlu1 %14426, %v739_v21  }
  0x28   : > { %811 = vst.msk [vmem:[%s14582_s5 + $0x70] sm:$0xff] %vm796_vm1, %v778_v26  ;;  %v781_v29 = vld [vmem:[%s14577_s29 + $0x88] sm:$0xff]  ;;  %812 = vst.msk [vmem:[%s14582_s5 + $0x78] sm:$0xff] %vm796_vm1, %v779_v27  ;;  %v782_v31 = vld [vmem:[%s14577_s29 + $0x90] sm:$0xff]  ;;  %2123 = vperm.xlu0 %14425, %v738_v22  }
  0x29   : > { %813 = vst.msk [vmem:[%s14582_s5 + $0x80] sm:$0xff] %vm796_vm1, %v780_v28  ;;  %814 = vst.msk [vmem:[%s14582_s5 + $0x88] sm:$0xff] %vm796_vm1, %v781_v29  ;;  %v783_v32 = vld [vmem:[%s14577_s29 + $0x98] sm:$0xff]  ;;  %v784_v33 = vld [vmem:[%s14577_s29 + $0xa0] sm:$0xff] }
  0x2a   : > { %815 = vst.msk [vmem:[%s14582_s5 + $0x90] sm:$0xff] %vm796_vm1, %v782_v31  ;;  %816 = vst.msk [vmem:[%s14582_s5 + $0x98] sm:$0xff] %vm796_vm1, %v783_v32  ;;  %v785_v34 = vld [vmem:[%s14577_s29 + $0xa8] sm:$0xff]  ;;  %v786_v35 = vld [vmem:[%s14577_s29 + $0xb0] sm:$0xff] }
  0x2b   : > { %817 = vst.msk [vmem:[%s14582_s5 + $0xa0] sm:$0xff] %vm796_vm1, %v784_v33  ;;  %v787_v36 = vld [vmem:[%s14577_s29 + $0xb8] sm:$0xff]  ;;  %v829_v38 = vld [vmem:[%s14582_s5] sm:$0xff]  ;;  %v830_v39 = vld [vmem:[%s14582_s5 + $0x8] sm:$0xff]  ;;  %2138 = vperm.xlu1 %14426, %v741_v37  }
  0x2c   : > { %v831_v40 = vld [vmem:[%s14582_s5 + $0x10] sm:$0xff]  ;;  %818 = vst.msk [vmem:[%s14582_s5 + $0xa8] sm:$0xff] %vm796_vm1, %v785_v34  ;;  %819 = vst.msk [vmem:[%s14582_s5 + $0xb0] sm:$0xff] %vm796_vm1, %v786_v35  ;;  %v868_v41 = vmul.f32 %v14629_v23, %v829_v38  ;;  %v869_v42 = vmul.f32 %v14629_v23, %v830_v39  ;;  %v832_v43 = vld [vmem:[%s14582_s5 + $0x18] sm:$0xff]  ;;  %2133 = vperm.xlu0 %14425, %v740_v52  }
  0x2d   : > { %820 = vst.msk [vmem:[%s14582_s5 + $0xb8] sm:$0xff] %vm796_vm1, %v787_v36  ;;  %v870_v44 = vmul.f32 %v14629_v23, %v831_v40  ;;  %v833_v45 = vld [vmem:[%s14582_s5 + $0x20] sm:$0xff]  ;;  %v834_v46 = vld [vmem:[%s14582_s5 + $0x28] sm:$0xff]  ;;  %v871_v47 = vmul.f32 %v14629_v23, %v832_v43  ;;  %v835_v50 = vld [vmem:[%s14582_s5 + $0x30] sm:$0xff] }
  0x2e   : > { %v872_v48 = vmul.f32 %v14629_v23, %v833_v45  ;;  %v873_v49 = vmul.f32 %v14629_v23, %v834_v46  ;;  %v836_v51 = vld [vmem:[%s14582_s5 + $0x38] sm:$0xff]  ;;  %v907_v53 = vadd.f32 %v14652_v30, %v868_v41  ;;  %v908_v54 = vadd.f32 %v14652_v30, %v869_v42  ;;  %v837_v61 = vld [vmem:[%s14582_s5 + $0x40] sm:$0xff]  ;;  %v838_v62 = vld [vmem:[%s14582_s5 + $0x48] sm:$0xff] }
  0x2f   : > { %v909_v55 = vadd.f32 %v14652_v30, %v870_v44  ;;  %v874_v56 = vmul.f32 %v14629_v23, %v835_v50  ;;  %v910_v57 = vadd.f32 %v14652_v30, %v871_v47  ;;  %v875_v60 = vmul.f32 %v14629_v23, %v836_v51  ;;  %v839_v8 = vld [vmem:[%s14582_s5 + $0x50] sm:$0xff]  ;;  %v840_v13 = vld [vmem:[%s14582_s5 + $0x58] sm:$0xff]  ;;  %v841_v14 = vld [vmem:[%s14582_s5 + $0x60] sm:$0xff]  ;;  %2148 = vperm.xlu1 %14426, %v743_v3  }
  0x30   : > { %v911_v58 = vadd.f32 %v14652_v30, %v872_v48  ;;  %v912_v59 = vadd.f32 %v14652_v30, %v873_v49  ;;  %v939_v63 = vmax.f32 %v907_v53, 0.0  ;;  %v940_v0 = vmax.f32 %v908_v54, 0.0  ;;  %v742_v9 = vld [vmem:[%s19197_s4 + $0x50] sm:$0xff]  ;;  %v842_v15 = vld [vmem:[%s14582_s5 + $0x68] sm:$0xff]  ;;  %v788_v19 = vld [vmem:[%s14577_s29 + $0xc0] sm:$0xff] }
  0x31   : > { %v941_v1 = vmax.f32 %v909_v55, 0.0  ;;  %v913_v2 = vadd.f32 %v14652_v30, %v874_v56  ;;  %v942_v4 = vmax.f32 %v910_v57, 0.0  ;;  %v914_v7 = vadd.f32 %v14652_v30, %v875_v60  ;;  %v745_v16 = vld [vmem:[%s19197_s4 + $0x68] sm:$0xff]  ;;  %v790_v21 = vld [vmem:[%s14577_s29 + $0xd0] sm:$0xff]  ;;  %821 = vst.msk [vmem:[%s14582_s5 + $0xc0] sm:$0xff] %vm796_vm1, %v788_v19  ;;  %v791_v25 = vld [vmem:[%s14577_s29 + $0xd8] sm:$0xff]  ;;  %2143 = vperm.xlu0 %14425, %v742_v9  }
  0x32   : > { %v943_v5 = vmax.f32 %v911_v58, 0.0  ;;  %v944_v6 = vmax.f32 %v912_v59, 0.0  ;;  %v971_v10 = vpack.c.bf16 %v940_v0, %v939_v63  ;;  %v876_v11 = vmul.f32 %v14629_v23, %v837_v61  ;;  %v789_v20 = vld [vmem:[%s14577_s29 + $0xc8] sm:$0xff]  ;;  %823 = vst.msk [vmem:[%s14582_s5 + $0xd0] sm:$0xff] %vm796_vm1, %v790_v21  ;;  %v792_v26 = vld [vmem:[%s14577_s29 + $0xe0] sm:$0xff]  ;;  %824 = vst.msk [vmem:[%s14582_s5 + $0xd8] sm:$0xff] %vm796_vm1, %v791_v25 }
  0x33   : > { %v877_v12 = vmul.f32 %v14629_v23, %v838_v62  ;;  %v972_v17 = vpack.c.bf16 %v942_v4, %v941_v1  ;;  %822 = vst.msk [vmem:[%s14582_s5 + $0xc8] sm:$0xff] %vm796_vm1, %v789_v20  ;;  %v793_v27 = vld [vmem:[%s14577_s29 + $0xe8] sm:$0xff]  ;;  %v945_v28 = vmax.f32 %v913_v2, 0.0  ;;  %v946_v29 = vmax.f32 %v914_v7, 0.0  ;;  %825 = vst.msk [vmem:[%s14582_s5 + $0xe0] sm:$0xff] %vm796_vm1, %v792_v26  ;;  %v794_v33 = vld [vmem:[%s14577_s29 + $0xf0] sm:$0xff]  ;;  %2158 = vperm.xlu1 %14426, %v745_v16  }
  0x34   : > { %v973_v18 = vpack.c.bf16 %v944_v6, %v943_v5  ;;  %12596 = vmatprep.mubr.msk.bf16.mxu0 %vm796_vm1, %v971_v10  ;;  %v915_v22 = vadd.f32 %v14652_v30, %v876_v11  ;;  %v878_v31 = vmul.f32 %v14629_v23, %v839_v8  ;;  %v879_v32 = vmul.f32 %v14629_v23, %v840_v13  ;;  %v795_v34 = vld [vmem:[%s14577_s29 + $0xf8] sm:$0xff]  ;;  %v744_v39 = vld [vmem:[%s19197_s4 + $0x60] sm:$0xff]  ;;  %v843_v47 = vld [vmem:[%s14582_s5 + $0x70] sm:$0xff] }
  0x35   : > { %v916_v24 = vadd.f32 %v14652_v30, %v877_v12  ;;  %12597 = vmatmul.mubr.msk.bf16.vlgmr.msra.gmra.mrb[0].mxu0 %vm796_vm1, %v972_v17  ;;  %826 = vst.msk [vmem:[%s14582_s5 + $0xe8] sm:$0xff] %vm796_vm1, %v793_v27  ;;  %v880_v37 = vmul.f32 %v14629_v23, %v841_v14  ;;  %v881_v38 = vmul.f32 %v14629_v23, %v842_v15  ;;  %827 = vst.msk [vmem:[%s14582_s5 + $0xf0] sm:$0xff] %vm796_vm1, %v794_v33  ;;  %v747_v40 = vld [vmem:[%s19197_s4 + $0x78] sm:$0xff]  ;;  %v845_v49 = vld [vmem:[%s14582_s5 + $0x80] sm:$0xff] }
  0x36   : > { %12600 = vmatprep.mubr.msk.bf16.mxu0 %vm796_vm1, %v973_v18  ;;  %v947_v35 = vmax.f32 %v915_v22, 0.0  ;;  %828 = vst.msk [vmem:[%s14582_s5 + $0xf8] sm:$0xff] %vm796_vm1, %v795_v34  ;;  %v974_v41 = vpack.c.bf16 %v946_v29, %v945_v28  ;;  %v917_v42 = vadd.f32 %v14652_v30, %v878_v31  ;;  %v918_v43 = vadd.f32 %v14652_v30, %v879_v32  ;;  %v844_v48 = vld [vmem:[%s14582_s5 + $0x78] sm:$0xff]  ;;  %v846_v50 = vld [vmem:[%s14582_s5 + $0x88] sm:$0xff]  ;;  %v746_v51 = vld [vmem:[%s19197_s4 + $0x70] sm:$0xff] }
  0x37   : > { %v948_v36 = vmax.f32 %v916_v24, 0.0  ;;  %v919_v45 = vadd.f32 %v14652_v30, %v880_v37  ;;  %v920_v46 = vadd.f32 %v14652_v30, %v881_v38  ;;  %2153 = vperm.xlu0 %14425, %v744_v39   ;;  %2168 = vperm.xlu1 %14426, %v747_v40   ;;  %v749_v52 = vld [vmem:[%s19197_s4 + $0x88] sm:$0xff]  ;;  %v882_v55 = vmul.f32 %v14629_v23, %v843_v47  ;;  %v748_v61 = vld [vmem:[%s19197_s4 + $0x80] sm:$0xff]  ;;  %v751_v62 = vld [vmem:[%s19197_s4 + $0x98] sm:$0xff] }
  0x38   : > { %v949_v53 = vmax.f32 %v917_v42, 0.0  ;;  %v950_v54 = vmax.f32 %v918_v43, 0.0  ;;  %v883_v56 = vmul.f32 %v14629_v23, %v844_v48  ;;  %v884_v59 = vmul.f32 %v14629_v23, %v845_v49  ;;  %v847_v5 = vld [vmem:[%s14582_s5 + $0x90] sm:$0xff]  ;;  %v848_v6 = vld [vmem:[%s14582_s5 + $0x98] sm:$0xff]  ;;  %v849_v7 = vld [vmem:[%s14582_s5 + $0xa0] sm:$0xff] }
  0x39   : > { %v975_v44 = vpack.c.bf16 %v948_v36, %v947_v35  ;;  %v951_v57 = vmax.f32 %v919_v45, 0.0  ;;  %v952_v58 = vmax.f32 %v920_v46, 0.0  ;;  %v885_v60 = vmul.f32 %v14629_v23, %v846_v50  ;;  %v850_v8 = vld [vmem:[%s14582_s5 + $0xa8] sm:$0xff]  ;;  %v750_v9 = vld [vmem:[%s19197_s4 + $0x90] sm:$0xff]  ;;  %v752_v19 = vld [vmem:[%s19197_s4 + $0xa0] sm:$0xff] }
  0x3a   : > { %v976_v63 = vpack.c.bf16 %v950_v54, %v949_v53  ;;  %v921_v0 = vadd.f32 %v14652_v30, %v882_v55  ;;  %v922_v1 = vadd.f32 %v14652_v30, %v883_v56  ;;  %v923_v3 = vadd.f32 %v14652_v30, %v884_v59  ;;  %v753_v10 = vld [vmem:[%s19197_s4 + $0xa8] sm:$0xff]  ;;  %v755_v20 = vld [vmem:[%s19197_s4 + $0xb8] sm:$0xff]  ;;  %v851_v25 = vld [vmem:[%s14582_s5 + $0xb0] sm:$0xff] }
  0x3b   : > { %2163 = vperm.xlu0 %14425, %v746_v51   ;;  %2178 = vperm.xlu1 %14426, %v749_v52   ;;  %v977_v2 = vpack.c.bf16 %v952_v58, %v951_v57  ;;  %v924_v4 = vadd.f32 %v14652_v30, %v885_v60  ;;  %v886_v13 = vmul.f32 %v14629_v23, %v847_v5  ;;  %v852_v29 = vld [vmem:[%s14582_s5 + $0xb8] sm:$0xff]  ;;  %v853_v31 = vld [vmem:[%s14582_s5 + $0xc0] sm:$0xff]  ;;  %v854_v32 = vld [vmem:[%s14582_s5 + $0xc8] sm:$0xff] }
  0x3c   : > { %v953_v11 = vmax.f32 %v921_v0, 0.0  ;;  %v954_v12 = vmax.f32 %v922_v1, 0.0  ;;  %v887_v14 = vmul.f32 %v14629_v23, %v848_v6  ;;  %v955_v15 = vmax.f32 %v923_v3, 0.0  ;;  %v754_v33 = vld [vmem:[%s19197_s4 + $0xb0] sm:$0xff]  ;;  %v757_v35 = vld [vmem:[%s19197_s4 + $0xc8] sm:$0xff]  ;;  %v756_v43 = vld [vmem:[%s19197_s4 + $0xc0] sm:$0xff] }
  0x3d   : > { %12601 = vmatmul.mubr.msk.bf16.gmra.mrb[4].mxu0 %vm796_vm1, %v974_v41  ;;  %v956_v16 = vmax.f32 %v924_v4, 0.0  ;;  %v888_v17 = vmul.f32 %v14629_v23, %v849_v7  ;;  %v889_v18 = vmul.f32 %v14629_v23, %v850_v8  ;;  %v925_v22 = vadd.f32 %v14652_v30, %v886_v13  ;;  %v759_v45 = vld [vmem:[%s19197_s4 + $0xd8] sm:$0xff]  ;;  %v855_v49 = vld [vmem:[%s14582_s5 + $0xd0] sm:$0xff]  ;;  %v857_v53 = vld [vmem:[%s14582_s5 + $0xe0] sm:$0xff] }
  0x3e   : > { %12604 = vmatprep.mubr.msk.bf16.mxu0 %vm796_vm1, %v975_v44  ;;  %v978_v21 = vpack.c.bf16 %v954_v12, %v953_v11  ;;  %v926_v24 = vadd.f32 %v14652_v30, %v887_v14  ;;  %v890_v34 = vmul.f32 %v14629_v23, %v851_v25  ;;  %v891_v38 = vmul.f32 %v14629_v23, %v852_v29  ;;  %v856_v52 = vld [vmem:[%s14582_s5 + $0xd8] sm:$0xff]  ;;  %v858_v54 = vld [vmem:[%s14582_s5 + $0xe8] sm:$0xff]  ;;  %v758_v55 = vld [vmem:[%s19197_s4 + $0xd0] sm:$0xff] }
  0x3f   : > { %2173 = vperm.xlu0 %14425, %v748_v61   ;;  %2188 = vperm.xlu1 %14426, %v751_v62   ;;  %v979_v26 = vpack.c.bf16 %v956_v16, %v955_v15  ;;  %v927_v27 = vadd.f32 %v14652_v30, %v888_v17  ;;  %v928_v28 = vadd.f32 %v14652_v30, %v889_v18  ;;  %v957_v36 = vmax.f32 %v925_v22, 0.0  ;;  %v761_v58 = vld [vmem:[%s19197_s4 + $0xe8] sm:$0xff]  ;;  %v760_v1 = vld [vmem:[%s19197_s4 + $0xe0] sm:$0xff]  ;;  %v763_v3 = vld [vmem:[%s19197_s4 + $0xf8] sm:$0xff] }
  0x40   : > { %v958_v37 = vmax.f32 %v926_v24, 0.0  ;;  %v892_v39 = vmul.f32 %v14629_v23, %v853_v31  ;;  %v893_v42 = vmul.f32 %v14629_v23, %v854_v32  ;;  %v14840_v44 = vadd.f32 %v14652_v30, %v890_v34  ;;  %v860_v11 = vld [vmem:[%s14582_s5 + $0xf8] sm:$0xff]  ;;  %v762_v12 = vld [vmem:[%s19197_s4 + $0xf0] sm:$0xff]  ;;  %v701_v13 = vld [vmem:[%s19201_s25 + $0x8] sm:$0xff] }
  0x41   : > { %v959_v40 = vmax.f32 %v927_v27, 0.0  ;;  %v960_v41 = vmax.f32 %v928_v28, 0.0  ;;  %v14846_v47 = vadd.f32 %v14652_v30, %v891_v38  ;;  %v894_v57 = vmul.f32 %v14629_v23, %v855_v49  ;;  %v705_v27 = vld [vmem:[%s19201_s25 + $0x28] sm:$0xff]  ;;  %v707_v31 = vld [vmem:[%s19201_s25 + $0x38] sm:$0xff]  ;;  %v722_v49 = vld [vmem:[%s19201_s25 + $0xb0] sm:$0xff] }
  0x42   : > { %v980_v46 = vpack.c.bf16 %v958_v37, %v957_v36  ;;  %v14849_v48 = vadd.f32 %v14652_v30, %v892_v39  ;;  %v14853_v51 = vadd.f32 %v14652_v30, %v893_v42  ;;  %v961_v56 = vmax.f32 %v14840_v44, 0.0  ;;  %v709_v34 = vld [vmem:[%s19201_s25 + $0x48] sm:$0xff]  ;;  %v711_v36 = vld [vmem:[%s19201_s25 + $0x58] sm:$0xff]  ;;  %v710_v37 = vld [vmem:[%s19201_s25 + $0x50] sm:$0xff] }
  0x43   : > { %2183 = vperm.xlu0 %14425, %v750_v9   ;;  %2198 = vperm.xlu1 %14426, %v753_v10   ;;  %v981_v50 = vpack.c.bf16 %v960_v41, %v959_v40  ;;  %v962_v59 = vmax.f32 %v14846_v47, 0.0  ;;  %v895_v61 = vmul.f32 %v14629_v23, %v856_v52  ;;  %v896_v62 = vmul.f32 %v14629_v23, %v857_v53  ;;  %v859_v10 = vld [vmem:[%s14582_s5 + $0xf0] sm:$0xff]  ;;  %v713_v38 = vld [vmem:[%s19201_s25 + $0x68] sm:$0xff]  ;;  %v712_v39 = vld [vmem:[%s19201_s25 + $0x60] sm:$0xff] }
  0x44   : > { %v963_v60 = vmax.f32 %v14849_v48, 0.0  ;;  %v897_v0 = vmul.f32 %v14629_v23, %v858_v54  ;;  %v933_v5 = vadd.f32 %v14652_v30, %v894_v57  ;;  %v898_v16 = vmul.f32 %v14629_v23, %v859_v10  ;;  %v715_v40 = vld [vmem:[%s19201_s25 + $0x78] sm:$0xff]  ;;  %v714_v41 = vld [vmem:[%s19201_s25 + $0x70] sm:$0xff]  ;;  %v717_v42 = vld [vmem:[%s19201_s25 + $0x88] sm:$0xff] }
  0x45   : > { %12605 = vmatmul.mubr.msk.bf16.gmra.mrb[8].mxu0 %vm796_vm1, %v976_v63  ;;  %v964_v63 = vmax.f32 %v14853_v51, 0.0  ;;  %v982_v4 = vpack.c.bf16 %v962_v59, %v961_v56  ;;  %v934_v6 = vadd.f32 %v14652_v30, %v895_v61  ;;  %v935_v8 = vadd.f32 %v14652_v30, %v896_v62  ;;  %v719_v44 = vld [vmem:[%s19201_s25 + $0x98] sm:$0xff]  ;;  %v720_v47 = vld [vmem:[%s19201_s25 + $0xa0] sm:$0xff]  ;;  %v726_v53 = vld [vmem:[%s19201_s25 + $0xd0] sm:$0xff] }
  0x46   : > { %12608 = vmatprep.mubr.msk.bf16.mxu0 %vm796_vm1, %v977_v2  ;;  %v14437_v2 = vmov 0.0   ;;  %v936_v9 = vadd.f32 %v14652_v30, %v897_v0  ;;  %v965_v14 = vmax.f32 %v933_v5, 0.0  ;;  %v899_v17 = vmul.f32 %v14629_v23, %v860_v11  ;;  %v723_v48 = vld [vmem:[%s19201_s25 + $0xb8] sm:$0xff]  ;;  %v724_v51 = vld [vmem:[%s19201_s25 + $0xc0] sm:$0xff]  ;;  %v729_v54 = vld [vmem:[%s19201_s25 + $0xe8] sm:$0xff] }
  0x47   : > { %2193 = vperm.xlu0 %14425, %v752_v19   ;;  %2208 = vperm.xlu1 %14426, %v755_v20   ;;  %667 = vst.msk [vmem:[#allocation2 + $0x28] sm:$0xff] %vm661_vm2, %v14437_v2  ;;  %662 = vst.msk [vmem:[#allocation2] sm:$0xff] %vm661_vm2, %v14437_v2  ;;  %v983_v7 = vpack.c.bf16 %v964_v63, %v963_v60  ;;  %v966_v15 = vmax.f32 %v934_v6, 0.0  ;;  %v967_v18 = vmax.f32 %v935_v8, 0.0  ;;  %v700_v20 = vld [vmem:[%s19201_s25] sm:$0xff]  ;;  %v727_v52 = vld [vmem:[%s19201_s25 + $0xd8] sm:$0xff] }
  0x48   : > { %663 = vst.msk [vmem:[#allocation2 + $0x8] sm:$0xff] %vm661_vm2, %v14437_v2  ;;  %664 = vst.msk [vmem:[#allocation2 + $0x10] sm:$0xff] %vm661_vm2, %v14437_v2  ;;  %v968_v19 = vmax.f32 %v936_v9, 0.0  ;;  %v937_v24 = vadd.f32 %v14652_v30, %v898_v16  ;;  %v938_v25 = vadd.f32 %v14652_v30, %v899_v17  ;;  %v704_v30 = vld [vmem:[%s19201_s25 + $0x20] sm:$0xff]  ;;  %v731_v56 = vld [vmem:[%s19201_s25 + $0xf8] sm:$0xff] }
  0x49   : > { %665 = vst.msk [vmem:[#allocation2 + $0x18] sm:$0xff] %vm661_vm2, %v14437_v2  ;;  %666 = vst.msk [vmem:[#allocation2 + $0x20] sm:$0xff] %vm661_vm2, %v14437_v2  ;;  %v984_v22 = vpack.c.bf16 %v966_v15, %v965_v14  ;;  %v11585_v57 = vld [vmem:[%s18702_s8 + $0x4] sm:$0xf]  ;;  %v730_v0 = vld [vmem:[%s19201_s25 + $0xf0] sm:$0xff] }
  0x4a   : > { %668 = vst.msk [vmem:[#allocation2 + $0x30] sm:$0xff] %vm661_vm2, %v14437_v2  ;;  %669 = vst.msk [vmem:[#allocation2 + $0x38] sm:$0xff] %vm661_vm2, %v14437_v2  ;;  %v985_v23 = vpack.c.bf16 %v968_v19, %v967_v18  ;;  %v969_v28 = vmax.f32 %v937_v24, 0.0  ;;  %v970_v29 = vmax.f32 %v938_v25, 0.0  ;;  %14383 = vmatprep.subr.msk.bf16.mxu0 %vm1682_vm3, %v11585_v57  ;;  %v1684_v59 = vsel %vm1682_vm3, %v11585_v57, 0 }
  0x4b   : > { %2203 = vperm.xlu0 %14425, %v754_v33   ;;  %2218 = vperm.xlu1 %14426, %v757_v35   ;;  %670 = vst.msk [vmem:[#allocation2 + $0x40] sm:$0xff] %vm661_vm2, %v14437_v2  ;;  %671 = vst.msk [vmem:[#allocation2 + $0x48] sm:$0xff] %vm661_vm2, %v14437_v2  ;;  %v706_v33 = vld [vmem:[%s19201_s25 + $0x30] sm:$0xff]  ;;  %v708_v35 = vld [vmem:[%s19201_s25 + $0x40] sm:$0xff] }
  0x4c   : > { %672 = vst.msk [vmem:[#allocation2 + $0x50] sm:$0xff] %vm661_vm2, %v14437_v2  ;;  %673 = vst.msk [vmem:[#allocation2 + $0x58] sm:$0xff] %vm661_vm2, %v14437_v2  ;;  %v986_v32 = vpack.c.bf16 %v970_v29, %v969_v28  ;;  %12629 = vmatpush3.bf16.msra.mxu0 %v1684_v59  ;;  %v15061_v6 = vld [vmem:[%s18702_s8] sm:$0xf] }
  0x4d   : > { %12609 = vmatmul.mubr.msk.bf16.gmra.mrb[12].mxu0 %vm796_vm1, %v978_v21  ;;  %674 = vst.msk [vmem:[#allocation2 + $0x60] sm:$0xff] %vm661_vm2, %v14437_v2  ;;  %675 = vst.msk [vmem:[#allocation2 + $0x68] sm:$0xff] %vm661_vm2, %v14437_v2  ;;  %v703_v21 = vld [vmem:[%s19201_s25 + $0x18] sm:$0xff]  ;;  %14384 = vmatprep.subr.msk.bf16.mxu0 %vm1682_vm3, %v15061_v6  ;;  %v15100_v24 = vld [vmem:[%s18700_s6] ss:$0 sm:$0xff] }
  0x4e   : > { %12612 = vmatprep.mubr.msk.bf16.mxu0 %vm796_vm1, %v979_v26  ;;  %676 = vst.msk [vmem:[#allocation2 + $0x70] sm:$0xff] %vm661_vm2, %v14437_v2  ;;  %677 = vst.msk [vmem:[#allocation2 + $0x78] sm:$0xff] %vm661_vm2, %v14437_v2  ;;  %v702_v26 = vld [vmem:[%s19201_s25 + $0x10] sm:$0xff] }
  0x4f   : > { %2213 = vperm.xlu0 %14425, %v756_v43   ;;  %2228 = vperm.xlu1 %14426, %v759_v45   ;;  %678 = vst.msk [vmem:[#allocation2 + $0x80] sm:$0xff] %vm661_vm2, %v14437_v2  ;;  %679 = vst.msk [vmem:[#allocation2 + $0x88] sm:$0xff] %vm661_vm2, %v14437_v2  ;;  %v716_v43 = vld [vmem:[%s19201_s25 + $0x80] sm:$0xff]  ;;  %v718_v45 = vld [vmem:[%s19201_s25 + $0x90] sm:$0xff] }
  0x50   : > { %680 = vst.msk [vmem:[#allocation2 + $0x90] sm:$0xff] %vm661_vm2, %v14437_v2  ;;  %681 = vst.msk [vmem:[#allocation2 + $0x98] sm:$0xff] %vm661_vm2, %v14437_v2  ;;  %v1584_v60 = vld [vmem:[#allocation2 + $0x8] sm:$0xff]  ;;  %v1585_v61 = vld [vmem:[#allocation2 + $0x10] sm:$0xff] }
  0x51   : > { %682 = vst.msk [vmem:[#allocation2 + $0xa0] sm:$0xff] %vm661_vm2, %v14437_v2  ;;  %683 = vst.msk [vmem:[#allocation2 + $0xa8] sm:$0xff] %vm661_vm2, %v14437_v2  ;;  %v1616_v63 = vpack.c.bf16 %v1585_v61, %v1584_v60 }
  0x52   : > { %684 = vst.msk [vmem:[#allocation2 + $0xb0] sm:$0xff] %vm661_vm2, %v14437_v2  ;;  %685 = vst.msk [vmem:[#allocation2 + $0xb8] sm:$0xff] %vm661_vm2, %v14437_v2 }
  0x53   : > { %2223 = vperm.xlu0 %14425, %v758_v55   ;;  %2238 = vperm.xlu1 %14426, %v761_v58   ;;  %686 = vst.msk [vmem:[#allocation2 + $0xc0] sm:$0xff] %vm661_vm2, %v14437_v2  ;;  %687 = vst.msk [vmem:[#allocation2 + $0xc8] sm:$0xff] %vm661_vm2, %v14437_v2  ;;  %v728_v55 = vld [vmem:[%s19201_s25 + $0xe0] sm:$0xff]  ;;  %v11652_v58 = vld [vmem:[%s18702_s8 + $0x10] sm:$0xf] }
  0x54   : > { %688 = vst.msk [vmem:[#allocation2 + $0xd0] sm:$0xff] %vm661_vm2, %v14437_v2  ;;  %689 = vst.msk [vmem:[#allocation2 + $0xd8] sm:$0xff] %vm661_vm2, %v14437_v2  ;;  %14387 = vmatprep.subr.msk.bf16.mxu1 %vm1682_vm3, %v11652_v58  ;;  %v2970_v62 = vsel %vm1682_vm3, %v11652_v58, 0 }
  0x55   : > { %12613 = vmatmul.mubr.msk.bf16.gmra.mrb[16].mxu0 %vm796_vm1, %v980_v46  ;;  %690 = vst.msk [vmem:[#allocation2 + $0xe0] sm:$0xff] %vm661_vm2, %v14437_v2  ;;  %691 = vst.msk [vmem:[#allocation2 + $0xe8] sm:$0xff] %vm661_vm2, %v14437_v2  ;;  %v721_v46 = vld [vmem:[%s19201_s25 + $0xa8] sm:$0xff]  ;;  %12765 = vmatpush3.bf16.msra.mxu1 %v2970_v62 }
  0x56   : > { %12616 = vmatprep.mubr.msk.bf16.mxu0 %vm796_vm1, %v981_v50  ;;  %692 = vst.msk [vmem:[#allocation2 + $0xf0] sm:$0xff] %vm661_vm2, %v14437_v2  ;;  %693 = vst.msk [vmem:[#allocation2 + $0xf8] sm:$0xff] %vm661_vm2, %v14437_v2  ;;  %v725_v50 = vld [vmem:[%s19201_s25 + $0xc8] sm:$0xff] }
  0x57   : > { %694 = vst.msk [vmem:[#allocation2 + $0x100] sm:$0xff] %vm661_vm2, %v14437_v2  ;;  %695 = vst.msk [vmem:[#allocation2 + $0x108] sm:$0xff] %vm661_vm2, %v14437_v2  ;;  %2233 = vperm.xlu0 %14425, %v760_v1   ;;  %2248 = vperm.xlu1 %14426, %v763_v3   ;;  %v15046_v1 = vld [vmem:[%s18702_s8 + $0x14] sm:$0xf] }
  0x58   : > { %696 = vst.msk [vmem:[#allocation2 + $0x110] sm:$0xff] %vm661_vm2, %v14437_v2  ;;  %697 = vst.msk [vmem:[#allocation2 + $0x118] sm:$0xff] %vm661_vm2, %v14437_v2  ;;  %14388 = vmatprep.subr.msk.bf16.mxu1 %vm1682_vm3, %v15046_v1 }
  0x59   : > { %698 = vst.msk [vmem:[#allocation2 + $0x120] sm:$0xff] %vm661_vm2, %v14437_v2  ;;  %699 = vst.msk [vmem:[#allocation2 + $0x128] sm:$0xff] %vm661_vm2, %v14437_v2 }
  0x5b   : > { %2243 = vperm.xlu0 %14425, %v762_v12   ;;  %1382 = vperm.xlu1 %14426, %v701_v13  }
  0x5d   : > { %12617 = vmatmul.mubr.msk.bf16.gmra.mrb[20].mxu0 %vm796_vm1, %v982_v4 }
  0x5e   : > { %12620 = vmatprep.mubr.msk.bf16.mxu0 %vm796_vm1, %v983_v7 }
  0x5f   : > { %1377 = vperm.xlu0 %14425, %v700_v20   ;;  %1392 = vperm.xlu1 %14426, %v703_v21  }
  0x63   : > { %1387 = vperm.xlu0 %14425, %v702_v26   ;;  %1402 = vperm.xlu1 %14426, %v705_v27  }
  0x65   : > { %12621 = vmatmul.mubr.msk.bf16.gmra.mrb[24].mxu0 %vm796_vm1, %v984_v22 }
  0x66   : > { %12624 = vmatprep.mubr.msk.bf16.mxu0 %vm796_vm1, %v985_v23  ;;  %v15105_v23 = vld [vmem:[%s18701_s7] ss:$0 sm:$0xff] }
  0x67   : > { %1397 = vperm.xlu0 %14425, %v704_v30   ;;  %1412 = vperm.xlu1 %14426, %v707_v31  }
  0x6b   : > { %1407 = vperm.xlu0 %14425, %v706_v33   ;;  %1422 = vperm.xlu1 %14426, %v709_v34  }
  0x6d   : > { %12625 = vmatmul.mubr.msk.bf16.gmra.mrb[28].mxu0 %vm796_vm1, %v986_v32 }
  0x6e   : > { %12630 = vmatprep.mubr.msk.bf16.mxu0 %vm661_vm2, %v1616_v63 }
  0x6f   : > { %1417 = vperm.xlu0 %14425, %v708_v35   ;;  %1432 = vperm.xlu1 %14426, %v711_v36  }
  0x73   : > { %1427 = vperm.xlu0 %14425, %v710_v37   ;;  %1442 = vperm.xlu1 %14426, %v713_v38  }
  0x77   : > { %1437 = vperm.xlu0 %14425, %v712_v39   ;;  %1452 = vperm.xlu1 %14426, %v715_v40  }
  0x7b   : > { %1447 = vperm.xlu0 %14425, %v714_v41   ;;  %1462 = vperm.xlu1 %14426, %v717_v42  }
  0x7f   : > { %1457 = vperm.xlu0 %14425, %v716_v43   ;;  %1472 = vperm.xlu1 %14426, %v719_v44  }
  0x83   : > { %1467 = vperm.xlu0 %14425, %v718_v45   ;;  %1482 = vperm.xlu1 %14426, %v721_v46  }
  0x87   : > { %1477 = vperm.xlu0 %14425, %v720_v47   ;;  %1492 = vperm.xlu1 %14426, %v723_v48  }
  0x8b   : > { %1487 = vperm.xlu0 %14425, %v722_v49   ;;  %1502 = vperm.xlu1 %14426, %v725_v50  }
  0x8f   : > { %1497 = vperm.xlu0 %14425, %v724_v51   ;;  %1512 = vperm.xlu1 %14426, %v727_v52  }
  0x93   : > { %1507 = vperm.xlu0 %14425, %v726_v53   ;;  %1522 = vperm.xlu1 %14426, %v729_v54  }
  0x97   : > { %1517 = vperm.xlu0 %14425, %v728_v55   ;;  %1532 = vperm.xlu1 %14426, %v731_v56  }
  0x9a   : > { %v15050_v2 = vpop.permute.xlu1 %2103 }
  0x9b   : > { %1527 = vperm.xlu0 %14425, %v730_v0   ;;  %19202 = vst [vmem:[#allocation3_spill] sm:$0xff] %v15050_v2  ;;  %v15052_v3 = vpop.permute.xlu0 %2093 }
  0x9c   : > { %19203 = vst [vmem:[#allocation4_spill] sm:$0xff] %v15052_v3 }
  0x9e   : > { %v15054_v4 = vpop.permute.xlu1 %2108 }
  0x9f   : > { %19204 = vst [vmem:[#allocation5_spill] sm:$0xff] %v15054_v4  ;;  %v15056_v5 = vpop.permute.xlu0 %2098 }
  0xa0   : > { %19205 = vst [vmem:[#allocation6_spill] sm:$0xff] %v15056_v5 }
  0xa2   : > { %v15065_v7 = vpop.permute.xlu1 %2118 }
  0xa3   : > { %19206 = vst [vmem:[#allocation7_spill] sm:$0xff] %v15065_v7  ;;  %v15067_v8 = vpop.permute.xlu0 %2113 }
  0xa4   : > { %19207 = vst [vmem:[#allocation8_spill] sm:$0xff] %v15067_v8 }
  0xa6   : > { %v15069_v9 = vpop.permute.xlu1 %2128 }
  0xa7   : > { %19208 = vst [vmem:[#allocation9_spill] sm:$0xff] %v15069_v9  ;;  %v15071_v10 = vpop.permute.xlu0 %2123 }
  0xa8   : > { %19209 = vst [vmem:[#allocation10_spill] sm:$0xff] %v15071_v10 }
  0xaa   : > { %v15073_v11 = vpop.permute.xlu1 %2138 }
  0xab   : > { %19210 = vst [vmem:[#allocation11_spill] sm:$0xff] %v15073_v11  ;;  %v15075_v12 = vpop.permute.xlu0 %2133 }
  0xac   : > { %19211 = vst [vmem:[#allocation12_spill] sm:$0xff] %v15075_v12 }
  0xae   : > { %v15077_v13 = vpop.permute.xlu1 %2148 }
  0xaf   : > { %19212 = vst [vmem:[#allocation13_spill] sm:$0xff] %v15077_v13 }
  0xb0   : > { %v15079_v14 = vpop.permute.xlu0 %2143 }
  0xb1   : > { %19213 = vst [vmem:[#allocation14_spill] sm:$0xff] %v15079_v14 }
  0xb2   : > { %v15081_v15 = vpop.permute.xlu1 %2158 }
  0xb3   : > { %19214 = vst [vmem:[#allocation15_spill] sm:$0xff] %v15081_v15 }
  0xb6   : > { %v15083_v16 = vpop.permute.xlu0 %2153  ;;  %v15085_v17 = vpop.permute.xlu1 %2168 }
  0xb7   : > { %19215 = vst [vmem:[#allocation16_spill] sm:$0xff] %v15083_v16  ;;  %19216 = vst [vmem:[#allocation17_spill] sm:$0xff] %v15085_v17 }
  0xba   : > { %v15087_v18 = vpop.permute.xlu0 %2163  ;;  %v15089_v19 = vpop.permute.xlu1 %2178 }
  0xbb   : > { %19217 = vst [vmem:[#allocation18_spill] sm:$0xff] %v15087_v18  ;;  %19218 = vst [vmem:[#allocation19_spill] sm:$0xff] %v15089_v19 }
  0xbe   : > { %v15091_v20 = vpop.permute.xlu0 %2173  ;;  %v15093_v21 = vpop.permute.xlu1 %2188 }
  0xbf   : > { %19219 = vst [vmem:[#allocation20_spill] sm:$0xff] %v15091_v20  ;;  %19220 = vst [vmem:[#allocation21_spill] sm:$0xff] %v15093_v21 }
  0xc2   : > { %v15095_v22 = vpop.permute.xlu0 %2183  ;;  %v15109_v30 = vpop.permute.xlu1 %2198 }
  0xc3   : > { %19221 = vst [vmem:[#allocation22_spill] sm:$0xff] %v15095_v22  ;;  %19222 = vst [vmem:[#allocation23_spill] sm:$0xff] %v15109_v30 }
  0xc6   : > { %v15113_v34 = vpop.permute.xlu0 %2193  ;;  %v15121_v44 = vpop.permute.xlu1 %2208 }
  0xc7   : > { %19223 = vst [vmem:[#allocation24_spill] sm:$0xff] %v15113_v34  ;;  %19224 = vst [vmem:[#allocation25_spill] sm:$0xff] %v15121_v44 }
  0xca   : > { %v15125_v47 = vpop.permute.xlu0 %2203  ;;  %v15135_v59 = vpop.permute.xlu1 %2218 }
  0xcb   : > { %19225 = vst [vmem:[#allocation26_spill] sm:$0xff] %v15125_v47  ;;  %19226 = vst [vmem:[#allocation27_spill] sm:$0xff] %v15135_v59 }
  0xce   : > { %v15138_v61 = vpop.permute.xlu0 %2213 }
  0xcf   : > { %19227 = vst [vmem:[#allocation28_spill] sm:$0xff] %v15138_v61 }
 0x108   : > { %v12598_v25 = vpop.f32.mrb[0].mxu0 }
 0x109   : > { %v1210_v26 = vmul.f32 %v12598_v25, %v15100_v24  ;;  %v1074_v27 = vpop.f32.mrb[1].mxu0 }
 0x10a   : > { %v1208_v28 = vmul.f32 %v15100_v24, %v1074_v27  ;;  %v12599_v29 = vpop.f32.mrb[2].mxu0 }
 0x10b   : > { %v1249_v31 = vadd.f32 %v15105_v23, %v1210_v26  ;;  %v1211_v32 = vmul.f32 %v12599_v29, %v15100_v24  ;;  %v1077_v33 = vpop.f32.mrb[3].mxu0 }
 0x10c   : > { %v1247_v35 = vadd.f32 %v15105_v23, %v1208_v28  ;;  %v1209_v36 = vmul.f32 %v15100_v24, %v1077_v33 }
 0x10d   : > { %v1281_v37 = vmax.f32 %v1249_v31, 0.0  ;;  %v1250_v38 = vadd.f32 %v15105_v23, %v1211_v32 }
 0x10e   : > { %v1279_v39 = vmax.f32 %v1247_v35, 0.0  ;;  %v1248_v40 = vadd.f32 %v15105_v23, %v1209_v36  ;;  %v3296_v35 = vsel %vm1682_vm3, %v15046_v1, 0  ;;  %v15158_v1 = vld [vmem:[%s18702_s8 + $0x18] sm:$0xf] }
 0x10f   : > { %1313 = vst.msk [vmem:[#allocation2 + $0x28] sm:$0xff] %vm661_vm2, %v1281_v37  ;;  %v1282_v41 = vmax.f32 %v1250_v38, 0.0 }
 0x110   : > { %1311 = vst.msk [vmem:[#allocation2 + $0x18] sm:$0xff] %vm661_vm2, %v1279_v39  ;;  %v1280_v42 = vmax.f32 %v1248_v40, 0.0  ;;  %v12602_v43 = vpop.f32.mrb[4].mxu0  ;;  %v1896_v40 = vsel %vm1682_vm3, %v15061_v6, 0 }
 0x111   : > { %1314 = vst.msk [vmem:[#allocation2 + $0x30] sm:$0xff] %vm661_vm2, %v1282_v41  ;;  %v1214_v45 = vmul.f32 %v12602_v43, %v15100_v24  ;;  %v1090_v46 = vpop.f32.mrb[5].mxu0  ;;  %v15163_v43 = vld [vmem:[%s18702_s8 + $0x8] sm:$0xf] }
 0x112   : > { %1312 = vst.msk [vmem:[#allocation2 + $0x20] sm:$0xff] %vm661_vm2, %v1280_v42  ;;  %v1212_v48 = vmul.f32 %v15100_v24, %v1090_v46  ;;  %v12603_v49 = vpop.f32.mrb[6].mxu0 }
 0x113   : > { %v1253_v50 = vadd.f32 %v15105_v23, %v1214_v45  ;;  %v1215_v51 = vmul.f32 %v12603_v49, %v15100_v24  ;;  %v1093_v52 = vpop.f32.mrb[7].mxu0  ;;  %v15165_v45 = vpop.permute.xlu1 %2228 }
 0x114   : > { %v1251_v53 = vadd.f32 %v15105_v23, %v1212_v48  ;;  %v1213_v54 = vmul.f32 %v15100_v24, %v1093_v52  ;;  %19228 = vst [vmem:[#allocation29_spill] sm:$0xff] %v15165_v45  ;;  %v15170_v48 = vpop.permute.xlu0 %2223 }
 0x115   : > { %v1285_v55 = vmax.f32 %v1253_v50, 0.0  ;;  %v1254_v56 = vadd.f32 %v15105_v23, %v1215_v51  ;;  %19229 = vst [vmem:[#allocation30_spill] sm:$0xff] %v15170_v48 }
 0x116   : > { %v1283_v57 = vmax.f32 %v1251_v53, 0.0  ;;  %v1252_v58 = vadd.f32 %v15105_v23, %v1213_v54  ;;  %v1588_v33 = vld [vmem:[#allocation2 + $0x28] sm:$0xff] }
 0x117   : > { %1317 = vst.msk [vmem:[#allocation2 + $0x48] sm:$0xff] %vm661_vm2, %v1285_v55  ;;  %v1286_v60 = vmax.f32 %v1254_v56, 0.0  ;;  %v1586_v27 = vld [vmem:[#allocation2 + $0x18] sm:$0xff] }
 0x118   : > { %1315 = vst.msk [vmem:[#allocation2 + $0x38] sm:$0xff] %vm661_vm2, %v1283_v57  ;;  %v1284_v62 = vmax.f32 %v1252_v58, 0.0  ;;  %v12606_v63 = vpop.f32.mrb[8].mxu0  ;;  %v1589_v0 = vld [vmem:[#allocation2 + $0x30] sm:$0xff] }
 0x119   : > { %1318 = vst.msk [vmem:[#allocation2 + $0x50] sm:$0xff] %vm661_vm2, %v1286_v60  ;;  %v1218_v25 = vmul.f32 %v12606_v63, %v15100_v24  ;;  %v1106_v26 = vpop.f32.mrb[9].mxu0  ;;  %v1587_v28 = vld [vmem:[#allocation2 + $0x20] sm:$0xff]  ;;  %v1618_v39 = vpack.c.bf16 %v1589_v0, %v1588_v33 }
 0x11a   : > { %1316 = vst.msk [vmem:[#allocation2 + $0x40] sm:$0xff] %vm661_vm2, %v1284_v62  ;;  %v1216_v29 = vmul.f32 %v15100_v24, %v1106_v26  ;;  %v12607_v31 = vpop.f32.mrb[10].mxu0  ;;  %v1617_v32 = vpack.c.bf16 %v1587_v28, %v1586_v27 }
 0x11b   : > { %v1257_v36 = vadd.f32 %v15105_v23, %v1218_v25  ;;  %v1219_v37 = vmul.f32 %v12607_v31, %v15100_v24  ;;  %v1109_v38 = vpop.f32.mrb[11].mxu0  ;;  %v15183_v25 = vpop.permute.xlu1 %2238 }
 0x11c   : > { %v1255_v41 = vadd.f32 %v15105_v23, %v1216_v29  ;;  %v1217_v42 = vmul.f32 %v15100_v24, %v1109_v38  ;;  %12631 = vmatmul.mubr.msk.bf16.vlgmr.msra.gmra.mrb[32].mxu0 %vm661_vm2, %v1617_v32  ;;  %12766 = vmatprep.mubr.msk.bf16.mxu1 %vm661_vm2, %v1617_v32  ;;  %19230 = vst [vmem:[#allocation31_spill] sm:$0xff] %v15183_v25  ;;  %v15187_v31 = vpop.permute.xlu0 %2233 }
 0x11d   : > { %v1289_v6 = vmax.f32 %v1257_v36, 0.0  ;;  %v1258_v46 = vadd.f32 %v15105_v23, %v1219_v37  ;;  %12634 = vmatprep.mubr.msk.bf16.mxu0 %vm661_vm2, %v1618_v39  ;;  %12767 = vmatmul.mubr.msk.bf16.vlgmr.msra.gmra.mrb[0].mxu1 %vm661_vm2, %v1618_v39  ;;  %19231 = vst [vmem:[#allocation32_spill] sm:$0xff] %v15187_v31 }
 0x11e   : > { %v1287_v49 = vmax.f32 %v1255_v41, 0.0  ;;  %v1256_v50 = vadd.f32 %v15105_v23, %v1217_v42  ;;  %12799 = vmatpush3.bf16.msra.mxu1 %v3296_v35  ;;  %12663 = vmatpush3.bf16.msra.mxu0 %v1896_v40  ;;  %v1592_v0 = vld [vmem:[#allocation2 + $0x48] sm:$0xff] }
 0x11f   : > { %1321 = vst.msk [vmem:[#allocation2 + $0x68] sm:$0xff] %vm661_vm2, %v1289_v6  ;;  %v1290_v51 = vmax.f32 %v1258_v46, 0.0  ;;  %14389 = vmatprep.subr.msk.bf16.mxu1 %vm1682_vm3, %v15158_v1  ;;  %14385 = vmatprep.subr.msk.bf16.mxu0 %vm1682_vm3, %v15163_v43  ;;  %v1590_v57 = vld [vmem:[#allocation2 + $0x38] sm:$0xff]  ;;  %v15199_v6 = vpop.permute.xlu1 %2248 }
 0x120   : > { %1319 = vst.msk [vmem:[#allocation2 + $0x58] sm:$0xff] %vm661_vm2, %v1287_v49  ;;  %v1288_v52 = vmax.f32 %v1256_v50, 0.0  ;;  %v12610_v53 = vpop.f32.mrb[12].mxu0  ;;  %v1593_v54 = vld [vmem:[#allocation2 + $0x50] sm:$0xff]  ;;  %19232 = vst [vmem:[#allocation33_spill] sm:$0xff] %v15199_v6 }
 0x121   : > { %1322 = vst.msk [vmem:[#allocation2 + $0x70] sm:$0xff] %vm661_vm2, %v1290_v51  ;;  %v1222_v55 = vmul.f32 %v12610_v53, %v15100_v24  ;;  %v1122_v56 = vpop.f32.mrb[13].mxu0  ;;  %v1591_v58 = vld [vmem:[#allocation2 + $0x40] sm:$0xff]  ;;  %v1620_v29 = vpack.c.bf16 %v1593_v54, %v1592_v0 }
 0x122   : > { %1320 = vst.msk [vmem:[#allocation2 + $0x60] sm:$0xff] %vm661_vm2, %v1288_v52  ;;  %v1220_v60 = vmul.f32 %v15100_v24, %v1122_v56  ;;  %v12611_v62 = vpop.f32.mrb[14].mxu0  ;;  %v1619_v63 = vpack.c.bf16 %v1591_v58, %v1590_v57  ;;  %v15203_v52 = vpop.permute.xlu0 %2243 }
 0x123   : > { %v1261_v26 = vadd.f32 %v15105_v23, %v1222_v55  ;;  %v1223_v27 = vmul.f32 %v12611_v62, %v15100_v24  ;;  %v1125_v28 = vpop.f32.mrb[15].mxu0  ;;  %19233 = vst [vmem:[#allocation34_spill] sm:$0xff] %v15203_v52 }
 0x124   : > { %v1259_v32 = vadd.f32 %v15105_v23, %v1220_v60  ;;  %v1221_v33 = vmul.f32 %v15100_v24, %v1125_v28  ;;  %12635 = vmatmul.mubr.msk.bf16.gmra.mrb[36].mxu0 %vm661_vm2, %v1619_v63  ;;  %12770 = vmatprep.mubr.msk.bf16.mxu1 %vm661_vm2, %v1619_v63 }
 0x125   : > { %v1293_v35 = vmax.f32 %v1261_v26, 0.0  ;;  %v1262_v36 = vadd.f32 %v15105_v23, %v1223_v27  ;;  %12638 = vmatprep.mubr.msk.bf16.mxu0 %vm661_vm2, %v1620_v29  ;;  %12771 = vmatmul.mubr.msk.bf16.gmra.mrb[4].mxu1 %vm661_vm2, %v1620_v29 }
 0x126   : > { %v1291_v37 = vmax.f32 %v1259_v32, 0.0  ;;  %v1260_v38 = vadd.f32 %v15105_v23, %v1221_v33  ;;  %v1596_v56 = vld [vmem:[#allocation2 + $0x68] sm:$0xff]  ;;  %v15217_v32 = vpop.permute.xlu1 %1382 }
 0x127   : > { %1325 = vst.msk [vmem:[#allocation2 + $0x88] sm:$0xff] %vm661_vm2, %v1293_v35  ;;  %v1294_v39 = vmax.f32 %v1262_v36, 0.0  ;;  %v1594_v50 = vld [vmem:[#allocation2 + $0x58] sm:$0xff]  ;;  %19234 = vst [vmem:[#allocation35_spill] sm:$0xff] %v15217_v32  ;;  %v15220_v35 = vpop.permute.xlu0 %1377 }
 0x128   : > { %1323 = vst.msk [vmem:[#allocation2 + $0x78] sm:$0xff] %vm661_vm2, %v1291_v37  ;;  %v1292_v40 = vmax.f32 %v1260_v38, 0.0  ;;  %v12614_v41 = vpop.f32.mrb[16].mxu0  ;;  %v1597_v42 = vld [vmem:[#allocation2 + $0x70] sm:$0xff]  ;;  %19235 = vst [vmem:[#allocation36_spill] sm:$0xff] %v15220_v35 }
 0x129   : > { %1326 = vst.msk [vmem:[#allocation2 + $0x90] sm:$0xff] %vm661_vm2, %v1294_v39  ;;  %v1226_v46 = vmul.f32 %v12614_v41, %v15100_v24  ;;  %v1138_v49 = vpop.f32.mrb[17].mxu0  ;;  %v1595_v51 = vld [vmem:[#allocation2 + $0x60] sm:$0xff]  ;;  %v1622_v62 = vpack.c.bf16 %v1597_v42, %v1596_v56 }
 0x12a   : > { %1324 = vst.msk [vmem:[#allocation2 + $0x80] sm:$0xff] %vm661_vm2, %v1292_v40  ;;  %v1224_v53 = vmul.f32 %v15100_v24, %v1138_v49  ;;  %v12615_v54 = vpop.f32.mrb[18].mxu0  ;;  %v1621_v55 = vpack.c.bf16 %v1595_v51, %v1594_v50 }
 0x12b   : > { %v1265_v57 = vadd.f32 %v15105_v23, %v1226_v46  ;;  %v1227_v58 = vmul.f32 %v12615_v54, %v15100_v24  ;;  %v1141_v60 = vpop.f32.mrb[19].mxu0 }
 0x12c   : > { %v1263_v63 = vadd.f32 %v15105_v23, %v1224_v53  ;;  %v1225_v0 = vmul.f32 %v15100_v24, %v1141_v60  ;;  %12639 = vmatmul.mubr.msk.bf16.gmra.mrb[40].mxu0 %vm661_vm2, %v1621_v55  ;;  %12774 = vmatprep.mubr.msk.bf16.mxu1 %vm661_vm2, %v1621_v55  ;;  %v15233_v60 = vpop.permute.xlu1 %1392 }
 0x12d   : > { %v1297_v26 = vmax.f32 %v1265_v57, 0.0  ;;  %v1266_v27 = vadd.f32 %v15105_v23, %v1227_v58  ;;  %12642 = vmatprep.mubr.msk.bf16.mxu0 %vm661_vm2, %v1622_v62  ;;  %12775 = vmatmul.mubr.msk.bf16.gmra.mrb[8].mxu1 %vm661_vm2, %v1622_v62  ;;  %19236 = vst [vmem:[#allocation37_spill] sm:$0xff] %v15233_v60 }
 0x12e   : > { %v1295_v28 = vmax.f32 %v1263_v63, 0.0  ;;  %v1264_v29 = vadd.f32 %v15105_v23, %v1225_v0  ;;  %v1600_v51 = vld [vmem:[#allocation2 + $0x88] sm:$0xff]  ;;  %v15238_v0 = vpop.permute.xlu0 %1387 }
 0x12f   : > { %1329 = vst.msk [vmem:[#allocation2 + $0xa8] sm:$0xff] %vm661_vm2, %v1297_v26  ;;  %v1298_v33 = vmax.f32 %v1266_v27, 0.0  ;;  %v1598_v41 = vld [vmem:[#allocation2 + $0x78] sm:$0xff]  ;;  %19237 = vst [vmem:[#allocation38_spill] sm:$0xff] %v15238_v0 }
 0x130   : > { %1327 = vst.msk [vmem:[#allocation2 + $0x98] sm:$0xff] %vm661_vm2, %v1295_v28  ;;  %v1296_v36 = vmax.f32 %v1264_v29, 0.0  ;;  %v12618_v37 = vpop.f32.mrb[20].mxu0  ;;  %v1601_v38 = vld [vmem:[#allocation2 + $0x90] sm:$0xff] }
 0x131   : > { %1330 = vst.msk [vmem:[#allocation2 + $0xb0] sm:$0xff] %vm661_vm2, %v1298_v33  ;;  %v1230_v39 = vmul.f32 %v12618_v37, %v15100_v24  ;;  %v1154_v40 = vpop.f32.mrb[21].mxu0  ;;  %v1599_v42 = vld [vmem:[#allocation2 + $0x80] sm:$0xff]  ;;  %v1624_v56 = vpack.c.bf16 %v1601_v38, %v1600_v51 }
 0x132   : > { %1328 = vst.msk [vmem:[#allocation2 + $0xa0] sm:$0xff] %vm661_vm2, %v1296_v36  ;;  %v1228_v46 = vmul.f32 %v15100_v24, %v1154_v40  ;;  %v12619_v49 = vpop.f32.mrb[22].mxu0  ;;  %v1623_v50 = vpack.c.bf16 %v1599_v42, %v1598_v41 }
 0x133   : > { %v1269_v53 = vadd.f32 %v15105_v23, %v1230_v39  ;;  %v1231_v54 = vmul.f32 %v12619_v49, %v15100_v24  ;;  %v1157_v55 = vpop.f32.mrb[23].mxu0 }
 0x134   : > { %v1267_v57 = vadd.f32 %v15105_v23, %v1228_v46  ;;  %v1229_v58 = vmul.f32 %v15100_v24, %v1157_v55  ;;  %12643 = vmatmul.mubr.msk.bf16.gmra.mrb[44].mxu0 %vm661_vm2, %v1623_v50  ;;  %12778 = vmatprep.mubr.msk.bf16.mxu1 %vm661_vm2, %v1623_v50  ;;  %v15247_v50 = vpop.permute.xlu1 %1402 }
 0x135   : > { %v1301_v62 = vmax.f32 %v1269_v53, 0.0  ;;  %v1270_v63 = vadd.f32 %v15105_v23, %v1231_v54  ;;  %12646 = vmatprep.mubr.msk.bf16.mxu0 %vm661_vm2, %v1624_v56  ;;  %12779 = vmatmul.mubr.msk.bf16.gmra.mrb[12].mxu1 %vm661_vm2, %v1624_v56  ;;  %19238 = vst [vmem:[#allocation39_spill] sm:$0xff] %v15247_v50  ;;  %v15251_v56 = vpop.permute.xlu0 %1397 }
 0x136   : > { %v1299_v26 = vmax.f32 %v1267_v57, 0.0  ;;  %v1268_v27 = vadd.f32 %v15105_v23, %v1229_v58  ;;  %v1604_v49 = vld [vmem:[#allocation2 + $0xa8] sm:$0xff]  ;;  %19239 = vst [vmem:[#allocation40_spill] sm:$0xff] %v15251_v56 }
 0x137   : > { %1333 = vst.msk [vmem:[#allocation2 + $0xc8] sm:$0xff] %vm661_vm2, %v1301_v62  ;;  %v1302_v28 = vmax.f32 %v1270_v63, 0.0  ;;  %v1602_v39 = vld [vmem:[#allocation2 + $0x98] sm:$0xff] }
 0x138   : > { %1331 = vst.msk [vmem:[#allocation2 + $0xb8] sm:$0xff] %vm661_vm2, %v1299_v26  ;;  %v1300_v29 = vmax.f32 %v1268_v27, 0.0  ;;  %v12622_v33 = vpop.f32.mrb[24].mxu0  ;;  %v1605_v36 = vld [vmem:[#allocation2 + $0xb0] sm:$0xff] }
 0x139   : > { %1334 = vst.msk [vmem:[#allocation2 + $0xd0] sm:$0xff] %vm661_vm2, %v1302_v28  ;;  %v1234_v37 = vmul.f32 %v12622_v33, %v15100_v24  ;;  %v1170_v38 = vpop.f32.mrb[25].mxu0  ;;  %v1603_v40 = vld [vmem:[#allocation2 + $0xa0] sm:$0xff]  ;;  %v1626_v55 = vpack.c.bf16 %v1605_v36, %v1604_v49 }
 0x13a   : > { %1332 = vst.msk [vmem:[#allocation2 + $0xc0] sm:$0xff] %vm661_vm2, %v1300_v29  ;;  %v1232_v41 = vmul.f32 %v15100_v24, %v1170_v38  ;;  %v12623_v42 = vpop.f32.mrb[26].mxu0  ;;  %v1625_v46 = vpack.c.bf16 %v1603_v40, %v1602_v39 }
 0x13b   : > { %v1273_v51 = vadd.f32 %v15105_v23, %v1234_v37  ;;  %v1235_v53 = vmul.f32 %v12623_v42, %v15100_v24  ;;  %v1173_v54 = vpop.f32.mrb[27].mxu0  ;;  %v15263_v37 = vpop.permute.xlu1 %1412 }
 0x13c   : > { %v1271_v57 = vadd.f32 %v15105_v23, %v1232_v41  ;;  %v1233_v58 = vmul.f32 %v15100_v24, %v1173_v54  ;;  %12647 = vmatmul.mubr.msk.bf16.gmra.mrb[48].mxu0 %vm661_vm2, %v1625_v46  ;;  %12782 = vmatprep.mubr.msk.bf16.mxu1 %vm661_vm2, %v1625_v46  ;;  %19240 = vst [vmem:[#allocation41_spill] sm:$0xff] %v15263_v37  ;;  %v15267_v42 = vpop.permute.xlu0 %1407 }
 0x13d   : > { %v1305_v62 = vmax.f32 %v1273_v51, 0.0  ;;  %v1274_v63 = vadd.f32 %v15105_v23, %v1235_v53  ;;  %12650 = vmatprep.mubr.msk.bf16.mxu0 %vm661_vm2, %v1626_v55  ;;  %12783 = vmatmul.mubr.msk.bf16.gmra.mrb[16].mxu1 %vm661_vm2, %v1626_v55  ;;  %19241 = vst [vmem:[#allocation42_spill] sm:$0xff] %v15267_v42 }
 0x13e   : > { %v1303_v26 = vmax.f32 %v1271_v57, 0.0  ;;  %v1272_v27 = vadd.f32 %v15105_v23, %v1233_v58  ;;  %v1608_v53 = vld [vmem:[#allocation2 + $0xc8] sm:$0xff] }
 0x13f   : > { %1337 = vst.msk [vmem:[#allocation2 + $0xe8] sm:$0xff] %vm661_vm2, %v1305_v62  ;;  %v1306_v28 = vmax.f32 %v1274_v63, 0.0  ;;  %v1606_v40 = vld [vmem:[#allocation2 + $0xb8] sm:$0xff] }
 0x140   : > { %1335 = vst.msk [vmem:[#allocation2 + $0xd8] sm:$0xff] %vm661_vm2, %v1303_v26  ;;  %v1304_v29 = vmax.f32 %v1272_v27, 0.0  ;;  %v12626_v33 = vpop.f32.mrb[28].mxu0  ;;  %v1609_v36 = vld [vmem:[#allocation2 + $0xd0] sm:$0xff] }
 0x141   : > { %1338 = vst.msk [vmem:[#allocation2 + $0xf0] sm:$0xff] %vm661_vm2, %v1306_v28  ;;  %v1238_v38 = vmul.f32 %v12626_v33, %v15100_v24  ;;  %v1186_v39 = vpop.f32.mrb[29].mxu0  ;;  %v1607_v41 = vld [vmem:[#allocation2 + $0xc0] sm:$0xff]  ;;  %v1628_v58 = vpack.c.bf16 %v1609_v36, %v1608_v53  ;;  %v15282_v36 = vpop.permute.xlu1 %1422 }
 0x142   : > { %1336 = vst.msk [vmem:[#allocation2 + $0xe0] sm:$0xff] %vm661_vm2, %v1304_v29  ;;  %v1236_v46 = vmul.f32 %v15100_v24, %v1186_v39  ;;  %v12627_v49 = vpop.f32.mrb[30].mxu0  ;;  %v1627_v51 = vpack.c.bf16 %v1607_v41, %v1606_v40  ;;  %19242 = vst [vmem:[#allocation43_spill] sm:$0xff] %v15282_v36 }
 0x143   : > { %v1277_v54 = vadd.f32 %v15105_v23, %v1238_v38  ;;  %v1239_v55 = vmul.f32 %v12627_v49, %v15100_v24  ;;  %v1189_v57 = vpop.f32.mrb[31].mxu0 }
 0x144   : > { %v1275_v62 = vadd.f32 %v15105_v23, %v1236_v46  ;;  %v1237_v63 = vmul.f32 %v15100_v24, %v1189_v57  ;;  %12651 = vmatmul.mubr.msk.bf16.gmra.mrb[52].mxu0 %vm661_vm2, %v1627_v51  ;;  %12786 = vmatprep.mubr.msk.bf16.mxu1 %vm661_vm2, %v1627_v51  ;;  %v15284_v24 = vpop.permute.xlu0 %1417  ;;  %v1344_v51 = vld [vmem:[#allocation2 + $0xf] sm:$0xff] }
 0x145   : > { %v1309_v26 = vmax.f32 %v1277_v54, 0.0  ;;  %v1278_v27 = vadd.f32 %v15105_v23, %v1239_v55  ;;  %12654 = vmatprep.mubr.msk.bf16.mxu0 %vm661_vm2, %v1628_v58  ;;  %12787 = vmatmul.mubr.msk.bf16.gmra.mrb[20].mxu1 %vm661_vm2, %v1628_v58  ;;  %19243 = vst [vmem:[#allocation44_spill] sm:$0xff] %v15284_v24  ;;  %v15293_v54 = vld [vmem:[#allocation2 + $0x19] sm:$0xff]  ;;  %v15295_v55 = vld [vmem:[#allocation2 + $0x21] sm:$0xff]  ;;  %v1536_v58 = vmul.f32 %v15217_v32, %v1344_v51 }
 0x146   : > { %v1307_v28 = vmax.f32 %v1275_v62, 0.0  ;;  %v1276_v29 = vadd.f32 %v15105_v23, %v1237_v63  ;;  %v1612_v49 = vld [vmem:[#allocation2 + $0xe8] sm:$0xff]  ;;  %19244 = vst [vmem:[#allocation45_spill] sm:$0xff] %v15293_v54  ;;  %19245 = vst [vmem:[#allocation46_spill] sm:$0xff] %v15295_v55  ;;  %v15299_v62 = vpop.permute.xlu1 %1432 }
 0x147   : > { %1341 = vst.msk [vmem:[#allocation2 + $0x108] sm:$0xff] %vm661_vm2, %v1309_v26  ;;  %v1310_v33 = vmax.f32 %v1278_v27, 0.0  ;;  %v1610_v40 = vld [vmem:[#allocation2 + $0xd8] sm:$0xff]  ;;  %v1343_v23 = vld [vmem:[#allocation2 + $0x7] sm:$0xff]  ;;  %19246 = vst [vmem:[#allocation47_spill] sm:$0xff] %v15299_v62  ;;  %v3197_v27 = vmul.f32 %v15293_v54, %v15052_v3 }
 0x148   : > { %1339 = vst.msk [vmem:[#allocation2 + $0xf8] sm:$0xff] %vm661_vm2, %v1307_v28  ;;  %v1308_v38 = vmax.f32 %v1276_v29, 0.0  ;;  %v1613_v39 = vld [vmem:[#allocation2 + $0xf0] sm:$0xff]  ;;  %v1535_v57 = vmul.f32 %v15220_v35, %v1343_v23  ;;  %v15301_v63 = vpop.permute.xlu0 %1427  ;;  %v3198_v28 = vmul.f32 %v15295_v55, %v15056_v5 }
 0x149   : > { %1342 = vst.msk [vmem:[#allocation2 + $0x110] sm:$0xff] %vm661_vm2, %v1310_v33  ;;  %v1611_v41 = vld [vmem:[#allocation2 + $0xe0] sm:$0xff]  ;;  %v1630_v53 = vpack.c.bf16 %v1613_v39, %v1612_v49  ;;  %19247 = vst [vmem:[#allocation48_spill] sm:$0xff] %v15301_v63  ;;  %v15317_v55 = vld [vmem:[#allocation2 + $0x2f] sm:$0xff] }
 0x14a   : > { %1340 = vst.msk [vmem:[#allocation2 + $0x100] sm:$0xff] %vm661_vm2, %v1308_v38  ;;  %v1629_v46 = vpack.c.bf16 %v1611_v41, %v1610_v40  ;;  %v1567_v38 = vpack.c.bf16 %v1536_v58, %v1535_v57  ;;  %v15309_v49 = vpop.permute.xlu1 %1442  ;;  %v3229_v51 = vpack.c.bf16 %v3198_v28, %v3197_v27  ;;  %19251 = vst [vmem:[#allocation52_spill] sm:$0xff] %v15317_v55  ;;  %v15319_v54 = vld [vmem:[#allocation2 + $0x31] sm:$0xff]  ;;  %v15325_v58 = vld [vmem:[#allocation2 + $0x39] sm:$0xff] }
 0x14b   : > { %19249 = vst [vmem:[#allocation50_spill] sm:$0xff] %v15309_v49  ;;  %19252 = vst [vmem:[#allocation53_spill] sm:$0xff] %v15319_v54  ;;  %v15323_v57 = vld [vmem:[#allocation2 + $0x17] sm:$0xff]  ;;  %v15332_v28 = vld [vmem:[#allocation2 + $0x29] sm:$0xff] }
 0x14c   : > { %12655 = vmatmul.mubr.msk.bf16.gmra.mrb[56].mxu0 %vm661_vm2, %v1629_v46  ;;  %12790 = vmatprep.mubr.msk.bf16.mxu1 %vm661_vm2, %v1629_v46  ;;  %v15307_v46 = vld [vmem:[#allocation2 + $0x1f] sm:$0xff]  ;;  %v15311_v23 = vpop.permute.xlu0 %1437  ;;  %19253 = vst [vmem:[#allocation54_spill] sm:$0xff] %v15323_v57  ;;  %19254 = vst [vmem:[#allocation55_spill] sm:$0xff] %v15325_v58 }
 0x14d   : > { %12658 = vmatprep.mubr.msk.bf16.mxu0 %vm661_vm2, %v1630_v53  ;;  %12791 = vmatmul.mubr.msk.bf16.gmra.mrb[24].mxu1 %vm661_vm2, %v1630_v53  ;;  %19248 = vst [vmem:[#allocation49_spill] sm:$0xff] %v15307_v46  ;;  %19250 = vst [vmem:[#allocation51_spill] sm:$0xff] %v15311_v23  ;;  %v15315_v53 = vld [vmem:[#allocation2 + $0x27] sm:$0xff]  ;;  %v1538_v27 = vmul.f32 %v15233_v60, %v15307_v46 }
 0x14e   : > { %v2901_v40 = vld [vmem:[#allocation2 + $0x108] sm:$0xff]  ;;  %19256 = vst [vmem:[#allocation57_spill] sm:$0xff] %v15332_v28  ;;  %v15348_v46 = vpop.permute.xlu1 %1452 }
 0x14f   : > { %v1614_v29 = vld [vmem:[#allocation2 + $0xf8] sm:$0xff]  ;;  %19257 = vst [vmem:[#allocation58_spill] sm:$0xff] %v15348_v46 }
 0x150   : > { %v2902_v26 = vld [vmem:[#allocation2 + $0x110] sm:$0xff] }
 0x151   : > { %v1615_v33 = vld [vmem:[#allocation2 + $0x100] sm:$0xff]  ;;  %v2918_v41 = vpack.c.bf16 %v2902_v26, %v2901_v40  ;;  %v3201_v40 = vmul.f32 %v15325_v58, %v15067_v8 }
 0x152   : > { %v1631_v39 = vpack.c.bf16 %v1615_v33, %v1614_v29  ;;  %v15327_v26 = vld [vmem:[#allocation2 + $0x41] sm:$0xff]  ;;  %v1539_v29 = vmul.f32 %v15251_v56, %v15315_v53  ;;  %v1540_v33 = vmul.f32 %v15247_v50, %v15317_v55  ;;  %v15350_v56 = vpop.permute.xlu0 %1447 }
 0x153   : > { %19255 = vst [vmem:[#allocation56_spill] sm:$0xff] %v15327_v26  ;;  %19258 = vst [vmem:[#allocation59_spill] sm:$0xff] %v15350_v56 }
 0x154   : > { %12659 = vmatmul.mubr.msk.bf16.gmra.mrb[60].mxu0 %vm661_vm2, %v1631_v39  ;;  %12794 = vmatprep.mubr.msk.bf16.mxu1 %vm661_vm2, %v1631_v39  ;;  %v1537_v39 = vmul.f32 %v15238_v0, %v15323_v57  ;;  %v1569_v60 = vpack.c.bf16 %v1540_v33, %v1539_v29  ;;  %v15354_v57 = vld [vmem:[#allocation2 + $0x37] sm:$0xff]  ;;  %v15356_v0 = vld [vmem:[#allocation2 + $0x3f] sm:$0xff] }
 0x155   : > { %12795 = vmatmul.mubr.msk.bf16.gmra.mrb[28].mxu1 %vm661_vm2, %v2918_v41  ;;  %12664 = vmatprep.mubr.msk.bf16.mxu0 %vm661_vm2, %v1567_v38  ;;  %v3200_v38 = vmul.f32 %v15319_v54, %v15054_v4  ;;  %v3202_v41 = vmul.f32 %v15327_v26, %v15065_v7  ;;  %v3622_v54 = vsel %vm1682_vm3, %v15158_v1, 0  ;;  %v15361_v26 = vld [vmem:[%s18702_s8 + $0x1c] sm:$0xf]  ;;  %v15368_v29 = vld [vmem:[#allocation2 + $0x51] sm:$0xff]  ;;  %v2350_v1 = vsel %vm1682_vm3, %v15163_v43, 0  ;;  %v15386_v43 = vld [vmem:[#allocation2 + $0x49] sm:$0xff] }
 0x156   : > { %12800 = vmatprep.mubr.msk.bf16.mxu1 %vm661_vm2, %v3229_v51  ;;  %v3199_v51 = vmul.f32 %v15332_v28, %v15050_v2  ;;  %v1568_v50 = vpack.c.bf16 %v1538_v27, %v1537_v39  ;;  %19259 = vst [vmem:[#allocation60_spill] sm:$0xff] %v15361_v26  ;;  %v15364_v28 = vld [vmem:[#allocation2 + $0x47] sm:$0xff]  ;;  %v15366_v27 = vld [vmem:[#allocation2 + $0x4f] sm:$0xff]  ;;  %19261 = vst [vmem:[#allocation62_spill] sm:$0xff] %v15368_v29  ;;  %v1542_v39 = vmul.f32 %v15263_v37, %v15356_v0 }
 0x157   : > { %v3231_v58 = vpack.c.bf16 %v3202_v41, %v3201_v40  ;;  %19260 = vst [vmem:[#allocation61_spill] sm:$0xff] %v15366_v27  ;;  %v15374_v33 = vld [vmem:[#allocation2 + $0x59] sm:$0xff]  ;;  %19264 = vst [vmem:[#allocation65_spill] sm:$0xff] %v15386_v43  ;;  %v3204_v40 = vmul.f32 %v15368_v29, %v15069_v9  ;;  %v1541_v41 = vmul.f32 %v15267_v42, %v15354_v57 }
 0x158   : > { %v3230_v32 = vpack.c.bf16 %v3200_v38, %v3199_v51  ;;  %19262 = vst [vmem:[#allocation63_spill] sm:$0xff] %v15374_v33  ;;  %v15376_v38 = vld [vmem:[#allocation2 + $0x61] sm:$0xff]  ;;  %v3205_v51 = vmul.f32 %v15374_v33, %v15075_v12  ;;  %v15415_v33 = vld [vmem:[#allocation2 + $0x6f] sm:$0xff] }
 0x159   : > { %19263 = vst [vmem:[#allocation64_spill] sm:$0xff] %v15376_v38  ;;  %v15410_v9 = vld [vmem:[#allocation2 + $0x5f] sm:$0xff]  ;;  %19269 = vst [vmem:[#allocation70_spill] sm:$0xff] %v15415_v33  ;;  %v15417_v12 = vld [vmem:[#allocation2 + $0x71] sm:$0xff] }
 0x15a   : > { %19267 = vst [vmem:[#allocation68_spill] sm:$0xff] %v15410_v9  ;;  %19270 = vst [vmem:[#allocation71_spill] sm:$0xff] %v15417_v12 }
 0x15c   : > { %12665 = vmatmul.mubr.msk.bf16.vlgmr.msra.gmra.mrb[32].mxu0 %vm661_vm2, %v1568_v50  ;;  %v15381_v50 = vld [vmem:[%s18702_s8 + $0xc] sm:$0xf] }
 0x15d   : > { %12668 = vmatprep.mubr.msk.bf16.mxu0 %vm661_vm2, %v1569_v60  ;;  %12801 = vmatmul.mubr.msk.bf16.vlgmr.msra.gmra.mrb[0].mxu1 %vm661_vm2, %v3230_v32  ;;  %v1543_v32 = vmul.f32 %v15284_v24, %v15364_v28  ;;  %v1544_v60 = vmul.f32 %v15282_v36, %v15366_v27  ;;  %v3206_v36 = vmul.f32 %v15376_v38, %v15073_v11  ;;  %v15421_v38 = vld [vmem:[#allocation2 + $0x57] sm:$0xff] }
 0x15e   : > { %12833 = vmatpush3.bf16.msra.mxu1 %v3622_v54  ;;  %12804 = vmatprep.mubr.msk.bf16.mxu1 %vm661_vm2, %v3231_v58  ;;  %v15396_v54 = vpop.permute.xlu1 %1462  ;;  %v15398_v58 = vpop.permute.xlu0 %1457  ;;  %v1570_v24 = vpack.c.bf16 %v1542_v39, %v1541_v41  ;;  %19271 = vst [vmem:[#allocation72_spill] sm:$0xff] %v15421_v38  ;;  %v15423_v39 = vld [vmem:[#allocation2 + $0x79] sm:$0xff]  ;;  %v3208_v41 = vmul.f32 %v15417_v12, %v15077_v13  ;;  %v15457_v13 = vld [vmem:[#allocation2 + $0x87] sm:$0xff] }
 0x15f   : > { %12697 = vmatpush3.bf16.msra.mxu0 %v2350_v1  ;;  %14390 = vmatprep.subr.msk.bf16.mxu1 %vm1682_vm3, %v15361_v26  ;;  %19265 = vst [vmem:[#allocation66_spill] sm:$0xff] %v15396_v54  ;;  %19266 = vst [vmem:[#allocation67_spill] sm:$0xff] %v15398_v58  ;;  %v3203_v1 = vmul.f32 %v15386_v43, %v15071_v10  ;;  %v1571_v37 = vpack.c.bf16 %v1544_v60, %v1543_v32  ;;  %v15413_v26 = vld [vmem:[#allocation2 + $0x67] sm:$0xff] }
 0x160   : > { %14386 = vmatprep.subr.msk.bf16.mxu0 %vm1682_vm3, %v15381_v50  ;;  %v3233_v42 = vpack.c.bf16 %v3206_v36, %v3205_v51  ;;  %19268 = vst [vmem:[#allocation69_spill] sm:$0xff] %v15413_v26  ;;  %19272 = vst [vmem:[#allocation73_spill] sm:$0xff] %v15423_v39  ;;  %v15425_v32 = vld [vmem:[#allocation2 + $0x81] sm:$0xff]  ;;  %v1546_v36 = vmul.f32 %v15299_v62, %v15410_v9  ;;  %v1545_v51 = vmul.f32 %v15301_v63, %v15421_v38 }
 0x161   : > { %v3232_v29 = vpack.c.bf16 %v3204_v40, %v3203_v1  ;;  %19273 = vst [vmem:[#allocation74_spill] sm:$0xff] %v15425_v32  ;;  %v15434_v40 = vld [vmem:[#allocation2 + $0x69] sm:$0xff]  ;;  %v3210_v1 = vmul.f32 %v15425_v32, %v15081_v15  ;;  %v15450_v9 = vld [vmem:[#allocation2 + $0x7f] sm:$0xff]  ;;  %19279 = vst [vmem:[#allocation80_spill] sm:$0xff] %v15457_v13 }
 0x162   : > { %v15427_v60 = vpop.permute.xlu1 %1472  ;;  %19276 = vst [vmem:[#allocation77_spill] sm:$0xff] %v15434_v40  ;;  %v3207_v62 = vmul.f32 %v15434_v40, %v15079_v14  ;;  %v1572_v43 = vpack.c.bf16 %v1546_v36, %v1545_v51  ;;  %v15461_v32 = vld [vmem:[#allocation2 + $0x91] sm:$0xff]  ;;  %v15467_v36 = vld [vmem:[#allocation2 + $0x99] sm:$0xff] }
 0x163   : > { %19274 = vst [vmem:[#allocation75_spill] sm:$0xff] %v15427_v60  ;;  %19281 = vst [vmem:[#allocation82_spill] sm:$0xff] %v15461_v32 }
 0x164   : > { %12669 = vmatmul.mubr.msk.bf16.gmra.mrb[36].mxu0 %vm661_vm2, %v1570_v24  ;;  %v15429_v24 = vpop.permute.xlu0 %1467  ;;  %19282 = vst [vmem:[#allocation83_spill] sm:$0xff] %v15467_v36 }
 0x165   : > { %12672 = vmatprep.mubr.msk.bf16.mxu0 %vm661_vm2, %v1571_v37  ;;  %12805 = vmatmul.mubr.msk.bf16.gmra.mrb[4].mxu1 %vm661_vm2, %v3232_v29  ;;  %19275 = vst [vmem:[#allocation76_spill] sm:$0xff] %v15429_v24  ;;  %v1547_v37 = vmul.f32 %v15311_v23, %v15413_v26  ;;  %v1548_v29 = vmul.f32 %v15309_v49, %v15415_v33 }
 0x166   : > { %12808 = vmatprep.mubr.msk.bf16.mxu1 %vm661_vm2, %v3233_v42  ;;  %v3209_v42 = vmul.f32 %v15423_v39, %v15083_v16  ;;  %v3234_v26 = vpack.c.bf16 %v3208_v41, %v3207_v62  ;;  %v15452_v49 = vpop.permute.xlu1 %1482  ;;  %v15459_v39 = vld [vmem:[#allocation2 + $0x8f] sm:$0xff]  ;;  %v15465_v62 = vld [vmem:[#allocation2 + $0x77] sm:$0xff]  ;;  %v1551_v41 = vmul.f32 %v15398_v58, %v15457_v13 }
 0x167   : > { %v1573_v23 = vpack.c.bf16 %v1548_v29, %v1547_v37  ;;  %19277 = vst [vmem:[#allocation78_spill] sm:$0xff] %v15452_v49  ;;  %19280 = vst [vmem:[#allocation81_spill] sm:$0xff] %v15459_v39  ;;  %v15469_v37 = vld [vmem:[#allocation2 + $0xa1] sm:$0xff]  ;;  %v15474_v29 = vld [vmem:[#allocation2 + $0x89] sm:$0xff]  ;;  %v1549_v51 = vmul.f32 %v15350_v56, %v15465_v62 }
 0x168   : > { %v15454_v12 = vpop.permute.xlu0 %1477  ;;  %v3235_v63 = vpack.c.bf16 %v3210_v1, %v3209_v42  ;;  %19283 = vst [vmem:[#allocation84_spill] sm:$0xff] %v15469_v37  ;;  %19284 = vst [vmem:[#allocation85_spill] sm:$0xff] %v15474_v29  ;;  %v3214_v42 = vmul.f32 %v15469_v37, %v15089_v19  ;;  %v3211_v1 = vmul.f32 %v15474_v29, %v15087_v18  ;;  %v15501_v37 = vld [vmem:[#allocation2 + $0xb1] sm:$0xff] }
 0x169   : > { %19278 = vst [vmem:[#allocation79_spill] sm:$0xff] %v15454_v12  ;;  %19289 = vst [vmem:[#allocation90_spill] sm:$0xff] %v15501_v37  ;;  %v15505_v29 = vld [vmem:[#allocation2 + $0x97] sm:$0xff] }
 0x16a   : > { %19290 = vst [vmem:[#allocation91_spill] sm:$0xff] %v15505_v29 }
 0x16c   : > { %12673 = vmatmul.mubr.msk.bf16.gmra.mrb[40].mxu0 %vm661_vm2, %v1572_v43  ;;  %v1550_v43 = vmul.f32 %v15348_v46, %v15450_v9  ;;  %v15490_v46 = vpop.permute.xlu1 %1492  ;;  %v15492_v58 = vpop.permute.xlu0 %1487 }
 0x16d   : > { %12676 = vmatprep.mubr.msk.bf16.mxu0 %vm661_vm2, %v1573_v23  ;;  %12809 = vmatmul.mubr.msk.bf16.gmra.mrb[8].mxu1 %vm661_vm2, %v3234_v26  ;;  %v1552_v23 = vmul.f32 %v15396_v54, %v15459_v39  ;;  %v3212_v26 = vmul.f32 %v15461_v32, %v15085_v17  ;;  %19285 = vst [vmem:[#allocation86_spill] sm:$0xff] %v15490_v46  ;;  %19286 = vst [vmem:[#allocation87_spill] sm:$0xff] %v15492_v58  ;;  %v15494_v32 = vld [vmem:[#allocation2 + $0x9f] sm:$0xff]  ;;  %v15497_v17 = vld [vmem:[#allocation2 + $0xa7] sm:$0xff] }
 0x16e   : > { %12812 = vmatprep.mubr.msk.bf16.mxu1 %vm661_vm2, %v3235_v63  ;;  %v3213_v63 = vmul.f32 %v15467_v36, %v15091_v20  ;;  %v1574_v54 = vpack.c.bf16 %v1550_v43, %v1549_v51  ;;  %19287 = vst [vmem:[#allocation88_spill] sm:$0xff] %v15497_v17  ;;  %v15499_v36 = vld [vmem:[#allocation2 + $0xaf] sm:$0xff]  ;;  %v15507_v43 = vld [vmem:[#allocation2 + $0xb9] sm:$0xff] }
 0x16f   : > { %v1575_v40 = vpack.c.bf16 %v1552_v23, %v1551_v41  ;;  %v3236_v16 = vpack.c.bf16 %v3212_v26, %v3211_v1  ;;  %19288 = vst [vmem:[#allocation89_spill] sm:$0xff] %v15499_v36  ;;  %19291 = vst [vmem:[#allocation92_spill] sm:$0xff] %v15507_v43  ;;  %v15509_v41 = vld [vmem:[#allocation2 + $0xc1] sm:$0xff]  ;;  %v15514_v23 = vld [vmem:[#allocation2 + $0xa9] sm:$0xff]  ;;  %v1555_v26 = vmul.f32 %v15454_v12, %v15497_v17 }
 0x170   : > { %v3237_v56 = vpack.c.bf16 %v3214_v42, %v3213_v63  ;;  %19292 = vst [vmem:[#allocation93_spill] sm:$0xff] %v15509_v41  ;;  %19293 = vst [vmem:[#allocation94_spill] sm:$0xff] %v15514_v23  ;;  %v15522_v51 = vpop.permute.xlu1 %1502  ;;  %v15524_v63 = vpop.permute.xlu0 %1497  ;;  %v3217_v42 = vmul.f32 %v15507_v43, %v15113_v34  ;;  %v3218_v1 = vmul.f32 %v15509_v41, %v15109_v30  ;;  %v15545_v41 = vld [vmem:[#allocation2 + $0xb7] sm:$0xff]  ;;  %v15574_v34 = vld [vmem:[#allocation2 + $0xdf] sm:$0xff] }
 0x171   : > { %19294 = vst [vmem:[#allocation95_spill] sm:$0xff] %v15522_v51  ;;  %19295 = vst [vmem:[#allocation96_spill] sm:$0xff] %v15524_v63  ;;  %v3215_v12 = vmul.f32 %v15514_v23, %v15095_v22 }
 0x174   : > { %12677 = vmatmul.mubr.msk.bf16.gmra.mrb[44].mxu0 %vm661_vm2, %v1574_v54  ;;  %v1554_v54 = vmul.f32 %v15427_v60, %v15494_v32 }
 0x175   : > { %12680 = vmatprep.mubr.msk.bf16.mxu0 %vm661_vm2, %v1575_v40  ;;  %12813 = vmatmul.mubr.msk.bf16.gmra.mrb[12].mxu1 %vm661_vm2, %v3236_v16  ;;  %v1556_v40 = vmul.f32 %v15452_v49, %v15499_v36  ;;  %v3216_v16 = vmul.f32 %v15501_v37, %v15093_v21  ;;  %v15534_v37 = vld [vmem:[#allocation2 + $0xbf] sm:$0xff]  ;;  %v3239_v21 = vpack.c.bf16 %v3218_v1, %v3217_v42  ;;  %v15537_v36 = vld [vmem:[#allocation2 + $0xc7] sm:$0xff] }
 0x176   : > { %12816 = vmatprep.mubr.msk.bf16.mxu1 %vm661_vm2, %v3237_v56  ;;  %v1553_v56 = vmul.f32 %v15429_v24, %v15505_v29  ;;  %19296 = vst [vmem:[#allocation97_spill] sm:$0xff] %v15537_v36  ;;  %v15539_v24 = vld [vmem:[#allocation2 + $0xcf] sm:$0xff]  ;;  %v1557_v42 = vmul.f32 %v15492_v58, %v15545_v41 }
 0x177   : > { %v1577_v60 = vpack.c.bf16 %v1556_v40, %v1555_v26  ;;  %v3238_v20 = vpack.c.bf16 %v3216_v16, %v3215_v12  ;;  %19297 = vst [vmem:[#allocation98_spill] sm:$0xff] %v15539_v24  ;;  %v15541_v29 = vld [vmem:[#allocation2 + $0xd1] sm:$0xff]  ;;  %v15549_v12 = vld [vmem:[#allocation2 + $0xe1] sm:$0xff]  ;;  %v15551_v26 = vpop.permute.xlu1 %1512  ;;  %v1558_v40 = vmul.f32 %v15490_v46, %v15534_v37  ;;  %v15558_v16 = vld [vmem:[#allocation2 + $0xc9] sm:$0xff] }
 0x178   : > { %v1576_v49 = vpack.c.bf16 %v1554_v54, %v1553_v56  ;;  %19298 = vst [vmem:[#allocation99_spill] sm:$0xff] %v15541_v29  ;;  %v15547_v54 = vld [vmem:[#allocation2 + $0xd9] sm:$0xff]  ;;  %19300 = vst [vmem:[#allocation101_spill] sm:$0xff] %v15549_v12  ;;  %v3220_v56 = vmul.f32 %v15541_v29, %v15121_v44  ;;  %v3222_v1 = vmul.f32 %v15549_v12, %v15135_v59  ;;  %v15581_v44 = vld [vmem:[#allocation2 + $0xe7] sm:$0xff] }
 0x179   : > { %19299 = vst [vmem:[#allocation100_spill] sm:$0xff] %v15547_v54  ;;  %19301 = vst [vmem:[#allocation102_spill] sm:$0xff] %v15551_v26  ;;  %v3219_v46 = vmul.f32 %v15558_v16, %v15125_v47  ;;  %v1578_v43 = vpack.c.bf16 %v1558_v40, %v1557_v42  ;;  %v15585_v12 = vld [vmem:[#allocation2 + $0xf1] sm:$0xff]  ;;  %v15591_v40 = vld [vmem:[#allocation2 + $0xf9] sm:$0xff] }
 0x17a   : > { %19303 = vst [vmem:[#allocation104_spill] sm:$0xff] %v15558_v16  ;;  %19306 = vst [vmem:[#allocation107_spill] sm:$0xff] %v15581_v44 }
 0x17b   : > { %v3240_v23 = vpack.c.bf16 %v3220_v56, %v3219_v46  ;;  %19308 = vst [vmem:[#allocation109_spill] sm:$0xff] %v15585_v12  ;;  %v15589_v46 = vld [vmem:[#allocation2 + $0xd7] sm:$0xff]  ;;  %19310 = vst [vmem:[#allocation111_spill] sm:$0xff] %v15591_v40 }
 0x17c   : > { %12681 = vmatmul.mubr.msk.bf16.gmra.mrb[48].mxu0 %vm661_vm2, %v1576_v49  ;;  %v15553_v49 = vpop.permute.xlu0 %1507  ;;  %19309 = vst [vmem:[#allocation110_spill] sm:$0xff] %v15589_v46 }
 0x17d   : > { %12684 = vmatprep.mubr.msk.bf16.mxu0 %vm661_vm2, %v1577_v60  ;;  %12817 = vmatmul.mubr.msk.bf16.gmra.mrb[16].mxu1 %vm661_vm2, %v3238_v20  ;;  %19302 = vst [vmem:[#allocation103_spill] sm:$0xff] %v15553_v49  ;;  %v1559_v20 = vmul.f32 %v15524_v63, %v15537_v36  ;;  %v1560_v60 = vmul.f32 %v15522_v51, %v15539_v24  ;;  %v15576_v51 = vpop.permute.xlu1 %1522 }
 0x17e   : > { %12820 = vmatprep.mubr.msk.bf16.mxu1 %vm661_vm2, %v3239_v21  ;;  %v3221_v21 = vmul.f32 %v15547_v54, %v15138_v61  ;;  %19304 = vst [vmem:[#allocation105_spill] sm:$0xff] %v15576_v51  ;;  %v15583_v54 = vld [vmem:[#allocation2 + $0xef] sm:$0xff]  ;;  %v1561_v42 = vmul.f32 %v15553_v49, %v15589_v46  ;;  %v15616_v61 = vld [vmem:[#allocation2 + $0xff] sm:$0xff] }
 0x17f   : > { %v1579_v63 = vpack.c.bf16 %v1560_v60, %v1559_v20  ;;  %19307 = vst [vmem:[#allocation108_spill] sm:$0xff] %v15583_v54  ;;  %v15593_v20 = vld [vmem:[#allocation2 + $0x101] sm:$0xff]  ;;  %v15598_v60 = vld [vmem:[#allocation2 + $0xe9] sm:$0xff]  ;;  %19314 = vst [vmem:[#allocation115_spill] sm:$0xff] %v15616_v61 }
 0x180   : > { %v15578_v29 = vpop.permute.xlu0 %1517  ;;  %v3241_v58 = vpack.c.bf16 %v3222_v1, %v3221_v21  ;;  %19311 = vst [vmem:[#allocation112_spill] sm:$0xff] %v15593_v20  ;;  %19312 = vst [vmem:[#allocation113_spill] sm:$0xff] %v15598_v60  ;;  %v3226_v21 = vmul.f32 %v15593_v20, %v15183_v25  ;;  %v3223_v1 = vmul.f32 %v15598_v60, %v15170_v48  ;;  %v15619_v46 = vld [vmem:[#allocation2 + $0x109] sm:$0xff] }
 0x181   : > { %19305 = vst [vmem:[#allocation106_spill] sm:$0xff] %v15578_v29  ;;  %v1563_v56 = vmul.f32 %v15578_v29, %v15581_v44  ;;  %v15614_v29 = vpop.permute.xlu1 %1532  ;;  %19315 = vst [vmem:[#allocation116_spill] sm:$0xff] %v15619_v46 }
 0x182   : > { %19313 = vst [vmem:[#allocation114_spill] sm:$0xff] %v15614_v29 }
 0x184   : > { %12685 = vmatmul.mubr.msk.bf16.gmra.mrb[52].mxu0 %vm661_vm2, %v1578_v43  ;;  %v1562_v43 = vmul.f32 %v15551_v26, %v15574_v34  ;;  %v15623_v20 = vpop.permute.xlu0 %1527 }
 0x185   : > { %12688 = vmatprep.mubr.msk.bf16.mxu0 %vm661_vm2, %v1579_v63  ;;  %12821 = vmatmul.mubr.msk.bf16.gmra.mrb[20].mxu1 %vm661_vm2, %v3240_v23  ;;  %v1564_v63 = vmul.f32 %v15576_v51, %v15583_v54  ;;  %v3224_v23 = vmul.f32 %v15585_v12, %v15165_v45  ;;  %v2059_v12 = vld [vmem:[#allocation2 + $0x9] sm:$0xff]  ;;  %v2060_v45 = vld [vmem:[#allocation2 + $0x11] sm:$0xff]  ;;  %19317 = vst [vmem:[#allocation118_spill] sm:$0xff] %v15623_v20 }
 0x186   : > { %12824 = vmatprep.mubr.msk.bf16.mxu1 %vm661_vm2, %v3241_v58  ;;  %v3225_v58 = vmul.f32 %v15591_v40, %v15187_v31  ;;  %v1580_v26 = vpack.c.bf16 %v1562_v43, %v1561_v42  ;;  %v15621_v40 = vld [vmem:[#allocation2 + $0x111] sm:$0xff] }
 0x187   : > { %v1581_v16 = vpack.c.bf16 %v1564_v63, %v1563_v56  ;;  %v3242_v51 = vpack.c.bf16 %v3224_v23, %v3223_v1  ;;  %19316 = vst [vmem:[#allocation117_spill] sm:$0xff] %v15621_v40  ;;  %v15627_v43 = vld [vmem:[#allocation2 + $0xf7] sm:$0xff]  ;;  %v1566_v56 = vmul.f32 %v15614_v29, %v15616_v61  ;;  %v2252_v63 = vmul.f32 %v15056_v5, %v2060_v45 }
 0x188   : > { %v3243_v49 = vpack.c.bf16 %v3226_v21, %v3225_v58  ;;  %v3227_v23 = vmul.f32 %v15619_v46, %v15203_v52  ;;  %v3228_v42 = vmul.f32 %v15621_v40, %v15199_v6  ;;  %v19319_v40 = vld [vmem:[#allocation45_spill] sm:$0xff] }
 0x189   : > { %v2253_v46 = vmul.f32 %v19319_v40, %v15050_v2  ;;  %v19326_v40 = vld [vmem:[#allocation38_spill] sm:$0xff]  ;;  %v2676_v2 = vsel %vm1682_vm3, %v15381_v50, 0 }
 0x18a   : > { %v19331_v50 = vld [vmem:[#allocation62_spill] sm:$0xff] }
 0x18c   : > { %12689 = vmatmul.mubr.msk.bf16.gmra.mrb[56].mxu0 %vm661_vm2, %v1580_v26  ;;  %v2251_v26 = vmul.f32 %v15052_v3, %v2059_v12  ;;  %v3244_v12 = vpack.c.bf16 %v3228_v42, %v3227_v23  ;;  %v19320_v3 = vld [vmem:[#allocation46_spill] sm:$0xff]  ;;  %v19323_v23 = vld [vmem:[#allocation40_spill] sm:$0xff] }
 0x18d   : > { %12692 = vmatprep.mubr.msk.bf16.mxu0 %vm661_vm2, %v1581_v16  ;;  %12825 = vmatmul.mubr.msk.bf16.gmra.mrb[24].mxu1 %vm661_vm2, %v3242_v51  ;;  %v1565_v51 = vmul.f32 %v15623_v20, %v15627_v43  ;;  %v3523_v16 = vmul.f32 %v15220_v35, %v15315_v53  ;;  %v2254_v5 = vmul.f32 %v19320_v3, %v15054_v4  ;;  %v19327_v4 = vld [vmem:[#allocation60_spill] sm:$0xff] }
 0x18e   : > { %12828 = vmatprep.mubr.msk.bf16.mxu1 %vm661_vm2, %v3243_v49  ;;  %v19318_v49 = vld [vmem:[#allocation35_spill] sm:$0xff]  ;;  %v2283_v1 = vpack.c.bf16 %v2252_v63, %v2251_v26  ;;  %v19322_v26 = vld [vmem:[#allocation37_spill] sm:$0xff]  ;;  %v3527_v42 = vmul.f32 %v19323_v23, %v15364_v28 }
 0x18f   : > { %v3524_v58 = vmul.f32 %v19318_v49, %v15317_v55  ;;  %v1582_v21 = vpack.c.bf16 %v1566_v56, %v1565_v51  ;;  %v19321_v55 = vld [vmem:[#allocation53_spill] sm:$0xff]  ;;  %v3526_v63 = vmul.f32 %v19322_v26, %v15356_v0  ;;  %v19324_v51 = vld [vmem:[#allocation39_spill] sm:$0xff] }
 0x190   : > { %v2256_v56 = vmul.f32 %v19321_v55, %v15065_v7  ;;  %v3916_v55 = vsel %vm1682_vm3, %v19327_v4, 0  ;;  %v19328_v4 = vld [vmem:[#allocation55_spill] sm:$0xff] }
 0x191   : > { %v3555_v45 = vpack.c.bf16 %v3524_v58, %v3523_v16  ;;  %v3528_v16 = vmul.f32 %v19324_v51, %v15366_v27  ;;  %v19325_v58 = vld [vmem:[#allocation57_spill] sm:$0xff] }
 0x192   : > { %v15672_v27 = vld [vmem:[%s18702_s8 + $0x20] sm:$0xf] }
 0x193   : > { %v3557_v7 = vpack.c.bf16 %v3528_v16, %v3527_v42  ;;  %v2260_v42 = vmul.f32 %v19331_v50, %v15073_v11  ;;  %v19332_v16 = vld [vmem:[#allocation68_spill] sm:$0xff] }
 0x194   : > { %12693 = vmatmul.mubr.msk.bf16.gmra.mrb[60].mxu0 %vm661_vm2, %v1582_v21  ;;  %v2255_v21 = vmul.f32 %v19325_v58, %v15067_v8  ;;  %v19333_v58 = vld [vmem:[#allocation41_spill] sm:$0xff] }
 0x195   : > { %12698 = vmatprep.mubr.msk.bf16.mxu0 %vm661_vm2, %v2283_v1  ;;  %12829 = vmatmul.mubr.msk.bf16.gmra.mrb[28].mxu1 %vm661_vm2, %v3244_v12  ;;  %v3525_v1 = vmul.f32 %v19326_v40, %v15354_v57  ;;  %v2284_v12 = vpack.c.bf16 %v2254_v5, %v2253_v46  ;;  %v2257_v5 = vmul.f32 %v19328_v4, %v15071_v10  ;;  %v19329_v46 = vld [vmem:[#allocation9_spill] sm:$0xff] }
 0x196   : > { %12834 = vmatprep.mubr.msk.bf16.mxu1 %vm661_vm2, %v3555_v45  ;;  %v2285_v3 = vpack.c.bf16 %v2256_v56, %v2255_v21  ;;  %v19330_v56 = vld [vmem:[#allocation56_spill] sm:$0xff]  ;;  %v3530_v21 = vmul.f32 %v19333_v58, %v19332_v16  ;;  %v19338_v4 = vld [vmem:[#allocation65_spill] sm:$0xff] }
 0x197   : > { %v3556_v45 = vpack.c.bf16 %v3526_v63, %v3525_v1  ;;  %v2258_v63 = vmul.f32 %v19330_v56, %v19329_v46  ;;  %v19334_v1 = vld [vmem:[#allocation69_spill] sm:$0xff]  ;;  %v19339_v56 = vld [vmem:[#allocation42_spill] sm:$0xff] }
 0x198   : > { %v3529_v46 = vmul.f32 %v19339_v56, %v15421_v38  ;;  %v19343_v38 = vld [vmem:[#allocation71_spill] sm:$0xff] }
 0x199   : > { %v2286_v50 = vpack.c.bf16 %v2258_v63, %v2257_v5  ;;  %v2264_v5 = vmul.f32 %v19343_v38, %v15081_v15  ;;  %v19345_v63 = vld [vmem:[#allocation51_spill] sm:$0xff] }
 0x19a   : > { %v3558_v8 = vpack.c.bf16 %v3530_v21, %v3529_v46  ;;  %v19347_v21 = vld [vmem:[#allocation16_spill] sm:$0xff] }
 0x19c   : > { %12699 = vmatmul.mubr.msk.bf16.vlgmr.msra.gmra.mrb[32].mxu0 %vm661_vm2, %v2284_v12  ;;  %v19335_v12 = vld [vmem:[#allocation44_spill] sm:$0xff] }
 0x19d   : > { %12702 = vmatprep.mubr.msk.bf16.mxu0 %vm661_vm2, %v2285_v3  ;;  %12835 = vmatmul.mubr.msk.bf16.vlgmr.msra.gmra.mrb[0].mxu1 %vm661_vm2, %v3556_v45  ;;  %v3531_v3 = vmul.f32 %v19335_v12, %v19334_v1  ;;  %v19341_v12 = vld [vmem:[#allocation13_spill] sm:$0xff] }
 0x19e   : > { %12867 = vmatpush3.bf16.msra.mxu1 %v3916_v55  ;;  %12838 = vmatprep.mubr.msk.bf16.mxu1 %vm661_vm2, %v3557_v7  ;;  %v19336_v7 = vld [vmem:[#allocation43_spill] sm:$0xff]  ;;  %v19337_v55 = vld [vmem:[#allocation12_spill] sm:$0xff] }
 0x19f   : > { %12731 = vmatpush3.bf16.msra.mxu0 %v2676_v2  ;;  %14391 = vmatprep.subr.msk.bf16.mxu1 %vm1682_vm3, %v15672_v27  ;;  %v3532_v45 = vmul.f32 %v19336_v7, %v15415_v33  ;;  %v2259_v10 = vmul.f32 %v19338_v4, %v19337_v55  ;;  %v19340_v33 = vld [vmem:[#allocation63_spill] sm:$0xff]  ;;  %v19342_v4 = vld [vmem:[#allocation64_spill] sm:$0xff] }
 0x1a0   : > { %v2261_v1 = vmul.f32 %v19340_v33, %v15079_v14  ;;  %v2262_v55 = vmul.f32 %v19342_v4, %v19341_v12  ;;  %v19349_v33 = vld [vmem:[#allocation48_spill] sm:$0xff]  ;;  %v19350_v14 = vld [vmem:[#allocation73_spill] sm:$0xff] }
 0x1a1   : > { %v2287_v11 = vpack.c.bf16 %v2260_v42, %v2259_v10  ;;  %v3559_v2 = vpack.c.bf16 %v3532_v45, %v3531_v3  ;;  %v19344_v10 = vld [vmem:[#allocation47_spill] sm:$0xff]  ;;  %v3535_v42 = vmul.f32 %v19345_v63, %v15457_v13  ;;  %v19348_v3 = vld [vmem:[#allocation77_spill] sm:$0xff]  ;;  %v2265_v38 = vmul.f32 %v19350_v14, %v15087_v18  ;;  %v19353_v13 = vld [vmem:[#allocation82_spill] sm:$0xff] }
 0x1a2   : > { %v3534_v46 = vmul.f32 %v19344_v10, %v15450_v9  ;;  %v2263_v45 = vmul.f32 %v19348_v3, %v19347_v21  ;;  %v19352_v21 = vld [vmem:[#allocation74_spill] sm:$0xff]  ;;  %v19361_v18 = vld [vmem:[#allocation59_spill] sm:$0xff] }
 0x1a4   : > { %12703 = vmatmul.mubr.msk.bf16.gmra.mrb[36].mxu0 %vm661_vm2, %v2286_v50  ;;  %v3533_v50 = vmul.f32 %v19349_v33, %v15465_v62  ;;  %v2289_v4 = vpack.c.bf16 %v2264_v5, %v2263_v45  ;;  %v19357_v45 = vld [vmem:[#allocation66_spill] sm:$0xff] }
 0x1a5   : > { %12706 = vmatprep.mubr.msk.bf16.mxu0 %vm661_vm2, %v2287_v11  ;;  %12839 = vmatmul.mubr.msk.bf16.gmra.mrb[4].mxu1 %vm661_vm2, %v3558_v8  ;;  %v19346_v11 = vld [vmem:[#allocation50_spill] sm:$0xff] }
 0x1a6   : > { %12842 = vmatprep.mubr.msk.bf16.mxu1 %vm661_vm2, %v3559_v2  ;;  %v3536_v8 = vmul.f32 %v19346_v11, %v15459_v39  ;;  %v2288_v2 = vpack.c.bf16 %v2262_v55, %v2261_v1  ;;  %v3560_v12 = vpack.c.bf16 %v3534_v46, %v3533_v50  ;;  %v19351_v39 = vld [vmem:[#allocation17_spill] sm:$0xff]  ;;  %v2268_v1 = vmul.f32 %v19353_v13, %v15089_v19  ;;  %v19354_v55 = vld [vmem:[#allocation58_spill] sm:$0xff]  ;;  %v19355_v46 = vld [vmem:[#allocation67_spill] sm:$0xff] }
 0x1a7   : > { %v2266_v3 = vmul.f32 %v19352_v21, %v19351_v39  ;;  %v3538_v5 = vmul.f32 %v19354_v55, %v15494_v32  ;;  %v19358_v50 = vld [vmem:[#allocation20_spill] sm:$0xff]  ;;  %v19362_v13 = vld [vmem:[#allocation83_spill] sm:$0xff] }
 0x1a8   : > { %v3561_v15 = vpack.c.bf16 %v3536_v8, %v3535_v42  ;;  %v3539_v42 = vmul.f32 %v19355_v46, %v15497_v17  ;;  %v19356_v8 = vld [vmem:[#allocation89_spill] sm:$0xff]  ;;  %v19365_v46 = vld [vmem:[#allocation90_spill] sm:$0xff] }
 0x1a9   : > { %v2290_v63 = vpack.c.bf16 %v2266_v3, %v2265_v38  ;;  %v19363_v17 = vld [vmem:[#allocation21_spill] sm:$0xff]  ;;  %v2272_v38 = vmul.f32 %v19365_v46, %v15109_v30  ;;  %v19372_v46 = vld [vmem:[#allocation92_spill] sm:$0xff] }
 0x1ac   : > { %12707 = vmatmul.mubr.msk.bf16.gmra.mrb[40].mxu0 %vm661_vm2, %v2288_v2 }
 0x1ad   : > { %12710 = vmatprep.mubr.msk.bf16.mxu0 %vm661_vm2, %v2289_v4  ;;  %12843 = vmatmul.mubr.msk.bf16.gmra.mrb[8].mxu1 %vm661_vm2, %v3560_v12  ;;  %v3540_v12 = vmul.f32 %v19357_v45, %v19356_v8  ;;  %v19360_v4 = vld [vmem:[#allocation91_spill] sm:$0xff]  ;;  %v2269_v8 = vmul.f32 %v19362_v13, %v15095_v22  ;;  %v2273_v13 = vmul.f32 %v19372_v46, %v15125_v47 }
 0x1ae   : > { %12846 = vmatprep.mubr.msk.bf16.mxu1 %vm661_vm2, %v3561_v15  ;;  %v19359_v15 = vld [vmem:[#allocation85_spill] sm:$0xff]  ;;  %v3537_v14 = vmul.f32 %v19361_v18, %v19360_v4 }
 0x1af   : > { %v2267_v2 = vmul.f32 %v19359_v15, %v19358_v50  ;;  %v3563_v19 = vpack.c.bf16 %v3540_v12, %v3539_v42  ;;  %v19364_v50 = vld [vmem:[#allocation84_spill] sm:$0xff] }
 0x1b0   : > { %v3562_v21 = vpack.c.bf16 %v3538_v5, %v3537_v14  ;;  %v2270_v15 = vmul.f32 %v19364_v50, %v19363_v17  ;;  %v19366_v14 = vld [vmem:[#allocation75_spill] sm:$0xff]  ;;  %v19369_v5 = vld [vmem:[#allocation24_spill] sm:$0xff] }
 0x1b1   : > { %v2291_v39 = vpack.c.bf16 %v2268_v1, %v2267_v2  ;;  %v3542_v3 = vmul.f32 %v19366_v14, %v15534_v37  ;;  %v19371_v12 = vld [vmem:[#allocation76_spill] sm:$0xff] }
 0x1b2   : > { %v3541_v2 = vmul.f32 %v19371_v12, %v15545_v41  ;;  %v2292_v22 = vpack.c.bf16 %v2270_v15, %v2269_v8  ;;  %v19376_v15 = vld [vmem:[#allocation86_spill] sm:$0xff] }
 0x1b4   : > { %12711 = vmatmul.mubr.msk.bf16.gmra.mrb[44].mxu0 %vm661_vm2, %v2290_v63  ;;  %v19367_v63 = vld [vmem:[#allocation79_spill] sm:$0xff]  ;;  %v3564_v50 = vpack.c.bf16 %v3542_v3, %v3541_v2 }
 0x1b5   : > { %12714 = vmatprep.mubr.msk.bf16.mxu0 %vm661_vm2, %v2291_v39  ;;  %12847 = vmatmul.mubr.msk.bf16.gmra.mrb[12].mxu1 %vm661_vm2, %v3562_v21  ;;  %v3543_v1 = vmul.f32 %v19367_v63, %v15537_v36  ;;  %v19368_v39 = vld [vmem:[#allocation78_spill] sm:$0xff]  ;;  %v19375_v36 = vld [vmem:[#allocation99_spill] sm:$0xff] }
 0x1b6   : > { %12850 = vmatprep.mubr.msk.bf16.mxu1 %vm661_vm2, %v3563_v19  ;;  %v3544_v21 = vmul.f32 %v19368_v39, %v15539_v24  ;;  %v19370_v19 = vld [vmem:[#allocation94_spill] sm:$0xff]  ;;  %v19373_v24 = vld [vmem:[#allocation25_spill] sm:$0xff]  ;;  %v2276_v8 = vmul.f32 %v19375_v36, %v15135_v59  ;;  %v19382_v2 = vld [vmem:[#allocation87_spill] sm:$0xff] }
 0x1b7   : > { %v2271_v42 = vmul.f32 %v19370_v19, %v19369_v5  ;;  %v19374_v5 = vld [vmem:[#allocation93_spill] sm:$0xff] }
 0x1b8   : > { %v3565_v30 = vpack.c.bf16 %v3544_v21, %v3543_v1  ;;  %v2274_v19 = vmul.f32 %v19374_v5, %v19373_v24  ;;  %v19379_v1 = vld [vmem:[#allocation28_spill] sm:$0xff]  ;;  %v15778_v36 = vld [vmem:[#allocation2 + $0x107] sm:$0xff] }
 0x1b9   : > { %v2293_v17 = vpack.c.bf16 %v2272_v38, %v2271_v42  ;;  %v3546_v38 = vmul.f32 %v19376_v15, %v15574_v34  ;;  %v19381_v42 = vld [vmem:[#allocation110_spill] sm:$0xff]  ;;  %19383 = vst [vmem:[#allocation45_spill] sm:$0xff] %v15778_v36 }
 0x1ba   : > { %v3545_v47 = vmul.f32 %v19382_v2, %v19381_v42  ;;  %v2294_v46 = vpack.c.bf16 %v2274_v19, %v2273_v13  ;;  %v19387_v13 = vld [vmem:[#allocation101_spill] sm:$0xff] }
 0x1bc   : > { %12715 = vmatmul.mubr.msk.bf16.gmra.mrb[48].mxu0 %vm661_vm2, %v2292_v22  ;;  %v19377_v22 = vld [vmem:[#allocation96_spill] sm:$0xff]  ;;  %v3566_v5 = vpack.c.bf16 %v3546_v38, %v3545_v47  ;;  %v19388_v47 = vld [vmem:[#allocation109_spill] sm:$0xff]  ;;  %v19390_v38 = vld [vmem:[#allocation106_spill] sm:$0xff] }
 0x1bd   : > { %12718 = vmatprep.mubr.msk.bf16.mxu0 %vm661_vm2, %v2293_v17  ;;  %12851 = vmatmul.mubr.msk.bf16.gmra.mrb[16].mxu1 %vm661_vm2, %v3564_v50  ;;  %v3547_v3 = vmul.f32 %v19377_v22, %v15581_v44  ;;  %v19378_v17 = vld [vmem:[#allocation95_spill] sm:$0xff] }
 0x1be   : > { %12854 = vmatprep.mubr.msk.bf16.mxu1 %vm661_vm2, %v3565_v30  ;;  %v3548_v50 = vmul.f32 %v19378_v17, %v15583_v54  ;;  %v19380_v30 = vld [vmem:[#allocation104_spill] sm:$0xff]  ;;  %v15780_v44 = vld [vmem:[#allocation2 + $0x10f] sm:$0xff]  ;;  %v19386_v54 = vld [vmem:[#allocation29_spill] sm:$0xff] }
 0x1bf   : > { %v2275_v21 = vmul.f32 %v19380_v30, %v19379_v1  ;;  %19384 = vst [vmem:[#allocation46_spill] sm:$0xff] %v15780_v44  ;;  %v19385_v1 = vld [vmem:[#allocation100_spill] sm:$0xff]  ;;  %v2278_v19 = vmul.f32 %v19387_v13, %v19386_v54 }
 0x1c0   : > { %v3567_v59 = vpack.c.bf16 %v3548_v50, %v3547_v3  ;;  %v2277_v30 = vmul.f32 %v19385_v1, %v15170_v48  ;;  %v19391_v3 = vld [vmem:[#allocation105_spill] sm:$0xff] }
 0x1c1   : > { %v2295_v24 = vpack.c.bf16 %v2276_v8, %v2275_v21  ;;  %v19389_v8 = vld [vmem:[#allocation102_spill] sm:$0xff]  ;;  %v3552_v50 = vmul.f32 %v15780_v44, %v19391_v3  ;;  %v19392_v21 = vld [vmem:[#allocation103_spill] sm:$0xff] }
 0x1c2   : > { %v3549_v48 = vmul.f32 %v19392_v21, %v15627_v43  ;;  %v2296_v1 = vpack.c.bf16 %v2278_v19, %v2277_v30  ;;  %v19393_v44 = vld [vmem:[#allocation111_spill] sm:$0xff]  ;;  %v19395_v30 = vld [vmem:[#allocation49_spill] sm:$0xff] }
 0x1c4   : > { %12719 = vmatmul.mubr.msk.bf16.gmra.mrb[52].mxu0 %vm661_vm2, %v2294_v46  ;;  %v2280_v46 = vmul.f32 %v19388_v47, %v15183_v25  ;;  %v3521_v47 = vld [vmem:[#allocation2 + $0x117] sm:$0xff] }
 0x1c5   : > { %12722 = vmatprep.mubr.msk.bf16.mxu0 %vm661_vm2, %v2295_v24  ;;  %12855 = vmatmul.mubr.msk.bf16.gmra.mrb[20].mxu1 %vm661_vm2, %v3566_v5  ;;  %v3550_v24 = vmul.f32 %v19389_v8, %v15616_v61  ;;  %v3551_v5 = vmul.f32 %v15778_v36, %v19390_v38  ;;  %v3522_v61 = vld [vmem:[#allocation2 + $0x11f] sm:$0xff] }
 0x1c6   : > { %12858 = vmatprep.mubr.msk.bf16.mxu1 %vm661_vm2, %v3567_v59  ;;  %v2279_v59 = vmul.f32 %v15598_v60, %v15187_v31  ;;  %v2281_v31 = vmul.f32 %v19393_v44, %v15203_v52  ;;  %v19394_v60 = vld [vmem:[#allocation112_spill] sm:$0xff]  ;;  %v3554_v19 = vmul.f32 %v3522_v61, %v15614_v29  ;;  %v2579_v61 = vmul.f32 %v19326_v40, %v15315_v53 }
 0x1c7   : > { %v3568_v13 = vpack.c.bf16 %v3550_v24, %v3549_v48  ;;  %v3569_v25 = vpack.c.bf16 %v3552_v50, %v3551_v5  ;;  %v2282_v36 = vmul.f32 %v19394_v60, %v15199_v6  ;;  %v2578_v48 = vmul.f32 %v19318_v49, %v19395_v30  ;;  %v3818_v24 = vld [vmem:[#allocation2 + $0x30] sm:$0xff]  ;;  %v3817_v50 = vld [vmem:[#allocation2 + $0x28] sm:$0xff] }
 0x1c8   : > { %v2297_v54 = vpack.c.bf16 %v2280_v46, %v2279_v59  ;;  %v19396_v46 = vld [vmem:[#allocation54_spill] sm:$0xff]  ;;  %v3849_v59 = vpack.c.bf16 %v3818_v24, %v3817_v50  ;;  %v3824_v50 = vld [vmem:[#allocation2 + $0x60] sm:$0xff] }
 0x1cc   : > { %12723 = vmatmul.mubr.msk.bf16.gmra.mrb[56].mxu0 %vm661_vm2, %v2296_v1  ;;  %v3553_v1 = vmul.f32 %v3521_v47, %v15623_v20  ;;  %v19397_v47 = vld [vmem:[#allocation52_spill] sm:$0xff] }
 0x1cd   : > { %12726 = vmatprep.mubr.msk.bf16.mxu0 %vm661_vm2, %v2297_v54  ;;  %12859 = vmatmul.mubr.msk.bf16.gmra.mrb[24].mxu1 %vm661_vm2, %v3568_v13  ;;  %v2577_v54 = vmul.f32 %v15220_v35, %v19396_v46  ;;  %v2298_v13 = vpack.c.bf16 %v2282_v36, %v2281_v31  ;;  %v2580_v30 = vmul.f32 %v19322_v26, %v19397_v47  ;;  %v3820_v36 = vld [vmem:[#allocation2 + $0x40] sm:$0xff]  ;;  %v3819_v46 = vld [vmem:[#allocation2 + $0x38] sm:$0xff] }
 0x1ce   : > { %12862 = vmatprep.mubr.msk.bf16.mxu1 %vm661_vm2, %v3569_v25  ;;  %v3570_v25 = vpack.c.bf16 %v3554_v19, %v3553_v1  ;;  %v2582_v31 = vmul.f32 %v19324_v51, %v15356_v0  ;;  %v3822_v1 = vld [vmem:[#allocation2 + $0x50] sm:$0xff]  ;;  %v3850_v24 = vpack.c.bf16 %v3820_v36, %v3819_v46  ;;  %v2583_v0 = vmul.f32 %v19339_v56, %v15364_v28  ;;  %v3823_v36 = vld [vmem:[#allocation2 + $0x58] sm:$0xff]  ;;  %v19401_v28 = vld [vmem:[#allocation69_spill] sm:$0xff] }
 0x1cf   : > { %v2609_v5 = vpack.c.bf16 %v2578_v48, %v2577_v54  ;;  %v2581_v48 = vmul.f32 %v19323_v23, %v15354_v57  ;;  %v2610_v19 = vpack.c.bf16 %v2580_v30, %v2579_v61  ;;  %v19398_v57 = vld [vmem:[#allocation61_spill] sm:$0xff]  ;;  %v19400_v61 = vld [vmem:[#allocation44_spill] sm:$0xff]  ;;  %v3826_v30 = vld [vmem:[#allocation2 + $0x70] sm:$0xff] }
 0x1d1   : > { %v2611_v54 = vpack.c.bf16 %v2582_v31, %v2581_v48 }
 0x1d4   : > { %12727 = vmatmul.mubr.msk.bf16.gmra.mrb[60].mxu0 %vm661_vm2, %v2298_v13  ;;  %v4242_v13 = vsel %vm1682_vm3, %v15672_v27, 0  ;;  %v2586_v27 = vmul.f32 %v19336_v7, %v19332_v16  ;;  %v2587_v16 = vmul.f32 %v19349_v33, %v19401_v28  ;;  %v3834_v28 = vld [vmem:[#allocation2 + $0xb0] sm:$0xff] }
 0x1d5   : > { %12732 = vmatprep.mubr.msk.bf16.mxu0 %vm661_vm2, %v2609_v5  ;;  %12863 = vmatmul.mubr.msk.bf16.gmra.mrb[28].mxu1 %vm661_vm2, %v3570_v25  ;;  %v3821_v5 = vld [vmem:[#allocation2 + $0x48] sm:$0xff]  ;;  %v2584_v25 = vmul.f32 %v19333_v58, %v19398_v57  ;;  %v3830_v57 = vld [vmem:[#allocation2 + $0x90] sm:$0xff] }
 0x1d6   : > { %12868 = vmatprep.mubr.msk.bf16.mxu1 %vm661_vm2, %v3849_v59  ;;  %v3851_v53 = vpack.c.bf16 %v3822_v1, %v3821_v5  ;;  %v19399_v59 = vld [vmem:[#allocation72_spill] sm:$0xff]  ;;  %v3852_v1 = vpack.c.bf16 %v3824_v50, %v3823_v36  ;;  %v3828_v5 = vld [vmem:[#allocation2 + $0x80] sm:$0xff] }
 0x1d7   : > { %v2585_v47 = vmul.f32 %v19400_v61, %v19399_v59  ;;  %v2612_v31 = vpack.c.bf16 %v2584_v25, %v2583_v0  ;;  %v19405_v36 = vld [vmem:[#allocation81_spill] sm:$0xff] }
 0x1d9   : > { %v2613_v48 = vpack.c.bf16 %v2586_v27, %v2585_v47  ;;  %v3827_v27 = vld [vmem:[#allocation2 + $0x78] sm:$0xff]  ;;  %v3829_v47 = vld [vmem:[#allocation2 + $0x88] sm:$0xff] }
 0x1da   : > { %v3854_v59 = vpack.c.bf16 %v3828_v5, %v3827_v27  ;;  %v3833_v5 = vld [vmem:[#allocation2 + $0xa8] sm:$0xff]  ;;  %v2598_v27 = vmul.f32 %v19368_v39, %v15534_v37  ;;  %v19409_v37 = vld [vmem:[#allocation97_spill] sm:$0xff] }
 0x1dc   : > { %12733 = vmatmul.mubr.msk.bf16.vlgmr.msra.gmra.mrb[32].mxu0 %vm661_vm2, %v2610_v19  ;;  %v3825_v19 = vld [vmem:[#allocation2 + $0x68] sm:$0xff] }
 0x1dd   : > { %12736 = vmatprep.mubr.msk.bf16.mxu0 %vm661_vm2, %v2611_v54  ;;  %12869 = vmatmul.mubr.msk.bf16.vlgmr.msra.gmra.mrb[0].mxu1 %vm661_vm2, %v3850_v24  ;;  %v3853_v46 = vpack.c.bf16 %v3826_v30, %v3825_v19  ;;  %v19402_v54 = vld [vmem:[#allocation70_spill] sm:$0xff]  ;;  %v3855_v30 = vpack.c.bf16 %v3830_v57, %v3829_v47  ;;  %v19406_v19 = vld [vmem:[#allocation67_spill] sm:$0xff] }
 0x1de   : > { %12901 = vmatpush3.bf16.msra.mxu1 %v4242_v13  ;;  %12872 = vmatprep.mubr.msk.bf16.mxu1 %vm661_vm2, %v3851_v53  ;;  %v2588_v24 = vmul.f32 %v19344_v10, %v19402_v54  ;;  %v2590_v13 = vmul.f32 %v19346_v11, %v15450_v9  ;;  %v19403_v53 = vld [vmem:[#allocation51_spill] sm:$0xff]  ;;  %v19404_v9 = vld [vmem:[#allocation80_spill] sm:$0xff] }
 0x1df   : > { %v2589_v0 = vmul.f32 %v19403_v53, %v15465_v62  ;;  %v2592_v62 = vmul.f32 %v19354_v55, %v19405_v36  ;;  %v3831_v54 = vld [vmem:[#allocation2 + $0x98] sm:$0xff]  ;;  %v3838_v47 = vld [vmem:[#allocation2 + $0xd0] sm:$0xff] }
 0x1e0   : > { %v2614_v25 = vpack.c.bf16 %v2588_v24, %v2587_v16 }
 0x1e1   : > { %v2615_v50 = vpack.c.bf16 %v2590_v13, %v2589_v0  ;;  %v3857_v0 = vpack.c.bf16 %v3834_v28, %v3833_v5  ;;  %v2602_v28 = vmul.f32 %v19378_v17, %v15574_v34  ;;  %v3839_v5 = vld [vmem:[#allocation2 + $0xd8] sm:$0xff]  ;;  %v19411_v34 = vld [vmem:[#allocation107_spill] sm:$0xff] }
 0x1e4   : > { %12737 = vmatmul.mubr.msk.bf16.gmra.mrb[36].mxu0 %vm661_vm2, %v2612_v31  ;;  %v2591_v31 = vmul.f32 %v19361_v18, %v19404_v9  ;;  %v3835_v9 = vld [vmem:[#allocation2 + $0xb8] sm:$0xff] }
 0x1e5   : > { %12740 = vmatprep.mubr.msk.bf16.mxu0 %vm661_vm2, %v2613_v48  ;;  %12873 = vmatmul.mubr.msk.bf16.gmra.mrb[4].mxu1 %vm661_vm2, %v3852_v1  ;;  %v2594_v48 = vmul.f32 %v19357_v45, %v15494_v32  ;;  %v3832_v1 = vld [vmem:[#allocation2 + $0xa0] sm:$0xff]  ;;  %v19407_v32 = vld [vmem:[#allocation88_spill] sm:$0xff] }
 0x1e6   : > { %12876 = vmatprep.mubr.msk.bf16.mxu1 %vm661_vm2, %v3853_v46  ;;  %v2593_v46 = vmul.f32 %v19406_v19, %v19360_v4  ;;  %v2616_v16 = vpack.c.bf16 %v2592_v62, %v2591_v31  ;;  %v3856_v13 = vpack.c.bf16 %v3832_v1, %v3831_v54  ;;  %v2595_v57 = vmul.f32 %v19371_v12, %v19407_v32  ;;  %v3837_v62 = vld [vmem:[#allocation2 + $0xc8] sm:$0xff] }
 0x1e7   : > { %v2599_v1 = vmul.f32 %v19382_v2, %v19409_v37  ;;  %v2601_v54 = vmul.f32 %v19377_v22, %v19381_v42  ;;  %v3845_v37 = vld [vmem:[#allocation2 + $0x108] sm:$0xff] }
 0x1e8   : > { %v2617_v24 = vpack.c.bf16 %v2594_v48, %v2593_v46  ;;  %v3859_v48 = vpack.c.bf16 %v3838_v47, %v3837_v62  ;;  %v19410_v46 = vld [vmem:[#allocation98_spill] sm:$0xff]  ;;  %v3844_v47 = vld [vmem:[#allocation2 + $0x100] sm:$0xff] }
 0x1ec   : > { %12741 = vmatmul.mubr.msk.bf16.gmra.mrb[40].mxu0 %vm661_vm2, %v2614_v25  ;;  %v19408_v25 = vld [vmem:[#allocation89_spill] sm:$0xff] }
 0x1ed   : > { %12744 = vmatprep.mubr.msk.bf16.mxu0 %vm661_vm2, %v2615_v50  ;;  %12877 = vmatmul.mubr.msk.bf16.gmra.mrb[8].mxu1 %vm661_vm2, %v3854_v59  ;;  %v2596_v4 = vmul.f32 %v19366_v14, %v19408_v25  ;;  %v3836_v50 = vld [vmem:[#allocation2 + $0xc0] sm:$0xff]  ;;  %v2597_v59 = vmul.f32 %v19367_v63, %v15545_v41  ;;  %v2600_v41 = vmul.f32 %v19376_v15, %v19410_v46  ;;  %v4112_v46 = vld [vmem:[#allocation2 + $0x31] sm:$0xff] }
 0x1ee   : > { %12880 = vmatprep.mubr.msk.bf16.mxu1 %vm661_vm2, %v3855_v30  ;;  %v3858_v36 = vpack.c.bf16 %v3836_v50, %v3835_v9  ;;  %v19413_v50 = vld [vmem:[#allocation115_spill] sm:$0xff] }
 0x1ef   : > { %v2618_v30 = vpack.c.bf16 %v2596_v4, %v2595_v57  ;;  %v2619_v31 = vpack.c.bf16 %v2598_v27, %v2597_v59  ;;  %v3841_v57 = vld [vmem:[#allocation2 + $0xe8] sm:$0xff]  ;;  %v2603_v4 = vmul.f32 %v19392_v21, %v19411_v34  ;;  %v19412_v27 = vld [vmem:[#allocation108_spill] sm:$0xff]  ;;  %v2606_v59 = vmul.f32 %v19391_v3, %v19413_v50  ;;  %v3846_v9 = vld [vmem:[#allocation2 + $0x110] sm:$0xff] }
 0x1f0   : > { %v2604_v42 = vmul.f32 %v19389_v8, %v19412_v27  ;;  %v4113_v27 = vld [vmem:[#allocation2 + $0x39] sm:$0xff]  ;;  %v4116_v50 = vld [vmem:[#allocation2 + $0x51] sm:$0xff] }
 0x1f4   : > { %12745 = vmatmul.mubr.msk.bf16.gmra.mrb[44].mxu0 %vm661_vm2, %v2616_v16  ;;  %v3840_v16 = vld [vmem:[#allocation2 + $0xe0] sm:$0xff] }
 0x1f5   : > { %12748 = vmatprep.mubr.msk.bf16.mxu0 %vm661_vm2, %v2617_v24  ;;  %12881 = vmatmul.mubr.msk.bf16.gmra.mrb[12].mxu1 %vm661_vm2, %v3856_v13  ;;  %v3842_v24 = vld [vmem:[#allocation2 + $0xf0] sm:$0xff]  ;;  %v2620_v13 = vpack.c.bf16 %v2600_v41, %v2599_v1  ;;  %v3860_v32 = vpack.c.bf16 %v3840_v16, %v3839_v5  ;;  %v3863_v1 = vpack.c.bf16 %v3846_v9, %v3845_v37  ;;  %v19414_v41 = vld [vmem:[#allocation45_spill] sm:$0xff]  ;;  %v19416_v5 = vld [vmem:[#allocation6_spill] sm:$0xff] }
 0x1f6   : > { %12884 = vmatprep.mubr.msk.bf16.mxu1 %vm661_vm2, %v3857_v0  ;;  %v2621_v0 = vpack.c.bf16 %v2602_v28, %v2601_v54  ;;  %v3861_v25 = vpack.c.bf16 %v3842_v24, %v3841_v57  ;;  %v2607_v28 = vmul.f32 %v19414_v41, %v15623_v20  ;;  %v3847_v54 = vld [vmem:[#allocation2 + $0x118] sm:$0xff]  ;;  %v3848_v24 = vld [vmem:[#allocation2 + $0x120] sm:$0xff] }
 0x1f7   : > { %v4117_v41 = vld [vmem:[#allocation2 + $0x59] sm:$0xff] }
 0x1fc   : > { %12749 = vmatmul.mubr.msk.bf16.gmra.mrb[48].mxu0 %vm661_vm2, %v2618_v30  ;;  %v2605_v30 = vmul.f32 %v19390_v38, %v15627_v43  ;;  %v19415_v43 = vld [vmem:[#allocation46_spill] sm:$0xff] }
 0x1fd   : > { %12752 = vmatprep.mubr.msk.bf16.mxu0 %vm661_vm2, %v2619_v31  ;;  %12885 = vmatmul.mubr.msk.bf16.gmra.mrb[16].mxu1 %vm661_vm2, %v3858_v36  ;;  %v2622_v31 = vpack.c.bf16 %v2604_v42, %v2603_v4  ;;  %v3843_v36 = vld [vmem:[#allocation2 + $0xf8] sm:$0xff]  ;;  %v2608_v16 = vmul.f32 %v19415_v43, %v15614_v29  ;;  %v4114_v42 = vld [vmem:[#allocation2 + $0x41] sm:$0xff] }
 0x1fe   : > { %12888 = vmatprep.mubr.msk.bf16.mxu1 %vm661_vm2, %v3859_v48  ;;  %v2623_v62 = vpack.c.bf16 %v2606_v59, %v2605_v30  ;;  %v3862_v48 = vpack.c.bf16 %v3844_v47, %v3843_v36  ;;  %v19418_v59 = vld [vmem:[#allocation3_spill] sm:$0xff]  ;;  %v19419_v30 = vld [vmem:[#allocation5_spill] sm:$0xff]  ;;  %v19422_v43 = vld [vmem:[#allocation10_spill] sm:$0xff] }
 0x1ff   : > { %v2624_v57 = vpack.c.bf16 %v2608_v16, %v2607_v28  ;;  %v4145_v47 = vmul.f32 %v4113_v27, %v19418_v59  ;;  %v4146_v9 = vmul.f32 %v4114_v42, %v19419_v30  ;;  %v19420_v36 = vld [vmem:[#allocation7_spill] sm:$0xff]  ;;  %v4118_v28 = vld [vmem:[#allocation2 + $0x61] sm:$0xff]  ;;  %v4149_v16 = vmul.f32 %v4117_v41, %v19422_v43 }
 0x204   : > { %12753 = vmatmul.mubr.msk.bf16.gmra.mrb[52].mxu0 %vm661_vm2, %v2620_v13  ;;  %v4111_v13 = vld [vmem:[#allocation2 + $0x29] sm:$0xff] }
 0x205   : > { %12756 = vmatprep.mubr.msk.bf16.mxu0 %vm661_vm2, %v2621_v0  ;;  %12889 = vmatmul.mubr.msk.bf16.gmra.mrb[20].mxu1 %vm661_vm2, %v3860_v32  ;;  %v4144_v0 = vmul.f32 %v4112_v46, %v19416_v5  ;;  %v3864_v32 = vpack.c.bf16 %v3848_v24, %v3847_v54  ;;  %v19423_v54 = vld [vmem:[#allocation9_spill] sm:$0xff] }
 0x206   : > { %12892 = vmatprep.mubr.msk.bf16.mxu1 %vm661_vm2, %v3861_v25  ;;  %v19417_v25 = vld [vmem:[#allocation4_spill] sm:$0xff]  ;;  %v4150_v24 = vmul.f32 %v4118_v28, %v19423_v54 }
 0x207   : > { %v4143_v34 = vmul.f32 %v4111_v13, %v19417_v25  ;;  %v19424_v13 = vld [vmem:[#allocation11_spill] sm:$0xff]  ;;  %v19434_v28 = vld [vmem:[#allocation16_spill] sm:$0xff] }
 0x208   : > { %v4178_v27 = vpack.c.bf16 %v4150_v24, %v4149_v16  ;;  %v19436_v16 = vld [vmem:[#allocation18_spill] sm:$0xff]  ;;  %v19437_v24 = vld [vmem:[#allocation83_spill] sm:$0xff] }
 0x209   : > { %v4175_v4 = vpack.c.bf16 %v4144_v0, %v4143_v34  ;;  %v19425_v0 = vld [vmem:[#allocation71_spill] sm:$0xff]  ;;  %v19427_v34 = vld [vmem:[#allocation77_spill] sm:$0xff] }
 0x20c   : > { %12757 = vmatmul.mubr.msk.bf16.gmra.mrb[56].mxu0 %vm661_vm2, %v2622_v31  ;;  %v4115_v31 = vld [vmem:[#allocation2 + $0x49] sm:$0xff] }
 0x20d   : > { %12760 = vmatprep.mubr.msk.bf16.mxu0 %vm661_vm2, %v2623_v62  ;;  %12893 = vmatmul.mubr.msk.bf16.gmra.mrb[24].mxu1 %vm661_vm2, %v3862_v48  ;;  %v4148_v62 = vmul.f32 %v4116_v50, %v19420_v36  ;;  %v19421_v48 = vld [vmem:[#allocation8_spill] sm:$0xff]  ;;  %v19428_v50 = vld [vmem:[#allocation14_spill] sm:$0xff] }
 0x20e   : > { %12896 = vmatprep.mubr.msk.bf16.mxu1 %vm661_vm2, %v3863_v1  ;;  %v4147_v37 = vmul.f32 %v4115_v31, %v19421_v48  ;;  %v4176_v1 = vpack.c.bf16 %v4146_v9, %v4145_v47  ;;  %v19429_v47 = vld [vmem:[#allocation73_spill] sm:$0xff] }
 0x20f   : > { %v4153_v9 = vmul.f32 %v19429_v47, %v19428_v50  ;;  %v19430_v31 = vld [vmem:[#allocation13_spill] sm:$0xff]  ;;  %v19440_v47 = vld [vmem:[#allocation19_spill] sm:$0xff]  ;;  %v19442_v50 = vld [vmem:[#allocation20_spill] sm:$0xff] }
 0x210   : > { %v4177_v46 = vpack.c.bf16 %v4148_v62, %v4147_v37  ;;  %v19431_v62 = vld [vmem:[#allocation74_spill] sm:$0xff] }
 0x211   : > { %v4154_v37 = vmul.f32 %v19431_v62, %v19430_v31  ;;  %v19441_v62 = vld [vmem:[#allocation90_spill] sm:$0xff] }
 0x212   : > { %v4160_v31 = vmul.f32 %v19441_v62, %v19440_v47  ;;  %v19451_v62 = vld [vmem:[#allocation104_spill] sm:$0xff] }
 0x213   : > { %v4180_v54 = vpack.c.bf16 %v4154_v37, %v4153_v9  ;;  %v19446_v37 = vld [vmem:[#allocation21_spill] sm:$0xff] }
 0x214   : > { %12761 = vmatmul.mubr.msk.bf16.gmra.mrb[60].mxu0 %vm661_vm2, %v2624_v57  ;;  %v19426_v57 = vld [vmem:[#allocation12_spill] sm:$0xff] }
 0x215   : > { %12897 = vmatmul.mubr.msk.bf16.gmra.mrb[28].mxu1 %vm661_vm2, %v3864_v32  ;;  %v4152_v32 = vmul.f32 %v19425_v0, %v19424_v13  ;;  %v19435_v0 = vld [vmem:[#allocation85_spill] sm:$0xff] }
 0x216   : > { %12902 = vmatprep.mubr.msk.bf16.mxu1 %vm661_vm2, %v4175_v4  ;;  %v4151_v4 = vmul.f32 %v19427_v34, %v19426_v57  ;;  %v4155_v13 = vmul.f32 %v19435_v0, %v19434_v28 }
 0x218   : > { %v4179_v42 = vpack.c.bf16 %v4152_v32, %v4151_v4  ;;  %v4157_v32 = vmul.f32 %v19437_v24, %v19436_v16  ;;  %v19438_v4 = vld [vmem:[#allocation17_spill] sm:$0xff]  ;;  %v19448_v24 = vld [vmem:[#allocation23_spill] sm:$0xff]  ;;  %v19450_v16 = vld [vmem:[#allocation24_spill] sm:$0xff] }
 0x219   : > { %v4163_v47 = vmul.f32 %v19451_v62, %v19450_v16 }
 0x21d   : > { %12903 = vmatmul.mubr.msk.bf16.vlgmr.msra.gmra.mrb[0].mxu1 %vm661_vm2, %v4176_v1  ;;  %v19432_v1 = vld [vmem:[#allocation15_spill] sm:$0xff] }
 0x21e   : > { %12906 = vmatprep.mubr.msk.bf16.mxu1 %vm661_vm2, %v4177_v46  ;;  %v19433_v46 = vld [vmem:[#allocation82_spill] sm:$0xff] }
 0x21f   : > { %v4156_v41 = vmul.f32 %v19433_v46, %v19432_v1  ;;  %v19443_v46 = vld [vmem:[#allocation94_spill] sm:$0xff] }
 0x220   : > { %v4159_v1 = vmul.f32 %v19443_v46, %v19442_v50 }
 0x221   : > { %v4181_v34 = vpack.c.bf16 %v4156_v41, %v4155_v13  ;;  %v19445_v13 = vld [vmem:[#allocation92_spill] sm:$0xff]  ;;  %v19447_v41 = vld [vmem:[#allocation93_spill] sm:$0xff] }
 0x222   : > { %v4183_v0 = vpack.c.bf16 %v4160_v31, %v4159_v1  ;;  %v19453_v31 = vld [vmem:[#allocation100_spill] sm:$0xff] }
 0x225   : > { %12907 = vmatmul.mubr.msk.bf16.gmra.mrb[4].mxu1 %vm661_vm2, %v4178_v27  ;;  %v19439_v27 = vld [vmem:[#allocation84_spill] sm:$0xff] }
 0x226   : > { %12910 = vmatprep.mubr.msk.bf16.mxu1 %vm661_vm2, %v4179_v42  ;;  %v4158_v42 = vmul.f32 %v19439_v27, %v19438_v4  ;;  %v19449_v27 = vld [vmem:[#allocation99_spill] sm:$0xff] }
 0x227   : > { %v4164_v4 = vmul.f32 %v19449_v27, %v19448_v24  ;;  %v19459_v27 = vld [vmem:[#allocation113_spill] sm:$0xff] }
 0x228   : > { %v4182_v57 = vpack.c.bf16 %v4158_v42, %v4157_v32  ;;  %v19454_v32 = vld [vmem:[#allocation25_spill] sm:$0xff] }
 0x229   : > { %v4185_v46 = vpack.c.bf16 %v4164_v4, %v4163_v47  ;;  %v19455_v42 = vld [vmem:[#allocation101_spill] sm:$0xff] }
 0x22a   : > { %v19461_v47 = vld [vmem:[#allocation29_spill] sm:$0xff] }
 0x22d   : > { %12911 = vmatmul.mubr.msk.bf16.gmra.mrb[8].mxu1 %vm661_vm2, %v4180_v54  ;;  %v19444_v54 = vld [vmem:[#allocation22_spill] sm:$0xff] }
 0x22e   : > { %12914 = vmatprep.mubr.msk.bf16.mxu1 %vm661_vm2, %v4181_v34  ;;  %v4161_v9 = vmul.f32 %v19445_v13, %v19444_v54  ;;  %v4162_v34 = vmul.f32 %v19447_v41, %v19446_v37  ;;  %v19456_v13 = vld [vmem:[#allocation27_spill] sm:$0xff]  ;;  %v19457_v41 = vld [vmem:[#allocation109_spill] sm:$0xff]  ;;  %v19458_v54 = vld [vmem:[#allocation28_spill] sm:$0xff] }
 0x22f   : > { %v4168_v37 = vmul.f32 %v19457_v41, %v19456_v13  ;;  %v4167_v24 = vmul.f32 %v19459_v27, %v19458_v54  ;;  %v19465_v41 = vld [vmem:[#allocation117_spill] sm:$0xff] }
 0x230   : > { %v4184_v28 = vpack.c.bf16 %v4162_v34, %v4161_v9  ;;  %v4170_v9 = vmul.f32 %v19394_v60, %v19461_v47  ;;  %v19462_v34 = vld [vmem:[#allocation32_spill] sm:$0xff] }
 0x231   : > { %v4187_v62 = vpack.c.bf16 %v4168_v37, %v4167_v24  ;;  %v4142_v37 = vld [vmem:[#allocation2 + $0x121] sm:$0xff] }
 0x235   : > { %12915 = vmatmul.mubr.msk.bf16.gmra.mrb[12].mxu1 %vm661_vm2, %v4182_v57  ;;  %v19452_v57 = vld [vmem:[#allocation26_spill] sm:$0xff] }
 0x236   : > { %12918 = vmatprep.mubr.msk.bf16.mxu1 %vm661_vm2, %v4183_v0  ;;  %v4165_v1 = vmul.f32 %v19453_v31, %v19452_v57  ;;  %v4166_v0 = vmul.f32 %v19455_v42, %v19454_v32  ;;  %v19464_v42 = vld [vmem:[#allocation31_spill] sm:$0xff] }
 0x237   : > { %v4172_v13 = vmul.f32 %v19465_v41, %v19464_v42 }
 0x238   : > { %v4186_v50 = vpack.c.bf16 %v4166_v0, %v4165_v1  ;;  %v4141_v1 = vld [vmem:[#allocation2 + $0x119] sm:$0xff] }
 0x23d   : > { %12919 = vmatmul.mubr.msk.bf16.gmra.mrb[16].mxu1 %vm661_vm2, %v4184_v28  ;;  %v19460_v28 = vld [vmem:[#allocation30_spill] sm:$0xff] }
 0x23e   : > { %12922 = vmatprep.mubr.msk.bf16.mxu1 %vm661_vm2, %v4185_v46  ;;  %v4169_v4 = vmul.f32 %v19393_v44, %v19460_v28  ;;  %v19463_v46 = vld [vmem:[#allocation116_spill] sm:$0xff]  ;;  %v4174_v44 = vmul.f32 %v4142_v37, %v15199_v6 }
 0x23f   : > { %v4171_v31 = vmul.f32 %v19463_v46, %v19462_v34 }
 0x240   : > { %v4188_v32 = vpack.c.bf16 %v4170_v9, %v4169_v4 }
 0x241   : > { %v4189_v27 = vpack.c.bf16 %v4172_v13, %v4171_v31  ;;  %v4756_v13 = vld [vmem:[%s18705_s11] sm:$0xf] }
 0x242   : > { %14392 = vmatprep.subr.msk.bf16.mxu0 %vm1682_vm3, %v4756_v13 }
 0x245   : > { %12923 = vmatmul.mubr.msk.bf16.gmra.mrb[20].mxu1 %vm661_vm2, %v4186_v50  ;;  %v4173_v50 = vmul.f32 %v4141_v1, %v15203_v52 }
 0x246   : > { %12926 = vmatprep.mubr.msk.bf16.mxu1 %vm661_vm2, %v4187_v62 }
 0x247   : > { %v4190_v24 = vpack.c.bf16 %v4174_v44, %v4173_v50 }
 0x24d   : > { %12927 = vmatmul.mubr.msk.bf16.gmra.mrb[24].mxu1 %vm661_vm2, %v4188_v32  ;;  %v4806_v32 = vsel %vm1682_vm3, %v4756_v13, 0 }
 0x24e   : > { %12930 = vmatprep.mubr.msk.bf16.mxu1 %vm661_vm2, %v4189_v27  ;;  %12935 = vmatpush3.bf16.msra.mxu0 %v4806_v32 }
 0x255   : > { %12931 = vmatmul.mubr.msk.bf16.gmra.mrb[28].mxu1 %vm661_vm2, %v4190_v24 }
 0x2af   : > { %v12734_v60 = vpop.f32.mrb[32].mxu0 }
 0x2b0   : > { %v2712_v0 = vpop.f32.mrb[33].mxu0 }
 0x2b1   : > { %v12735_v62 = vpop.f32.mrb[34].mxu0 }
 0x2b2   : > { %v2715_v46 = vpop.f32.mrb[35].mxu0 }
 0x2b7   : > { %v12738_v4 = vpop.f32.mrb[36].mxu0 }
 0x2b8   : > { %v2728_v9 = vpop.f32.mrb[37].mxu0 }
 0x2b9   : > { %v12739_v31 = vpop.f32.mrb[38].mxu0 }
 0x2ba   : > { %v2731_v41 = vpop.f32.mrb[39].mxu0 }
 0x2bf   : > { %v12742_v27 = vpop.f32.mrb[40].mxu0 }
 0x2c0   : > { %v2744_v1 = vpop.f32.mrb[41].mxu0 }
 0x2c1   : > { %v12743_v37 = vpop.f32.mrb[42].mxu0 }
 0x2c2   : > { %v2747_v50 = vpop.f32.mrb[43].mxu0 }
 0x2c7   : > { %v12746_v44 = vpop.f32.mrb[44].mxu0 }
 0x2c8   : > { %v2760_v24 = vpop.f32.mrb[45].mxu0 }
 0x2c9   : > { %v12747_v6 = vpop.f32.mrb[46].mxu0 }
 0x2ca   : > { %v2763_v52 = vpop.f32.mrb[47].mxu0 }
 0x2cf   : > { %v15984_v34 = vpop.f32.mrb[48].mxu0 }
 0x2d0   : > { %v15986_v42 = vpop.f32.mrb[49].mxu0 }
 0x2d1   : > { %v15988_v47 = vpop.f32.mrb[50].mxu0 }
 0x2d2   : > { %v15990_v13 = vpop.f32.mrb[51].mxu0 }
 0x2d7   : > { %v15992_v32 = vpop.f32.mrb[52].mxu0 }
 0x2d8   : > { %v15994_v28 = vpop.f32.mrb[53].mxu0 }
 0x2d9   : > { %v15996_v54 = vpop.f32.mrb[54].mxu0 }
 0x2da   : > { %v15998_v57 = vpop.f32.mrb[55].mxu0 }
 0x2df   : > { %v16000_v16 = vpop.f32.mrb[56].mxu0 }
 0x2e0   : > { %v16002_v43 = vpop.f32.mrb[57].mxu0 }
 0x2e1   : > { %v16004_v48 = vpop.f32.mrb[58].mxu0 }
 0x2e2   : > { %v16006_v36 = vpop.f32.mrb[59].mxu0 }
 0x2e7   : > { %v16008_v30 = vpop.f32.mrb[60].mxu0 }
 0x2e8   : > { %v16010_v59 = vpop.f32.mrb[61].mxu0 }
 0x2e9   : > { %v16012_v25 = vpop.f32.mrb[62].mxu0 }
 0x2ea   : > { %v16014_v20 = vpop.f32.mrb[63].mxu0 }
 0x2f0   : > { %v12904_v5 = vpop.f32.mrb[0].mxu1 }
 0x2f1   : > { %v13614_v29 = vadd.f32 %v12904_v5, %v12734_v60  ;;  %v4278_v21 = vpop.f32.mrb[1].mxu1 }
 0x2f2   : > { %v13615_v3 = vadd.f32 %v4278_v21, %v2712_v0  ;;  %v12905_v38 = vpop.f32.mrb[2].mxu1 }
 0x2f3   : > { %v13616_v8 = vadd.f32 %v12905_v38, %v12735_v62  ;;  %v4281_v2 = vpop.f32.mrb[3].mxu1 }
 0x2f4   : > { %v13617_v17 = vadd.f32 %v4281_v2, %v2715_v46  ;;  %4469 = vrot.lane.b32.xlu0 %v13615_v3, %s14438_s1 }
 0x2f6   : > { %4471 = vrot.lane.b32.xlu1 %v13617_v17, %s14438_s1 }
 0x2f8   : > { %v12908_v22 = vpop.f32.mrb[4].mxu1  ;;  %4473 = vrot.lane.b32.xlu0 %v13614_v29, %s14438_s1 }
 0x2f9   : > { %v13618_v15 = vadd.f32 %v12908_v22, %v12738_v4  ;;  %v4294_v12 = vpop.f32.mrb[5].mxu1 }
 0x2fa   : > { %v13619_v39 = vadd.f32 %v4294_v12, %v2728_v9  ;;  %v12909_v63 = vpop.f32.mrb[6].mxu1  ;;  %4475 = vrot.lane.b32.xlu1 %v13616_v8, %s14438_s1 }
 0x2fb   : > { %v13620_v5 = vadd.f32 %v12909_v63, %v12739_v31  ;;  %v4297_v21 = vpop.f32.mrb[7].mxu1 }
 0x2fc   : > { %v13621_v60 = vadd.f32 %v4297_v21, %v2731_v41  ;;  %4477 = vrot.lane.b32.xlu0 %v13619_v39, %s14438_s1 }
 0x2fe   : > { %4479 = vrot.lane.b32.xlu1 %v13621_v60, %s14438_s1 }
 0x300   : > { %v12912_v2 = vpop.f32.mrb[8].mxu1  ;;  %4481 = vrot.lane.b32.xlu0 %v13618_v15, %s14438_s1 }
 0x301   : > { %v13622_v17 = vadd.f32 %v12912_v2, %v12742_v27  ;;  %v4310_v38 = vpop.f32.mrb[9].mxu1 }
 0x302   : > { %v13623_v3 = vadd.f32 %v4310_v38, %v2744_v1  ;;  %v12913_v29 = vpop.f32.mrb[10].mxu1  ;;  %4483 = vrot.lane.b32.xlu1 %v13620_v5, %s14438_s1 }
 0x303   : > { %v13624_v12 = vadd.f32 %v12913_v29, %v12743_v37  ;;  %v4313_v22 = vpop.f32.mrb[11].mxu1 }
 0x304   : > { %v13625_v0 = vadd.f32 %v4313_v22, %v2747_v50  ;;  %4485 = vrot.lane.b32.xlu0 %v13623_v3, %s14438_s1 }
 0x306   : > { %4487 = vrot.lane.b32.xlu1 %v13625_v0, %s14438_s1 }
 0x308   : > { %v12916_v63 = vpop.f32.mrb[12].mxu1  ;;  %4489 = vrot.lane.b32.xlu0 %v13622_v17, %s14438_s1 }
 0x309   : > { %v13626_v39 = vadd.f32 %v12916_v63, %v12746_v44  ;;  %v4326_v8 = vpop.f32.mrb[13].mxu1  ;;  %v16077_v63 = vld [vmem:[%s18703_s9] ss:$0 sm:$0xff] }
 0x30a   : > { %v13627_v62 = vadd.f32 %v4326_v8, %v2760_v24  ;;  %v12917_v15 = vpop.f32.mrb[14].mxu1  ;;  %4491 = vrot.lane.b32.xlu1 %v13624_v12, %s14438_s1 }
 0x30b   : > { %v13628_v46 = vadd.f32 %v12917_v15, %v12747_v6  ;;  %v4329_v4 = vpop.f32.mrb[15].mxu1 }
 0x30c   : > { %v13629_v9 = vadd.f32 %v4329_v4, %v2763_v52  ;;  %4493 = vrot.lane.b32.xlu0 %v13627_v62, %s14438_s1  ;;  %v16085_v62 = vld [vmem:[%s18704_s10] ss:$0 sm:$0xff] }
 0x30e   : > { %4495 = vrot.lane.b32.xlu1 %v13629_v9, %s14438_s1 }
 0x310   : > { %v12920_v31 = vpop.f32.mrb[16].mxu1  ;;  %4497 = vrot.lane.b32.xlu0 %v13626_v39, %s14438_s1 }
 0x311   : > { %v13630_v41 = vadd.f32 %v12920_v31, %v15984_v34  ;;  %v4342_v27 = vpop.f32.mrb[17].mxu1 }
 0x312   : > { %v13631_v1 = vadd.f32 %v4342_v27, %v15986_v42  ;;  %v12921_v37 = vpop.f32.mrb[18].mxu1  ;;  %4499 = vrot.lane.b32.xlu1 %v13628_v46, %s14438_s1 }
 0x313   : > { %v13632_v50 = vadd.f32 %v12921_v37, %v15988_v47  ;;  %v4345_v6 = vpop.f32.mrb[19].mxu1 }
 0x314   : > { %v13633_v52 = vadd.f32 %v4345_v6, %v15990_v13  ;;  %4501 = vrot.lane.b32.xlu0 %v13631_v1, %s14438_s1 }
 0x316   : > { %4503 = vrot.lane.b32.xlu1 %v13633_v52, %s14438_s1 }
 0x318   : > { %v12924_v44 = vpop.f32.mrb[20].mxu1  ;;  %4505 = vrot.lane.b32.xlu0 %v13630_v41, %s14438_s1 }
 0x319   : > { %v13634_v34 = vadd.f32 %v12924_v44, %v15992_v32  ;;  %v4358_v24 = vpop.f32.mrb[21].mxu1 }
 0x31a   : > { %v13635_v42 = vadd.f32 %v4358_v24, %v15994_v28  ;;  %v12925_v5 = vpop.f32.mrb[22].mxu1  ;;  %4507 = vrot.lane.b32.xlu1 %v13632_v50, %s14438_s1 }
 0x31b   : > { %v13636_v47 = vadd.f32 %v12925_v5, %v15996_v54  ;;  %v4361_v21 = vpop.f32.mrb[23].mxu1 }
 0x31c   : > { %v13637_v13 = vadd.f32 %v4361_v21, %v15998_v57  ;;  %4509 = vrot.lane.b32.xlu0 %v13635_v42, %s14438_s1 }
 0x31e   : > { %4511 = vrot.lane.b32.xlu1 %v13637_v13, %s14438_s1 }
 0x320   : > { %v12928_v60 = vpop.f32.mrb[24].mxu1  ;;  %4513 = vrot.lane.b32.xlu0 %v13634_v34, %s14438_s1 }
 0x321   : > { %v13638_v32 = vadd.f32 %v12928_v60, %v16000_v16  ;;  %v4374_v2 = vpop.f32.mrb[25].mxu1 }
 0x322   : > { %v13639_v28 = vadd.f32 %v4374_v2, %v16002_v43  ;;  %v12929_v17 = vpop.f32.mrb[26].mxu1  ;;  %4515 = vrot.lane.b32.xlu1 %v13636_v47, %s14438_s1 }
 0x323   : > { %v13640_v54 = vadd.f32 %v12929_v17, %v16004_v48  ;;  %v4377_v38 = vpop.f32.mrb[27].mxu1 }
 0x324   : > { %v13641_v57 = vadd.f32 %v4377_v38, %v16006_v36  ;;  %4517 = vrot.lane.b32.xlu0 %v13639_v28, %s14438_s1 }
 0x326   : > { %4519 = vrot.lane.b32.xlu1 %v13641_v57, %s14438_s1 }
 0x328   : > { %v12932_v3 = vpop.f32.mrb[28].mxu1  ;;  %4521 = vrot.lane.b32.xlu0 %v13638_v32, %s14438_s1 }
 0x329   : > { %v13642_v16 = vadd.f32 %v12932_v3, %v16008_v30  ;;  %v4390_v29 = vpop.f32.mrb[29].mxu1 }
 0x32a   : > { %v13643_v43 = vadd.f32 %v4390_v29, %v16010_v59  ;;  %v12933_v12 = vpop.f32.mrb[30].mxu1  ;;  %4523 = vrot.lane.b32.xlu1 %v13640_v54, %s14438_s1  ;;  %v11757_v59 = vld [vmem:[%s18708_s14 + $0x4] sm:$0xf] }
 0x32b   : > { %v13644_v36 = vadd.f32 %v12933_v12, %v16012_v25  ;;  %v4393_v48 = vpop.f32.mrb[31].mxu1  ;;  %14393 = vmatprep.subr.msk.bf16.mxu0 %vm1682_vm3, %v11757_v59 }
 0x32c   : > { %v13645_v22 = vadd.f32 %v4393_v48, %v16014_v20  ;;  %4525 = vrot.lane.b32.xlu0 %v13643_v43, %s14438_s1  ;;  %v5291_v43 = vsel %vm1682_vm3, %v11757_v59, 0 }
 0x32e   : > { %4527 = vrot.lane.b32.xlu1 %v13645_v22, %s14438_s1 }
 0x330   : > { %4529 = vrot.lane.b32.xlu0 %v13642_v16, %s14438_s1 }
 0x332   : > { %4531 = vrot.lane.b32.xlu1 %v13644_v36, %s14438_s1 }
 0x366   : > { %v4470_v20 = vpop.permute.xlu0 %4469 }
 0x367   : > { %4566 = vst.msk [vmem:[%s14582_s5] sm:$0xff] %vm4565_vm4, %v4470_v20 }
 0x368   : > { %v4472_v25 = vpop.permute.xlu1 %4471 }
 0x369   : > { %4567 = vst.msk [vmem:[%s14582_s5 + $0x8] sm:$0xff] %vm4565_vm4, %v4472_v25 }
 0x36a   : > { %v4474_v30 = vpop.permute.xlu0 %4473 }
 0x36b   : > { %4568 = vst.msk [vmem:[%s14582_s5 + $0x10] sm:$0xff] %vm4565_vm4, %v4474_v30 }
 0x36c   : > { %v4476_v0 = vpop.permute.xlu1 %4475 }
 0x36d   : > { %4569 = vst.msk [vmem:[%s14582_s5 + $0x18] sm:$0xff] %vm4565_vm4, %v4476_v0 }
 0x36e   : > { %v4478_v39 = vpop.permute.xlu0 %4477  ;;  %v4598_v8 = vld [vmem:[%s14582_s5] sm:$0xff] }
 0x36f   : > { %4570 = vst.msk [vmem:[%s14582_s5 + $0x20] sm:$0xff] %vm4565_vm4, %v4478_v39  ;;  %v4637_v15 = vmul.f32 %v16077_v63, %v4598_v8 }
 0x370   : > { %v4480_v46 = vpop.permute.xlu1 %4479  ;;  %v4599_v4 = vld [vmem:[%s14582_s5 + $0x8] sm:$0xff] }
 0x371   : > { %4571 = vst.msk [vmem:[%s14582_s5 + $0x28] sm:$0xff] %vm4565_vm4, %v4480_v46  ;;  %v4638_v9 = vmul.f32 %v16077_v63, %v4599_v4  ;;  %v4676_v31 = vadd.f32 %v16085_v62, %v4637_v15 }
 0x372   : > { %v4482_v41 = vpop.permute.xlu0 %4481  ;;  %v4600_v27 = vld [vmem:[%s14582_s5 + $0x10] sm:$0xff] }
 0x373   : > { %4572 = vst.msk [vmem:[%s14582_s5 + $0x30] sm:$0xff] %vm4565_vm4, %v4482_v41  ;;  %v4677_v1 = vadd.f32 %v16085_v62, %v4638_v9  ;;  %v4639_v37 = vmul.f32 %v16077_v63, %v4600_v27  ;;  %v4708_v52 = vmax.f32 %v4676_v31, 0.0 }
 0x374   : > { %v4484_v50 = vpop.permute.xlu1 %4483  ;;  %v4601_v6 = vld [vmem:[%s14582_s5 + $0x18] sm:$0xff] }
 0x375   : > { %4573 = vst.msk [vmem:[%s14582_s5 + $0x38] sm:$0xff] %vm4565_vm4, %v4484_v50  ;;  %v4709_v44 = vmax.f32 %v4677_v1, 0.0  ;;  %v4640_v34 = vmul.f32 %v16077_v63, %v4601_v6  ;;  %v4678_v24 = vadd.f32 %v16085_v62, %v4639_v37 }
 0x376   : > { %v4486_v42 = vpop.permute.xlu0 %4485  ;;  %v4602_v5 = vld [vmem:[%s14582_s5 + $0x20] sm:$0xff] }
 0x377   : > { %4574 = vst.msk [vmem:[%s14582_s5 + $0x40] sm:$0xff] %vm4565_vm4, %v4486_v42  ;;  %v4740_v47 = vpack.c.bf16 %v4709_v44, %v4708_v52  ;;  %v4679_v21 = vadd.f32 %v16085_v62, %v4640_v34  ;;  %v4641_v13 = vmul.f32 %v16077_v63, %v4602_v5  ;;  %v4710_v2 = vmax.f32 %v4678_v24, 0.0 }
 0x378   : > { %v4488_v60 = vpop.permute.xlu1 %4487  ;;  %v4603_v32 = vld [vmem:[%s14582_s5 + $0x28] sm:$0xff] }
 0x379   : > { %4575 = vst.msk [vmem:[%s14582_s5 + $0x48] sm:$0xff] %vm4565_vm4, %v4488_v60  ;;  %12936 = vmatprep.mubr.msk.bf16.mxu0 %vm661_vm2, %v4740_v47  ;;  %v4711_v28 = vmax.f32 %v4679_v21, 0.0  ;;  %v4642_v17 = vmul.f32 %v16077_v63, %v4603_v32  ;;  %v4680_v54 = vadd.f32 %v16085_v62, %v4641_v13 }
 0x37a   : > { %v4490_v38 = vpop.permute.xlu0 %4489  ;;  %v4604_v57 = vld [vmem:[%s14582_s5 + $0x30] sm:$0xff] }
 0x37b   : > { %4576 = vst.msk [vmem:[%s14582_s5 + $0x50] sm:$0xff] %vm4565_vm4, %v4490_v38  ;;  %v4741_v3 = vpack.c.bf16 %v4711_v28, %v4710_v2  ;;  %v4681_v16 = vadd.f32 %v16085_v62, %v4642_v17  ;;  %v4643_v29 = vmul.f32 %v16077_v63, %v4604_v57  ;;  %v4712_v48 = vmax.f32 %v4680_v54, 0.0 }
 0x37c   : > { %v4492_v12 = vpop.permute.xlu1 %4491  ;;  %v4605_v36 = vld [vmem:[%s14582_s5 + $0x38] sm:$0xff] }
 0x37d   : > { %4577 = vst.msk [vmem:[%s14582_s5 + $0x58] sm:$0xff] %vm4565_vm4, %v4492_v12  ;;  %12937 = vmatmul.mubr.msk.bf16.vlgmr.msra.gmra.mrb[64].mxu0 %vm661_vm2, %v4741_v3  ;;  %v4713_v22 = vmax.f32 %v4681_v16, 0.0  ;;  %v4644_v20 = vmul.f32 %v16077_v63, %v4605_v36  ;;  %v4682_v25 = vadd.f32 %v16085_v62, %v4643_v29 }
 0x37e   : > { %v4494_v30 = vpop.permute.xlu0 %4493  ;;  %v4606_v0 = vld [vmem:[%s14582_s5 + $0x40] sm:$0xff]  ;;  %12969 = vmatpush3.bf16.msra.mxu0 %v5291_v43 }
 0x37f   : > { %4578 = vst.msk [vmem:[%s14582_s5 + $0x60] sm:$0xff] %vm4565_vm4, %v4494_v30  ;;  %v4742_v59 = vpack.c.bf16 %v4713_v22, %v4712_v48  ;;  %v4683_v39 = vadd.f32 %v16085_v62, %v4644_v20  ;;  %v4645_v8 = vmul.f32 %v16077_v63, %v4606_v0  ;;  %v4714_v4 = vmax.f32 %v4682_v25, 0.0 }
 0x380   : > { %v4496_v15 = vpop.permute.xlu1 %4495  ;;  %v4607_v46 = vld [vmem:[%s14582_s5 + $0x48] sm:$0xff] }
 0x381   : > { %4579 = vst.msk [vmem:[%s14582_s5 + $0x68] sm:$0xff] %vm4565_vm4, %v4496_v15  ;;  %12940 = vmatprep.mubr.msk.bf16.mxu0 %vm661_vm2, %v4742_v59  ;;  %v4715_v9 = vmax.f32 %v4683_v39, 0.0  ;;  %v4646_v31 = vmul.f32 %v16077_v63, %v4607_v46  ;;  %v4684_v41 = vadd.f32 %v16085_v62, %v4645_v8 }
 0x382   : > { %v4498_v27 = vpop.permute.xlu0 %4497  ;;  %v4608_v1 = vld [vmem:[%s14582_s5 + $0x50] sm:$0xff] }
 0x383   : > { %4580 = vst.msk [vmem:[%s14582_s5 + $0x70] sm:$0xff] %vm4565_vm4, %v4498_v27  ;;  %v4743_v37 = vpack.c.bf16 %v4715_v9, %v4714_v4  ;;  %v4685_v50 = vadd.f32 %v16085_v62, %v4646_v31  ;;  %v4647_v6 = vmul.f32 %v16077_v63, %v4608_v1  ;;  %v4716_v34 = vmax.f32 %v4684_v41, 0.0 }
 0x384   : > { %v4500_v52 = vpop.permute.xlu1 %4499  ;;  %v4609_v44 = vld [vmem:[%s14582_s5 + $0x58] sm:$0xff] }
 0x385   : > { %4581 = vst.msk [vmem:[%s14582_s5 + $0x78] sm:$0xff] %vm4565_vm4, %v4500_v52  ;;  %12941 = vmatmul.mubr.msk.bf16.gmra.mrb[68].mxu0 %vm661_vm2, %v4743_v37  ;;  %v4717_v24 = vmax.f32 %v4685_v50, 0.0  ;;  %v4648_v42 = vmul.f32 %v16077_v63, %v4609_v44  ;;  %v4686_v5 = vadd.f32 %v16085_v62, %v4647_v6 }
 0x386   : > { %v4502_v47 = vpop.permute.xlu0 %4501  ;;  %v4610_v21 = vld [vmem:[%s14582_s5 + $0x60] sm:$0xff] }
 0x387   : > { %4582 = vst.msk [vmem:[%s14582_s5 + $0x80] sm:$0xff] %vm4565_vm4, %v4502_v47  ;;  %v4744_v13 = vpack.c.bf16 %v4717_v24, %v4716_v34  ;;  %v4687_v60 = vadd.f32 %v16085_v62, %v4648_v42  ;;  %v4649_v32 = vmul.f32 %v16077_v63, %v4610_v21  ;;  %v4718_v17 = vmax.f32 %v4686_v5, 0.0 }
 0x388   : > { %v4504_v2 = vpop.permute.xlu1 %4503  ;;  %v4611_v28 = vld [vmem:[%s14582_s5 + $0x68] sm:$0xff] }
 0x389   : > { %4583 = vst.msk [vmem:[%s14582_s5 + $0x88] sm:$0xff] %vm4565_vm4, %v4504_v2  ;;  %12944 = vmatprep.mubr.msk.bf16.mxu0 %vm661_vm2, %v4744_v13  ;;  %v4719_v54 = vmax.f32 %v4687_v60, 0.0  ;;  %v4650_v38 = vmul.f32 %v16077_v63, %v4611_v28  ;;  %v4688_v57 = vadd.f32 %v16085_v62, %v4649_v32 }
 0x38a   : > { %v4506_v3 = vpop.permute.xlu0 %4505  ;;  %v4612_v16 = vld [vmem:[%s14582_s5 + $0x70] sm:$0xff] }
 0x38b   : > { %4584 = vst.msk [vmem:[%s14582_s5 + $0x90] sm:$0xff] %vm4565_vm4, %v4506_v3  ;;  %v4745_v29 = vpack.c.bf16 %v4719_v54, %v4718_v17  ;;  %v4689_v43 = vadd.f32 %v16085_v62, %v4650_v38  ;;  %v4651_v12 = vmul.f32 %v16077_v63, %v4612_v16  ;;  %v4720_v22 = vmax.f32 %v4688_v57, 0.0 }
 0x38c   : > { %v4508_v36 = vpop.permute.xlu1 %4507  ;;  %v4613_v48 = vld [vmem:[%s14582_s5 + $0x78] sm:$0xff] }
 0x38d   : > { %4585 = vst.msk [vmem:[%s14582_s5 + $0x98] sm:$0xff] %vm4565_vm4, %v4508_v36  ;;  %12945 = vmatmul.mubr.msk.bf16.gmra.mrb[72].mxu0 %vm661_vm2, %v4745_v29  ;;  %v4721_v20 = vmax.f32 %v4689_v43, 0.0  ;;  %v4652_v25 = vmul.f32 %v16077_v63, %v4613_v48  ;;  %v4690_v30 = vadd.f32 %v16085_v62, %v4651_v12 }
 0x38e   : > { %v4510_v0 = vpop.permute.xlu0 %4509  ;;  %v4614_v59 = vld [vmem:[%s14582_s5 + $0x80] sm:$0xff] }
 0x38f   : > { %4586 = vst.msk [vmem:[%s14582_s5 + $0xa0] sm:$0xff] %vm4565_vm4, %v4510_v0  ;;  %v4746_v39 = vpack.c.bf16 %v4721_v20, %v4720_v22  ;;  %v4691_v8 = vadd.f32 %v16085_v62, %v4652_v25  ;;  %v4653_v15 = vmul.f32 %v16077_v63, %v4614_v59  ;;  %v4722_v9 = vmax.f32 %v4690_v30, 0.0 }
 0x390   : > { %v4512_v46 = vpop.permute.xlu1 %4511  ;;  %v4615_v4 = vld [vmem:[%s14582_s5 + $0x88] sm:$0xff] }
 0x391   : > { %4587 = vst.msk [vmem:[%s14582_s5 + $0xa8] sm:$0xff] %vm4565_vm4, %v4512_v46  ;;  %12948 = vmatprep.mubr.msk.bf16.mxu0 %vm661_vm2, %v4746_v39  ;;  %v4723_v31 = vmax.f32 %v4691_v8, 0.0  ;;  %v4654_v41 = vmul.f32 %v16077_v63, %v4615_v4  ;;  %v4692_v27 = vadd.f32 %v16085_v62, %v4653_v15 }
 0x392   : > { %v4514_v1 = vpop.permute.xlu0 %4513  ;;  %v4616_v37 = vld [vmem:[%s14582_s5 + $0x90] sm:$0xff] }
 0x393   : > { %4588 = vst.msk [vmem:[%s14582_s5 + $0xb0] sm:$0xff] %vm4565_vm4, %v4514_v1  ;;  %v4747_v50 = vpack.c.bf16 %v4723_v31, %v4722_v9  ;;  %v4693_v6 = vadd.f32 %v16085_v62, %v4654_v41  ;;  %v4655_v52 = vmul.f32 %v16077_v63, %v4616_v37  ;;  %v4724_v24 = vmax.f32 %v4692_v27, 0.0 }
 0x394   : > { %v4516_v44 = vpop.permute.xlu1 %4515  ;;  %v4617_v34 = vld [vmem:[%s14582_s5 + $0x98] sm:$0xff] }
 0x395   : > { %4589 = vst.msk [vmem:[%s14582_s5 + $0xb8] sm:$0xff] %vm4565_vm4, %v4516_v44  ;;  %12949 = vmatmul.mubr.msk.bf16.gmra.mrb[76].mxu0 %vm661_vm2, %v4747_v50  ;;  %v4725_v42 = vmax.f32 %v4693_v6, 0.0  ;;  %v4656_v5 = vmul.f32 %v16077_v63, %v4617_v34  ;;  %v4694_v47 = vadd.f32 %v16085_v62, %v4655_v52 }
 0x396   : > { %v4518_v21 = vpop.permute.xlu0 %4517  ;;  %v4618_v13 = vld [vmem:[%s14582_s5 + $0xa0] sm:$0xff] }
 0x397   : > { %4590 = vst.msk [vmem:[%s14582_s5 + $0xc0] sm:$0xff] %vm4565_vm4, %v4518_v21  ;;  %v4748_v60 = vpack.c.bf16 %v4725_v42, %v4724_v24  ;;  %v4695_v32 = vadd.f32 %v16085_v62, %v4656_v5  ;;  %v4657_v2 = vmul.f32 %v16077_v63, %v4618_v13  ;;  %v4726_v54 = vmax.f32 %v4694_v47, 0.0 }
 0x398   : > { %v4520_v28 = vpop.permute.xlu1 %4519  ;;  %v4619_v17 = vld [vmem:[%s14582_s5 + $0xa8] sm:$0xff] }
 0x399   : > { %4591 = vst.msk [vmem:[%s14582_s5 + $0xc8] sm:$0xff] %vm4565_vm4, %v4520_v28  ;;  %12952 = vmatprep.mubr.msk.bf16.mxu0 %vm661_vm2, %v4748_v60  ;;  %v4727_v38 = vmax.f32 %v4695_v32, 0.0  ;;  %v4658_v57 = vmul.f32 %v16077_v63, %v4619_v17  ;;  %v4696_v3 = vadd.f32 %v16085_v62, %v4657_v2 }
 0x39a   : > { %v4522_v16 = vpop.permute.xlu0 %4521  ;;  %v4620_v29 = vld [vmem:[%s14582_s5 + $0xb0] sm:$0xff] }
 0x39b   : > { %4592 = vst.msk [vmem:[%s14582_s5 + $0xd0] sm:$0xff] %vm4565_vm4, %v4522_v16  ;;  %v4749_v43 = vpack.c.bf16 %v4727_v38, %v4726_v54  ;;  %v4697_v12 = vadd.f32 %v16085_v62, %v4658_v57  ;;  %v4659_v36 = vmul.f32 %v16077_v63, %v4620_v29  ;;  %v4728_v20 = vmax.f32 %v4696_v3, 0.0 }
 0x39c   : > { %v4524_v48 = vpop.permute.xlu1 %4523  ;;  %v4621_v22 = vld [vmem:[%s14582_s5 + $0xb8] sm:$0xff] }
 0x39d   : > { %4593 = vst.msk [vmem:[%s14582_s5 + $0xd8] sm:$0xff] %vm4565_vm4, %v4524_v48  ;;  %12953 = vmatmul.mubr.msk.bf16.gmra.mrb[80].mxu0 %vm661_vm2, %v4749_v43  ;;  %v4729_v25 = vmax.f32 %v4697_v12, 0.0  ;;  %v4660_v30 = vmul.f32 %v16077_v63, %v4621_v22  ;;  %v4698_v0 = vadd.f32 %v16085_v62, %v4659_v36 }
 0x39e   : > { %v4526_v59 = vpop.permute.xlu0 %4525  ;;  %v4622_v39 = vld [vmem:[%s14582_s5 + $0xc0] sm:$0xff] }
 0x39f   : > { %4594 = vst.msk [vmem:[%s14582_s5 + $0xe0] sm:$0xff] %vm4565_vm4, %v4526_v59  ;;  %v4750_v8 = vpack.c.bf16 %v4729_v25, %v4728_v20  ;;  %v4699_v15 = vadd.f32 %v16085_v62, %v4660_v30  ;;  %v4661_v46 = vmul.f32 %v16077_v63, %v4622_v39  ;;  %v4730_v31 = vmax.f32 %v4698_v0, 0.0 }
 0x3a0   : > { %v4528_v4 = vpop.permute.xlu1 %4527  ;;  %v4623_v9 = vld [vmem:[%s14582_s5 + $0xc8] sm:$0xff] }
 0x3a1   : > { %4595 = vst.msk [vmem:[%s14582_s5 + $0xe8] sm:$0xff] %vm4565_vm4, %v4528_v4  ;;  %12956 = vmatprep.mubr.msk.bf16.mxu0 %vm661_vm2, %v4750_v8  ;;  %v4731_v41 = vmax.f32 %v4699_v15, 0.0  ;;  %v4662_v27 = vmul.f32 %v16077_v63, %v4623_v9  ;;  %v4700_v1 = vadd.f32 %v16085_v62, %v4661_v46  ;;  %v5192_v8 = vld [vmem:[#allocation2 + $0x8] sm:$0xff]  ;;  %v5193_v15 = vld [vmem:[#allocation2 + $0x10] sm:$0xff]  ;;  %v5191_v46 = vld [vmem:[%s18708_s14] sm:$0xf] }
 0x3a2   : > { %v4530_v37 = vpop.permute.xlu0 %4529  ;;  %v4624_v50 = vld [vmem:[%s14582_s5 + $0xd0] sm:$0xff]  ;;  %v5224_v4 = vpack.c.bf16 %v5193_v15, %v5192_v8  ;;  %14394 = vmatprep.subr.msk.bf16.mxu0 %vm1682_vm3, %v5191_v46  ;;  %v16268_v9 = vld [vmem:[%s18707_s13] ss:$0 sm:$0xff] }
 0x3a3   : > { %4596 = vst.msk [vmem:[%s14582_s5 + $0xf0] sm:$0xff] %vm4565_vm4, %v4530_v37  ;;  %v4751_v6 = vpack.c.bf16 %v4731_v41, %v4730_v31  ;;  %v4701_v52 = vadd.f32 %v16085_v62, %v4662_v27  ;;  %v4663_v44 = vmul.f32 %v16077_v63, %v4624_v50  ;;  %v4732_v42 = vmax.f32 %v4700_v1, 0.0 }
 0x3a4   : > { %v4532_v34 = vpop.permute.xlu1 %4531  ;;  %v4625_v24 = vld [vmem:[%s14582_s5 + $0xd8] sm:$0xff] }
 0x3a5   : > { %4597 = vst.msk [vmem:[%s14582_s5 + $0xf8] sm:$0xff] %vm4565_vm4, %v4532_v34  ;;  %12957 = vmatmul.mubr.msk.bf16.gmra.mrb[84].mxu0 %vm661_vm2, %v4751_v6  ;;  %v4733_v5 = vmax.f32 %v4701_v52, 0.0  ;;  %v4664_v47 = vmul.f32 %v16077_v63, %v4625_v24  ;;  %v4702_v21 = vadd.f32 %v16085_v62, %v4663_v44 }
 0x3a6   : > { %v4626_v13 = vld [vmem:[%s14582_s5 + $0xe0] sm:$0xff] }
 0x3a7   : > { %v4752_v60 = vpack.c.bf16 %v4733_v5, %v4732_v42  ;;  %v4703_v32 = vadd.f32 %v16085_v62, %v4664_v47  ;;  %v4665_v2 = vmul.f32 %v16077_v63, %v4626_v13  ;;  %v4734_v17 = vmax.f32 %v4702_v21, 0.0 }
 0x3a8   : > { %v4627_v28 = vld [vmem:[%s14582_s5 + $0xe8] sm:$0xff] }
 0x3a9   : > { %12960 = vmatprep.mubr.msk.bf16.mxu0 %vm661_vm2, %v4752_v60  ;;  %v4735_v54 = vmax.f32 %v4703_v32, 0.0  ;;  %v4666_v38 = vmul.f32 %v16077_v63, %v4627_v28  ;;  %v4704_v57 = vadd.f32 %v16085_v62, %v4665_v2 }
 0x3aa   : > { %v4628_v3 = vld [vmem:[%s14582_s5 + $0xf0] sm:$0xff] }
 0x3ab   : > { %v4753_v16 = vpack.c.bf16 %v4735_v54, %v4734_v17  ;;  %v4705_v29 = vadd.f32 %v16085_v62, %v4666_v38  ;;  %v4667_v43 = vmul.f32 %v16077_v63, %v4628_v3  ;;  %v4736_v36 = vmax.f32 %v4704_v57, 0.0 }
 0x3ac   : > { %v4629_v12 = vld [vmem:[%s14582_s5 + $0xf8] sm:$0xff] }
 0x3ad   : > { %12961 = vmatmul.mubr.msk.bf16.gmra.mrb[88].mxu0 %vm661_vm2, %v4753_v16  ;;  %v4737_v48 = vmax.f32 %v4705_v29, 0.0  ;;  %v4668_v22 = vmul.f32 %v16077_v63, %v4629_v12  ;;  %v4706_v20 = vadd.f32 %v16085_v62, %v4667_v43  ;;  %v16263_v63 = vld [vmem:[%s18706_s12] ss:$0 sm:$0xff] }
 0x3af   : > { %v4754_v25 = vpack.c.bf16 %v4737_v48, %v4736_v36  ;;  %v4707_v30 = vadd.f32 %v16085_v62, %v4668_v22  ;;  %v4738_v0 = vmax.f32 %v4706_v20, 0.0 }
 0x3b1   : > { %12964 = vmatprep.mubr.msk.bf16.mxu0 %vm661_vm2, %v4754_v25  ;;  %v4739_v59 = vmax.f32 %v4707_v30, 0.0 }
 0x3b3   : > { %v4755_v39 = vpack.c.bf16 %v4739_v59, %v4738_v0 }
 0x3b5   : > { %12965 = vmatmul.mubr.msk.bf16.gmra.mrb[92].mxu0 %vm661_vm2, %v4755_v39 }
 0x3b6   : > { %12970 = vmatprep.mubr.msk.bf16.mxu0 %vm661_vm2, %v5224_v4  ;;  %v5503_v4 = vsel %vm1682_vm3, %v5191_v46, 0 }
 0x450   : > { %v12938_v62 = vpop.f32.mrb[64].mxu0 }
 0x451   : > { %v4978_v31 = vmul.f32 %v12938_v62, %v16263_v63  ;;  %v4842_v41 = vpop.f32.mrb[65].mxu0 }
 0x452   : > { %v4976_v27 = vmul.f32 %v16263_v63, %v4842_v41  ;;  %v12939_v1 = vpop.f32.mrb[66].mxu0 }
 0x453   : > { %v5017_v37 = vadd.f32 %v16268_v9, %v4978_v31  ;;  %v4979_v50 = vmul.f32 %v12939_v1, %v16263_v63  ;;  %v4845_v6 = vpop.f32.mrb[67].mxu0 }
 0x454   : > { %v5015_v52 = vadd.f32 %v16268_v9, %v4976_v27  ;;  %v4977_v44 = vmul.f32 %v16263_v63, %v4845_v6 }
 0x455   : > { %v5049_v34 = vmax.f32 %v5017_v37, 0.0  ;;  %v5018_v24 = vadd.f32 %v16268_v9, %v4979_v50  ;;  %v16306_v37 = vld [vmem:[%s18708_s14 + $0x8] sm:$0xf] }
 0x456   : > { %v5047_v42 = vmax.f32 %v5015_v52, 0.0  ;;  %v5016_v5 = vadd.f32 %v16268_v9, %v4977_v44 }
 0x457   : > { %5081 = vst.msk [vmem:[#allocation2 + $0x28] sm:$0xff] %vm661_vm2, %v5049_v34  ;;  %v5050_v47 = vmax.f32 %v5018_v24, 0.0 }
 0x458   : > { %5079 = vst.msk [vmem:[#allocation2 + $0x18] sm:$0xff] %vm661_vm2, %v5047_v42  ;;  %v5048_v21 = vmax.f32 %v5016_v5, 0.0  ;;  %v12942_v13 = vpop.f32.mrb[68].mxu0 }
 0x459   : > { %5082 = vst.msk [vmem:[#allocation2 + $0x30] sm:$0xff] %vm661_vm2, %v5050_v47  ;;  %v4982_v60 = vmul.f32 %v12942_v13, %v16263_v63  ;;  %v4858_v32 = vpop.f32.mrb[69].mxu0 }
 0x45a   : > { %5080 = vst.msk [vmem:[#allocation2 + $0x20] sm:$0xff] %vm661_vm2, %v5048_v21  ;;  %v4980_v2 = vmul.f32 %v16263_v63, %v4858_v32  ;;  %v12943_v28 = vpop.f32.mrb[70].mxu0 }
 0x45b   : > { %v5021_v17 = vadd.f32 %v16268_v9, %v4982_v60  ;;  %v4983_v54 = vmul.f32 %v12943_v28, %v16263_v63  ;;  %v4861_v38 = vpop.f32.mrb[71].mxu0 }
 0x45c   : > { %v5019_v57 = vadd.f32 %v16268_v9, %v4980_v2  ;;  %v4981_v3 = vmul.f32 %v16263_v63, %v4861_v38 }
 0x45d   : > { %v5053_v16 = vmax.f32 %v5021_v17, 0.0  ;;  %v5022_v29 = vadd.f32 %v16268_v9, %v4983_v54 }
 0x45e   : > { %v5051_v43 = vmax.f32 %v5019_v57, 0.0  ;;  %v5020_v12 = vadd.f32 %v16268_v9, %v4981_v3  ;;  %v5196_v62 = vld [vmem:[#allocation2 + $0x28] sm:$0xff] }
 0x45f   : > { %5085 = vst.msk [vmem:[#allocation2 + $0x48] sm:$0xff] %vm661_vm2, %v5053_v16  ;;  %v5054_v36 = vmax.f32 %v5022_v29, 0.0  ;;  %v5194_v0 = vld [vmem:[#allocation2 + $0x18] sm:$0xff] }
 0x460   : > { %5083 = vst.msk [vmem:[#allocation2 + $0x38] sm:$0xff] %vm661_vm2, %v5051_v43  ;;  %v5052_v48 = vmax.f32 %v5020_v12, 0.0  ;;  %v12946_v22 = vpop.f32.mrb[72].mxu0  ;;  %v5197_v20 = vld [vmem:[#allocation2 + $0x30] sm:$0xff] }
 0x461   : > { %5086 = vst.msk [vmem:[#allocation2 + $0x50] sm:$0xff] %vm661_vm2, %v5054_v36  ;;  %v4986_v25 = vmul.f32 %v12946_v22, %v16263_v63  ;;  %v4874_v30 = vpop.f32.mrb[73].mxu0  ;;  %v5195_v59 = vld [vmem:[#allocation2 + $0x20] sm:$0xff]  ;;  %v16301_v1 = vpack.c.bf16 %v5197_v20, %v5196_v62 }
 0x462   : > { %5084 = vst.msk [vmem:[#allocation2 + $0x40] sm:$0xff] %vm661_vm2, %v5052_v48  ;;  %v4984_v39 = vmul.f32 %v16263_v63, %v4874_v30  ;;  %v12947_v8 = vpop.f32.mrb[74].mxu0  ;;  %v16296_v15 = vpack.c.bf16 %v5195_v59, %v5194_v0 }
 0x463   : > { %v5025_v31 = vadd.f32 %v16268_v9, %v4986_v25  ;;  %v4987_v41 = vmul.f32 %v12947_v8, %v16263_v63  ;;  %v4877_v27 = vpop.f32.mrb[75].mxu0  ;;  %19467 = vst [vmem:[#allocation40_spill] sm:$0xff] %v16301_v1 }
 0x464   : > { %19466 = vst [vmem:[#allocation53_spill] sm:$0xff] %v16296_v15  ;;  %v5023_v50 = vadd.f32 %v16268_v9, %v4984_v39  ;;  %v4985_v6 = vmul.f32 %v16263_v63, %v4877_v27  ;;  %12971 = vmatmul.mubr.msk.bf16.vlgmr.msra.gmra.mrb[96].mxu0 %vm661_vm2, %v16296_v15  ;;  %v19498_v15 = vld [vmem:[#allocation106_spill] sm:$0xff] }
 0x465   : > { %v5057_v46 = vmax.f32 %v5025_v31, 0.0  ;;  %v5026_v52 = vadd.f32 %v16268_v9, %v4987_v41  ;;  %13003 = vmatpush3.bf16.msra.mxu0 %v5503_v4  ;;  %12974 = vmatprep.mubr.msk.bf16.mxu0 %vm661_vm2, %v16301_v1 }
 0x466   : > { %v5055_v44 = vmax.f32 %v5023_v50, 0.0  ;;  %v5024_v34 = vadd.f32 %v16268_v9, %v4985_v6  ;;  %14395 = vmatprep.subr.msk.bf16.mxu0 %vm1682_vm3, %v16306_v37  ;;  %v5200_v54 = vld [vmem:[#allocation2 + $0x48] sm:$0xff] }
 0x467   : > { %5089 = vst.msk [vmem:[#allocation2 + $0x68] sm:$0xff] %vm661_vm2, %v5057_v46  ;;  %v5058_v24 = vmax.f32 %v5026_v52, 0.0  ;;  %v5198_v60 = vld [vmem:[#allocation2 + $0x38] sm:$0xff] }
 0x468   : > { %5087 = vst.msk [vmem:[#allocation2 + $0x58] sm:$0xff] %vm661_vm2, %v5055_v44  ;;  %v5056_v42 = vmax.f32 %v5024_v34, 0.0  ;;  %v12950_v5 = vpop.f32.mrb[76].mxu0  ;;  %v5201_v47 = vld [vmem:[#allocation2 + $0x50] sm:$0xff] }
 0x469   : > { %5090 = vst.msk [vmem:[#allocation2 + $0x70] sm:$0xff] %vm661_vm2, %v5058_v24  ;;  %v4990_v21 = vmul.f32 %v12950_v5, %v16263_v63  ;;  %v4890_v13 = vpop.f32.mrb[77].mxu0  ;;  %v5199_v32 = vld [vmem:[#allocation2 + $0x40] sm:$0xff]  ;;  %v16328_v16 = vpack.c.bf16 %v5201_v47, %v5200_v54 }
 0x46a   : > { %5088 = vst.msk [vmem:[#allocation2 + $0x60] sm:$0xff] %vm661_vm2, %v5056_v42  ;;  %v4988_v2 = vmul.f32 %v16263_v63, %v4890_v13  ;;  %v12951_v28 = vpop.f32.mrb[78].mxu0  ;;  %v16324_v17 = vpack.c.bf16 %v5199_v32, %v5198_v60 }
 0x46b   : > { %v5029_v38 = vadd.f32 %v16268_v9, %v4990_v21  ;;  %v4991_v57 = vmul.f32 %v12951_v28, %v16263_v63  ;;  %v4893_v3 = vpop.f32.mrb[79].mxu0  ;;  %19469 = vst [vmem:[#allocation57_spill] sm:$0xff] %v16328_v16 }
 0x46c   : > { %19468 = vst [vmem:[#allocation39_spill] sm:$0xff] %v16324_v17  ;;  %v5027_v29 = vadd.f32 %v16268_v9, %v4988_v2  ;;  %v4989_v43 = vmul.f32 %v16263_v63, %v4893_v3  ;;  %12975 = vmatmul.mubr.msk.bf16.gmra.mrb[100].mxu0 %vm661_vm2, %v16324_v17  ;;  %v19497_v17 = vld [vmem:[#allocation102_spill] sm:$0xff] }
 0x46d   : > { %v5061_v12 = vmax.f32 %v5029_v38, 0.0  ;;  %v5030_v36 = vadd.f32 %v16268_v9, %v4991_v57  ;;  %12978 = vmatprep.mubr.msk.bf16.mxu0 %vm661_vm2, %v16328_v16 }
 0x46e   : > { %v5059_v48 = vmax.f32 %v5027_v29, 0.0  ;;  %v5028_v22 = vadd.f32 %v16268_v9, %v4989_v43  ;;  %v5204_v27 = vld [vmem:[#allocation2 + $0x68] sm:$0xff] }
 0x46f   : > { %5093 = vst.msk [vmem:[#allocation2 + $0x88] sm:$0xff] %vm661_vm2, %v5061_v12  ;;  %v5062_v20 = vmax.f32 %v5030_v36, 0.0  ;;  %v5202_v8 = vld [vmem:[#allocation2 + $0x58] sm:$0xff] }
 0x470   : > { %5091 = vst.msk [vmem:[#allocation2 + $0x78] sm:$0xff] %vm661_vm2, %v5059_v48  ;;  %v5060_v25 = vmax.f32 %v5028_v22, 0.0  ;;  %v12954_v30 = vpop.f32.mrb[80].mxu0  ;;  %v5205_v0 = vld [vmem:[#allocation2 + $0x70] sm:$0xff] }
 0x471   : > { %5094 = vst.msk [vmem:[#allocation2 + $0x90] sm:$0xff] %vm661_vm2, %v5062_v20  ;;  %v4994_v59 = vmul.f32 %v12954_v30, %v16263_v63  ;;  %v4906_v39 = vpop.f32.mrb[81].mxu0  ;;  %v5203_v4 = vld [vmem:[#allocation2 + $0x60] sm:$0xff]  ;;  %v16348_v52 = vpack.c.bf16 %v5205_v0, %v5204_v27 }
 0x472   : > { %5092 = vst.msk [vmem:[#allocation2 + $0x80] sm:$0xff] %vm661_vm2, %v5060_v25  ;;  %v4992_v62 = vmul.f32 %v16263_v63, %v4906_v39  ;;  %v12955_v31 = vpop.f32.mrb[82].mxu0  ;;  %v16344_v41 = vpack.c.bf16 %v5203_v4, %v5202_v8 }
 0x473   : > { %v5033_v50 = vadd.f32 %v16268_v9, %v4994_v59  ;;  %v4995_v6 = vmul.f32 %v12955_v31, %v16263_v63  ;;  %v4909_v46 = vpop.f32.mrb[83].mxu0  ;;  %19471 = vst [vmem:[#allocation55_spill] sm:$0xff] %v16348_v52 }
 0x474   : > { %19470 = vst [vmem:[#allocation60_spill] sm:$0xff] %v16344_v41  ;;  %v5031_v44 = vadd.f32 %v16268_v9, %v4992_v62  ;;  %v4993_v34 = vmul.f32 %v16263_v63, %v4909_v46  ;;  %12979 = vmatmul.mubr.msk.bf16.gmra.mrb[104].mxu0 %vm661_vm2, %v16344_v41 }
 0x475   : > { %v5065_v24 = vmax.f32 %v5033_v50, 0.0  ;;  %v5034_v42 = vadd.f32 %v16268_v9, %v4995_v6  ;;  %12982 = vmatprep.mubr.msk.bf16.mxu0 %vm661_vm2, %v16348_v52 }
 0x476   : > { %v5063_v5 = vmax.f32 %v5031_v44, 0.0  ;;  %v5032_v47 = vadd.f32 %v16268_v9, %v4993_v34  ;;  %v5208_v43 = vld [vmem:[#allocation2 + $0x88] sm:$0xff] }
 0x477   : > { %5097 = vst.msk [vmem:[#allocation2 + $0xa8] sm:$0xff] %vm661_vm2, %v5065_v24  ;;  %v5066_v21 = vmax.f32 %v5034_v42, 0.0  ;;  %v5206_v54 = vld [vmem:[#allocation2 + $0x78] sm:$0xff] }
 0x478   : > { %5095 = vst.msk [vmem:[#allocation2 + $0x98] sm:$0xff] %vm661_vm2, %v5063_v5  ;;  %v5064_v13 = vmax.f32 %v5032_v47, 0.0  ;;  %v12958_v60 = vpop.f32.mrb[84].mxu0  ;;  %v5209_v32 = vld [vmem:[#allocation2 + $0x90] sm:$0xff] }
 0x479   : > { %5098 = vst.msk [vmem:[#allocation2 + $0xb0] sm:$0xff] %vm661_vm2, %v5066_v21  ;;  %v4998_v2 = vmul.f32 %v12958_v60, %v16263_v63  ;;  %v4922_v28 = vpop.f32.mrb[85].mxu0  ;;  %v5207_v38 = vld [vmem:[#allocation2 + $0x80] sm:$0xff]  ;;  %v16368_v22 = vpack.c.bf16 %v5209_v32, %v5208_v43 }
 0x47a   : > { %5096 = vst.msk [vmem:[#allocation2 + $0xa0] sm:$0xff] %vm661_vm2, %v5064_v13  ;;  %v4996_v57 = vmul.f32 %v16263_v63, %v4922_v28  ;;  %v12959_v3 = vpop.f32.mrb[86].mxu0  ;;  %v16364_v29 = vpack.c.bf16 %v5207_v38, %v5206_v54 }
 0x47b   : > { %v5037_v12 = vadd.f32 %v16268_v9, %v4998_v2  ;;  %v4999_v36 = vmul.f32 %v12959_v3, %v16263_v63  ;;  %v4925_v48 = vpop.f32.mrb[87].mxu0  ;;  %19473 = vst [vmem:[#allocation62_spill] sm:$0xff] %v16368_v22 }
 0x47c   : > { %19472 = vst [vmem:[#allocation56_spill] sm:$0xff] %v16364_v29  ;;  %v5035_v20 = vadd.f32 %v16268_v9, %v4996_v57  ;;  %v4997_v25 = vmul.f32 %v16263_v63, %v4925_v48  ;;  %12983 = vmatmul.mubr.msk.bf16.gmra.mrb[108].mxu0 %vm661_vm2, %v16364_v29 }
 0x47d   : > { %v5069_v30 = vmax.f32 %v5037_v12, 0.0  ;;  %v5038_v0 = vadd.f32 %v16268_v9, %v4999_v36  ;;  %12986 = vmatprep.mubr.msk.bf16.mxu0 %vm661_vm2, %v16368_v22 }
 0x47e   : > { %v5067_v59 = vmax.f32 %v5035_v20, 0.0  ;;  %v5036_v39 = vadd.f32 %v16268_v9, %v4997_v25  ;;  %v5212_v42 = vld [vmem:[#allocation2 + $0xa8] sm:$0xff] }
 0x47f   : > { %5101 = vst.msk [vmem:[#allocation2 + $0xc8] sm:$0xff] %vm661_vm2, %v5069_v30  ;;  %v5070_v8 = vmax.f32 %v5038_v0, 0.0  ;;  %v5210_v6 = vld [vmem:[#allocation2 + $0x98] sm:$0xff] }
 0x480   : > { %5099 = vst.msk [vmem:[#allocation2 + $0xb8] sm:$0xff] %vm661_vm2, %v5067_v59  ;;  %v5068_v4 = vmax.f32 %v5036_v39, 0.0  ;;  %v12962_v62 = vpop.f32.mrb[88].mxu0  ;;  %v5213_v31 = vld [vmem:[#allocation2 + $0xb0] sm:$0xff] }
 0x481   : > { %5102 = vst.msk [vmem:[#allocation2 + $0xd0] sm:$0xff] %vm661_vm2, %v5070_v8  ;;  %v5002_v27 = vmul.f32 %v12962_v62, %v16263_v63  ;;  %v4938_v50 = vpop.f32.mrb[89].mxu0  ;;  %v5211_v46 = vld [vmem:[#allocation2 + $0xa0] sm:$0xff]  ;;  %v16388_v13 = vpack.c.bf16 %v5213_v31, %v5212_v42 }
 0x482   : > { %5100 = vst.msk [vmem:[#allocation2 + $0xc0] sm:$0xff] %vm661_vm2, %v5068_v4  ;;  %v5000_v44 = vmul.f32 %v16263_v63, %v4938_v50  ;;  %v12963_v34 = vpop.f32.mrb[90].mxu0  ;;  %v16384_v24 = vpack.c.bf16 %v5211_v46, %v5210_v6 }
 0x483   : > { %v5041_v5 = vadd.f32 %v16268_v9, %v5002_v27  ;;  %v5003_v47 = vmul.f32 %v12963_v34, %v16263_v63  ;;  %v4941_v21 = vpop.f32.mrb[91].mxu0  ;;  %19475 = vst [vmem:[#allocation41_spill] sm:$0xff] %v16388_v13 }
 0x484   : > { %19474 = vst [vmem:[#allocation68_spill] sm:$0xff] %v16384_v24  ;;  %v5039_v60 = vadd.f32 %v16268_v9, %v5000_v44  ;;  %v5001_v32 = vmul.f32 %v16263_v63, %v4941_v21  ;;  %12987 = vmatmul.mubr.msk.bf16.gmra.mrb[112].mxu0 %vm661_vm2, %v16384_v24  ;;  %v19490_v24 = vld [vmem:[#allocation96_spill] sm:$0xff] }
 0x485   : > { %v5073_v2 = vmax.f32 %v5041_v5, 0.0  ;;  %v5042_v28 = vadd.f32 %v16268_v9, %v5003_v47  ;;  %12990 = vmatprep.mubr.msk.bf16.mxu0 %vm661_vm2, %v16388_v13 }
 0x486   : > { %v5071_v54 = vmax.f32 %v5039_v60, 0.0  ;;  %v5040_v38 = vadd.f32 %v16268_v9, %v5001_v32  ;;  %v5216_v39 = vld [vmem:[#allocation2 + $0xc8] sm:$0xff] }
 0x487   : > { %5105 = vst.msk [vmem:[#allocation2 + $0xe8] sm:$0xff] %vm661_vm2, %v5073_v2  ;;  %v5074_v57 = vmax.f32 %v5042_v28, 0.0  ;;  %v5214_v20 = vld [vmem:[#allocation2 + $0xb8] sm:$0xff]  ;;  %v5112_v28 = vld [vmem:[#allocation2 + $0xf] sm:$0xff] }
 0x488   : > { %5103 = vst.msk [vmem:[#allocation2 + $0xd8] sm:$0xff] %vm661_vm2, %v5071_v54  ;;  %v5072_v3 = vmax.f32 %v5040_v38, 0.0  ;;  %v12966_v43 = vpop.f32.mrb[92].mxu0  ;;  %v5217_v12 = vld [vmem:[#allocation2 + $0xd0] sm:$0xff]  ;;  %v5144_v38 = vmul.f32 %v5112_v28, %v19318_v49 }
 0x489   : > { %5106 = vst.msk [vmem:[#allocation2 + $0xf0] sm:$0xff] %vm661_vm2, %v5074_v57  ;;  %v5006_v36 = vmul.f32 %v12966_v43, %v16263_v63  ;;  %v4954_v48 = vpop.f32.mrb[93].mxu0  ;;  %v5215_v25 = vld [vmem:[#allocation2 + $0xc0] sm:$0xff]  ;;  %v16408_v31 = vpack.c.bf16 %v5217_v12, %v5216_v39  ;;  %v16485_v28 = vld [vmem:[#allocation2 + $0x6f] sm:$0xff] }
 0x48a   : > { %5104 = vst.msk [vmem:[#allocation2 + $0xe0] sm:$0xff] %vm661_vm2, %v5072_v3  ;;  %v5004_v30 = vmul.f32 %v16263_v63, %v4954_v48  ;;  %v12967_v0 = vpop.f32.mrb[94].mxu0  ;;  %v16404_v59 = vpack.c.bf16 %v5215_v25, %v5214_v20  ;;  %v16438_v48 = vld [vmem:[#allocation2 + $0x27] sm:$0xff]  ;;  %v16440_v20 = vld [vmem:[#allocation2 + $0x2f] sm:$0xff]  ;;  %v16443_v25 = vld [vmem:[#allocation2 + $0x17] sm:$0xff] }
 0x48b   : > { %v5045_v8 = vadd.f32 %v16268_v9, %v5006_v36  ;;  %v5007_v4 = vmul.f32 %v12967_v0, %v16263_v63  ;;  %v4957_v62 = vpop.f32.mrb[95].mxu0  ;;  %19477 = vst [vmem:[#allocation65_spill] sm:$0xff] %v16408_v31  ;;  %v16434_v36 = vld [vmem:[#allocation2 + $0x1f] sm:$0xff]  ;;  %v5147_v0 = vmul.f32 %v16438_v48, %v19323_v23  ;;  %v5148_v39 = vmul.f32 %v16440_v20, %v19324_v51 }
 0x48c   : > { %19476 = vst [vmem:[#allocation43_spill] sm:$0xff] %v16404_v59  ;;  %v5043_v27 = vadd.f32 %v16268_v9, %v5004_v30  ;;  %v5005_v50 = vmul.f32 %v16263_v63, %v4957_v62  ;;  %12991 = vmatmul.mubr.msk.bf16.gmra.mrb[116].mxu0 %vm661_vm2, %v16404_v59  ;;  %v5146_v30 = vmul.f32 %v16434_v36, %v19322_v26  ;;  %v5797_v62 = vsel %vm1682_vm3, %v16306_v37, 0  ;;  %v19489_v59 = vld [vmem:[#allocation86_spill] sm:$0xff] }
 0x48d   : > { %v5077_v6 = vmax.f32 %v5045_v8, 0.0  ;;  %v5046_v46 = vadd.f32 %v16268_v9, %v5007_v4  ;;  %12994 = vmatprep.mubr.msk.bf16.mxu0 %vm661_vm2, %v16408_v31  ;;  %v5145_v8 = vmul.f32 %v16443_v25, %v19326_v40  ;;  %v16542_v31 = vld [vmem:[#allocation2 + $0xb7] sm:$0xff] }
 0x48e   : > { %v5075_v44 = vmax.f32 %v5043_v27, 0.0  ;;  %v5044_v34 = vadd.f32 %v16268_v9, %v5005_v50  ;;  %v5220_v32 = vld [vmem:[#allocation2 + $0xe8] sm:$0xff]  ;;  %v5177_v27 = vpack.c.bf16 %v5148_v39, %v5147_v0  ;;  %v16455_v50 = vld [vmem:[#allocation2 + $0x3f] sm:$0xff]  ;;  %19488 = vst [vmem:[#allocation111_spill] sm:$0xff] %v16542_v31 }
 0x48f   : > { %5109 = vst.msk [vmem:[#allocation2 + $0x108] sm:$0xff] %vm661_vm2, %v5077_v6  ;;  %v5078_v42 = vmax.f32 %v5046_v46, 0.0  ;;  %v5218_v63 = vld [vmem:[#allocation2 + $0xd8] sm:$0xff]  ;;  %v5111_v9 = vld [vmem:[#allocation2 + $0x7] sm:$0xff]  ;;  %v5176_v4 = vpack.c.bf16 %v5146_v30, %v5145_v8  ;;  %v5150_v37 = vmul.f32 %v16455_v50, %v19333_v58 }
 0x490   : > { %5107 = vst.msk [vmem:[#allocation2 + $0xf8] sm:$0xff] %vm661_vm2, %v5075_v44  ;;  %v5076_v5 = vmax.f32 %v5044_v34, 0.0  ;;  %v5221_v47 = vld [vmem:[#allocation2 + $0xf0] sm:$0xff]  ;;  %v5143_v54 = vmul.f32 %v5111_v9, %v15220_v35  ;;  %v16460_v6 = vld [vmem:[%s18708_s14 + $0xc] sm:$0xf]  ;;  %v16498_v39 = vld [vmem:[#allocation2 + $0x7f] sm:$0xff] }
 0x491   : > { %5110 = vst.msk [vmem:[#allocation2 + $0x110] sm:$0xff] %vm661_vm2, %v5078_v42  ;;  %v5219_v21 = vld [vmem:[#allocation2 + $0xe0] sm:$0xff]  ;;  %v16424_v2 = vpack.c.bf16 %v5221_v47, %v5220_v32  ;;  %v16465_v44 = vld [vmem:[#allocation2 + $0x4f] sm:$0xff]  ;;  %v16468_v34 = vld [vmem:[#allocation2 + $0x37] sm:$0xff] }
 0x492   : > { %5108 = vst.msk [vmem:[#allocation2 + $0x100] sm:$0xff] %vm661_vm2, %v5076_v5  ;;  %v16422_v60 = vpack.c.bf16 %v5219_v21, %v5218_v63  ;;  %v5175_v12 = vpack.c.bf16 %v5144_v38, %v5143_v54  ;;  %v16463_v46 = vld [vmem:[#allocation2 + $0x47] sm:$0xff]  ;;  %v5152_v5 = vmul.f32 %v16465_v44, %v19336_v7  ;;  %v5149_v47 = vmul.f32 %v16468_v34, %v19339_v56  ;;  %v16480_v32 = vld [vmem:[#allocation2 + $0x5f] sm:$0xff]  ;;  %v16488_v54 = vld [vmem:[#allocation2 + $0x57] sm:$0xff] }
 0x493   : > { %19479 = vst [vmem:[#allocation63_spill] sm:$0xff] %v16424_v2  ;;  %v5151_v42 = vmul.f32 %v16463_v46, %v19400_v61  ;;  %v16483_v9 = vld [vmem:[#allocation2 + $0x67] sm:$0xff]  ;;  %v5154_v38 = vmul.f32 %v16480_v32, %v19344_v10  ;;  %v16552_v52 = vld [vmem:[#allocation2 + $0xdf] sm:$0xff]  ;;  %v16557_v41 = vld [vmem:[#allocation2 + $0xef] sm:$0xff] }
 0x494   : > { %19478 = vst [vmem:[#allocation42_spill] sm:$0xff] %v16422_v60  ;;  %12995 = vmatmul.mubr.msk.bf16.gmra.mrb[120].mxu0 %vm661_vm2, %v16422_v60  ;;  %v5178_v63 = vpack.c.bf16 %v5150_v37, %v5149_v47  ;;  %v16501_v8 = vld [vmem:[#allocation2 + $0x87] sm:$0xff]  ;;  %v16539_v60 = vld [vmem:[#allocation2 + $0xcf] sm:$0xff]  ;;  %19493 = vst [vmem:[#allocation112_spill] sm:$0xff] %v16552_v52  ;;  %v5170_v1 = vmul.f32 %v16552_v52, %v19497_v17 }
 0x495   : > { %12998 = vmatprep.mubr.msk.bf16.mxu0 %vm661_vm2, %v16424_v2  ;;  %v5179_v21 = vpack.c.bf16 %v5152_v5, %v5151_v42  ;;  %v5159_v37 = vmul.f32 %v16501_v8, %v19406_v19  ;;  %v16534_v2 = vld [vmem:[#allocation2 + $0xbf] sm:$0xff]  ;;  %19487 = vst [vmem:[#allocation110_spill] sm:$0xff] %v16539_v60  ;;  %19495 = vst [vmem:[#allocation54_spill] sm:$0xff] %v16557_v41  ;;  %v16560_v16 = vld [vmem:[#allocation2 + $0xd7] sm:$0xff] }
 0x496   : > { %19485 = vst [vmem:[#allocation50_spill] sm:$0xff] %v16534_v2  ;;  %v5166_v13 = vmul.f32 %v16534_v2, %v19489_v59  ;;  %19496 = vst [vmem:[#allocation52_spill] sm:$0xff] %v16560_v16  ;;  %v19503_v17 = vld [vmem:[#allocation114_spill] sm:$0xff] }
 0x497   : > { %v5222_v57 = vld [vmem:[#allocation2 + $0xf8] sm:$0xff]  ;;  %v19504_v52 = vld [vmem:[#allocation6_spill] sm:$0xff] }
 0x498   : > { %v16574_v59 = vld [vmem:[#allocation2 + $0xf7] sm:$0xff] }
 0x499   : > { %v5223_v3 = vld [vmem:[#allocation2 + $0x100] sm:$0xff]  ;;  %19502 = vst [vmem:[#allocation72_spill] sm:$0xff] %v16574_v59 }
 0x49a   : > { %v16432_v43 = vpack.c.bf16 %v5223_v3, %v5222_v57  ;;  %v5155_v57 = vmul.f32 %v16483_v9, %v19403_v53  ;;  %v5156_v3 = vmul.f32 %v16485_v28, %v19346_v11 }
 0x49c   : > { %19480 = vst [vmem:[#allocation64_spill] sm:$0xff] %v16432_v43  ;;  %12999 = vmatmul.mubr.msk.bf16.gmra.mrb[124].mxu0 %vm661_vm2, %v16432_v43  ;;  %v5181_v0 = vpack.c.bf16 %v5156_v3, %v5155_v57  ;;  %v16521_v57 = vld [vmem:[#allocation2 + $0xaf] sm:$0xff]  ;;  %v16524_v3 = vld [vmem:[#allocation2 + $0x97] sm:$0xff] }
 0x49d   : > { %13004 = vmatprep.mubr.msk.bf16.mxu0 %vm661_vm2, %v5175_v12  ;;  %v5153_v12 = vmul.f32 %v16488_v54, %v19349_v33  ;;  %19481 = vst [vmem:[#allocation47_spill] sm:$0xff] %v16524_v3 }
 0x49f   : > { %v5180_v30 = vpack.c.bf16 %v5154_v38, %v5153_v12  ;;  %v16519_v38 = vld [vmem:[#allocation2 + $0xa7] sm:$0xff] }
 0x4a4   : > { %13005 = vmatmul.mubr.msk.bf16.vlgmr.msra.gmra.mrb[96].mxu0 %vm661_vm2, %v5176_v4  ;;  %v16503_v4 = vld [vmem:[#allocation2 + $0x8f] sm:$0xff] }
 0x4a5   : > { %13037 = vmatpush3.bf16.msra.mxu0 %v5797_v62  ;;  %13008 = vmatprep.mubr.msk.bf16.mxu0 %vm661_vm2, %v5177_v27  ;;  %v16506_v62 = vld [vmem:[#allocation2 + $0x77] sm:$0xff]  ;;  %v5158_v27 = vmul.f32 %v16498_v39, %v19354_v55  ;;  %v5160_v42 = vmul.f32 %v16503_v4, %v19357_v45 }
 0x4a6   : > { %14396 = vmatprep.subr.msk.bf16.mxu0 %vm1682_vm3, %v16460_v6  ;;  %v5157_v5 = vmul.f32 %v16506_v62, %v19361_v18 }
 0x4a8   : > { %v5182_v47 = vpack.c.bf16 %v5158_v27, %v5157_v5  ;;  %v19483_v27 = vld [vmem:[#allocation78_spill] sm:$0xff] }
 0x4ac   : > { %13009 = vmatmul.mubr.msk.bf16.gmra.mrb[100].mxu0 %vm661_vm2, %v5178_v63  ;;  %v5183_v63 = vpack.c.bf16 %v5160_v42, %v5159_v37  ;;  %v5164_v37 = vmul.f32 %v16521_v57, %v19483_v27  ;;  %v19484_v42 = vld [vmem:[#allocation76_spill] sm:$0xff] }
 0x4ad   : > { %13012 = vmatprep.mubr.msk.bf16.mxu0 %vm661_vm2, %v5179_v21  ;;  %v16516_v21 = vld [vmem:[#allocation2 + $0x9f] sm:$0xff]  ;;  %v5161_v5 = vmul.f32 %v16524_v3, %v19484_v42 }
 0x4ae   : > { %v5162_v12 = vmul.f32 %v16516_v21, %v19366_v14 }
 0x4b4   : > { %13013 = vmatmul.mubr.msk.bf16.gmra.mrb[104].mxu0 %vm661_vm2, %v5180_v30  ;;  %v19482_v30 = vld [vmem:[#allocation79_spill] sm:$0xff] }
 0x4b5   : > { %13016 = vmatprep.mubr.msk.bf16.mxu0 %vm661_vm2, %v5181_v0  ;;  %v5163_v0 = vmul.f32 %v16519_v38, %v19482_v30 }
 0x4b7   : > { %v5185_v43 = vpack.c.bf16 %v5164_v37, %v5163_v0  ;;  %v19492_v37 = vld [vmem:[#allocation87_spill] sm:$0xff] }
 0x4bc   : > { %13017 = vmatmul.mubr.msk.bf16.gmra.mrb[108].mxu0 %vm661_vm2, %v5182_v47  ;;  %v5184_v47 = vpack.c.bf16 %v5162_v12, %v5161_v5  ;;  %v19491_v12 = vld [vmem:[#allocation95_spill] sm:$0xff]  ;;  %v5165_v5 = vmul.f32 %v16542_v31, %v19492_v37 }
 0x4bd   : > { %13020 = vmatprep.mubr.msk.bf16.mxu0 %vm661_vm2, %v5183_v63  ;;  %v16537_v63 = vld [vmem:[#allocation2 + $0xc7] sm:$0xff]  ;;  %v5168_v0 = vmul.f32 %v16539_v60, %v19491_v12  ;;  %v16570_v60 = vld [vmem:[#allocation2 + $0xff] sm:$0xff] }
 0x4be   : > { %19486 = vst [vmem:[#allocation91_spill] sm:$0xff] %v16537_v63  ;;  %v5167_v22 = vmul.f32 %v16537_v63, %v19490_v24  ;;  %19501 = vst [vmem:[#allocation61_spill] sm:$0xff] %v16570_v60 }
 0x4c0   : > { %v5187_v29 = vpack.c.bf16 %v5168_v0, %v5167_v22  ;;  %v19500_v0 = vld [vmem:[#allocation103_spill] sm:$0xff] }
 0x4c4   : > { %13021 = vmatmul.mubr.msk.bf16.gmra.mrb[112].mxu0 %vm661_vm2, %v5184_v47  ;;  %v5186_v47 = vpack.c.bf16 %v5166_v13, %v5165_v5  ;;  %v19499_v13 = vld [vmem:[#allocation105_spill] sm:$0xff]  ;;  %v5169_v5 = vmul.f32 %v16560_v16, %v19500_v0 }
 0x4c5   : > { %13024 = vmatprep.mubr.msk.bf16.mxu0 %vm661_vm2, %v5185_v43  ;;  %v16555_v43 = vld [vmem:[#allocation2 + $0xe7] sm:$0xff]  ;;  %v5172_v22 = vmul.f32 %v16557_v41, %v19499_v13  ;;  %v16582_v16 = vld [vmem:[#allocation2 + $0x19] sm:$0xff] }
 0x4c6   : > { %19494 = vst [vmem:[#allocation49_spill] sm:$0xff] %v16555_v43  ;;  %v5171_v24 = vmul.f32 %v16555_v43, %v19498_v15  ;;  %v5174_v15 = vmul.f32 %v16570_v60, %v19503_v17  ;;  %v5666_v43 = vld [vmem:[#allocation2 + $0x9] sm:$0xff]  ;;  %19507 = vst [vmem:[#allocation44_spill] sm:$0xff] %v16582_v16  ;;  %v16604_v60 = vld [vmem:[#allocation2 + $0x41] sm:$0xff] }
 0x4c7   : > { %v19505_v41 = vld [vmem:[#allocation118_spill] sm:$0xff]  ;;  %v19510_v17 = vld [vmem:[#allocation3_spill] sm:$0xff]  ;;  %19516 = vst [vmem:[#allocation81_spill] sm:$0xff] %v16604_v60 }
 0x4c8   : > { %v5189_v12 = vpack.c.bf16 %v5172_v22, %v5171_v24  ;;  %v5173_v0 = vmul.f32 %v16574_v59, %v19505_v41  ;;  %v16594_v59 = vld [vmem:[#allocation2 + $0x29] sm:$0xff] }
 0x4c9   : > { %19512 = vst [vmem:[#allocation51_spill] sm:$0xff] %v16594_v59 }
 0x4ca   : > { %v5190_v22 = vpack.c.bf16 %v5174_v15, %v5173_v0  ;;  %v19513_v15 = vld [vmem:[#allocation7_spill] sm:$0xff] }
 0x4cc   : > { %13025 = vmatmul.mubr.msk.bf16.gmra.mrb[116].mxu0 %vm661_vm2, %v5186_v47  ;;  %v5188_v47 = vpack.c.bf16 %v5170_v1, %v5169_v5  ;;  %v19506_v1 = vld [vmem:[#allocation4_spill] sm:$0xff] }
 0x4cd   : > { %13028 = vmatprep.mubr.msk.bf16.mxu0 %vm661_vm2, %v5187_v29  ;;  %v5667_v29 = vld [vmem:[#allocation2 + $0x11] sm:$0xff]  ;;  %v5698_v24 = vmul.f32 %v5666_v43, %v19506_v1 }
 0x4ce   : > { %v5699_v13 = vmul.f32 %v5667_v29, %v19504_v52  ;;  %v5700_v29 = vmul.f32 %v16582_v16, %v19510_v17  ;;  %v19511_v52 = vld [vmem:[#allocation5_spill] sm:$0xff]  ;;  %v16609_v17 = vld [vmem:[%s18708_s14 + $0x10] sm:$0xf] }
 0x4cf   : > { %v16647_v16 = vld [vmem:[#allocation2 + $0x81] sm:$0xff] }
 0x4d0   : > { %v5730_v5 = vpack.c.bf16 %v5699_v13, %v5698_v24  ;;  %v19514_v13 = vld [vmem:[#allocation8_spill] sm:$0xff]  ;;  %19532 = vst [vmem:[#allocation115_spill] sm:$0xff] %v16647_v16 }
 0x4d1   : > { %v5702_v0 = vmul.f32 %v16594_v59, %v19514_v13  ;;  %v19521_v59 = vld [vmem:[#allocation11_spill] sm:$0xff] }
 0x4d4   : > { %13029 = vmatmul.mubr.msk.bf16.gmra.mrb[120].mxu0 %vm661_vm2, %v5188_v47  ;;  %v16584_v47 = vld [vmem:[#allocation2 + $0x21] sm:$0xff] }
 0x4d5   : > { %13032 = vmatprep.mubr.msk.bf16.mxu0 %vm661_vm2, %v5189_v12  ;;  %19508 = vst [vmem:[#allocation69_spill] sm:$0xff] %v16584_v47  ;;  %v16587_v12 = vld [vmem:[#allocation2 + $0x31] sm:$0xff]  ;;  %v5701_v41 = vmul.f32 %v16584_v47, %v19511_v52  ;;  %v16629_v47 = vld [vmem:[#allocation2 + $0x61] sm:$0xff] }
 0x4d6   : > { %19509 = vst [vmem:[#allocation70_spill] sm:$0xff] %v16587_v12  ;;  %v5703_v43 = vmul.f32 %v16587_v12, %v19513_v15  ;;  %v16612_v15 = vld [vmem:[#allocation2 + $0x51] sm:$0xff]  ;;  %19524 = vst [vmem:[#allocation97_spill] sm:$0xff] %v16629_v47 }
 0x4d7   : > { %v5731_v24 = vpack.c.bf16 %v5701_v41, %v5700_v29  ;;  %19517 = vst [vmem:[#allocation67_spill] sm:$0xff] %v16612_v15  ;;  %v19518_v41 = vld [vmem:[#allocation10_spill] sm:$0xff]  ;;  %v19519_v29 = vld [vmem:[#allocation9_spill] sm:$0xff]  ;;  %v5707_v13 = vmul.f32 %v16612_v15, %v19521_v59 }
 0x4d8   : > { %v5732_v1 = vpack.c.bf16 %v5703_v43, %v5702_v0  ;;  %v5705_v43 = vmul.f32 %v16604_v60, %v19519_v29  ;;  %v16619_v0 = vld [vmem:[#allocation2 + $0x49] sm:$0xff] }
 0x4d9   : > { %19520 = vst [vmem:[#allocation88_spill] sm:$0xff] %v16619_v0  ;;  %v19526_v29 = vld [vmem:[#allocation14_spill] sm:$0xff] }
 0x4da   : > { %v16639_v15 = vld [vmem:[#allocation2 + $0x69] sm:$0xff] }
 0x4db   : > { %19528 = vst [vmem:[#allocation107_spill] sm:$0xff] %v16639_v15 }
 0x4dc   : > { %13033 = vmatmul.mubr.msk.bf16.gmra.mrb[124].mxu0 %vm661_vm2, %v5190_v22  ;;  %v6123_v22 = vsel %vm1682_vm3, %v16460_v6, 0 }
 0x4dd   : > { %13038 = vmatprep.mubr.msk.bf16.mxu0 %vm661_vm2, %v5730_v5  ;;  %v16602_v5 = vld [vmem:[#allocation2 + $0x39] sm:$0xff] }
 0x4de   : > { %19515 = vst [vmem:[#allocation80_spill] sm:$0xff] %v16602_v5  ;;  %v5704_v6 = vmul.f32 %v16602_v5, %v19518_v41  ;;  %v16632_v41 = vld [vmem:[#allocation2 + $0x71] sm:$0xff]  ;;  %v19527_v5 = vld [vmem:[#allocation13_spill] sm:$0xff] }
 0x4df   : > { %19525 = vst [vmem:[#allocation98_spill] sm:$0xff] %v16632_v41  ;;  %v5709_v59 = vmul.f32 %v16629_v47, %v19527_v5  ;;  %v19535_v47 = vld [vmem:[#allocation17_spill] sm:$0xff] }
 0x4e4   : > { %13039 = vmatmul.mubr.msk.bf16.vlgmr.msra.gmra.mrb[96].mxu0 %vm661_vm2, %v5731_v24  ;;  %v19522_v24 = vld [vmem:[#allocation12_spill] sm:$0xff] }
 0x4e5   : > { %13071 = vmatpush3.bf16.msra.mxu0 %v6123_v22  ;;  %13042 = vmatprep.mubr.msk.bf16.mxu0 %vm661_vm2, %v5732_v1  ;;  %v5706_v12 = vmul.f32 %v16619_v0, %v19522_v24  ;;  %v5733_v22 = vpack.c.bf16 %v5705_v43, %v5704_v6  ;;  %v16627_v1 = vld [vmem:[#allocation2 + $0x59] sm:$0xff]  ;;  %v19529_v6 = vld [vmem:[#allocation15_spill] sm:$0xff] }
 0x4e6   : > { %14397 = vmatprep.subr.msk.bf16.mxu0 %vm1682_vm3, %v16609_v17  ;;  %19523 = vst [vmem:[#allocation89_spill] sm:$0xff] %v16627_v1  ;;  %v5708_v60 = vmul.f32 %v16627_v1, %v19526_v29  ;;  %v16645_v24 = vld [vmem:[#allocation2 + $0x79] sm:$0xff]  ;;  %v19534_v29 = vld [vmem:[#allocation18_spill] sm:$0xff] }
 0x4e7   : > { %v5734_v52 = vpack.c.bf16 %v5707_v13, %v5706_v12  ;;  %v5711_v12 = vmul.f32 %v16632_v41, %v19529_v6  ;;  %v19530_v13 = vld [vmem:[#allocation16_spill] sm:$0xff]  ;;  %19531 = vst [vmem:[#allocation108_spill] sm:$0xff] %v16645_v24  ;;  %v5712_v5 = vmul.f32 %v16645_v24, %v19534_v29  ;;  %v5713_v6 = vmul.f32 %v16647_v16, %v19535_v47  ;;  %v16657_v41 = vld [vmem:[#allocation2 + $0x89] sm:$0xff]  ;;  %v16665_v1 = vld [vmem:[#allocation2 + $0xa1] sm:$0xff] }
 0x4e8   : > { %v5710_v43 = vmul.f32 %v16639_v15, %v19530_v13  ;;  %v5735_v0 = vpack.c.bf16 %v5709_v59, %v5708_v60  ;;  %19536 = vst [vmem:[#allocation46_spill] sm:$0xff] %v16657_v41  ;;  %v19537_v59 = vld [vmem:[#allocation19_spill] sm:$0xff]  ;;  %v16663_v13 = vld [vmem:[#allocation2 + $0x99] sm:$0xff]  ;;  %19540 = vst [vmem:[#allocation77_spill] sm:$0xff] %v16665_v1 }
 0x4e9   : > { %v5737_v15 = vpack.c.bf16 %v5713_v6, %v5712_v5  ;;  %19539 = vst [vmem:[#allocation71_spill] sm:$0xff] %v16663_v13  ;;  %v19542_v29 = vld [vmem:[#allocation22_spill] sm:$0xff]  ;;  %v19543_v16 = vld [vmem:[#allocation21_spill] sm:$0xff]  ;;  %v19545_v5 = vld [vmem:[#allocation23_spill] sm:$0xff] }
 0x4ea   : > { %v5716_v47 = vmul.f32 %v16663_v13, %v19542_v29  ;;  %v16683_v24 = vld [vmem:[#allocation2 + $0xc1] sm:$0xff] }
 0x4eb   : > { %19548 = vst [vmem:[#allocation85_spill] sm:$0xff] %v16683_v24  ;;  %v19550_v29 = vld [vmem:[#allocation26_spill] sm:$0xff] }
 0x4ec   : > { %13043 = vmatmul.mubr.msk.bf16.gmra.mrb[100].mxu0 %vm661_vm2, %v5733_v22  ;;  %v5736_v22 = vpack.c.bf16 %v5711_v12, %v5710_v43  ;;  %v19538_v12 = vld [vmem:[#allocation20_spill] sm:$0xff]  ;;  %v16701_v13 = vld [vmem:[#allocation2 + $0xe1] sm:$0xff] }
 0x4ed   : > { %13046 = vmatprep.mubr.msk.bf16.mxu0 %vm661_vm2, %v5734_v52  ;;  %v16650_v52 = vld [vmem:[#allocation2 + $0x91] sm:$0xff]  ;;  %v5714_v43 = vmul.f32 %v16657_v41, %v19538_v12  ;;  %v16681_v12 = vld [vmem:[#allocation2 + $0xb9] sm:$0xff]  ;;  %19555 = vst [vmem:[#allocation90_spill] sm:$0xff] %v16701_v13 }
 0x4ee   : > { %19533 = vst [vmem:[#allocation45_spill] sm:$0xff] %v16650_v52  ;;  %v5715_v60 = vmul.f32 %v16650_v52, %v19537_v59  ;;  %v5717_v59 = vmul.f32 %v16665_v1, %v19543_v16  ;;  %v16675_v52 = vld [vmem:[#allocation2 + $0xa9] sm:$0xff]  ;;  %19547 = vst [vmem:[#allocation82_spill] sm:$0xff] %v16681_v12  ;;  %v5720_v16 = vmul.f32 %v16681_v12, %v19550_v29  ;;  %v19551_v1 = vld [vmem:[#allocation25_spill] sm:$0xff] }
 0x4ef   : > { %19544 = vst [vmem:[#allocation74_spill] sm:$0xff] %v16675_v52  ;;  %v19556_v29 = vld [vmem:[#allocation30_spill] sm:$0xff] }
 0x4f0   : > { %v5739_v41 = vpack.c.bf16 %v5717_v59, %v5716_v47  ;;  %v19553_v47 = vld [vmem:[#allocation27_spill] sm:$0xff]  ;;  %v16719_v12 = vld [vmem:[#allocation2 + $0x101] sm:$0xff] }
 0x4f4   : > { %13047 = vmatmul.mubr.msk.bf16.gmra.mrb[104].mxu0 %vm661_vm2, %v5735_v0  ;;  %v5738_v0 = vpack.c.bf16 %v5715_v60, %v5714_v43  ;;  %v19546_v60 = vld [vmem:[#allocation24_spill] sm:$0xff] }
 0x4f5   : > { %13050 = vmatprep.mubr.msk.bf16.mxu0 %vm661_vm2, %v5736_v22  ;;  %v16668_v22 = vld [vmem:[#allocation2 + $0xb1] sm:$0xff]  ;;  %v5718_v43 = vmul.f32 %v16675_v52, %v19546_v60  ;;  %v16699_v60 = vld [vmem:[#allocation2 + $0xd9] sm:$0xff] }
 0x4f6   : > { %19541 = vst [vmem:[#allocation73_spill] sm:$0xff] %v16668_v22  ;;  %v5719_v6 = vmul.f32 %v16668_v22, %v19545_v5  ;;  %v5721_v5 = vmul.f32 %v16683_v24, %v19551_v1  ;;  %v16693_v22 = vld [vmem:[#allocation2 + $0xc9] sm:$0xff]  ;;  %v5724_v1 = vmul.f32 %v16699_v60, %v19556_v29  ;;  %v19557_v24 = vld [vmem:[#allocation29_spill] sm:$0xff] }
 0x4f7   : > { %19552 = vst [vmem:[#allocation84_spill] sm:$0xff] %v16693_v22 }
 0x4f8   : > { %v5741_v52 = vpack.c.bf16 %v5721_v5, %v5720_v16  ;;  %v19558_v16 = vld [vmem:[#allocation31_spill] sm:$0xff] }
 0x4fc   : > { %13051 = vmatmul.mubr.msk.bf16.gmra.mrb[108].mxu0 %vm661_vm2, %v5737_v15  ;;  %v5740_v15 = vpack.c.bf16 %v5719_v6, %v5718_v43  ;;  %v19554_v6 = vld [vmem:[#allocation28_spill] sm:$0xff] }
 0x4fd   : > { %13054 = vmatprep.mubr.msk.bf16.mxu0 %vm661_vm2, %v5738_v0  ;;  %v16686_v0 = vld [vmem:[#allocation2 + $0xd1] sm:$0xff]  ;;  %v5722_v43 = vmul.f32 %v16693_v22, %v19554_v6  ;;  %v16717_v6 = vld [vmem:[#allocation2 + $0xf9] sm:$0xff] }
 0x4fe   : > { %19549 = vst [vmem:[#allocation83_spill] sm:$0xff] %v16686_v0  ;;  %v5723_v59 = vmul.f32 %v16686_v0, %v19553_v47  ;;  %v5725_v47 = vmul.f32 %v16701_v13, %v19557_v24  ;;  %v16711_v0 = vld [vmem:[#allocation2 + $0xe9] sm:$0xff]  ;;  %v19561_v24 = vld [vmem:[#allocation33_spill] sm:$0xff] }
 0x4ff   : > { %v5729_v13 = vmul.f32 %v16719_v12, %v19561_v24 }
 0x500   : > { %v5743_v22 = vpack.c.bf16 %v5725_v47, %v5724_v1  ;;  %v6024_v1 = vmul.f32 %v16443_v25, %v15220_v35  ;;  %v6417_v25 = vsel %vm1682_vm3, %v16609_v17, 0  ;;  %v6033_v17 = vmul.f32 %v16480_v32, %v19336_v7 }
 0x504   : > { %13055 = vmatmul.mubr.msk.bf16.gmra.mrb[112].mxu0 %vm661_vm2, %v5739_v41  ;;  %v5742_v41 = vpack.c.bf16 %v5723_v59, %v5722_v43  ;;  %v19559_v59 = vld [vmem:[#allocation32_spill] sm:$0xff] }
 0x505   : > { %13058 = vmatprep.mubr.msk.bf16.mxu0 %vm661_vm2, %v5740_v15  ;;  %v16704_v15 = vld [vmem:[#allocation2 + $0xf1] sm:$0xff]  ;;  %v5726_v43 = vmul.f32 %v16711_v0, %v19559_v59 }
 0x506   : > { %v5727_v5 = vmul.f32 %v16704_v15, %v19558_v16  ;;  %v6025_v16 = vmul.f32 %v16434_v36, %v19318_v49  ;;  %v6028_v36 = vmul.f32 %v16468_v34, %v19323_v23 }
 0x50c   : > { %13059 = vmatmul.mubr.msk.bf16.gmra.mrb[116].mxu0 %vm661_vm2, %v5741_v52  ;;  %v5744_v52 = vpack.c.bf16 %v5727_v5, %v5726_v43  ;;  %v6056_v5 = vpack.c.bf16 %v6025_v16, %v6024_v1  ;;  %v6027_v43 = vmul.f32 %v16440_v20, %v19322_v26  ;;  %v6030_v16 = vmul.f32 %v16463_v46, %v19339_v56 }
 0x50d   : > { %13062 = vmatprep.mubr.msk.bf16.mxu0 %vm661_vm2, %v5742_v41  ;;  %v19560_v41 = vld [vmem:[#allocation34_spill] sm:$0xff]  ;;  %v6031_v1 = vmul.f32 %v16465_v44, %v19333_v58 }
 0x50e   : > { %v5728_v29 = vmul.f32 %v16717_v6, %v19560_v41 }
 0x510   : > { %v5745_v47 = vpack.c.bf16 %v5729_v13, %v5728_v29  ;;  %v11841_v13 = vld [vmem:[%s18708_s14 + $0x14] sm:$0xf] }
 0x514   : > { %13063 = vmatmul.mubr.msk.bf16.gmra.mrb[120].mxu0 %vm661_vm2, %v5743_v22  ;;  %v6026_v22 = vmul.f32 %v16438_v48, %v19326_v40 }
 0x515   : > { %13066 = vmatprep.mubr.msk.bf16.mxu0 %vm661_vm2, %v5744_v52  ;;  %v6029_v52 = vmul.f32 %v16455_v50, %v19324_v51 }
 0x516   : > { %v6057_v49 = vpack.c.bf16 %v6027_v43, %v6026_v22  ;;  %v6035_v43 = vmul.f32 %v16485_v28, %v19344_v10 }
 0x517   : > { %v6058_v29 = vpack.c.bf16 %v6029_v52, %v6028_v36  ;;  %v6037_v52 = vmul.f32 %v16498_v39, %v19346_v11  ;;  %v6036_v36 = vmul.f32 %v16506_v62, %v19403_v53 }
 0x51c   : > { %13067 = vmatmul.mubr.msk.bf16.gmra.mrb[124].mxu0 %vm661_vm2, %v5745_v47  ;;  %v6032_v47 = vmul.f32 %v16488_v54, %v19400_v61 }
 0x51d   : > { %13072 = vmatprep.mubr.msk.bf16.mxu0 %vm661_vm2, %v6056_v5  ;;  %v6059_v5 = vpack.c.bf16 %v6031_v1, %v6030_v16  ;;  %v6038_v16 = vmul.f32 %v16501_v8, %v19361_v18  ;;  %v6039_v1 = vmul.f32 %v16503_v4, %v19354_v55 }
 0x51e   : > { %v6060_v22 = vpack.c.bf16 %v6033_v17, %v6032_v47  ;;  %v6041_v17 = vmul.f32 %v16516_v21, %v19357_v45  ;;  %v6040_v47 = vmul.f32 %v16524_v3, %v19406_v19 }
 0x524   : > { %13073 = vmatmul.mubr.msk.bf16.vlgmr.msra.gmra.mrb[96].mxu0 %vm661_vm2, %v6057_v49  ;;  %v6034_v49 = vmul.f32 %v16483_v9, %v19349_v33 }
 0x525   : > { %13105 = vmatpush3.bf16.msra.mxu0 %v6417_v25  ;;  %13076 = vmatprep.mubr.msk.bf16.mxu0 %vm661_vm2, %v6058_v29  ;;  %v6062_v29 = vpack.c.bf16 %v6037_v52, %v6036_v36  ;;  %v6045_v52 = vmul.f32 %v16534_v2, %v19483_v27  ;;  %v6044_v36 = vmul.f32 %v16542_v31, %v19482_v30  ;;  %v19567_v27 = vld [vmem:[#allocation52_spill] sm:$0xff] }
 0x526   : > { %14398 = vmatprep.subr.msk.bf16.mxu0 %vm1682_vm3, %v11841_v13  ;;  %v6061_v25 = vpack.c.bf16 %v6035_v43, %v6034_v49  ;;  %v6042_v49 = vmul.f32 %v16519_v38, %v19484_v42  ;;  %v6043_v43 = vmul.f32 %v16521_v57, %v19366_v14  ;;  %v19566_v14 = vld [vmem:[#allocation96_spill] sm:$0xff] }
 0x527   : > { %v6048_v2 = vmul.f32 %v19567_v27, %v19566_v14 }
 0x52c   : > { %13077 = vmatmul.mubr.msk.bf16.gmra.mrb[100].mxu0 %vm661_vm2, %v6059_v5  ;;  %v6063_v5 = vpack.c.bf16 %v6039_v1, %v6038_v16  ;;  %v6046_v16 = vmul.f32 %v16537_v63, %v19492_v37  ;;  %v19562_v1 = vld [vmem:[#allocation86_spill] sm:$0xff]  ;;  %v19572_v37 = vld [vmem:[#allocation105_spill] sm:$0xff] }
 0x52d   : > { %13080 = vmatprep.mubr.msk.bf16.mxu0 %vm661_vm2, %v6060_v22  ;;  %v6064_v22 = vpack.c.bf16 %v6041_v17, %v6040_v47  ;;  %v19563_v17 = vld [vmem:[#allocation110_spill] sm:$0xff] }
 0x52e   : > { %v6047_v47 = vmul.f32 %v19563_v17, %v19562_v1  ;;  %v19573_v1 = vld [vmem:[#allocation61_spill] sm:$0xff]  ;;  %v19574_v63 = vld [vmem:[#allocation106_spill] sm:$0xff] }
 0x52f   : > { %v6053_v17 = vmul.f32 %v19573_v1, %v19572_v37  ;;  %v19604_v1 = vld [vmem:[#allocation7_spill] sm:$0xff] }
 0x530   : > { %v6067_v3 = vpack.c.bf16 %v6047_v47, %v6046_v16  ;;  %v16807_v16 = vld [vmem:[#allocation2 + $0x107] sm:$0xff] }
 0x531   : > { %19576 = vst [vmem:[#allocation94_spill] sm:$0xff] %v16807_v16 }
 0x534   : > { %13081 = vmatmul.mubr.msk.bf16.gmra.mrb[104].mxu0 %vm661_vm2, %v6061_v25  ;;  %v6065_v25 = vpack.c.bf16 %v6043_v43, %v6042_v49  ;;  %v19568_v49 = vld [vmem:[#allocation103_spill] sm:$0xff]  ;;  %v19569_v43 = vld [vmem:[#allocation49_spill] sm:$0xff] }
 0x535   : > { %13084 = vmatprep.mubr.msk.bf16.mxu0 %vm661_vm2, %v6062_v29  ;;  %v6066_v29 = vpack.c.bf16 %v6045_v52, %v6044_v36  ;;  %v6050_v52 = vmul.f32 %v19569_v43, %v19568_v49  ;;  %v19570_v36 = vld [vmem:[#allocation102_spill] sm:$0xff] }
 0x536   : > { %v19622_v43 = vld [vmem:[#allocation14_spill] sm:$0xff] }
 0x53c   : > { %13085 = vmatmul.mubr.msk.bf16.gmra.mrb[108].mxu0 %vm661_vm2, %v6063_v5  ;;  %v19564_v5 = vld [vmem:[#allocation95_spill] sm:$0xff] }
 0x53d   : > { %13088 = vmatprep.mubr.msk.bf16.mxu0 %vm661_vm2, %v6064_v22  ;;  %v19565_v22 = vld [vmem:[#allocation112_spill] sm:$0xff] }
 0x53e   : > { %v6049_v42 = vmul.f32 %v19565_v22, %v19564_v5  ;;  %v19575_v5 = vld [vmem:[#allocation72_spill] sm:$0xff] }
 0x53f   : > { %v6052_v22 = vmul.f32 %v19575_v5, %v19574_v63  ;;  %v19580_v5 = vld [vmem:[#allocation53_spill] sm:$0xff] }
 0x540   : > { %v6068_v31 = vpack.c.bf16 %v6049_v42, %v6048_v2  ;;  %v16809_v2 = vld [vmem:[#allocation2 + $0x10f] sm:$0xff] }
 0x541   : > { %v6070_v27 = vpack.c.bf16 %v6053_v17, %v6052_v22  ;;  %19577 = vst [vmem:[#allocation92_spill] sm:$0xff] %v16809_v2  ;;  %v19579_v42 = vld [vmem:[#allocation114_spill] sm:$0xff]  ;;  %v6743_v17 = vsel %vm1682_vm3, %v11841_v13, 0  ;;  %v19581_v22 = vld [vmem:[#allocation40_spill] sm:$0xff]  ;;  %v19585_v13 = vld [vmem:[#allocation55_spill] sm:$0xff] }
 0x542   : > { %v6055_v47 = vmul.f32 %v16809_v2, %v19579_v42  ;;  %v19598_v42 = vld [vmem:[#allocation69_spill] sm:$0xff] }
 0x544   : > { %13089 = vmatmul.mubr.msk.bf16.gmra.mrb[112].mxu0 %vm661_vm2, %v6065_v25  ;;  %v19571_v25 = vld [vmem:[#allocation54_spill] sm:$0xff] }
 0x545   : > { %13092 = vmatprep.mubr.msk.bf16.mxu0 %vm661_vm2, %v6066_v29  ;;  %v6051_v29 = vmul.f32 %v19571_v25, %v19570_v36  ;;  %v19606_v36 = vld [vmem:[#allocation3_spill] sm:$0xff] }
 0x546   : > { %v19620_v25 = vld [vmem:[#allocation15_spill] sm:$0xff] }
 0x547   : > { %v6069_v30 = vpack.c.bf16 %v6051_v29, %v6050_v52  ;;  %v19583_v52 = vld [vmem:[#allocation57_spill] sm:$0xff]  ;;  %v19587_v29 = vld [vmem:[#allocation62_spill] sm:$0xff] }
 0x54c   : > { %13093 = vmatmul.mubr.msk.bf16.gmra.mrb[116].mxu0 %vm661_vm2, %v6067_v3 }
 0x54d   : > { %13096 = vmatprep.mubr.msk.bf16.mxu0 %vm661_vm2, %v6068_v31  ;;  %v19578_v31 = vld [vmem:[#allocation118_spill] sm:$0xff] }
 0x54e   : > { %v6054_v3 = vmul.f32 %v16807_v16, %v19578_v31  ;;  %v19603_v16 = vld [vmem:[#allocation80_spill] sm:$0xff] }
 0x550   : > { %v6071_v49 = vpack.c.bf16 %v6055_v47, %v6054_v3  ;;  %v19588_v3 = vld [vmem:[#allocation68_spill] sm:$0xff]  ;;  %v19589_v47 = vld [vmem:[#allocation41_spill] sm:$0xff] }
 0x554   : > { %13097 = vmatmul.mubr.msk.bf16.gmra.mrb[120].mxu0 %vm661_vm2, %v6069_v30  ;;  %v11858_v30 = vld [vmem:[%s18708_s14 + $0x18] sm:$0xf] }
 0x555   : > { %13100 = vmatprep.mubr.msk.bf16.mxu0 %vm661_vm2, %v6070_v27  ;;  %v19582_v27 = vld [vmem:[#allocation39_spill] sm:$0xff] }
 0x55c   : > { %13101 = vmatmul.mubr.msk.bf16.gmra.mrb[124].mxu0 %vm661_vm2, %v6071_v49  ;;  %v19584_v49 = vld [vmem:[#allocation60_spill] sm:$0xff] }
 0x55d   : > { %13106 = vmatprep.mubr.msk.bf16.mxu0 %vm661_vm2, %v19580_v5  ;;  %v19586_v5 = vld [vmem:[#allocation56_spill] sm:$0xff] }
 0x564   : > { %13107 = vmatmul.mubr.msk.bf16.vlgmr.msra.gmra.mrb[96].mxu0 %vm661_vm2, %v19581_v22  ;;  %v19591_v22 = vld [vmem:[#allocation65_spill] sm:$0xff] }
 0x565   : > { %13139 = vmatpush3.bf16.msra.mxu0 %v6743_v17  ;;  %13110 = vmatprep.mubr.msk.bf16.mxu0 %vm661_vm2, %v19582_v27  ;;  %v19590_v17 = vld [vmem:[#allocation43_spill] sm:$0xff]  ;;  %v19592_v27 = vld [vmem:[#allocation42_spill] sm:$0xff] }
 0x566   : > { %14399 = vmatprep.subr.msk.bf16.mxu0 %vm1682_vm3, %v11858_v30 }
 0x56c   : > { %13111 = vmatmul.mubr.msk.bf16.gmra.mrb[100].mxu0 %vm661_vm2, %v19583_v52  ;;  %v19593_v52 = vld [vmem:[#allocation63_spill] sm:$0xff] }
 0x56d   : > { %13114 = vmatprep.mubr.msk.bf16.mxu0 %vm661_vm2, %v19584_v49  ;;  %v19594_v49 = vld [vmem:[#allocation64_spill] sm:$0xff] }
 0x574   : > { %13115 = vmatmul.mubr.msk.bf16.gmra.mrb[104].mxu0 %vm661_vm2, %v19585_v13  ;;  %v6349_v13 = vld [vmem:[#allocation2 + $0x110] sm:$0xff] }
 0x575   : > { %13118 = vmatprep.mubr.msk.bf16.mxu0 %vm661_vm2, %v19586_v5  ;;  %v19595_v5 = vld [vmem:[#allocation4_spill] sm:$0xff] }
 0x57c   : > { %13119 = vmatmul.mubr.msk.bf16.gmra.mrb[108].mxu0 %vm661_vm2, %v19587_v29  ;;  %v19596_v29 = vld [vmem:[#allocation44_spill] sm:$0xff] }
 0x57d   : > { %13122 = vmatprep.mubr.msk.bf16.mxu0 %vm661_vm2, %v19588_v3  ;;  %v6644_v3 = vmul.f32 %v19596_v29, %v19595_v5  ;;  %v19605_v29 = vld [vmem:[#allocation81_spill] sm:$0xff] }
 0x57e   : > { %v6649_v5 = vmul.f32 %v19605_v29, %v19604_v1 }
 0x584   : > { %13123 = vmatmul.mubr.msk.bf16.gmra.mrb[112].mxu0 %vm661_vm2, %v19589_v47  ;;  %v19597_v47 = vld [vmem:[#allocation6_spill] sm:$0xff] }
 0x585   : > { %13126 = vmatprep.mubr.msk.bf16.mxu0 %vm661_vm2, %v19590_v17  ;;  %v6645_v31 = vmul.f32 %v19598_v42, %v19597_v47  ;;  %v6348_v17 = vld [vmem:[#allocation2 + $0x108] sm:$0xff]  ;;  %v19607_v42 = vld [vmem:[#allocation51_spill] sm:$0xff] }
 0x586   : > { %v16857_v2 = vpack.c.bf16 %v6349_v13, %v6348_v17  ;;  %v6646_v47 = vmul.f32 %v19607_v42, %v19606_v36  ;;  %v16874_v17 = vld [vmem:[%s18708_s14 + $0x1c] sm:$0xf]  ;;  %v19614_v42 = vld [vmem:[#allocation10_spill] sm:$0xff] }
 0x587   : > { %v19619_v36 = vld [vmem:[#allocation108_spill] sm:$0xff] }
 0x588   : > { %19599 = vst [vmem:[#allocation93_spill] sm:$0xff] %v16857_v2 }
 0x58c   : > { %13127 = vmatmul.mubr.msk.bf16.gmra.mrb[116].mxu0 %vm661_vm2, %v19591_v22  ;;  %v6676_v22 = vpack.c.bf16 %v6645_v31, %v6644_v3  ;;  %v7069_v31 = vsel %vm1682_vm3, %v11858_v30, 0 }
 0x58d   : > { %13130 = vmatprep.mubr.msk.bf16.mxu0 %vm661_vm2, %v19592_v27  ;;  %v19600_v27 = vld [vmem:[#allocation5_spill] sm:$0xff] }
 0x594   : > { %13131 = vmatmul.mubr.msk.bf16.gmra.mrb[120].mxu0 %vm661_vm2, %v19593_v52  ;;  %v19601_v52 = vld [vmem:[#allocation70_spill] sm:$0xff] }
 0x595   : > { %13134 = vmatprep.mubr.msk.bf16.mxu0 %vm661_vm2, %v19594_v49  ;;  %v6647_v37 = vmul.f32 %v19601_v52, %v19600_v27  ;;  %v19602_v49 = vld [vmem:[#allocation8_spill] sm:$0xff] }
 0x596   : > { %v6648_v63 = vmul.f32 %v19603_v16, %v19602_v49  ;;  %v19608_v16 = vld [vmem:[#allocation9_spill] sm:$0xff]  ;;  %v19615_v49 = vld [vmem:[#allocation88_spill] sm:$0xff] }
 0x597   : > { %v6677_v13 = vpack.c.bf16 %v6647_v37, %v6646_v47  ;;  %v19610_v37 = vld [vmem:[#allocation12_spill] sm:$0xff]  ;;  %v19611_v47 = vld [vmem:[#allocation89_spill] sm:$0xff]  ;;  %v6650_v1 = vmul.f32 %v19615_v49, %v19614_v42 }
 0x598   : > { %v6678_v3 = vpack.c.bf16 %v6649_v5, %v6648_v63  ;;  %v6652_v30 = vmul.f32 %v19611_v47, %v19610_v37  ;;  %v19612_v63 = vld [vmem:[#allocation11_spill] sm:$0xff]  ;;  %v19613_v5 = vld [vmem:[#allocation97_spill] sm:$0xff] }
 0x599   : > { %v6653_v29 = vmul.f32 %v19613_v5, %v19612_v63  ;;  %v19621_v47 = vld [vmem:[#allocation115_spill] sm:$0xff] }
 0x59a   : > { %v6657_v37 = vmul.f32 %v19621_v47, %v19620_v25  ;;  %v19623_v5 = vld [vmem:[#allocation107_spill] sm:$0xff]  ;;  %v19631_v47 = vld [vmem:[#allocation46_spill] sm:$0xff] }
 0x59b   : > { %v6654_v63 = vmul.f32 %v19623_v5, %v19622_v43 }
 0x59c   : > { %13135 = vmatmul.mubr.msk.bf16.gmra.mrb[124].mxu0 %vm661_vm2, %v16857_v2 }
 0x59d   : > { %13140 = vmatprep.mubr.msk.bf16.mxu0 %vm661_vm2, %v6676_v22  ;;  %v19609_v22 = vld [vmem:[#allocation67_spill] sm:$0xff] }
 0x59e   : > { %v6651_v52 = vmul.f32 %v19609_v22, %v19608_v16  ;;  %v19618_v16 = vld [vmem:[#allocation16_spill] sm:$0xff] }
 0x59f   : > { %v6656_v2 = vmul.f32 %v19619_v36, %v19618_v16  ;;  %v19629_v36 = vld [vmem:[#allocation77_spill] sm:$0xff] }
 0x5a0   : > { %v6679_v27 = vpack.c.bf16 %v6651_v52, %v6650_v1  ;;  %v19624_v1 = vld [vmem:[#allocation17_spill] sm:$0xff] }
 0x5a1   : > { %v6682_v49 = vpack.c.bf16 %v6657_v37, %v6656_v2  ;;  %v19633_v2 = vld [vmem:[#allocation73_spill] sm:$0xff] }
 0x5a4   : > { %13141 = vmatmul.mubr.msk.bf16.vlgmr.msra.gmra.mrb[96].mxu0 %vm661_vm2, %v6677_v13  ;;  %v6680_v13 = vpack.c.bf16 %v6653_v29, %v6652_v30  ;;  %v19626_v30 = vld [vmem:[#allocation20_spill] sm:$0xff]  ;;  %v19627_v29 = vld [vmem:[#allocation71_spill] sm:$0xff] }
 0x5a5   : > { %13173 = vmatpush3.bf16.msra.mxu0 %v7069_v31  ;;  %13144 = vmatprep.mubr.msk.bf16.mxu0 %vm661_vm2, %v6678_v3  ;;  %v19616_v31 = vld [vmem:[#allocation13_spill] sm:$0xff]  ;;  %v19617_v3 = vld [vmem:[#allocation98_spill] sm:$0xff] }
 0x5a6   : > { %14400 = vmatprep.subr.msk.bf16.mxu0 %vm1682_vm3, %v16874_v17  ;;  %v6655_v22 = vmul.f32 %v19617_v3, %v19616_v31  ;;  %v19628_v3 = vld [vmem:[#allocation19_spill] sm:$0xff]  ;;  %v19630_v31 = vld [vmem:[#allocation18_spill] sm:$0xff] }
 0x5a7   : > { %v6661_v16 = vmul.f32 %v19629_v36, %v19628_v3  ;;  %v6658_v25 = vmul.f32 %v19631_v47, %v19630_v31  ;;  %v19639_v36 = vld [vmem:[#allocation74_spill] sm:$0xff] }
 0x5a8   : > { %v6681_v14 = vpack.c.bf16 %v6655_v22, %v6654_v63  ;;  %v19634_v63 = vld [vmem:[#allocation24_spill] sm:$0xff]  ;;  %v19635_v22 = vld [vmem:[#allocation82_spill] sm:$0xff] }
 0x5ac   : > { %13145 = vmatmul.mubr.msk.bf16.gmra.mrb[100].mxu0 %vm661_vm2, %v6679_v27  ;;  %v19625_v27 = vld [vmem:[#allocation45_spill] sm:$0xff] }
 0x5ad   : > { %13148 = vmatprep.mubr.msk.bf16.mxu0 %vm661_vm2, %v6680_v13  ;;  %v6659_v52 = vmul.f32 %v19625_v27, %v19624_v1  ;;  %v6660_v13 = vmul.f32 %v19627_v29, %v19626_v30  ;;  %v19636_v27 = vld [vmem:[#allocation23_spill] sm:$0xff]  ;;  %v19637_v29 = vld [vmem:[#allocation85_spill] sm:$0xff]  ;;  %v19638_v1 = vld [vmem:[#allocation22_spill] sm:$0xff] }
 0x5ae   : > { %v6665_v30 = vmul.f32 %v19637_v29, %v19636_v27  ;;  %v6662_v3 = vmul.f32 %v19639_v36, %v19638_v1  ;;  %v19646_v29 = vld [vmem:[#allocation84_spill] sm:$0xff] }
 0x5af   : > { %v6683_v42 = vpack.c.bf16 %v6659_v52, %v6658_v25  ;;  %v6684_v5 = vpack.c.bf16 %v6661_v16, %v6660_v13  ;;  %v19640_v25 = vld [vmem:[#allocation25_spill] sm:$0xff]  ;;  %v19641_v16 = vld [vmem:[#allocation83_spill] sm:$0xff]  ;;  %v19642_v52 = vld [vmem:[#allocation28_spill] sm:$0xff] }
 0x5b0   : > { %v6668_v13 = vmul.f32 %v16699_v60, %v19642_v52 }
 0x5b4   : > { %13149 = vmatmul.mubr.msk.bf16.gmra.mrb[104].mxu0 %vm661_vm2, %v6681_v14  ;;  %v19632_v14 = vld [vmem:[#allocation21_spill] sm:$0xff] }
 0x5b5   : > { %13152 = vmatprep.mubr.msk.bf16.mxu0 %vm661_vm2, %v6682_v49  ;;  %v6663_v37 = vmul.f32 %v19633_v2, %v19632_v14  ;;  %v6664_v49 = vmul.f32 %v19635_v22, %v19634_v63  ;;  %v19644_v2 = vld [vmem:[#allocation90_spill] sm:$0xff] }
 0x5b6   : > { %v19645_v63 = vld [vmem:[#allocation26_spill] sm:$0xff] }
 0x5b7   : > { %v6685_v43 = vpack.c.bf16 %v6663_v37, %v6662_v3  ;;  %v6686_v47 = vpack.c.bf16 %v6665_v30, %v6664_v49  ;;  %v6666_v27 = vmul.f32 %v19646_v29, %v19645_v63  ;;  %v6672_v3 = vmul.f32 %v16717_v6, %v19559_v59  ;;  %v19648_v37 = vld [vmem:[#allocation31_spill] sm:$0xff]  ;;  %v19649_v49 = vld [vmem:[#allocation30_spill] sm:$0xff] }
 0x5b8   : > { %v6673_v60 = vmul.f32 %v16719_v12, %v19648_v37  ;;  %v6970_v12 = vmul.f32 %v16438_v48, %v15220_v35  ;;  %v6973_v29 = vmul.f32 %v16455_v50, %v19322_v26  ;;  %v6972_v48 = vmul.f32 %v16468_v34, %v19326_v40  ;;  %v7566_v40 = vld [vmem:[#allocation2 + $0x69] sm:$0xff] }
 0x5b9   : > { %v6977_v50 = vmul.f32 %v16480_v32, %v19333_v58  ;;  %v6976_v34 = vmul.f32 %v16488_v54, %v19339_v56  ;;  %v6981_v32 = vmul.f32 %v16498_v39, %v19344_v10  ;;  %v6986_v39 = vmul.f32 %v16519_v38, %v19406_v19  ;;  %v19657_v38 = vld [vmem:[#allocation110_spill] sm:$0xff] }
 0x5bc   : > { %13153 = vmatmul.mubr.msk.bf16.gmra.mrb[108].mxu0 %vm661_vm2, %v6683_v42  ;;  %v6667_v42 = vmul.f32 %v19641_v16, %v19640_v25 }
 0x5bd   : > { %13156 = vmatprep.mubr.msk.bf16.mxu0 %vm661_vm2, %v6684_v5  ;;  %v19643_v5 = vld [vmem:[#allocation27_spill] sm:$0xff] }
 0x5be   : > { %v6669_v22 = vmul.f32 %v19644_v2, %v19643_v5  ;;  %v6687_v14 = vpack.c.bf16 %v6667_v42, %v6666_v27  ;;  %v6690_v2 = vpack.c.bf16 %v6673_v60, %v6672_v3  ;;  %v16938_v27 = vld [vmem:[#allocation2 + $0x109] sm:$0xff]  ;;  %v16940_v42 = vld [vmem:[#allocation2 + $0x111] sm:$0xff]  ;;  %v7003_v3 = vpack.c.bf16 %v6973_v29, %v6972_v48 }
 0x5bf   : > { %v6675_v6 = vmul.f32 %v16940_v42, %v19561_v24  ;;  %v19656_v48 = vld [vmem:[#allocation78_spill] sm:$0xff] }
 0x5c0   : > { %v6688_v36 = vpack.c.bf16 %v6669_v22, %v6668_v13 }
 0x5c4   : > { %13157 = vmatmul.mubr.msk.bf16.gmra.mrb[112].mxu0 %vm661_vm2, %v6685_v43  ;;  %v19647_v43 = vld [vmem:[#allocation29_spill] sm:$0xff] }
 0x5c5   : > { %13160 = vmatprep.mubr.msk.bf16.mxu0 %vm661_vm2, %v6686_v47  ;;  %v6671_v30 = vmul.f32 %v16704_v15, %v19647_v43  ;;  %v6670_v47 = vmul.f32 %v16711_v0, %v19649_v49  ;;  %v6674_v15 = vmul.f32 %v16938_v27, %v19560_v41  ;;  %v19650_v0 = vld [vmem:[#allocation35_spill] sm:$0xff] }
 0x5c7   : > { %v6689_v16 = vpack.c.bf16 %v6671_v30, %v6670_v47  ;;  %v6691_v13 = vpack.c.bf16 %v6675_v6, %v6674_v15  ;;  %v6975_v30 = vmul.f32 %v16465_v44, %v19324_v51  ;;  %v16967_v47 = vld [vmem:[%s18708_s14 + $0x20] sm:$0xf]  ;;  %v6979_v44 = vmul.f32 %v16485_v28, %v19336_v7 }
 0x5c8   : > { %v6980_v28 = vmul.f32 %v16506_v62, %v19349_v33  ;;  %v6985_v6 = vmul.f32 %v16516_v21, %v19354_v55  ;;  %v19655_v21 = vld [vmem:[#allocation91_spill] sm:$0xff] }
 0x5ca   : > { %v7007_v15 = vpack.c.bf16 %v6981_v32, %v6980_v28  ;;  %v19663_v32 = vld [vmem:[#allocation49_spill] sm:$0xff]  ;;  %v19665_v28 = vld [vmem:[#allocation54_spill] sm:$0xff] }
 0x5cc   : > { %13161 = vmatmul.mubr.msk.bf16.gmra.mrb[116].mxu0 %vm661_vm2, %v6687_v14  ;;  %v6971_v14 = vmul.f32 %v16440_v20, %v19650_v0  ;;  %v7363_v20 = vsel %vm1682_vm3, %v16874_v17, 0  ;;  %v7005_v17 = vpack.c.bf16 %v6977_v50, %v6976_v34  ;;  %v19661_v34 = vld [vmem:[#allocation112_spill] sm:$0xff] }
 0x5cd   : > { %13164 = vmatprep.mubr.msk.bf16.mxu0 %vm661_vm2, %v6688_v36  ;;  %v6974_v36 = vmul.f32 %v16463_v46, %v19323_v23  ;;  %v6978_v46 = vmul.f32 %v16483_v9, %v19400_v61  ;;  %v6983_v9 = vmul.f32 %v16503_v4, %v19346_v11  ;;  %v19651_v4 = vld [vmem:[#allocation47_spill] sm:$0xff] }
 0x5ce   : > { %v7002_v22 = vpack.c.bf16 %v6971_v14, %v6970_v12  ;;  %v6984_v12 = vmul.f32 %v19651_v4, %v19361_v18 }
 0x5cf   : > { %v7004_v60 = vpack.c.bf16 %v6975_v30, %v6974_v36  ;;  %v19654_v36 = vld [vmem:[#allocation79_spill] sm:$0xff] }
 0x5d0   : > { %v7009_v14 = vpack.c.bf16 %v6985_v6, %v6984_v12  ;;  %v6990_v30 = vmul.f32 %v19655_v21, %v19654_v36  ;;  %v19667_v6 = vld [vmem:[#allocation52_spill] sm:$0xff]  ;;  %v19668_v12 = vld [vmem:[#allocation102_spill] sm:$0xff] }
 0x5d4   : > { %13165 = vmatmul.mubr.msk.bf16.gmra.mrb[120].mxu0 %vm661_vm2, %v6689_v16  ;;  %v7006_v16 = vpack.c.bf16 %v6979_v44, %v6978_v46  ;;  %v19660_v44 = vld [vmem:[#allocation86_spill] sm:$0xff] }
 0x5d5   : > { %13168 = vmatprep.mubr.msk.bf16.mxu0 %vm661_vm2, %v6690_v2  ;;  %v6982_v2 = vmul.f32 %v16501_v8, %v19403_v53  ;;  %v6987_v8 = vmul.f32 %v16521_v57, %v19357_v45  ;;  %v19659_v57 = vld [vmem:[#allocation111_spill] sm:$0xff] }
 0x5d7   : > { %v7008_v54 = vpack.c.bf16 %v6983_v9, %v6982_v2  ;;  %v7010_v62 = vpack.c.bf16 %v6987_v8, %v6986_v39  ;;  %v19664_v9 = vld [vmem:[#allocation95_spill] sm:$0xff] }
 0x5dc   : > { %13169 = vmatmul.mubr.msk.bf16.gmra.mrb[124].mxu0 %vm661_vm2, %v6691_v13  ;;  %v19652_v13 = vld [vmem:[#allocation75_spill] sm:$0xff] }
 0x5dd   : > { %13174 = vmatprep.mubr.msk.bf16.mxu0 %vm661_vm2, %v7002_v22  ;;  %v19653_v22 = vld [vmem:[#allocation50_spill] sm:$0xff] }
 0x5de   : > { %v6989_v29 = vmul.f32 %v19653_v22, %v19652_v13  ;;  %v19670_v22 = vld [vmem:[#allocation106_spill] sm:$0xff] }
 0x5e4   : > { %13175 = vmatmul.mubr.msk.bf16.vlgmr.msra.gmra.mrb[96].mxu0 %vm661_vm2, %v7003_v3  ;;  %v6991_v3 = vmul.f32 %v19657_v38, %v19656_v48  ;;  %v19673_v38 = vld [vmem:[#allocation92_spill] sm:$0xff] }
 0x5e5   : > { %13207 = vmatpush3.bf16.msra.mxu0 %v7363_v20  ;;  %13178 = vmatprep.mubr.msk.bf16.mxu0 %vm661_vm2, %v7004_v60  ;;  %v19658_v20 = vld [vmem:[#allocation76_spill] sm:$0xff] }
 0x5e6   : > { %14401 = vmatprep.subr.msk.bf16.mxu0 %vm1682_vm3, %v16967_v47  ;;  %v6988_v60 = vmul.f32 %v19659_v57, %v19658_v20  ;;  %v7012_v46 = vpack.c.bf16 %v6991_v3, %v6990_v30  ;;  %v19672_v30 = vld [vmem:[#allocation105_spill] sm:$0xff]  ;;  %v19674_v57 = vld [vmem:[#allocation103_spill] sm:$0xff] }
 0x5e7   : > { %v6999_v3 = vmul.f32 %v19673_v38, %v19672_v30  ;;  %v19684_v30 = vld [vmem:[#allocation8_spill] sm:$0xff] }
 0x5e8   : > { %v7011_v50 = vpack.c.bf16 %v6989_v29, %v6988_v60  ;;  %v19671_v29 = vld [vmem:[#allocation94_spill] sm:$0xff]  ;;  %v19675_v60 = vld [vmem:[#allocation72_spill] sm:$0xff] }
 0x5e9   : > { %v6998_v21 = vmul.f32 %v19671_v29, %v19670_v22  ;;  %v7269_v29 = vld [vmem:[#allocation2 + $0x50] sm:$0xff]  ;;  %v19686_v22 = vld [vmem:[#allocation9_spill] sm:$0xff] }
 0x5ec   : > { %13179 = vmatmul.mubr.msk.bf16.gmra.mrb[100].mxu0 %vm661_vm2, %v7005_v17  ;;  %v6993_v17 = vmul.f32 %v19661_v34, %v19660_v44  ;;  %v7016_v34 = vpack.c.bf16 %v6999_v3, %v6998_v21  ;;  %v7266_v21 = vld [vmem:[#allocation2 + $0x38] sm:$0xff]  ;;  %v7689_v3 = vsel %vm1682_vm3, %v16967_v47, 0 }
 0x5ed   : > { %13182 = vmatprep.mubr.msk.bf16.mxu0 %vm661_vm2, %v7006_v16  ;;  %v19662_v16 = vld [vmem:[#allocation96_spill] sm:$0xff] }
 0x5ee   : > { %v6994_v2 = vmul.f32 %v19663_v32, %v19662_v16  ;;  %v6969_v32 = vld [vmem:[#allocation2 + $0x11f] sm:$0xff] }
 0x5ef   : > { %v7274_v47 = vld [vmem:[#allocation2 + $0x78] sm:$0xff] }
 0x5f4   : > { %13183 = vmatmul.mubr.msk.bf16.gmra.mrb[104].mxu0 %vm661_vm2, %v7007_v15  ;;  %v6995_v15 = vmul.f32 %v19665_v28, %v19664_v9 }
 0x5f5   : > { %13186 = vmatprep.mubr.msk.bf16.mxu0 %vm661_vm2, %v7008_v54  ;;  %v19666_v54 = vld [vmem:[#allocation87_spill] sm:$0xff] }
 0x5f6   : > { %v6992_v39 = vmul.f32 %v19667_v6, %v19666_v54  ;;  %v7014_v4 = vpack.c.bf16 %v6995_v15, %v6994_v2  ;;  %v19676_v2 = vld [vmem:[#allocation118_spill] sm:$0xff] }
 0x5f7   : > { %v19677_v15 = vld [vmem:[#allocation114_spill] sm:$0xff] }
 0x5f8   : > { %v7013_v8 = vpack.c.bf16 %v6993_v17, %v6992_v39  ;;  %v6968_v17 = vld [vmem:[#allocation2 + $0x117] sm:$0xff]  ;;  %v7001_v6 = vmul.f32 %v6969_v32, %v19677_v15 }
 0x5f9   : > { %v7000_v28 = vmul.f32 %v6968_v17, %v19676_v2  ;;  %v7265_v39 = vld [vmem:[#allocation2 + $0x30] sm:$0xff]  ;;  %v7270_v17 = vld [vmem:[#allocation2 + $0x58] sm:$0xff] }
 0x5fa   : > { %v19683_v2 = vld [vmem:[#allocation7_spill] sm:$0xff] }
 0x5fc   : > { %13187 = vmatmul.mubr.msk.bf16.gmra.mrb[108].mxu0 %vm661_vm2, %v7009_v14  ;;  %v19669_v14 = vld [vmem:[#allocation61_spill] sm:$0xff] }
 0x5fd   : > { %13190 = vmatprep.mubr.msk.bf16.mxu0 %vm661_vm2, %v7010_v62  ;;  %v6997_v62 = vmul.f32 %v19669_v14, %v19668_v12 }
 0x604   : > { %13191 = vmatmul.mubr.msk.bf16.gmra.mrb[112].mxu0 %vm661_vm2, %v7011_v50  ;;  %v6996_v50 = vmul.f32 %v19675_v60, %v19674_v57  ;;  %v7268_v60 = vld [vmem:[#allocation2 + $0x48] sm:$0xff] }
 0x605   : > { %13194 = vmatprep.mubr.msk.bf16.mxu0 %vm661_vm2, %v7012_v46 }
 0x606   : > { %v7015_v46 = vpack.c.bf16 %v6997_v62, %v6996_v50  ;;  %v7267_v62 = vld [vmem:[#allocation2 + $0x40] sm:$0xff]  ;;  %v7298_v50 = vpack.c.bf16 %v7269_v29, %v7268_v60  ;;  %v7280_v60 = vld [vmem:[#allocation2 + $0xa8] sm:$0xff] }
 0x607   : > { %v7297_v38 = vpack.c.bf16 %v7267_v62, %v7266_v21  ;;  %v7279_v29 = vld [vmem:[#allocation2 + $0xa0] sm:$0xff]  ;;  %v7281_v21 = vld [vmem:[#allocation2 + $0xb0] sm:$0xff] }
 0x60c   : > { %13195 = vmatmul.mubr.msk.bf16.gmra.mrb[116].mxu0 %vm661_vm2, %v7013_v8  ;;  %v7017_v8 = vpack.c.bf16 %v7001_v6, %v7000_v28  ;;  %v7272_v28 = vld [vmem:[#allocation2 + $0x68] sm:$0xff] }
 0x60d   : > { %13198 = vmatprep.mubr.msk.bf16.mxu0 %vm661_vm2, %v7014_v4  ;;  %v7264_v4 = vld [vmem:[#allocation2 + $0x28] sm:$0xff] }
 0x60e   : > { %v7296_v14 = vpack.c.bf16 %v7265_v39, %v7264_v4  ;;  %v7275_v39 = vld [vmem:[#allocation2 + $0x80] sm:$0xff] }
 0x60f   : > { %v7301_v4 = vpack.c.bf16 %v7275_v39, %v7274_v47  ;;  %v7287_v39 = vld [vmem:[#allocation2 + $0xe0] sm:$0xff]  ;;  %v7286_v47 = vld [vmem:[#allocation2 + $0xd8] sm:$0xff] }
 0x614   : > { %13199 = vmatmul.mubr.msk.bf16.gmra.mrb[120].mxu0 %vm661_vm2, %v7015_v46  ;;  %v7271_v46 = vld [vmem:[#allocation2 + $0x60] sm:$0xff] }
 0x615   : > { %13202 = vmatprep.mubr.msk.bf16.mxu0 %vm661_vm2, %v7016_v34  ;;  %v7273_v34 = vld [vmem:[#allocation2 + $0x70] sm:$0xff]  ;;  %v7299_v32 = vpack.c.bf16 %v7271_v46, %v7270_v17  ;;  %v7283_v46 = vld [vmem:[#allocation2 + $0xc0] sm:$0xff]  ;;  %v7282_v17 = vld [vmem:[#allocation2 + $0xb8] sm:$0xff] }
 0x616   : > { %v7300_v6 = vpack.c.bf16 %v7273_v34, %v7272_v28  ;;  %v7285_v34 = vld [vmem:[#allocation2 + $0xd0] sm:$0xff]  ;;  %v7284_v28 = vld [vmem:[#allocation2 + $0xc8] sm:$0xff] }
 0x61c   : > { %13203 = vmatmul.mubr.msk.bf16.gmra.mrb[124].mxu0 %vm661_vm2, %v7017_v8  ;;  %v7277_v8 = vld [vmem:[#allocation2 + $0x90] sm:$0xff] }
 0x61d   : > { %13208 = vmatprep.mubr.msk.bf16.mxu0 %vm661_vm2, %v7296_v14  ;;  %v7276_v14 = vld [vmem:[#allocation2 + $0x88] sm:$0xff] }
 0x61e   : > { %v7302_v62 = vpack.c.bf16 %v7277_v8, %v7276_v14  ;;  %v7289_v8 = vld [vmem:[#allocation2 + $0xf0] sm:$0xff]  ;;  %v7288_v14 = vld [vmem:[#allocation2 + $0xe8] sm:$0xff] }
 0x624   : > { %13209 = vmatmul.mubr.msk.bf16.vlgmr.msra.gmra.mrb[96].mxu0 %vm661_vm2, %v7297_v38  ;;  %v7278_v38 = vld [vmem:[#allocation2 + $0x98] sm:$0xff] }
 0x625   : > { %13241 = vmatpush3.bf16.msra.mxu0 %v7689_v3  ;;  %13212 = vmatprep.mubr.msk.bf16.mxu0 %vm661_vm2, %v7298_v50  ;;  %v7303_v3 = vpack.c.bf16 %v7279_v29, %v7278_v38  ;;  %v7304_v50 = vpack.c.bf16 %v7281_v21, %v7280_v60  ;;  %v7291_v29 = vld [vmem:[#allocation2 + $0x100] sm:$0xff]  ;;  %v7290_v21 = vld [vmem:[#allocation2 + $0xf8] sm:$0xff] }
 0x626   : > { %v7309_v38 = vpack.c.bf16 %v7291_v29, %v7290_v21  ;;  %v19678_v60 = vld [vmem:[#allocation93_spill] sm:$0xff] }
 0x627   : > { %v19682_v21 = vld [vmem:[#allocation5_spill] sm:$0xff] }
 0x62c   : > { %13213 = vmatmul.mubr.msk.bf16.gmra.mrb[100].mxu0 %vm661_vm2, %v7299_v32  ;;  %v7305_v32 = vpack.c.bf16 %v7283_v46, %v7282_v17  ;;  %v7295_v46 = vld [vmem:[#allocation2 + $0x120] sm:$0xff]  ;;  %v19679_v17 = vld [vmem:[#allocation6_spill] sm:$0xff] }
 0x62d   : > { %13216 = vmatprep.mubr.msk.bf16.mxu0 %vm661_vm2, %v7300_v6  ;;  %v7306_v6 = vpack.c.bf16 %v7285_v34, %v7284_v28  ;;  %v7558_v34 = vld [vmem:[#allocation2 + $0x29] sm:$0xff] }
 0x634   : > { %13217 = vmatmul.mubr.msk.bf16.gmra.mrb[104].mxu0 %vm661_vm2, %v7301_v4  ;;  %v7307_v4 = vpack.c.bf16 %v7287_v39, %v7286_v47  ;;  %v7560_v47 = vld [vmem:[#allocation2 + $0x39] sm:$0xff] }
 0x635   : > { %13220 = vmatprep.mubr.msk.bf16.mxu0 %vm661_vm2, %v7302_v62  ;;  %v7308_v62 = vpack.c.bf16 %v7289_v8, %v7288_v14  ;;  %v7563_v14 = vld [vmem:[#allocation2 + $0x51] sm:$0xff] }
 0x636   : > { %v7595_v15 = vmul.f32 %v7563_v14, %v19683_v2 }
 0x63c   : > { %13221 = vmatmul.mubr.msk.bf16.gmra.mrb[108].mxu0 %vm661_vm2, %v7303_v3  ;;  %v7559_v3 = vld [vmem:[#allocation2 + $0x31] sm:$0xff] }
 0x63d   : > { %13224 = vmatprep.mubr.msk.bf16.mxu0 %vm661_vm2, %v7304_v50  ;;  %v7294_v50 = vld [vmem:[#allocation2 + $0x118] sm:$0xff] }
 0x63e   : > { %v7311_v28 = vpack.c.bf16 %v7295_v46, %v7294_v50 }
 0x644   : > { %13225 = vmatmul.mubr.msk.bf16.gmra.mrb[112].mxu0 %vm661_vm2, %v7305_v32  ;;  %v7591_v32 = vmul.f32 %v7559_v3, %v19679_v17 }
 0x645   : > { %13228 = vmatprep.mubr.msk.bf16.mxu0 %vm661_vm2, %v7306_v6  ;;  %v19680_v6 = vld [vmem:[#allocation4_spill] sm:$0xff] }
 0x646   : > { %v7590_v39 = vmul.f32 %v7558_v34, %v19680_v6  ;;  %v7564_v34 = vld [vmem:[#allocation2 + $0x59] sm:$0xff] }
 0x648   : > { %v7622_v8 = vpack.c.bf16 %v7591_v32, %v7590_v39  ;;  %v7565_v32 = vld [vmem:[#allocation2 + $0x61] sm:$0xff]  ;;  %v7567_v39 = vld [vmem:[#allocation2 + $0x71] sm:$0xff] }
 0x64c   : > { %13229 = vmatmul.mubr.msk.bf16.gmra.mrb[116].mxu0 %vm661_vm2, %v7307_v4  ;;  %v7561_v4 = vld [vmem:[#allocation2 + $0x41] sm:$0xff] }
 0x64d   : > { %13232 = vmatprep.mubr.msk.bf16.mxu0 %vm661_vm2, %v7308_v62  ;;  %v19681_v62 = vld [vmem:[#allocation3_spill] sm:$0xff] }
 0x64e   : > { %v7592_v29 = vmul.f32 %v7560_v47, %v19681_v62  ;;  %v7597_v47 = vmul.f32 %v7565_v32, %v19686_v22  ;;  %v19688_v62 = vld [vmem:[#allocation12_spill] sm:$0xff]  ;;  %v19691_v32 = vld [vmem:[#allocation15_spill] sm:$0xff] }
 0x64f   : > { %v7598_v14 = vmul.f32 %v7566_v40, %v19688_v62 }
 0x654   : > { %13233 = vmatmul.mubr.msk.bf16.gmra.mrb[120].mxu0 %vm661_vm2, %v7309_v38  ;;  %v7593_v38 = vmul.f32 %v7561_v4, %v19682_v21  ;;  %v19687_v4 = vld [vmem:[#allocation11_spill] sm:$0xff] }
 0x655   : > { %13236 = vmatprep.mubr.msk.bf16.mxu0 %vm661_vm2, %v19678_v60  ;;  %v7562_v60 = vld [vmem:[#allocation2 + $0x49] sm:$0xff]  ;;  %v7599_v21 = vmul.f32 %v7567_v39, %v19687_v4 }
 0x656   : > { %v7594_v3 = vmul.f32 %v7562_v60, %v19684_v30  ;;  %v7623_v50 = vpack.c.bf16 %v7593_v38, %v7592_v29  ;;  %v7568_v29 = vld [vmem:[#allocation2 + $0x79] sm:$0xff]  ;;  %v7571_v38 = vld [vmem:[#allocation2 + $0x91] sm:$0xff] }
 0x657   : > { %v7626_v60 = vpack.c.bf16 %v7599_v21, %v7598_v14  ;;  %v7603_v22 = vmul.f32 %v7571_v38, %v19691_v32  ;;  %v19692_v30 = vld [vmem:[#allocation16_spill] sm:$0xff]  ;;  %v7573_v21 = vld [vmem:[#allocation2 + $0xa1] sm:$0xff] }
 0x658   : > { %v7624_v46 = vpack.c.bf16 %v7595_v15, %v7594_v3  ;;  %v7569_v15 = vld [vmem:[#allocation2 + $0x81] sm:$0xff] }
 0x659   : > { %v19689_v3 = vld [vmem:[#allocation14_spill] sm:$0xff]  ;;  %v19693_v14 = vld [vmem:[#allocation17_spill] sm:$0xff] }
 0x65c   : > { %13237 = vmatmul.mubr.msk.bf16.gmra.mrb[124].mxu0 %vm661_vm2, %v7311_v28  ;;  %v19685_v28 = vld [vmem:[#allocation10_spill] sm:$0xff] }
 0x65d   : > { %13242 = vmatprep.mubr.msk.bf16.mxu0 %vm661_vm2, %v7622_v8  ;;  %v7596_v8 = vmul.f32 %v7564_v34, %v19685_v28  ;;  %v7570_v28 = vld [vmem:[#allocation2 + $0x89] sm:$0xff] }
 0x65e   : > { %v7602_v39 = vmul.f32 %v7570_v28, %v19692_v30 }
 0x65f   : > { %v7625_v2 = vpack.c.bf16 %v7597_v47, %v7596_v8  ;;  %v7572_v8 = vld [vmem:[#allocation2 + $0x99] sm:$0xff]  ;;  %v7575_v47 = vld [vmem:[#allocation2 + $0xb1] sm:$0xff] }
 0x660   : > { %v7628_v40 = vpack.c.bf16 %v7603_v22, %v7602_v39  ;;  %v7577_v22 = vld [vmem:[#allocation2 + $0xc1] sm:$0xff] }
 0x661   : > { %v19696_v39 = vld [vmem:[#allocation21_spill] sm:$0xff] }
 0x664   : > { %13243 = vmatmul.mubr.msk.bf16.vlgmr.msra.gmra.mrb[96].mxu0 %vm661_vm2, %v7623_v50  ;;  %v7600_v50 = vmul.f32 %v7568_v29, %v19689_v3  ;;  %v7574_v29 = vld [vmem:[#allocation2 + $0xa9] sm:$0xff]  ;;  %v19695_v3 = vld [vmem:[#allocation20_spill] sm:$0xff] }
 0x665   : > { %13246 = vmatprep.mubr.msk.bf16.mxu0 %vm661_vm2, %v7624_v46  ;;  %v19690_v46 = vld [vmem:[#allocation13_spill] sm:$0xff]  ;;  %v7606_v38 = vmul.f32 %v7574_v29, %v19695_v3 }
 0x666   : > { %v7601_v34 = vmul.f32 %v7569_v15, %v19690_v46  ;;  %v19694_v15 = vld [vmem:[#allocation19_spill] sm:$0xff] }
 0x667   : > { %v7607_v46 = vmul.f32 %v7575_v47, %v19694_v15 }
 0x668   : > { %v7627_v4 = vpack.c.bf16 %v7601_v34, %v7600_v50  ;;  %v7576_v50 = vld [vmem:[#allocation2 + $0xb9] sm:$0xff]  ;;  %v7579_v34 = vld [vmem:[#allocation2 + $0xd1] sm:$0xff] }
 0x669   : > { %v7630_v28 = vpack.c.bf16 %v7607_v46, %v7606_v38  ;;  %v7581_v46 = vld [vmem:[#allocation2 + $0xe1] sm:$0xff] }
 0x66a   : > { %v7613_v38 = vmul.f32 %v7581_v46, %v19640_v25 }
 0x66c   : > { %13247 = vmatmul.mubr.msk.bf16.gmra.mrb[100].mxu0 %vm661_vm2, %v7625_v2  ;;  %v7604_v2 = vmul.f32 %v7572_v8, %v19630_v31  ;;  %v7578_v8 = vld [vmem:[#allocation2 + $0xc9] sm:$0xff]  ;;  %v19698_v31 = vld [vmem:[#allocation24_spill] sm:$0xff] }
 0x66d   : > { %13250 = vmatprep.mubr.msk.bf16.mxu0 %vm661_vm2, %v7626_v60  ;;  %v7605_v60 = vmul.f32 %v7573_v21, %v19693_v14  ;;  %v19697_v21 = vld [vmem:[#allocation23_spill] sm:$0xff]  ;;  %v7610_v47 = vmul.f32 %v7578_v8, %v19698_v31 }
 0x66e   : > { %v7611_v14 = vmul.f32 %v7579_v34, %v19697_v21 }
 0x66f   : > { %v7629_v32 = vpack.c.bf16 %v7605_v60, %v7604_v2  ;;  %v7580_v2 = vld [vmem:[#allocation2 + $0xd9] sm:$0xff]  ;;  %v7583_v60 = vld [vmem:[#allocation2 + $0xf1] sm:$0xff] }
 0x670   : > { %v7632_v29 = vpack.c.bf16 %v7611_v14, %v7610_v47  ;;  %v7585_v14 = vld [vmem:[#allocation2 + $0x101] sm:$0xff]  ;;  %v7618_v47 = vmul.f32 %v16938_v27, %v19559_v59 }
 0x671   : > { %v14427_v27 = vld [vmem:[%s18711_s17] sm:$0x3f]  }
 0x672   : > { %14402 = vmatprep.subr.msk.bf16.mxu1 %vm8259_vm5, %v14427_v27 }
 0x674   : > { %13251 = vmatmul.mubr.msk.bf16.gmra.mrb[104].mxu0 %vm661_vm2, %v7627_v4  ;;  %v7608_v4 = vmul.f32 %v7576_v50, %v19638_v1  ;;  %v7615_v50 = vmul.f32 %v7583_v60, %v19643_v5  ;;  %v7588_v60 = vld [vmem:[#allocation2 + $0x119] sm:$0xff] }
 0x675   : > { %13254 = vmatprep.mubr.msk.bf16.mxu0 %vm661_vm2, %v7628_v40  ;;  %v7609_v40 = vmul.f32 %v7577_v22, %v19696_v39 }
 0x677   : > { %v7631_v15 = vpack.c.bf16 %v7609_v40, %v7608_v4  ;;  %v7584_v4 = vld [vmem:[#allocation2 + $0xf9] sm:$0xff]  ;;  %v7617_v40 = vmul.f32 %v7585_v14, %v19647_v43 }
 0x67c   : > { %13255 = vmatmul.mubr.msk.bf16.gmra.mrb[108].mxu0 %vm661_vm2, %v7629_v32  ;;  %v7612_v32 = vmul.f32 %v7580_v2, %v19645_v63 }
 0x67d   : > { %13258 = vmatprep.mubr.msk.bf16.mxu0 %vm661_vm2, %v7630_v28  ;;  %v7582_v28 = vld [vmem:[#allocation2 + $0xe9] sm:$0xff] }
 0x67e   : > { %v7614_v22 = vmul.f32 %v7582_v28, %v19642_v52  ;;  %v7633_v34 = vpack.c.bf16 %v7613_v38, %v7612_v32  ;;  %v7589_v32 = vld [vmem:[#allocation2 + $0x121] sm:$0xff]  ;;  %v7620_v38 = vmul.f32 %v7588_v60, %v19560_v41 }
 0x67f   : > { %v7621_v28 = vmul.f32 %v7589_v32, %v19561_v24 }
 0x680   : > { %v7634_v8 = vpack.c.bf16 %v7615_v50, %v7614_v22 }
 0x681   : > { %v7637_v50 = vpack.c.bf16 %v7621_v28, %v7620_v38 }
 0x684   : > { %13259 = vmatmul.mubr.msk.bf16.gmra.mrb[112].mxu0 %vm661_vm2, %v7631_v15  ;;  %v7616_v15 = vmul.f32 %v7584_v4, %v19649_v49 }
 0x685   : > { %13262 = vmatprep.mubr.msk.bf16.mxu0 %vm661_vm2, %v7632_v29  ;;  %v7619_v29 = vmul.f32 %v16940_v42, %v19648_v37  ;;  %v8261_v42 = vsel %vm8259_vm5, %v14427_v27, 0 }
 0x686   : > { %v7635_v2 = vpack.c.bf16 %v7617_v40, %v7616_v15  ;;  %13275 = vmatpush3.bf16.msra.mxu1 %v8261_v42 }
 0x687   : > { %v7636_v46 = vpack.c.bf16 %v7619_v29, %v7618_v47 }
 0x68c   : > { %13263 = vmatmul.mubr.msk.bf16.gmra.mrb[116].mxu0 %vm661_vm2, %v7633_v34 }
 0x68d   : > { %13266 = vmatprep.mubr.msk.bf16.mxu0 %vm661_vm2, %v7634_v8 }
 0x694   : > { %13267 = vmatmul.mubr.msk.bf16.gmra.mrb[120].mxu0 %vm661_vm2, %v7635_v2 }
 0x695   : > { %13270 = vmatprep.mubr.msk.bf16.mxu0 %vm661_vm2, %v7636_v46 }
 0x69c   : > { %13271 = vmatmul.mubr.msk.bf16.gmra.mrb[124].mxu0 %vm661_vm2, %v7637_v50 }
 0x737   : > { %v13244_v22 = vpop.f32.mrb[96].mxu0 }
 0x738   : > { %v7725_v34 = vpop.f32.mrb[97].mxu0 }
 0x739   : > { %7916 = vrot.lane.b32.xlu0 %v7725_v34, %s14439_s22  ;;  %v13245_v8 = vpop.f32.mrb[98].mxu0 }
 0x73a   : > { %v7728_v4 = vpop.f32.mrb[99].mxu0 }
 0x73b   : > { %7918 = vrot.lane.b32.xlu1 %v7728_v4, %s14439_s22 }
 0x73d   : > { %7920 = vrot.lane.b32.xlu0 %v13244_v22, %s14439_s22 }
 0x73f   : > { %7922 = vrot.lane.b32.xlu1 %v13245_v8, %s14439_s22  ;;  %v13248_v14 = vpop.f32.mrb[100].mxu0 }
 0x740   : > { %v7741_v15 = vpop.f32.mrb[101].mxu0 }
 0x741   : > { %7924 = vrot.lane.b32.xlu0 %v7741_v15, %s14439_s22  ;;  %v13249_v40 = vpop.f32.mrb[102].mxu0 }
 0x742   : > { %v7744_v47 = vpop.f32.mrb[103].mxu0 }
 0x743   : > { %7926 = vrot.lane.b32.xlu1 %v7744_v47, %s14439_s22 }
 0x745   : > { %7928 = vrot.lane.b32.xlu0 %v13248_v14, %s14439_s22 }
 0x747   : > { %7930 = vrot.lane.b32.xlu1 %v13249_v40, %s14439_s22  ;;  %v13252_v29 = vpop.f32.mrb[104].mxu0 }
 0x748   : > { %v7757_v2 = vpop.f32.mrb[105].mxu0 }
 0x749   : > { %7932 = vrot.lane.b32.xlu0 %v7757_v2, %s14439_s22  ;;  %v13253_v46 = vpop.f32.mrb[106].mxu0 }
 0x74a   : > { %v7760_v60 = vpop.f32.mrb[107].mxu0 }
 0x74b   : > { %7934 = vrot.lane.b32.xlu1 %v7760_v60, %s14439_s22 }
 0x74d   : > { %7936 = vrot.lane.b32.xlu0 %v13252_v29, %s14439_s22 }
 0x74f   : > { %7938 = vrot.lane.b32.xlu1 %v13253_v46, %s14439_s22  ;;  %v13256_v32 = vpop.f32.mrb[108].mxu0 }
 0x750   : > { %v7773_v38 = vpop.f32.mrb[109].mxu0 }
 0x751   : > { %7940 = vrot.lane.b32.xlu0 %v7773_v38, %s14439_s22  ;;  %v13257_v28 = vpop.f32.mrb[110].mxu0 }
 0x752   : > { %v7776_v50 = vpop.f32.mrb[111].mxu0 }
 0x753   : > { %7942 = vrot.lane.b32.xlu1 %v7776_v50, %s14439_s22 }
 0x755   : > { %7944 = vrot.lane.b32.xlu0 %v13256_v32, %s14439_s22 }
 0x757   : > { %7946 = vrot.lane.b32.xlu1 %v13257_v28, %s14439_s22  ;;  %v13260_v27 = vpop.f32.mrb[112].mxu0  ;;  %v11930_v28 = vld [vmem:[%s18714_s20 + $0x4] sm:$0xf] }
 0x758   : > { %v7789_v42 = vpop.f32.mrb[113].mxu0  ;;  %14403 = vmatprep.subr.msk.bf16.mxu1 %vm1682_vm3, %v11930_v28 }
 0x759   : > { %7948 = vrot.lane.b32.xlu0 %v7789_v42, %s14439_s22  ;;  %v13261_v22 = vpop.f32.mrb[114].mxu0 }
 0x75a   : > { %v7792_v34 = vpop.f32.mrb[115].mxu0 }
 0x75b   : > { %7950 = vrot.lane.b32.xlu1 %v7792_v34, %s14439_s22  ;;  %v17153_v34 = vld [vmem:[%s18709_s15] ss:$0 sm:$0xff] }
 0x75d   : > { %7952 = vrot.lane.b32.xlu0 %v13260_v27, %s14439_s22 }
 0x75f   : > { %7954 = vrot.lane.b32.xlu1 %v13261_v22, %s14439_s22  ;;  %v13264_v8 = vpop.f32.mrb[116].mxu0 }
 0x760   : > { %v7805_v4 = vpop.f32.mrb[117].mxu0 }
 0x761   : > { %7956 = vrot.lane.b32.xlu0 %v7805_v4, %s14439_s22  ;;  %v13265_v14 = vpop.f32.mrb[118].mxu0 }
 0x762   : > { %v7808_v15 = vpop.f32.mrb[119].mxu0 }
 0x763   : > { %7958 = vrot.lane.b32.xlu1 %v7808_v15, %s14439_s22 }
 0x765   : > { %7960 = vrot.lane.b32.xlu0 %v13264_v8, %s14439_s22 }
 0x767   : > { %7962 = vrot.lane.b32.xlu1 %v13265_v14, %s14439_s22  ;;  %v13268_v40 = vpop.f32.mrb[120].mxu0  ;;  %v17161_v14 = vld [vmem:[%s18710_s16] ss:$0 sm:$0xff] }
 0x768   : > { %v7821_v47 = vpop.f32.mrb[121].mxu0 }
 0x769   : > { %7964 = vrot.lane.b32.xlu0 %v7821_v47, %s14439_s22  ;;  %v13269_v29 = vpop.f32.mrb[122].mxu0 }
 0x76a   : > { %v7824_v2 = vpop.f32.mrb[123].mxu0 }
 0x76b   : > { %7966 = vrot.lane.b32.xlu1 %v7824_v2, %s14439_s22 }
 0x76d   : > { %7968 = vrot.lane.b32.xlu0 %v13268_v40, %s14439_s22 }
 0x76f   : > { %7970 = vrot.lane.b32.xlu1 %v13269_v29, %s14439_s22  ;;  %v13272_v46 = vpop.f32.mrb[124].mxu0 }
 0x770   : > { %v7837_v60 = vpop.f32.mrb[125].mxu0 }
 0x771   : > { %7972 = vrot.lane.b32.xlu0 %v7837_v60, %s14439_s22  ;;  %v13273_v32 = vpop.f32.mrb[126].mxu0 }
 0x772   : > { %v7840_v38 = vpop.f32.mrb[127].mxu0 }
 0x773   : > { %7974 = vrot.lane.b32.xlu1 %v7840_v38, %s14439_s22 }
 0x775   : > { %7976 = vrot.lane.b32.xlu0 %v13272_v46, %s14439_s22 }
 0x777   : > { %7978 = vrot.lane.b32.xlu1 %v13273_v32, %s14439_s22 }
 0x7ab   : > { %v7917_v50 = vpop.permute.xlu0 %7916 }
 0x7ac   : > { %8013 = vst.msk [vmem:[%s14582_s5] sm:$0xff] %vm8012_vm6, %v7917_v50 }
 0x7ad   : > { %v7919_v27 = vpop.permute.xlu1 %7918 }
 0x7ae   : > { %8014 = vst.msk [vmem:[%s14582_s5 + $0x8] sm:$0xff] %vm8012_vm6, %v7919_v27 }
 0x7af   : > { %v7921_v42 = vpop.permute.xlu0 %7920 }
 0x7b0   : > { %8015 = vst.msk [vmem:[%s14582_s5 + $0x10] sm:$0xff] %vm8012_vm6, %v7921_v42 }
 0x7b1   : > { %v7923_v22 = vpop.permute.xlu1 %7922 }
 0x7b2   : > { %8016 = vst.msk [vmem:[%s14582_s5 + $0x18] sm:$0xff] %vm8012_vm6, %v7923_v22 }
 0x7b3   : > { %v7925_v8 = vpop.permute.xlu0 %7924  ;;  %v8045_v4 = vld [vmem:[%s14582_s5] sm:$0xff] }
 0x7b4   : > { %8017 = vst.msk [vmem:[%s14582_s5 + $0x20] sm:$0xff] %vm8012_vm6, %v7925_v8  ;;  %v8084_v15 = vmul.f32 %v17153_v34, %v8045_v4 }
 0x7b5   : > { %v7927_v40 = vpop.permute.xlu1 %7926  ;;  %v8046_v47 = vld [vmem:[%s14582_s5 + $0x8] sm:$0xff] }
 0x7b6   : > { %8018 = vst.msk [vmem:[%s14582_s5 + $0x28] sm:$0xff] %vm8012_vm6, %v7927_v40  ;;  %v8085_v29 = vmul.f32 %v17153_v34, %v8046_v47  ;;  %v8123_v2 = vadd.f32 %v17161_v14, %v8084_v15 }
 0x7b7   : > { %v7929_v46 = vpop.permute.xlu0 %7928  ;;  %v8047_v60 = vld [vmem:[%s14582_s5 + $0x10] sm:$0xff] }
 0x7b8   : > { %8019 = vst.msk [vmem:[%s14582_s5 + $0x30] sm:$0xff] %vm8012_vm6, %v7929_v46  ;;  %v8124_v32 = vadd.f32 %v17161_v14, %v8085_v29  ;;  %v8086_v38 = vmul.f32 %v17153_v34, %v8047_v60  ;;  %v8155_v42 = vmax.f32 %v8123_v2, 0.0 }
 0x7b9   : > { %v7931_v50 = vpop.permute.xlu1 %7930  ;;  %v8048_v27 = vld [vmem:[%s14582_s5 + $0x18] sm:$0xff] }
 0x7ba   : > { %8020 = vst.msk [vmem:[%s14582_s5 + $0x38] sm:$0xff] %vm8012_vm6, %v7931_v50  ;;  %v8156_v22 = vmax.f32 %v8124_v32, 0.0  ;;  %v8087_v8 = vmul.f32 %v17153_v34, %v8048_v27  ;;  %v8125_v4 = vadd.f32 %v17161_v14, %v8086_v38 }
 0x7bb   : > { %v7933_v15 = vpop.permute.xlu0 %7932  ;;  %v8049_v40 = vld [vmem:[%s14582_s5 + $0x20] sm:$0xff] }
 0x7bc   : > { %8021 = vst.msk [vmem:[%s14582_s5 + $0x40] sm:$0xff] %vm8012_vm6, %v7933_v15  ;;  %v8187_v47 = vpack.c.bf16 %v8156_v22, %v8155_v42  ;;  %v8126_v29 = vadd.f32 %v17161_v14, %v8087_v8  ;;  %v8088_v46 = vmul.f32 %v17153_v34, %v8049_v40  ;;  %v8157_v32 = vmax.f32 %v8125_v4, 0.0 }
 0x7bd   : > { %v7935_v60 = vpop.permute.xlu1 %7934  ;;  %v8050_v2 = vld [vmem:[%s14582_s5 + $0x28] sm:$0xff] }
 0x7be   : > { %8022 = vst.msk [vmem:[%s14582_s5 + $0x48] sm:$0xff] %vm8012_vm6, %v7935_v60  ;;  %13276 = vmatprep.mubr.msk.bf16.mxu1 %vm8210_vm7, %v8187_v47  ;;  %v8158_v38 = vmax.f32 %v8126_v29, 0.0  ;;  %v8089_v50 = vmul.f32 %v17153_v34, %v8050_v2  ;;  %v8127_v27 = vadd.f32 %v17161_v14, %v8088_v46  ;;  %v8746_v60 = vsel %vm1682_vm3, %v11930_v28, 0 }
 0x7bf   : > { %v7937_v15 = vpop.permute.xlu0 %7936  ;;  %v8051_v42 = vld [vmem:[%s14582_s5 + $0x30] sm:$0xff] }
 0x7c0   : > { %8023 = vst.msk [vmem:[%s14582_s5 + $0x50] sm:$0xff] %vm8012_vm6, %v7937_v15  ;;  %v8188_v22 = vpack.c.bf16 %v8158_v38, %v8157_v32  ;;  %v8128_v8 = vadd.f32 %v17161_v14, %v8089_v50  ;;  %v8090_v40 = vmul.f32 %v17153_v34, %v8051_v42  ;;  %v8159_v29 = vmax.f32 %v8127_v27, 0.0 }
 0x7c1   : > { %v7939_v47 = vpop.permute.xlu1 %7938  ;;  %v8052_v4 = vld [vmem:[%s14582_s5 + $0x38] sm:$0xff] }
 0x7c2   : > { %8024 = vst.msk [vmem:[%s14582_s5 + $0x58] sm:$0xff] %vm8012_vm6, %v7939_v47  ;;  %13277 = vmatmul.mubr.msk.bf16.vlgmr.msra.gmra.mrb[32].mxu1 %vm8210_vm7, %v8188_v22  ;;  %v8160_v46 = vmax.f32 %v8128_v8, 0.0  ;;  %v8091_v2 = vmul.f32 %v17153_v34, %v8052_v4  ;;  %v8129_v32 = vadd.f32 %v17161_v14, %v8090_v40 }
 0x7c3   : > { %v7941_v38 = vpop.permute.xlu0 %7940  ;;  %v8053_v50 = vld [vmem:[%s14582_s5 + $0x40] sm:$0xff]  ;;  %13309 = vmatpush3.bf16.msra.mxu1 %v8746_v60 }
 0x7c4   : > { %8025 = vst.msk [vmem:[%s14582_s5 + $0x60] sm:$0xff] %vm8012_vm6, %v7941_v38  ;;  %v8189_v28 = vpack.c.bf16 %v8160_v46, %v8159_v29  ;;  %v8130_v15 = vadd.f32 %v17161_v14, %v8091_v2  ;;  %v8092_v42 = vmul.f32 %v17153_v34, %v8053_v50  ;;  %v8161_v8 = vmax.f32 %v8129_v32, 0.0 }
 0x7c5   : > { %v7943_v22 = vpop.permute.xlu1 %7942  ;;  %v8054_v27 = vld [vmem:[%s14582_s5 + $0x48] sm:$0xff] }
 0x7c6   : > { %8026 = vst.msk [vmem:[%s14582_s5 + $0x68] sm:$0xff] %vm8012_vm6, %v7943_v22  ;;  %13280 = vmatprep.mubr.msk.bf16.mxu1 %vm8210_vm7, %v8189_v28  ;;  %v8162_v40 = vmax.f32 %v8130_v15, 0.0  ;;  %v8093_v47 = vmul.f32 %v17153_v34, %v8054_v27  ;;  %v8131_v60 = vadd.f32 %v17161_v14, %v8092_v42 }
 0x7c7   : > { %v7945_v4 = vpop.permute.xlu0 %7944  ;;  %v8055_v29 = vld [vmem:[%s14582_s5 + $0x50] sm:$0xff] }
 0x7c8   : > { %8027 = vst.msk [vmem:[%s14582_s5 + $0x70] sm:$0xff] %vm8012_vm6, %v7945_v4  ;;  %v8190_v46 = vpack.c.bf16 %v8162_v40, %v8161_v8  ;;  %v8132_v2 = vadd.f32 %v17161_v14, %v8093_v47  ;;  %v8094_v38 = vmul.f32 %v17153_v34, %v8055_v29  ;;  %v8163_v28 = vmax.f32 %v8131_v60, 0.0 }
 0x7c9   : > { %v7947_v50 = vpop.permute.xlu1 %7946  ;;  %v8056_v32 = vld [vmem:[%s14582_s5 + $0x58] sm:$0xff] }
 0x7ca   : > { %8028 = vst.msk [vmem:[%s14582_s5 + $0x78] sm:$0xff] %vm8012_vm6, %v7947_v50  ;;  %13281 = vmatmul.mubr.msk.bf16.gmra.mrb[36].mxu1 %vm8210_vm7, %v8190_v46  ;;  %v8164_v15 = vmax.f32 %v8132_v2, 0.0  ;;  %v8095_v42 = vmul.f32 %v17153_v34, %v8056_v32  ;;  %v8133_v22 = vadd.f32 %v17161_v14, %v8094_v38 }
 0x7cb   : > { %v7949_v27 = vpop.permute.xlu0 %7948  ;;  %v8057_v8 = vld [vmem:[%s14582_s5 + $0x60] sm:$0xff] }
 0x7cc   : > { %8029 = vst.msk [vmem:[%s14582_s5 + $0x80] sm:$0xff] %vm8012_vm6, %v7949_v27  ;;  %v8191_v40 = vpack.c.bf16 %v8164_v15, %v8163_v28  ;;  %v8134_v47 = vadd.f32 %v17161_v14, %v8095_v42  ;;  %v8096_v4 = vmul.f32 %v17153_v34, %v8057_v8  ;;  %v8165_v46 = vmax.f32 %v8133_v22, 0.0 }
 0x7cd   : > { %v7951_v29 = vpop.permute.xlu1 %7950  ;;  %v8058_v60 = vld [vmem:[%s14582_s5 + $0x68] sm:$0xff] }
 0x7ce   : > { %8030 = vst.msk [vmem:[%s14582_s5 + $0x88] sm:$0xff] %vm8012_vm6, %v7951_v29  ;;  %13284 = vmatprep.mubr.msk.bf16.mxu1 %vm8210_vm7, %v8191_v40  ;;  %v8166_v2 = vmax.f32 %v8134_v47, 0.0  ;;  %v8097_v38 = vmul.f32 %v17153_v34, %v8058_v60  ;;  %v8135_v50 = vadd.f32 %v17161_v14, %v8096_v4 }
 0x7cf   : > { %v7953_v32 = vpop.permute.xlu0 %7952  ;;  %v8059_v28 = vld [vmem:[%s14582_s5 + $0x70] sm:$0xff] }
 0x7d0   : > { %8031 = vst.msk [vmem:[%s14582_s5 + $0x90] sm:$0xff] %vm8012_vm6, %v7953_v32  ;;  %v8192_v15 = vpack.c.bf16 %v8166_v2, %v8165_v46  ;;  %v8136_v42 = vadd.f32 %v17161_v14, %v8097_v38  ;;  %v8098_v27 = vmul.f32 %v17153_v34, %v8059_v28  ;;  %v8167_v40 = vmax.f32 %v8135_v50, 0.0 }
 0x7d1   : > { %v7955_v8 = vpop.permute.xlu1 %7954  ;;  %v8060_v22 = vld [vmem:[%s14582_s5 + $0x78] sm:$0xff] }
 0x7d2   : > { %8032 = vst.msk [vmem:[%s14582_s5 + $0x98] sm:$0xff] %vm8012_vm6, %v7955_v8  ;;  %13285 = vmatmul.mubr.msk.bf16.gmra.mrb[40].mxu1 %vm8210_vm7, %v8192_v15  ;;  %v8168_v47 = vmax.f32 %v8136_v42, 0.0  ;;  %v8099_v4 = vmul.f32 %v17153_v34, %v8060_v22  ;;  %v8137_v29 = vadd.f32 %v17161_v14, %v8098_v27 }
 0x7d3   : > { %v7957_v60 = vpop.permute.xlu0 %7956  ;;  %v8061_v46 = vld [vmem:[%s14582_s5 + $0x80] sm:$0xff] }
 0x7d4   : > { %8033 = vst.msk [vmem:[%s14582_s5 + $0xa0] sm:$0xff] %vm8012_vm6, %v7957_v60  ;;  %v8193_v2 = vpack.c.bf16 %v8168_v47, %v8167_v40  ;;  %v8138_v38 = vadd.f32 %v17161_v14, %v8099_v4  ;;  %v8100_v32 = vmul.f32 %v17153_v34, %v8061_v46  ;;  %v8169_v15 = vmax.f32 %v8137_v29, 0.0 }
 0x7d5   : > { %v7959_v28 = vpop.permute.xlu1 %7958  ;;  %v8062_v50 = vld [vmem:[%s14582_s5 + $0x88] sm:$0xff] }
 0x7d6   : > { %8034 = vst.msk [vmem:[%s14582_s5 + $0xa8] sm:$0xff] %vm8012_vm6, %v7959_v28  ;;  %13288 = vmatprep.mubr.msk.bf16.mxu1 %vm8210_vm7, %v8193_v2  ;;  %v8170_v42 = vmax.f32 %v8138_v38, 0.0  ;;  %v8101_v27 = vmul.f32 %v17153_v34, %v8062_v50  ;;  %v8139_v8 = vadd.f32 %v17161_v14, %v8100_v32 }
 0x7d7   : > { %v7961_v22 = vpop.permute.xlu0 %7960  ;;  %v8063_v40 = vld [vmem:[%s14582_s5 + $0x90] sm:$0xff] }
 0x7d8   : > { %8035 = vst.msk [vmem:[%s14582_s5 + $0xb0] sm:$0xff] %vm8012_vm6, %v7961_v22  ;;  %v8194_v47 = vpack.c.bf16 %v8170_v42, %v8169_v15  ;;  %v8140_v4 = vadd.f32 %v17161_v14, %v8101_v27  ;;  %v8102_v60 = vmul.f32 %v17153_v34, %v8063_v40  ;;  %v8171_v2 = vmax.f32 %v8139_v8, 0.0 }
 0x7d9   : > { %v7963_v46 = vpop.permute.xlu1 %7962  ;;  %v8064_v29 = vld [vmem:[%s14582_s5 + $0x98] sm:$0xff] }
 0x7da   : > { %8036 = vst.msk [vmem:[%s14582_s5 + $0xb8] sm:$0xff] %vm8012_vm6, %v7963_v46  ;;  %13289 = vmatmul.mubr.msk.bf16.gmra.mrb[44].mxu1 %vm8210_vm7, %v8194_v47  ;;  %v8172_v38 = vmax.f32 %v8140_v4, 0.0  ;;  %v8103_v32 = vmul.f32 %v17153_v34, %v8064_v29  ;;  %v8141_v28 = vadd.f32 %v17161_v14, %v8102_v60 }
 0x7db   : > { %v7965_v50 = vpop.permute.xlu0 %7964  ;;  %v8065_v15 = vld [vmem:[%s14582_s5 + $0xa0] sm:$0xff] }
 0x7dc   : > { %8037 = vst.msk [vmem:[%s14582_s5 + $0xc0] sm:$0xff] %vm8012_vm6, %v7965_v50  ;;  %v8195_v42 = vpack.c.bf16 %v8172_v38, %v8171_v2  ;;  %v8142_v27 = vadd.f32 %v17161_v14, %v8103_v32  ;;  %v8104_v22 = vmul.f32 %v17153_v34, %v8065_v15  ;;  %v8173_v47 = vmax.f32 %v8141_v28, 0.0 }
 0x7dd   : > { %v7967_v40 = vpop.permute.xlu1 %7966  ;;  %v8066_v8 = vld [vmem:[%s14582_s5 + $0xa8] sm:$0xff] }
 0x7de   : > { %8038 = vst.msk [vmem:[%s14582_s5 + $0xc8] sm:$0xff] %vm8012_vm6, %v7967_v40  ;;  %13292 = vmatprep.mubr.msk.bf16.mxu1 %vm8210_vm7, %v8195_v42  ;;  %v8174_v4 = vmax.f32 %v8142_v27, 0.0  ;;  %v8105_v60 = vmul.f32 %v17153_v34, %v8066_v8  ;;  %v8143_v46 = vadd.f32 %v17161_v14, %v8104_v22 }
 0x7df   : > { %v7969_v29 = vpop.permute.xlu0 %7968  ;;  %v8067_v2 = vld [vmem:[%s14582_s5 + $0xb0] sm:$0xff] }
 0x7e0   : > { %8039 = vst.msk [vmem:[%s14582_s5 + $0xd0] sm:$0xff] %vm8012_vm6, %v7969_v29  ;;  %v8196_v38 = vpack.c.bf16 %v8174_v4, %v8173_v47  ;;  %v8144_v32 = vadd.f32 %v17161_v14, %v8105_v60  ;;  %v8106_v50 = vmul.f32 %v17153_v34, %v8067_v2  ;;  %v8175_v42 = vmax.f32 %v8143_v46, 0.0 }
 0x7e1   : > { %v7971_v15 = vpop.permute.xlu1 %7970  ;;  %v8068_v28 = vld [vmem:[%s14582_s5 + $0xb8] sm:$0xff] }
 0x7e2   : > { %8040 = vst.msk [vmem:[%s14582_s5 + $0xd8] sm:$0xff] %vm8012_vm6, %v7971_v15  ;;  %13293 = vmatmul.mubr.msk.bf16.gmra.mrb[48].mxu1 %vm8210_vm7, %v8196_v38  ;;  %v8176_v27 = vmax.f32 %v8144_v32, 0.0  ;;  %v8107_v22 = vmul.f32 %v17153_v34, %v8068_v28  ;;  %v8145_v40 = vadd.f32 %v17161_v14, %v8106_v50 }
 0x7e3   : > { %v7973_v8 = vpop.permute.xlu0 %7972  ;;  %v8069_v47 = vld [vmem:[%s14582_s5 + $0xc0] sm:$0xff] }
 0x7e4   : > { %8041 = vst.msk [vmem:[%s14582_s5 + $0xe0] sm:$0xff] %vm8012_vm6, %v7973_v8  ;;  %v8197_v4 = vpack.c.bf16 %v8176_v27, %v8175_v42  ;;  %v8146_v60 = vadd.f32 %v17161_v14, %v8107_v22  ;;  %v8108_v29 = vmul.f32 %v17153_v34, %v8069_v47  ;;  %v8177_v38 = vmax.f32 %v8145_v40, 0.0 }
 0x7e5   : > { %v7975_v2 = vpop.permute.xlu1 %7974  ;;  %v8070_v46 = vld [vmem:[%s14582_s5 + $0xc8] sm:$0xff] }
 0x7e6   : > { %8042 = vst.msk [vmem:[%s14582_s5 + $0xe8] sm:$0xff] %vm8012_vm6, %v7975_v2  ;;  %13296 = vmatprep.mubr.msk.bf16.mxu1 %vm8210_vm7, %v8197_v4  ;;  %v8178_v32 = vmax.f32 %v8146_v60, 0.0  ;;  %v8109_v50 = vmul.f32 %v17153_v34, %v8070_v46  ;;  %v8147_v15 = vadd.f32 %v17161_v14, %v8108_v29 }
 0x7e7   : > { %v7977_v28 = vpop.permute.xlu0 %7976  ;;  %v8071_v42 = vld [vmem:[%s14582_s5 + $0xd0] sm:$0xff] }
 0x7e8   : > { %8043 = vst.msk [vmem:[%s14582_s5 + $0xf0] sm:$0xff] %vm8012_vm6, %v7977_v28  ;;  %v8198_v27 = vpack.c.bf16 %v8178_v32, %v8177_v38  ;;  %v8148_v22 = vadd.f32 %v17161_v14, %v8109_v50  ;;  %v8110_v8 = vmul.f32 %v17153_v34, %v8071_v42  ;;  %v8179_v40 = vmax.f32 %v8147_v15, 0.0 }
 0x7e9   : > { %v7979_v47 = vpop.permute.xlu1 %7978  ;;  %v8072_v2 = vld [vmem:[%s14582_s5 + $0xd8] sm:$0xff] }
 0x7ea   : > { %8044 = vst.msk [vmem:[%s14582_s5 + $0xf8] sm:$0xff] %vm8012_vm6, %v7979_v47  ;;  %13297 = vmatmul.mubr.msk.bf16.gmra.mrb[52].mxu1 %vm8210_vm7, %v8198_v27  ;;  %v8180_v4 = vmax.f32 %v8148_v22, 0.0  ;;  %v8111_v60 = vmul.f32 %v17153_v34, %v8072_v2  ;;  %v8149_v29 = vadd.f32 %v17161_v14, %v8110_v8 }
 0x7eb   : > { %v8073_v46 = vld [vmem:[%s14582_s5 + $0xe0] sm:$0xff] }
 0x7ec   : > { %v8199_v38 = vpack.c.bf16 %v8180_v4, %v8179_v40  ;;  %v8150_v32 = vadd.f32 %v17161_v14, %v8111_v60  ;;  %v8112_v50 = vmul.f32 %v17153_v34, %v8073_v46  ;;  %v8181_v42 = vmax.f32 %v8149_v29, 0.0 }
 0x7ed   : > { %v8074_v28 = vld [vmem:[%s14582_s5 + $0xe8] sm:$0xff] }
 0x7ee   : > { %13300 = vmatprep.mubr.msk.bf16.mxu1 %vm8210_vm7, %v8199_v38  ;;  %v8182_v47 = vmax.f32 %v8150_v32, 0.0  ;;  %v8113_v27 = vmul.f32 %v17153_v34, %v8074_v28  ;;  %v8151_v15 = vadd.f32 %v17161_v14, %v8112_v50 }
 0x7ef   : > { %v8075_v22 = vld [vmem:[%s14582_s5 + $0xf0] sm:$0xff] }
 0x7f0   : > { %v8200_v2 = vpack.c.bf16 %v8182_v47, %v8181_v42  ;;  %v8152_v24 = vadd.f32 %v17161_v14, %v8113_v27  ;;  %v8114_v8 = vmul.f32 %v17153_v34, %v8075_v22  ;;  %v8183_v4 = vmax.f32 %v8151_v15, 0.0  ;;  %v8647_v47 = vld [vmem:[#allocation2 + $0x8] sm:$0xff]  ;;  %v8648_v27 = vld [vmem:[#allocation2 + $0x10] sm:$0xff]  ;;  %v17344_v22 = vld [vmem:[%s18713_s19] ss:$0 sm:$0xff] }
 0x7f1   : > { %v8076_v40 = vld [vmem:[%s14582_s5 + $0xf8] sm:$0xff]  ;;  %v8679_v15 = vpack.c.bf16 %v8648_v27, %v8647_v47 }
 0x7f2   : > { %13301 = vmatmul.mubr.msk.bf16.gmra.mrb[56].mxu1 %vm8210_vm7, %v8200_v2  ;;  %v8184_v60 = vmax.f32 %v8152_v24, 0.0  ;;  %v8115_v46 = vmul.f32 %v17153_v34, %v8076_v40  ;;  %v8153_v29 = vadd.f32 %v17161_v14, %v8114_v8  ;;  %v8646_v24 = vld [vmem:[%s18714_s20] sm:$0xf] }
 0x7f3   : > { %14404 = vmatprep.subr.msk.bf16.mxu1 %vm1682_vm3, %v8646_v24  ;;  %v17339_v34 = vld [vmem:[%s18712_s18] ss:$0 sm:$0xff] }
 0x7f4   : > { %v8201_v38 = vpack.c.bf16 %v8184_v60, %v8183_v4  ;;  %v8154_v32 = vadd.f32 %v17161_v14, %v8115_v46  ;;  %v8185_v50 = vmax.f32 %v8153_v29, 0.0 }
 0x7f6   : > { %13304 = vmatprep.mubr.msk.bf16.mxu1 %vm8210_vm7, %v8201_v38  ;;  %v8186_v28 = vmax.f32 %v8154_v32, 0.0 }
 0x7f8   : > { %v8202_v42 = vpack.c.bf16 %v8186_v28, %v8185_v50 }
 0x7fa   : > { %13305 = vmatmul.mubr.msk.bf16.gmra.mrb[60].mxu1 %vm8210_vm7, %v8202_v42 }
 0x7fb   : > { %13310 = vmatprep.mubr.msk.bf16.mxu1 %vm661_vm2, %v8679_v15 }
 0x895   : > { %v13278_v14 = vpop.f32.mrb[32].mxu1 }
 0x896   : > { %v8433_v2 = vmul.f32 %v13278_v14, %v17339_v34  ;;  %v8297_v8 = vpop.f32.mrb[33].mxu1 }
 0x897   : > { %v8431_v40 = vmul.f32 %v17339_v34, %v8297_v8  ;;  %v13279_v4 = vpop.f32.mrb[34].mxu1 }
 0x898   : > { %v8472_v60 = vadd.f32 %v17344_v22, %v8433_v2  ;;  %v8434_v46 = vmul.f32 %v13279_v4, %v17339_v34  ;;  %v8300_v29 = vpop.f32.mrb[35].mxu1 }
 0x899   : > { %v8470_v38 = vadd.f32 %v17344_v22, %v8431_v40  ;;  %v8432_v32 = vmul.f32 %v17339_v34, %v8300_v29 }
 0x89a   : > { %v8504_v50 = vmax.f32 %v8472_v60, 0.0  ;;  %v8473_v28 = vadd.f32 %v17344_v22, %v8434_v46 }
 0x89b   : > { %v8502_v42 = vmax.f32 %v8470_v38, 0.0  ;;  %v8471_v47 = vadd.f32 %v17344_v22, %v8432_v32 }
 0x89c   : > { %8536 = vst.msk [vmem:[#allocation2 + $0x28] sm:$0xff] %vm661_vm2, %v8504_v50  ;;  %v8505_v27 = vmax.f32 %v8473_v28, 0.0 }
 0x89d   : > { %8534 = vst.msk [vmem:[#allocation2 + $0x18] sm:$0xff] %vm661_vm2, %v8502_v42  ;;  %v8503_v15 = vmax.f32 %v8471_v47, 0.0  ;;  %v13282_v14 = vpop.f32.mrb[36].mxu1 }
 0x89e   : > { %8537 = vst.msk [vmem:[#allocation2 + $0x30] sm:$0xff] %vm661_vm2, %v8505_v27  ;;  %v8437_v2 = vmul.f32 %v13282_v14, %v17339_v34  ;;  %v8313_v8 = vpop.f32.mrb[37].mxu1 }
 0x89f   : > { %8535 = vst.msk [vmem:[#allocation2 + $0x20] sm:$0xff] %vm661_vm2, %v8503_v15  ;;  %v8435_v40 = vmul.f32 %v17339_v34, %v8313_v8  ;;  %v13283_v4 = vpop.f32.mrb[38].mxu1 }
 0x8a0   : > { %v8476_v60 = vadd.f32 %v17344_v22, %v8437_v2  ;;  %v8438_v46 = vmul.f32 %v13283_v4, %v17339_v34  ;;  %v8316_v29 = vpop.f32.mrb[39].mxu1 }
 0x8a1   : > { %v8474_v38 = vadd.f32 %v17344_v22, %v8435_v40  ;;  %v8436_v32 = vmul.f32 %v17339_v34, %v8316_v29 }
 0x8a2   : > { %v8508_v50 = vmax.f32 %v8476_v60, 0.0  ;;  %v8477_v28 = vadd.f32 %v17344_v22, %v8438_v46 }
 0x8a3   : > { %v8506_v42 = vmax.f32 %v8474_v38, 0.0  ;;  %v8475_v47 = vadd.f32 %v17344_v22, %v8436_v32  ;;  %v8958_v32 = vsel %vm1682_vm3, %v8646_v24, 0 }
 0x8a4   : > { %8540 = vst.msk [vmem:[#allocation2 + $0x48] sm:$0xff] %vm661_vm2, %v8508_v50  ;;  %v8509_v27 = vmax.f32 %v8477_v28, 0.0  ;;  %v8649_v4 = vld [vmem:[#allocation2 + $0x18] sm:$0xff]  ;;  %v8651_v50 = vld [vmem:[#allocation2 + $0x28] sm:$0xff] }
 0x8a5   : > { %8538 = vst.msk [vmem:[#allocation2 + $0x38] sm:$0xff] %vm661_vm2, %v8506_v42  ;;  %v8507_v15 = vmax.f32 %v8475_v47, 0.0  ;;  %v13286_v14 = vpop.f32.mrb[40].mxu1  ;;  %v8652_v2 = vld [vmem:[#allocation2 + $0x30] sm:$0xff] }
 0x8a6   : > { %8541 = vst.msk [vmem:[#allocation2 + $0x50] sm:$0xff] %vm661_vm2, %v8509_v27  ;;  %v8441_v8 = vmul.f32 %v13286_v14, %v17339_v34  ;;  %v8329_v40 = vpop.f32.mrb[41].mxu1  ;;  %v8650_v60 = vld [vmem:[#allocation2 + $0x20] sm:$0xff]  ;;  %v17377_v27 = vpack.c.bf16 %v8652_v2, %v8651_v50  ;;  %v17382_v14 = vld [vmem:[%s18714_s20 + $0x8] sm:$0xf] }
 0x8a7   : > { %8539 = vst.msk [vmem:[#allocation2 + $0x40] sm:$0xff] %vm661_vm2, %v8507_v15  ;;  %v8439_v46 = vmul.f32 %v17339_v34, %v8329_v40  ;;  %v13287_v29 = vpop.f32.mrb[42].mxu1  ;;  %v17372_v38 = vpack.c.bf16 %v8650_v60, %v8649_v4  ;;  %v17384_v15 = vld [vmem:[#allocation2 + $0x17] sm:$0xff]  ;;  %v17386_v40 = vld [vmem:[#allocation2 + $0x1f] sm:$0xff] }
 0x8a8   : > { %v8480_v28 = vadd.f32 %v17344_v22, %v8441_v8  ;;  %v8442_v42 = vmul.f32 %v13287_v29, %v17339_v34  ;;  %v8332_v47 = vpop.f32.mrb[43].mxu1  ;;  %19700 = vst [vmem:[#allocation104_spill] sm:$0xff] %v17377_v27  ;;  %v17404_v50 = vmul.f32 %v17386_v40, %v19650_v0 }
 0x8a9   : > { %19699 = vst [vmem:[#allocation99_spill] sm:$0xff] %v17372_v38  ;;  %v8478_v4 = vadd.f32 %v17344_v22, %v8439_v46  ;;  %v8440_v24 = vmul.f32 %v17339_v34, %v8332_v47  ;;  %13311 = vmatmul.mubr.msk.bf16.vlgmr.msra.gmra.mrb[64].mxu1 %vm661_vm2, %v17372_v38  ;;  %v17400_v46 = vmul.f32 %v17384_v15, %v15220_v35 }
 0x8aa   : > { %v8512_v8 = vmax.f32 %v8480_v28, 0.0  ;;  %v8481_v2 = vadd.f32 %v17344_v22, %v8442_v42  ;;  %13343 = vmatpush3.bf16.msra.mxu1 %v8958_v32  ;;  %13314 = vmatprep.mubr.msk.bf16.mxu1 %vm661_vm2, %v17377_v27  ;;  %19702 = vst [vmem:[#allocation101_spill] sm:$0xff] %v17404_v50 }
 0x8ab   : > { %v8510_v60 = vmax.f32 %v8478_v4, 0.0  ;;  %v8479_v29 = vadd.f32 %v17344_v22, %v8440_v24  ;;  %14405 = vmatprep.subr.msk.bf16.mxu1 %vm1682_vm3, %v17382_v14  ;;  %19701 = vst [vmem:[#allocation100_spill] sm:$0xff] %v17400_v46 }
 0x8ac   : > { %8544 = vst.msk [vmem:[#allocation2 + $0x68] sm:$0xff] %vm661_vm2, %v8512_v8  ;;  %v8513_v32 = vmax.f32 %v8481_v2, 0.0  ;;  %v8653_v38 = vld [vmem:[#allocation2 + $0x38] sm:$0xff] }
 0x8ad   : > { %8542 = vst.msk [vmem:[#allocation2 + $0x58] sm:$0xff] %vm661_vm2, %v8510_v60  ;;  %v8511_v28 = vmax.f32 %v8479_v29, 0.0  ;;  %v13290_v42 = vpop.f32.mrb[44].mxu1  ;;  %v8656_v47 = vld [vmem:[#allocation2 + $0x50] sm:$0xff]  ;;  %v8655_v60 = vld [vmem:[#allocation2 + $0x48] sm:$0xff] }
 0x8ae   : > { %8545 = vst.msk [vmem:[#allocation2 + $0x70] sm:$0xff] %vm661_vm2, %v8513_v32  ;;  %v8445_v24 = vmul.f32 %v13290_v42, %v17339_v34  ;;  %v8345_v27 = vpop.f32.mrb[45].mxu1  ;;  %v8654_v41 = vld [vmem:[#allocation2 + $0x40] sm:$0xff]  ;;  %v17418_v46 = vpack.c.bf16 %v8656_v47, %v8655_v60  ;;  %v17420_v32 = vld [vmem:[#allocation2 + $0x37] sm:$0xff] }
 0x8af   : > { %8543 = vst.msk [vmem:[#allocation2 + $0x60] sm:$0xff] %vm661_vm2, %v8511_v28  ;;  %v8443_v8 = vmul.f32 %v17339_v34, %v8345_v27  ;;  %v13291_v2 = vpop.f32.mrb[46].mxu1  ;;  %v17414_v37 = vpack.c.bf16 %v8654_v41, %v8653_v38  ;;  %v17422_v42 = vld [vmem:[#allocation2 + $0x3f] sm:$0xff] }
 0x8b0   : > { %v8484_v29 = vadd.f32 %v17344_v22, %v8445_v24  ;;  %v8446_v59 = vmul.f32 %v13291_v2, %v17339_v34  ;;  %v8348_v4 = vpop.f32.mrb[47].mxu1  ;;  %19704 = vst [vmem:[#allocation113_spill] sm:$0xff] %v17418_v46  ;;  %v17432_v24 = vld [vmem:[#allocation2 + $0x47] sm:$0xff]  ;;  %v17434_v2 = vld [vmem:[#allocation2 + $0x4f] sm:$0xff] }
 0x8b1   : > { %19703 = vst [vmem:[#allocation109_spill] sm:$0xff] %v17414_v37  ;;  %v8482_v50 = vadd.f32 %v17344_v22, %v8443_v8  ;;  %v8444_v28 = vmul.f32 %v17339_v34, %v8348_v4  ;;  %13315 = vmatmul.mubr.msk.bf16.gmra.mrb[68].mxu1 %vm661_vm2, %v17414_v37  ;;  %v17438_v8 = vmul.f32 %v17420_v32, %v19323_v23 }
 0x8b2   : > { %v8516_v41 = vmax.f32 %v8484_v29, 0.0  ;;  %v8485_v38 = vadd.f32 %v17344_v22, %v8446_v59  ;;  %13318 = vmatprep.mubr.msk.bf16.mxu1 %vm661_vm2, %v17418_v46  ;;  %v17442_v4 = vmul.f32 %v17422_v42, %v19324_v51  ;;  %v17452_v5 = vmul.f32 %v17432_v24, %v19339_v56 }
 0x8b3   : > { %v8514_v27 = vmax.f32 %v8482_v50, 0.0  ;;  %v8483_v47 = vadd.f32 %v17344_v22, %v8444_v28  ;;  %19705 = vst [vmem:[#allocation116_spill] sm:$0xff] %v17438_v8 }
 0x8b4   : > { %19706 = vst [vmem:[#allocation117_spill] sm:$0xff] %v17442_v4  ;;  %8548 = vst.msk [vmem:[#allocation2 + $0x88] sm:$0xff] %vm661_vm2, %v8516_v41  ;;  %v8517_v59 = vmax.f32 %v8485_v38, 0.0  ;;  %v8657_v43 = vld [vmem:[#allocation2 + $0x58] sm:$0xff]  ;;  %v17456_v41 = vmul.f32 %v17434_v2, %v19333_v58 }
 0x8b5   : > { %8546 = vst.msk [vmem:[#allocation2 + $0x78] sm:$0xff] %vm661_vm2, %v8514_v27  ;;  %v8515_v50 = vmax.f32 %v8483_v47, 0.0  ;;  %v13294_v60 = vpop.f32.mrb[48].mxu1  ;;  %v8660_v29 = vld [vmem:[#allocation2 + $0x70] sm:$0xff]  ;;  %19707 = vst [vmem:[#allocation53_spill] sm:$0xff] %v17452_v5 }
 0x8b6   : > { %8549 = vst.msk [vmem:[#allocation2 + $0x90] sm:$0xff] %vm661_vm2, %v8517_v59  ;;  %v8449_v46 = vmul.f32 %v13294_v60, %v17339_v34  ;;  %v8361_v37 = vpop.f32.mrb[49].mxu1  ;;  %v8658_v49 = vld [vmem:[#allocation2 + $0x60] sm:$0xff]  ;;  %19708 = vst [vmem:[#allocation40_spill] sm:$0xff] %v17456_v41  ;;  %v8659_v59 = vld [vmem:[#allocation2 + $0x68] sm:$0xff] }
 0x8b7   : > { %8547 = vst.msk [vmem:[#allocation2 + $0x80] sm:$0xff] %vm661_vm2, %v8515_v50  ;;  %v8447_v38 = vmul.f32 %v17339_v34, %v8361_v37  ;;  %v13295_v27 = vpop.f32.mrb[50].mxu1  ;;  %v17460_v47 = vpack.c.bf16 %v8658_v49, %v8657_v43  ;;  %v17464_v4 = vpack.c.bf16 %v8660_v29, %v8659_v59  ;;  %v17466_v52 = vld [vmem:[#allocation2 + $0x57] sm:$0xff]  ;;  %v17468_v25 = vld [vmem:[#allocation2 + $0x5f] sm:$0xff] }
 0x8b8   : > { %v8488_v60 = vadd.f32 %v17344_v22, %v8449_v46  ;;  %v8450_v28 = vmul.f32 %v13295_v27, %v17339_v34  ;;  %v8364_v8 = vpop.f32.mrb[51].mxu1  ;;  %19711 = vst [vmem:[#allocation60_spill] sm:$0xff] %v17466_v52  ;;  %v17480_v27 = vld [vmem:[#allocation2 + $0x67] sm:$0xff] }
 0x8b9   : > { %19709 = vst [vmem:[#allocation39_spill] sm:$0xff] %v17460_v47  ;;  %19710 = vst [vmem:[#allocation57_spill] sm:$0xff] %v17464_v4  ;;  %v8486_v63 = vadd.f32 %v17344_v22, %v8447_v38  ;;  %v8448_v50 = vmul.f32 %v17339_v34, %v8364_v8  ;;  %13319 = vmatmul.mubr.msk.bf16.gmra.mrb[72].mxu1 %vm661_vm2, %v17460_v47  ;;  %v17482_v38 = vld [vmem:[#allocation2 + $0x6f] sm:$0xff]  ;;  %v17486_v8 = vmul.f32 %v17466_v52, %v19400_v61 }
 0x8ba   : > { %v8520_v43 = vmax.f32 %v8488_v60, 0.0  ;;  %v8489_v37 = vadd.f32 %v17344_v22, %v8450_v28  ;;  %13322 = vmatprep.mubr.msk.bf16.mxu1 %vm661_vm2, %v17464_v4  ;;  %19712 = vst [vmem:[#allocation55_spill] sm:$0xff] %v17480_v27  ;;  %19713 = vst [vmem:[#allocation56_spill] sm:$0xff] %v17482_v38  ;;  %v17490_v28 = vmul.f32 %v17468_v25, %v19336_v7 }
 0x8bb   : > { %v8518_v46 = vmax.f32 %v8486_v63, 0.0  ;;  %v8487_v29 = vadd.f32 %v17344_v22, %v8448_v50  ;;  %19714 = vst [vmem:[#allocation62_spill] sm:$0xff] %v17486_v8  ;;  %v17500_v52 = vmul.f32 %v17480_v27, %v19349_v33 }
 0x8bc   : > { %19715 = vst [vmem:[#allocation68_spill] sm:$0xff] %v17490_v28  ;;  %8552 = vst.msk [vmem:[#allocation2 + $0xa8] sm:$0xff] %vm661_vm2, %v8520_v43  ;;  %v8521_v59 = vmax.f32 %v8489_v37, 0.0  ;;  %v8661_v5 = vld [vmem:[#allocation2 + $0x78] sm:$0xff]  ;;  %v17504_v43 = vmul.f32 %v17482_v38, %v19344_v10 }
 0x8bd   : > { %8550 = vst.msk [vmem:[#allocation2 + $0x98] sm:$0xff] %vm661_vm2, %v8518_v46  ;;  %v8519_v63 = vmax.f32 %v8487_v29, 0.0  ;;  %v13298_v60 = vpop.f32.mrb[52].mxu1  ;;  %v8664_v50 = vld [vmem:[#allocation2 + $0x90] sm:$0xff]  ;;  %19716 = vst [vmem:[#allocation41_spill] sm:$0xff] %v17500_v52 }
 0x8be   : > { %8553 = vst.msk [vmem:[#allocation2 + $0xb0] sm:$0xff] %vm661_vm2, %v8521_v59  ;;  %v8453_v4 = vmul.f32 %v13298_v60, %v17339_v34  ;;  %v8377_v47 = vpop.f32.mrb[53].mxu1  ;;  %v8662_v41 = vld [vmem:[#allocation2 + $0x80] sm:$0xff]  ;;  %19717 = vst [vmem:[#allocation43_spill] sm:$0xff] %v17504_v43  ;;  %v8663_v59 = vld [vmem:[#allocation2 + $0x88] sm:$0xff] }
 0x8bf   : > { %8551 = vst.msk [vmem:[#allocation2 + $0xa0] sm:$0xff] %vm661_vm2, %v8519_v63  ;;  %v8451_v37 = vmul.f32 %v17339_v34, %v8377_v47  ;;  %v13299_v46 = vpop.f32.mrb[54].mxu1  ;;  %v17508_v29 = vpack.c.bf16 %v8662_v41, %v8661_v5  ;;  %v17512_v28 = vpack.c.bf16 %v8664_v50, %v8663_v59  ;;  %v17514_v33 = vld [vmem:[#allocation2 + $0x77] sm:$0xff]  ;;  %v17516_v27 = vld [vmem:[#allocation2 + $0x7f] sm:$0xff] }
 0x8c0   : > { %v8492_v60 = vadd.f32 %v17344_v22, %v8453_v4  ;;  %v8454_v49 = vmul.f32 %v13299_v46, %v17339_v34  ;;  %v8380_v8 = vpop.f32.mrb[55].mxu1  ;;  %19720 = vst [vmem:[#allocation63_spill] sm:$0xff] %v17516_v27  ;;  %v17528_v46 = vld [vmem:[#allocation2 + $0x87] sm:$0xff] }
 0x8c1   : > { %19718 = vst [vmem:[#allocation65_spill] sm:$0xff] %v17508_v29  ;;  %19719 = vst [vmem:[#allocation42_spill] sm:$0xff] %v17512_v28  ;;  %v8490_v38 = vadd.f32 %v17344_v22, %v8451_v37  ;;  %v8452_v63 = vmul.f32 %v17339_v34, %v8380_v8  ;;  %13323 = vmatmul.mubr.msk.bf16.gmra.mrb[76].mxu1 %vm661_vm2, %v17508_v29  ;;  %v17530_v37 = vld [vmem:[#allocation2 + $0x8f] sm:$0xff]  ;;  %v17534_v8 = vmul.f32 %v17514_v33, %v19403_v53 }
 0x8c2   : > { %v8524_v5 = vmax.f32 %v8492_v60, 0.0  ;;  %v8493_v41 = vadd.f32 %v17344_v22, %v8454_v49  ;;  %13326 = vmatprep.mubr.msk.bf16.mxu1 %vm661_vm2, %v17512_v28  ;;  %19721 = vst [vmem:[#allocation64_spill] sm:$0xff] %v17528_v46  ;;  %v17538_v49 = vmul.f32 %v17516_v27, %v19346_v11  ;;  %v17548_v27 = vmul.f32 %v17528_v46, %v19361_v18 }
 0x8c3   : > { %v8522_v47 = vmax.f32 %v8490_v38, 0.0  ;;  %v8491_v50 = vadd.f32 %v17344_v22, %v8452_v63  ;;  %19722 = vst [vmem:[#allocation44_spill] sm:$0xff] %v17534_v8 }
 0x8c4   : > { %19723 = vst [vmem:[#allocation69_spill] sm:$0xff] %v17538_v49  ;;  %8556 = vst.msk [vmem:[#allocation2 + $0xc8] sm:$0xff] %vm661_vm2, %v8524_v5  ;;  %v8525_v59 = vmax.f32 %v8493_v41, 0.0  ;;  %v8665_v52 = vld [vmem:[#allocation2 + $0x98] sm:$0xff]  ;;  %v17552_v5 = vmul.f32 %v17530_v37, %v19354_v55 }
 0x8c5   : > { %8554 = vst.msk [vmem:[#allocation2 + $0xb8] sm:$0xff] %vm661_vm2, %v8522_v47  ;;  %v8523_v38 = vmax.f32 %v8491_v50, 0.0  ;;  %v13302_v60 = vpop.f32.mrb[56].mxu1  ;;  %v8668_v63 = vld [vmem:[#allocation2 + $0xb0] sm:$0xff]  ;;  %19724 = vst [vmem:[#allocation70_spill] sm:$0xff] %v17548_v27 }
 0x8c6   : > { %8557 = vst.msk [vmem:[#allocation2 + $0xd0] sm:$0xff] %vm661_vm2, %v8525_v59  ;;  %v8457_v28 = vmul.f32 %v13302_v60, %v17339_v34  ;;  %v8393_v29 = vpop.f32.mrb[57].mxu1  ;;  %v8666_v43 = vld [vmem:[#allocation2 + $0xa0] sm:$0xff]  ;;  %19725 = vst [vmem:[#allocation80_spill] sm:$0xff] %v17552_v5  ;;  %v8667_v59 = vld [vmem:[#allocation2 + $0xa8] sm:$0xff] }
 0x8c7   : > { %8555 = vst.msk [vmem:[#allocation2 + $0xc0] sm:$0xff] %vm661_vm2, %v8523_v38  ;;  %v8455_v41 = vmul.f32 %v17339_v34, %v8393_v29  ;;  %v13303_v47 = vpop.f32.mrb[58].mxu1  ;;  %v17556_v50 = vpack.c.bf16 %v8666_v43, %v8665_v52  ;;  %v17560_v49 = vpack.c.bf16 %v8668_v63, %v8667_v59  ;;  %v17562_v18 = vld [vmem:[#allocation2 + $0x97] sm:$0xff]  ;;  %v17564_v46 = vld [vmem:[#allocation2 + $0x9f] sm:$0xff] }
 0x8c8   : > { %v8496_v60 = vadd.f32 %v17344_v22, %v8457_v28  ;;  %v8458_v4 = vmul.f32 %v13303_v47, %v17339_v34  ;;  %v8396_v8 = vpop.f32.mrb[59].mxu1  ;;  %v17576_v47 = vld [vmem:[#allocation2 + $0xa7] sm:$0xff] }
 0x8c9   : > { %19726 = vst [vmem:[#allocation81_spill] sm:$0xff] %v17556_v50  ;;  %19727 = vst [vmem:[#allocation51_spill] sm:$0xff] %v17560_v49  ;;  %v8494_v55 = vadd.f32 %v17344_v22, %v8455_v41  ;;  %v8456_v38 = vmul.f32 %v17339_v34, %v8396_v8  ;;  %13327 = vmatmul.mubr.msk.bf16.gmra.mrb[80].mxu1 %vm661_vm2, %v17556_v50  ;;  %v17578_v41 = vld [vmem:[#allocation2 + $0xaf] sm:$0xff]  ;;  %v17582_v8 = vmul.f32 %v17562_v18, %v19406_v19 }
 0x8ca   : > { %v8528_v52 = vmax.f32 %v8496_v60, 0.0  ;;  %v8497_v43 = vadd.f32 %v17344_v22, %v8458_v4  ;;  %13330 = vmatprep.mubr.msk.bf16.mxu1 %vm661_vm2, %v17560_v49  ;;  %19728 = vst [vmem:[#allocation67_spill] sm:$0xff] %v17576_v47  ;;  %v17586_v4 = vmul.f32 %v17564_v46, %v19357_v45  ;;  %v17596_v45 = vmul.f32 %v17576_v47, %v19658_v20 }
 0x8cb   : > { %v8526_v29 = vmax.f32 %v8494_v55, 0.0  ;;  %v8495_v63 = vadd.f32 %v17344_v22, %v8456_v38  ;;  %19729 = vst [vmem:[#allocation89_spill] sm:$0xff] %v17582_v8 }
 0x8cc   : > { %19730 = vst [vmem:[#allocation97_spill] sm:$0xff] %v17586_v4  ;;  %8560 = vst.msk [vmem:[#allocation2 + $0xe8] sm:$0xff] %vm661_vm2, %v8528_v52  ;;  %v8529_v59 = vmax.f32 %v8497_v43, 0.0  ;;  %v8669_v27 = vld [vmem:[#allocation2 + $0xb8] sm:$0xff]  ;;  %v17600_v52 = vmul.f32 %v17578_v41, %v19652_v13 }
 0x8cd   : > { %8558 = vst.msk [vmem:[#allocation2 + $0xd8] sm:$0xff] %vm661_vm2, %v8526_v29  ;;  %v8527_v55 = vmax.f32 %v8495_v63, 0.0  ;;  %v13306_v60 = vpop.f32.mrb[60].mxu1  ;;  %v8672_v38 = vld [vmem:[#allocation2 + $0xd0] sm:$0xff]  ;;  %19731 = vst [vmem:[#allocation88_spill] sm:$0xff] %v17596_v45 }
 0x8ce   : > { %8561 = vst.msk [vmem:[#allocation2 + $0xf0] sm:$0xff] %vm661_vm2, %v8529_v59  ;;  %v8461_v49 = vmul.f32 %v13306_v60, %v17339_v34  ;;  %v8409_v50 = vpop.f32.mrb[61].mxu1  ;;  %v8670_v5 = vld [vmem:[#allocation2 + $0xc0] sm:$0xff]  ;;  %19732 = vst [vmem:[#allocation98_spill] sm:$0xff] %v17600_v52  ;;  %v8671_v59 = vld [vmem:[#allocation2 + $0xc8] sm:$0xff] }
 0x8cf   : > { %8559 = vst.msk [vmem:[#allocation2 + $0xe0] sm:$0xff] %vm661_vm2, %v8527_v55  ;;  %v8459_v43 = vmul.f32 %v17339_v34, %v8409_v50  ;;  %v13307_v29 = vpop.f32.mrb[62].mxu1  ;;  %v17604_v63 = vpack.c.bf16 %v8670_v5, %v8669_v27  ;;  %v17608_v4 = vpack.c.bf16 %v8672_v38, %v8671_v59  ;;  %v17610_v20 = vld [vmem:[#allocation2 + $0xb7] sm:$0xff]  ;;  %v17612_v47 = vld [vmem:[#allocation2 + $0xbf] sm:$0xff]  ;;  %v17618_v27 = vld [vmem:[#allocation2 + $0xc7] sm:$0xff] }
 0x8d0   : > { %v8500_v60 = vadd.f32 %v17344_v22, %v8461_v49  ;;  %v8462_v28 = vmul.f32 %v13307_v29, %v17339_v34  ;;  %v8412_v8 = vpop.f32.mrb[63].mxu1  ;;  %19735 = vst [vmem:[#allocation107_spill] sm:$0xff] %v17612_v47  ;;  %19736 = vst [vmem:[#allocation45_spill] sm:$0xff] %v17618_v27  ;;  %v17620_v5 = vld [vmem:[#allocation2 + $0xcf] sm:$0xff]  ;;  %v17630_v59 = vmul.f32 %v17610_v20, %v19654_v36  ;;  %v17639_v38 = vld [vmem:[#allocation2 + $0x19] sm:$0xff] }
 0x8d1   : > { %19733 = vst [vmem:[#allocation108_spill] sm:$0xff] %v17604_v63  ;;  %19734 = vst [vmem:[#allocation115_spill] sm:$0xff] %v17608_v4  ;;  %v8498_v13 = vadd.f32 %v17344_v22, %v8459_v43  ;;  %v8460_v55 = vmul.f32 %v17339_v34, %v8412_v8  ;;  %13331 = vmatmul.mubr.msk.bf16.gmra.mrb[84].mxu1 %vm661_vm2, %v17604_v63  ;;  %v8566_v34 = vld [vmem:[#allocation2 + $0x7] sm:$0xff]  ;;  %v8567_v8 = vld [vmem:[#allocation2 + $0xf] sm:$0xff] }
 0x8d2   : > { %19737 = vst [vmem:[#allocation71_spill] sm:$0xff] %v17620_v5  ;;  %v8532_v49 = vmax.f32 %v8500_v60, 0.0  ;;  %v8501_v50 = vadd.f32 %v17344_v22, %v8462_v28  ;;  %13334 = vmatprep.mubr.msk.bf16.mxu1 %vm661_vm2, %v17608_v4  ;;  %19738 = vst [vmem:[#allocation77_spill] sm:$0xff] %v17630_v59  ;;  %v17634_v60 = vmul.f32 %v17612_v47, %v19656_v48  ;;  %v17637_v63 = vld [vmem:[#allocation2 + $0x2f] sm:$0xff]  ;;  %v17676_v59 = vld [vmem:[#allocation2 + $0x21] sm:$0xff] }
 0x8d3   : > { %v8530_v29 = vmax.f32 %v8498_v13, 0.0  ;;  %v8499_v43 = vadd.f32 %v17344_v22, %v8460_v55  ;;  %19740 = vst [vmem:[#allocation73_spill] sm:$0xff] %v17637_v63  ;;  %19741 = vst [vmem:[#allocation82_spill] sm:$0xff] %v17639_v38  ;;  %v17643_v13 = vmul.f32 %v17618_v27, %v19666_v54  ;;  %v17647_v22 = vmul.f32 %v17620_v5, %v19660_v44  ;;  %v8675_v5 = vld [vmem:[#allocation2 + $0xe8] sm:$0xff]  ;;  %v17680_v47 = vld [vmem:[#allocation2 + $0x31] sm:$0xff] }
 0x8d4   : > { %19739 = vst [vmem:[#allocation46_spill] sm:$0xff] %v17634_v60  ;;  %8564 = vst.msk [vmem:[#allocation2 + $0x108] sm:$0xff] %vm661_vm2, %v8532_v49  ;;  %v8533_v28 = vmax.f32 %v8501_v50, 0.0  ;;  %v8673_v4 = vld [vmem:[#allocation2 + $0xd8] sm:$0xff]  ;;  %v17654_v50 = vld [vmem:[#allocation2 + $0x29] sm:$0xff]  ;;  %v17669_v36 = vmul.f32 %v8566_v34, %v15220_v35  ;;  %v17672_v48 = vmul.f32 %v8567_v8, %v19650_v0  ;;  %v17696_v34 = vmul.f32 %v17639_v38, %v19680_v6 }
 0x8d5   : > { %19742 = vst [vmem:[#allocation85_spill] sm:$0xff] %v17643_v13  ;;  %19743 = vst [vmem:[#allocation74_spill] sm:$0xff] %v17647_v22  ;;  %v8531_v55 = vmax.f32 %v8499_v43, 0.0  ;;  %v8676_v45 = vld [vmem:[#allocation2 + $0xf0] sm:$0xff]  ;;  %v17730_v22 = vmul.f32 %v17676_v59, %v19679_v17  ;;  %v17736_v6 = vld [vmem:[#allocation2 + $0x59] sm:$0xff] }
 0x8d6   : > { %8562 = vst.msk [vmem:[#allocation2 + $0xf8] sm:$0xff] %vm661_vm2, %v8530_v29  ;;  %v17650_v52 = vld [vmem:[#allocation2 + $0xd7] sm:$0xff]  ;;  %v17652_v49 = vld [vmem:[#allocation2 + $0xef] sm:$0xff]  ;;  %19745 = vst [vmem:[#allocation90_spill] sm:$0xff] %v17654_v50  ;;  %v17678_v60 = vpack.c.bf16 %v8676_v45, %v8675_v5  ;;  %v17702_v45 = vmul.f32 %v17386_v40, %v19322_v26  ;;  %v17706_v5 = vmul.f32 %v17637_v63, %v19324_v51 }
 0x8d7   : > { %19744 = vst [vmem:[#allocation83_spill] sm:$0xff] %v17652_v49  ;;  %8565 = vst.msk [vmem:[#allocation2 + $0x110] sm:$0xff] %vm661_vm2, %v8533_v28  ;;  %v8674_v54 = vld [vmem:[#allocation2 + $0xe0] sm:$0xff]  ;;  %v17708_v8 = vld [vmem:[#allocation2 + $0x49] sm:$0xff]  ;;  %v17718_v13 = vmul.f32 %v17652_v49, %v19668_v12 }
 0x8d8   : > { %v17659_v27 = vld [vmem:[#allocation2 + $0xdf] sm:$0xff]  ;;  %v17661_v44 = vld [vmem:[#allocation2 + $0xe7] sm:$0xff]  ;;  %8563 = vst.msk [vmem:[#allocation2 + $0x100] sm:$0xff] %vm661_vm2, %v8531_v55  ;;  %v17666_v43 = vpack.c.bf16 %v8674_v54, %v8673_v4  ;;  %19749 = vst [vmem:[#allocation91_spill] sm:$0xff] %v17676_v59  ;;  %v17688_v54 = vmul.f32 %v17650_v52, %v19662_v16 }
 0x8d9   : > { %19746 = vst [vmem:[#allocation84_spill] sm:$0xff] %v17661_v44  ;;  %v17674_v28 = vld [vmem:[#allocation2 + $0x27] sm:$0xff]  ;;  %19750 = vst [vmem:[#allocation110_spill] sm:$0xff] %v17678_v60  ;;  %v17682_v29 = vld [vmem:[#allocation2 + $0x39] sm:$0xff]  ;;  %v17692_v4 = vmul.f32 %v17659_v27, %v19664_v9  ;;  %v17714_v35 = vmul.f32 %v17661_v44, %v19674_v57 }
 0x8da   : > { %19747 = vst [vmem:[#allocation47_spill] sm:$0xff] %v17666_v43  ;;  %19748 = vst [vmem:[#allocation50_spill] sm:$0xff] %v17674_v28  ;;  %v17684_v55 = vld [vmem:[#allocation2 + $0x41] sm:$0xff]  ;;  %13335 = vmatmul.mubr.msk.bf16.gmra.mrb[88].mxu1 %vm661_vm2, %v17666_v43  ;;  %v17710_v0 = vld [vmem:[#allocation2 + $0x51] sm:$0xff]  ;;  %v17724_v40 = vmul.f32 %v17674_v28, %v19323_v23 }
 0x8db   : > { %19751 = vst [vmem:[#allocation111_spill] sm:$0xff] %v17680_v47  ;;  %19752 = vst [vmem:[#allocation112_spill] sm:$0xff] %v17682_v29  ;;  %13338 = vmatprep.mubr.msk.bf16.mxu1 %vm661_vm2, %v17678_v60  ;;  %v19762_v63 = vld [vmem:[#allocation3_spill] sm:$0xff]  ;;  %v19765_v12 = vld [vmem:[#allocation5_spill] sm:$0xff] }
 0x8dc   : > { %19753 = vst [vmem:[#allocation96_spill] sm:$0xff] %v17684_v55  ;;  %19754 = vst [vmem:[#allocation49_spill] sm:$0xff] %v17688_v54  ;;  %v17734_v38 = vmul.f32 %v17654_v50, %v19762_v63  ;;  %v17742_v28 = vmul.f32 %v17680_v47, %v19765_v12  ;;  %v19767_v57 = vld [vmem:[#allocation8_spill] sm:$0xff]  ;;  %v19769_v54 = vld [vmem:[#allocation7_spill] sm:$0xff] }
 0x8dd   : > { %19755 = vst [vmem:[#allocation54_spill] sm:$0xff] %v17692_v4  ;;  %19756 = vst [vmem:[#allocation52_spill] sm:$0xff] %v17696_v34  ;;  %v17746_v43 = vmul.f32 %v17682_v29, %v19767_v57  ;;  %v17750_v4 = vmul.f32 %v17684_v55, %v19769_v54  ;;  %v17752_v59 = vld [vmem:[#allocation2 + $0x61] sm:$0xff]  ;;  %v17754_v50 = vld [vmem:[#allocation2 + $0x69] sm:$0xff] }
 0x8de   : > { %19757 = vst [vmem:[#allocation61_spill] sm:$0xff] %v17708_v8  ;;  %19758 = vst [vmem:[#allocation94_spill] sm:$0xff] %v17710_v0  ;;  %v19773_v60 = vld [vmem:[#allocation10_spill] sm:$0xff]  ;;  %v17770_v55 = vld [vmem:[#allocation2 + $0xf7] sm:$0xff] }
 0x8df   : > { %19759 = vst [vmem:[#allocation92_spill] sm:$0xff] %v17714_v35  ;;  %19760 = vst [vmem:[#allocation72_spill] sm:$0xff] %v17718_v13  ;;  %v17760_v35 = vmul.f32 %v17708_v8, %v19773_v60  ;;  %v19775_v13 = vld [vmem:[#allocation9_spill] sm:$0xff]  ;;  %v19777_v29 = vld [vmem:[#allocation38_spill] sm:$0xff]  ;;  %v8630_v8 = vpack.c.bf16 %v17672_v48, %v17669_v36  ;;  %v17788_v60 = vmul.f32 %v17736_v6, %v19688_v62  ;;  %v9252_v36 = vsel %vm1682_vm3, %v17382_v14, 0 }
 0x8e0   : > { %19761 = vst [vmem:[#allocation93_spill] sm:$0xff] %v17730_v22  ;;  %19763 = vst [vmem:[#allocation23_spill] sm:$0xff] %v17734_v38  ;;  %v17764_v47 = vmul.f32 %v17710_v0, %v19775_v13  ;;  %v17768_v57 = vmul.f32 %v17384_v15, %v19777_v29  ;;  %v17772_v54 = vld [vmem:[#allocation2 + $0x71] sm:$0xff]  ;;  %v17774_v12 = vld [vmem:[#allocation2 + $0x79] sm:$0xff]  ;;  %v8632_v48 = vpack.c.bf16 %v17706_v5, %v17724_v40 }
 0x8e1   : > { %19764 = vst [vmem:[#allocation24_spill] sm:$0xff] %v17736_v6  ;;  %19766 = vst [vmem:[#allocation119_spill] sm:$0xff] %v17742_v28  ;;  %v8677_v34 = vld [vmem:[#allocation2 + $0xf8] sm:$0xff]  ;;  %v8678_v22 = vld [vmem:[#allocation2 + $0x100] sm:$0xff]  ;;  %v17802_v13 = vmul.f32 %v17420_v32, %v19339_v56 }
 0x8e2   : > { %19768 = vst [vmem:[#allocation120_spill] sm:$0xff] %v17746_v43  ;;  %19770 = vst [vmem:[#allocation121_spill] sm:$0xff] %v17750_v4  ;;  %v17780_v0 = vld [vmem:[#allocation2 + $0xff] sm:$0xff]  ;;  %v17790_v17 = vpack.c.bf16 %v8678_v22, %v8677_v34  ;;  %v8631_v63 = vpack.c.bf16 %v17702_v45, %v17768_v57  ;;  %v17798_v38 = vld [vmem:[#allocation2 + $0x89] sm:$0xff] }
 0x8e3   : > { %19771 = vst [vmem:[#allocation122_spill] sm:$0xff] %v17752_v59  ;;  %19772 = vst [vmem:[#allocation123_spill] sm:$0xff] %v17754_v50  ;;  %v17804_v15 = vld [vmem:[#allocation2 + $0x81] sm:$0xff]  ;;  %v17808_v22 = vld [vmem:[#allocation2 + $0xa9] sm:$0xff] }
 0x8e4   : > { %19774 = vst [vmem:[#allocation124_spill] sm:$0xff] %v17760_v35  ;;  %19776 = vst [vmem:[#allocation125_spill] sm:$0xff] %v17764_v47  ;;  %v17806_v35 = vld [vmem:[#allocation2 + $0x91] sm:$0xff]  ;;  %v19788_v34 = vld [vmem:[#allocation106_spill] sm:$0xff]  ;;  %13339 = vmatmul.mubr.msk.bf16.gmra.mrb[92].mxu1 %vm661_vm2, %v17790_v17  ;;  %v17826_v47 = vmul.f32 %v17434_v2, %v19336_v7 }
 0x8e5   : > { %19778 = vst [vmem:[#allocation126_spill] sm:$0xff] %v17770_v55  ;;  %19779 = vst [vmem:[#allocation127_spill] sm:$0xff] %v17772_v54  ;;  %v17812_v57 = vmul.f32 %v17770_v55, %v19788_v34  ;;  %v19790_v14 = vld [vmem:[#allocation105_spill] sm:$0xff]  ;;  %v19792_v5 = vld [vmem:[#allocation11_spill] sm:$0xff]  ;;  %13344 = vmatprep.mubr.msk.bf16.mxu1 %vm661_vm2, %v8630_v8  ;;  %v17853_v34 = vmul.f32 %v17432_v24, %v19400_v61 }
 0x8e6   : > { %19780 = vst [vmem:[#allocation128_spill] sm:$0xff] %v17774_v12  ;;  %19781 = vst [vmem:[#allocation129_spill] sm:$0xff] %v17780_v0  ;;  %v17816_v45 = vmul.f32 %v17780_v0, %v19790_v14  ;;  %v17820_v40 = vmul.f32 %v17752_v59, %v19792_v5  ;;  %v17828_v43 = vld [vmem:[#allocation2 + $0x99] sm:$0xff]  ;;  %v17830_v4 = vld [vmem:[#allocation2 + $0xa1] sm:$0xff]  ;;  %v17849_v5 = vmul.f32 %v17422_v42, %v19333_v58 }
 0x8e7   : > { %19782 = vst [vmem:[#allocation130_spill] sm:$0xff] %v17788_v60  ;;  %19783 = vst [vmem:[#allocation131_spill] sm:$0xff] %v17790_v17  ;;  %v17832_v28 = vld [vmem:[#allocation2 + $0xb1] sm:$0xff]  ;;  %v19797_v6 = vld [vmem:[#allocation14_spill] sm:$0xff]  ;;  %v17844_v17 = vmul.f32 %v17774_v12, %v19692_v30 }
 0x8e8   : > { %19784 = vst [vmem:[#allocation132_spill] sm:$0xff] %v17798_v38  ;;  %19785 = vst [vmem:[#allocation133_spill] sm:$0xff] %v17804_v15  ;;  %v17836_v62 = vmul.f32 %v17754_v50, %v19797_v6  ;;  %v19799_v14 = vld [vmem:[#allocation13_spill] sm:$0xff]  ;;  %v17863_v30 = vld [vmem:[#allocation2 + $0xc9] sm:$0xff] }
 0x8e9   : > { %19786 = vst [vmem:[#allocation134_spill] sm:$0xff] %v17806_v35  ;;  %19787 = vst [vmem:[#allocation135_spill] sm:$0xff] %v17808_v22  ;;  %v17840_v59 = vmul.f32 %v17772_v54, %v19799_v14  ;;  %v17855_v50 = vld [vmem:[#allocation2 + $0xb9] sm:$0xff]  ;;  %v17857_v6 = vld [vmem:[#allocation2 + $0xc1] sm:$0xff]  ;;  %v17889_v14 = vmul.f32 %v17828_v43, %v19695_v3 }
 0x8ea   : > { %19789 = vst [vmem:[#allocation136_spill] sm:$0xff] %v17812_v57  ;;  %19791 = vst [vmem:[#allocation137_spill] sm:$0xff] %v17816_v45  ;;  %v17865_v8 = vld [vmem:[#allocation2 + $0xd1] sm:$0xff]  ;;  %v19808_v49 = vld [vmem:[#allocation18_spill] sm:$0xff]  ;;  %v17897_v57 = vmul.f32 %v17808_v22, %v19638_v1  ;;  %v17901_v45 = vmul.f32 %v17832_v28, %v19696_v39  ;;  %v17915_v22 = vmul.f32 %v17855_v50, %v19698_v31 }
 0x8eb   : > { %19793 = vst [vmem:[#allocation138_spill] sm:$0xff] %v17820_v40  ;;  %19794 = vst [vmem:[#allocation139_spill] sm:$0xff] %v17828_v43  ;;  %v19806_v0 = vld [vmem:[#allocation15_spill] sm:$0xff]  ;;  %v17875_v9 = vmul.f32 %v17798_v38, %v19808_v49  ;;  %v19810_v44 = vld [vmem:[#allocation17_spill] sm:$0xff] }
 0x8ec   : > { %19795 = vst [vmem:[#allocation140_spill] sm:$0xff] %v17830_v4  ;;  %19796 = vst [vmem:[#allocation141_spill] sm:$0xff] %v17832_v28  ;;  %v17871_v55 = vmul.f32 %v17804_v15, %v19806_v0  ;;  %v17879_v54 = vmul.f32 %v17806_v35, %v19810_v44  ;;  %v17881_v12 = vld [vmem:[#allocation2 + $0xd9] sm:$0xff]  ;;  %v17883_v60 = vld [vmem:[#allocation2 + $0xe1] sm:$0xff]  ;;  %v17919_v28 = vmul.f32 %v17857_v6, %v19697_v21  ;;  %13345 = vmatmul.mubr.msk.bf16.vlgmr.msra.gmra.mrb[64].mxu1 %vm661_vm2, %v8631_v63 }
 0x8ed   : > { %19798 = vst [vmem:[#allocation142_spill] sm:$0xff] %v17836_v62  ;;  %19800 = vst [vmem:[#allocation143_spill] sm:$0xff] %v17840_v59  ;;  %v17885_v40 = vld [vmem:[#allocation2 + $0xe9] sm:$0xff]  ;;  %v17903_v38 = vld [vmem:[#allocation2 + $0xf1] sm:$0xff]  ;;  %13377 = vmatpush3.bf16.msra.mxu1 %v9252_v36  ;;  %13348 = vmatprep.mubr.msk.bf16.mxu1 %vm661_vm2, %v8632_v48  ;;  %v8609_v63 = vmul.f32 %v17468_v25, %v19344_v10  ;;  %v17986_v36 = vmul.f32 %v17420_v32, %v19777_v29 }
 0x8ee   : > { %19801 = vst [vmem:[#allocation144_spill] sm:$0xff] %v17844_v17  ;;  %19802 = vst [vmem:[#allocation145_spill] sm:$0xff] %v17855_v50  ;;  %v19816_v62 = vld [vmem:[#allocation19_spill] sm:$0xff]  ;;  %v17905_v35 = vld [vmem:[#allocation2 + $0xf9] sm:$0xff]  ;;  %v17994_v48 = vmul.f32 %v17432_v24, %v19323_v23  ;;  %v18006_v32 = vmul.f32 %v17468_v25, %v19333_v58 }
 0x8ef   : > { %19803 = vst [vmem:[#allocation146_spill] sm:$0xff] %v17857_v6  ;;  %19804 = vst [vmem:[#allocation147_spill] sm:$0xff] %v17863_v30  ;;  %v17893_v59 = vmul.f32 %v17830_v4, %v19816_v62  ;;  %v17907_v15 = vld [vmem:[#allocation2 + $0x101] sm:$0xff]  ;;  %v19831_v6 = vld [vmem:[#allocation27_spill] sm:$0xff] }
 0x8f0   : > { %19805 = vst [vmem:[#allocation148_spill] sm:$0xff] %v17865_v8  ;;  %19807 = vst [vmem:[#allocation15_spill] sm:$0xff] %v17871_v55  ;;  %v19825_v3 = vld [vmem:[#allocation26_spill] sm:$0xff]  ;;  %v19827_v17 = vld [vmem:[#allocation25_spill] sm:$0xff]  ;;  %v17941_v39 = vmul.f32 %v17883_v60, %v19831_v6 }
 0x8f1   : > { %19809 = vst [vmem:[#allocation18_spill] sm:$0xff] %v17875_v9  ;;  %19811 = vst [vmem:[#allocation17_spill] sm:$0xff] %v17879_v54  ;;  %v17927_v43 = vmul.f32 %v17863_v30, %v19825_v3  ;;  %v17931_v4 = vmul.f32 %v17865_v8, %v19827_v17  ;;  %v19829_v54 = vld [vmem:[#allocation28_spill] sm:$0xff]  ;;  %v19833_v1 = vld [vmem:[#allocation30_spill] sm:$0xff] }
 0x8f2   : > { %19812 = vst [vmem:[#allocation149_spill] sm:$0xff] %v17881_v12  ;;  %19813 = vst [vmem:[#allocation150_spill] sm:$0xff] %v17883_v60  ;;  %v17937_v55 = vmul.f32 %v17881_v12, %v19829_v54  ;;  %v19839_v60 = vld [vmem:[#allocation31_spill] sm:$0xff]  ;;  %v8633_v12 = vpack.c.bf16 %v17849_v5, %v17802_v13  ;;  %v19841_v13 = vld [vmem:[#allocation56_spill] sm:$0xff] }
 0x8f3   : > { %19814 = vst [vmem:[#allocation151_spill] sm:$0xff] %v17885_v40  ;;  %19815 = vst [vmem:[#allocation152_spill] sm:$0xff] %v17889_v14  ;;  %v19837_v14 = vld [vmem:[#allocation32_spill] sm:$0xff]  ;;  %v8611_v5 = vmul.f32 %v19841_v13, %v19346_v11  ;;  %v19849_v9 = vld [vmem:[#allocation55_spill] sm:$0xff] }
 0x8f4   : > { %19817 = vst [vmem:[#allocation19_spill] sm:$0xff] %v17893_v59  ;;  %19818 = vst [vmem:[#allocation153_spill] sm:$0xff] %v17897_v57  ;;  %v17945_v57 = vmul.f32 %v17885_v40, %v19833_v1  ;;  %v17960_v59 = vmul.f32 %v17905_v35, %v19837_v14  ;;  %v17964_v40 = vmul.f32 %v17907_v15, %v19839_v60  ;;  %v19852_v25 = vld [vmem:[#allocation48_spill] sm:$0xff]  ;;  %v19859_v58 = vld [vmem:[#allocation59_spill] sm:$0xff]  ;;  %13349 = vmatmul.mubr.msk.bf16.gmra.mrb[68].mxu1 %vm661_vm2, %v8633_v12 }
 0x8f5   : > { %19819 = vst [vmem:[#allocation154_spill] sm:$0xff] %v17901_v45  ;;  %19820 = vst [vmem:[#allocation155_spill] sm:$0xff] %v17903_v38  ;;  %v17950_v45 = vld [vmem:[%s18714_s20 + $0xc] sm:$0xf]  ;;  %v18014_v23 = vmul.f32 %v19849_v9, %v19400_v61  ;;  %v18026_v24 = vmul.f32 %v17514_v33, %v19852_v25  ;;  %v19863_v61 = vld [vmem:[#allocation67_spill] sm:$0xff] }
 0x8f6   : > { %19821 = vst [vmem:[#allocation156_spill] sm:$0xff] %v17905_v35  ;;  %19822 = vst [vmem:[#allocation157_spill] sm:$0xff] %v17907_v15  ;;  %14406 = vmatprep.subr.msk.bf16.mxu1 %vm1682_vm3, %v17950_v45  ;;  %v19846_v15 = vld [vmem:[#allocation60_spill] sm:$0xff]  ;;  %v18078_v12 = vld [vmem:[#allocation2 + $0x10f] sm:$0xff] }
 0x8f7   : > { %19823 = vst [vmem:[#allocation158_spill] sm:$0xff] %v17915_v22  ;;  %19824 = vst [vmem:[#allocation159_spill] sm:$0xff] %v17919_v28  ;;  %v19835_v22 = vld [vmem:[#allocation29_spill] sm:$0xff]  ;;  %v19886_v29 = vld [vmem:[#allocation102_spill] sm:$0xff]  ;;  %v8608_v8 = vmul.f32 %v19846_v15, %v19852_v25 }
 0x8f8   : > { %19826 = vst [vmem:[#allocation160_spill] sm:$0xff] %v17927_v43  ;;  %19828 = vst [vmem:[#allocation161_spill] sm:$0xff] %v17931_v4  ;;  %v17956_v28 = vmul.f32 %v17903_v38, %v19835_v22  ;;  %v8634_v43 = vpack.c.bf16 %v17826_v47, %v17853_v34  ;;  %v17990_v47 = vmul.f32 %v17422_v42, %v19322_v26  ;;  %v19884_v38 = vld [vmem:[#allocation103_spill] sm:$0xff]  ;;  %v19885_v22 = vld [vmem:[#allocation126_spill] sm:$0xff] }
 0x8f9   : > { %19830 = vst [vmem:[#allocation162_spill] sm:$0xff] %v17937_v55  ;;  %19832 = vst [vmem:[#allocation163_spill] sm:$0xff] %v17941_v39  ;;  %v17998_v34 = vmul.f32 %v17434_v2, %v19324_v51  ;;  %v18002_v4 = vmul.f32 %v19846_v15, %v19339_v56  ;;  %v8610_v42 = vmul.f32 %v19849_v9, %v19403_v53  ;;  %v19854_v2 = vld [vmem:[#allocation63_spill] sm:$0xff]  ;;  %v19888_v30 = vld [vmem:[#allocation106_spill] sm:$0xff] }
 0x8fa   : > { %19834 = vst [vmem:[#allocation164_spill] sm:$0xff] %v17945_v57  ;;  %19836 = vst [vmem:[#allocation165_spill] sm:$0xff] %v17956_v28  ;;  %v18018_v51 = vmul.f32 %v19841_v13, %v19336_v7  ;;  %v19856_v7 = vld [vmem:[#allocation64_spill] sm:$0xff]  ;;  %v18040_v13 = vmul.f32 %v17530_v37, %v19346_v11  ;;  %v18044_v56 = vmul.f32 %v17562_v18, %v19859_v58  ;;  %v18061_v11 = vld [vmem:[#allocation2 + $0x107] sm:$0xff]  ;;  %13352 = vmatprep.mubr.msk.bf16.mxu1 %vm661_vm2, %v8634_v43 }
 0x8fb   : > { %19838 = vst [vmem:[#allocation32_spill] sm:$0xff] %v17960_v59  ;;  %19840 = vst [vmem:[#allocation31_spill] sm:$0xff] %v17964_v40  ;;  %v18030_v59 = vmul.f32 %v19854_v2, %v19344_v10  ;;  %v18036_v9 = vmul.f32 %v19856_v7, %v19403_v53  ;;  %v19861_v10 = vld [vmem:[#allocation58_spill] sm:$0xff]  ;;  %v19874_v40 = vld [vmem:[#allocation45_spill] sm:$0xff]  ;;  %v18110_v1 = vmul.f32 %v19885_v22, %v19884_v38 }
 0x8fc   : > { %19842 = vst [vmem:[#allocation56_spill] sm:$0xff] %v17986_v36  ;;  %19843 = vst [vmem:[#allocation166_spill] sm:$0xff] %v17990_v47  ;;  %v19865_v53 = vld [vmem:[#allocation66_spill] sm:$0xff]  ;;  %v19873_v47 = vld [vmem:[#allocation79_spill] sm:$0xff]  ;;  %v18118_v54 = vmul.f32 %v18061_v11, %v19888_v30  ;;  %v8635_v50 = vpack.c.bf16 %v8609_v63, %v8608_v8  ;;  %v8636_v3 = vpack.c.bf16 %v8611_v5, %v8610_v42 }
 0x8fd   : > { %19844 = vst [vmem:[#allocation167_spill] sm:$0xff] %v17994_v48  ;;  %19845 = vst [vmem:[#allocation168_spill] sm:$0xff] %v17998_v34  ;;  %v19871_v34 = vld [vmem:[#allocation107_spill] sm:$0xff]  ;;  %v18075_v57 = vmul.f32 %v19874_v40, %v19873_v47  ;;  %v19880_v43 = vld [vmem:[#allocation86_spill] sm:$0xff]  ;;  %v8613_v15 = vmul.f32 %v19854_v2, %v19861_v10  ;;  %v8614_v25 = vmul.f32 %v19856_v7, %v19406_v19 }
 0x8fe   : > { %19847 = vst [vmem:[#allocation60_spill] sm:$0xff] %v18002_v4  ;;  %19848 = vst [vmem:[#allocation169_spill] sm:$0xff] %v18006_v32  ;;  %v18050_v32 = vmul.f32 %v17564_v46, %v19861_v10  ;;  %v19868_v4 = vld [vmem:[#allocation76_spill] sm:$0xff]  ;;  %v19879_v39 = vld [vmem:[#allocation87_spill] sm:$0xff]  ;;  %v18096_v35 = vmul.f32 %v17659_v27, %v19880_v43  ;;  %13353 = vmatmul.mubr.msk.bf16.gmra.mrb[72].mxu1 %vm661_vm2, %v8635_v50  ;;  %v8612_v8 = vmul.f32 %v17514_v33, %v19859_v58 }
 0x8ff   : > { %19850 = vst [vmem:[#allocation55_spill] sm:$0xff] %v18014_v23  ;;  %19851 = vst [vmem:[#allocation170_spill] sm:$0xff] %v18018_v51  ;;  %v18054_v23 = vmul.f32 %v19863_v61, %v19406_v19  ;;  %v18058_v51 = vmul.f32 %v17578_v41, %v19865_v53  ;;  %v18090_v26 = vmul.f32 %v17650_v52, %v19879_v39  ;;  %v19881_v28 = vld [vmem:[#allocation84_spill] sm:$0xff]  ;;  %v19882_v48 = vld [vmem:[#allocation95_spill] sm:$0xff]  ;;  %13356 = vmatprep.mubr.msk.bf16.mxu1 %vm661_vm2, %v8636_v3 }
 0x900   : > { %19853 = vst [vmem:[#allocation48_spill] sm:$0xff] %v18026_v24  ;;  %19855 = vst [vmem:[#allocation63_spill] sm:$0xff] %v18030_v59  ;;  %v18067_v24 = vmul.f32 %v17610_v20, %v19868_v4  ;;  %v19870_v59 = vld [vmem:[#allocation75_spill] sm:$0xff]  ;;  %v8637_v63 = vpack.c.bf16 %v8613_v15, %v8612_v8  ;;  %v8618_v19 = vmul.f32 %v19863_v61, %v19873_v47  ;;  %v19890_v7 = vld [vmem:[#allocation114_spill] sm:$0xff] }
 0x901   : > { %19857 = vst [vmem:[#allocation64_spill] sm:$0xff] %v18036_v9  ;;  %19858 = vst [vmem:[#allocation171_spill] sm:$0xff] %v18040_v13  ;;  %v18071_v36 = vmul.f32 %v19871_v34, %v19870_v59  ;;  %v19876_v9 = vld [vmem:[#allocation78_spill] sm:$0xff]  ;;  %v19877_v13 = vld [vmem:[#allocation71_spill] sm:$0xff]  ;;  %v10468_v6 = vpack.c.bf16 %v18096_v35, %v18090_v26  ;;  %v8617_v3 = vmul.f32 %v17564_v46, %v19870_v59 }
 0x902   : > { %19860 = vst [vmem:[#allocation59_spill] sm:$0xff] %v18044_v56  ;;  %19862 = vst [vmem:[#allocation58_spill] sm:$0xff] %v18050_v32  ;;  %v18086_v55 = vmul.f32 %v19877_v13, %v19876_v9  ;;  %v18100_v56 = vmul.f32 %v19881_v28, %v19662_v16  ;;  %v8615_v32 = vmul.f32 %v17530_v37, %v19865_v53  ;;  %v18145_v5 = vld [vmem:[#allocation2 + $0x109] sm:$0xff]  ;;  %v18147_v50 = vld [vmem:[#allocation2 + $0x111] sm:$0xff] }
 0x903   : > { %19864 = vst [vmem:[#allocation67_spill] sm:$0xff] %v18054_v23  ;;  %19866 = vst [vmem:[#allocation66_spill] sm:$0xff] %v18058_v51  ;;  %v19883_v23 = vld [vmem:[#allocation83_spill] sm:$0xff]  ;;  %v8619_v37 = vmul.f32 %v17578_v41, %v19876_v9  ;;  %v18158_v33 = vmul.f32 %v18145_v5, %v19837_v14  ;;  %v8621_v41 = vmul.f32 %v19871_v34, %v19880_v43  ;;  %v19895_v53 = vld [vmem:[#allocation82_spill] sm:$0xff] }
 0x904   : > { %19867 = vst [vmem:[#allocation172_spill] sm:$0xff] %v18061_v11  ;;  %19869 = vst [vmem:[#allocation76_spill] sm:$0xff] %v18067_v24  ;;  %v18104_v51 = vmul.f32 %v19883_v23, %v19882_v48  ;;  %v19887_v24 = vld [vmem:[#allocation129_spill] sm:$0xff]  ;;  %v8638_v17 = vpack.c.bf16 %v8615_v32, %v8614_v25  ;;  %v18162_v32 = vmul.f32 %v18147_v50, %v19839_v60  ;;  %v19897_v25 = vld [vmem:[#allocation91_spill] sm:$0xff] }
 0x905   : > { %19872 = vst [vmem:[#allocation75_spill] sm:$0xff] %v18071_v36  ;;  %19875 = vst [vmem:[#allocation107_spill] sm:$0xff] %v18075_v57  ;;  %v18114_v36 = vmul.f32 %v19887_v24, %v19886_v29  ;;  %v19889_v57 = vld [vmem:[#allocation105_spill] sm:$0xff]  ;;  %v8640_v42 = vpack.c.bf16 %v8619_v37, %v8618_v19  ;;  %v8622_v47 = vmul.f32 %v19874_v40, %v19662_v16  ;;  %v19898_v8 = vld [vmem:[#allocation7_spill] sm:$0xff] }
 0x906   : > { %19878 = vst [vmem:[#allocation79_spill] sm:$0xff] %v18086_v55  ;;  %v18128_v55 = vmul.f32 %v18078_v12, %v19889_v57  ;;  %13357 = vmatmul.mubr.msk.bf16.gmra.mrb[76].mxu1 %vm661_vm2, %v8637_v63  ;;  %v8623_v58 = vmul.f32 %v19877_v13, %v19882_v48  ;;  %v8625_v61 = vmul.f32 %v17659_v27, %v19886_v29  ;;  %v9121_v27 = vld [vmem:[#allocation2 + $0x9] sm:$0xff]  ;;  %v19896_v15 = vld [vmem:[#allocation5_spill] sm:$0xff]  ;;  %v19900_v19 = vld [vmem:[#allocation8_spill] sm:$0xff] }
 0x907   : > { %13360 = vmatprep.mubr.msk.bf16.mxu1 %vm661_vm2, %v8638_v17  ;;  %v8616_v17 = vmul.f32 %v17562_v18, %v19868_v4  ;;  %v8620_v18 = vmul.f32 %v17610_v20, %v19879_v39  ;;  %v8626_v34 = vmul.f32 %v19881_v28, %v19888_v30  ;;  %v8627_v16 = vmul.f32 %v19883_v23, %v19889_v57  ;;  %v9122_v39 = vld [vmem:[#allocation2 + $0x11] sm:$0xff]  ;;  %v19891_v29 = vld [vmem:[#allocation6_spill] sm:$0xff] }
 0x908   : > { %v10471_v11 = vpack.c.bf16 %v18128_v55, %v18118_v54  ;;  %v8642_v2 = vpack.c.bf16 %v8623_v58, %v8622_v47  ;;  %v8624_v40 = vmul.f32 %v17650_v52, %v19884_v38  ;;  %v8629_v9 = vmul.f32 %v19887_v24, %v19890_v7  ;;  %v19892_v30 = vld [vmem:[#allocation118_spill] sm:$0xff]  ;;  %v19893_v57 = vld [vmem:[#allocation4_spill] sm:$0xff]  ;;  %v19894_v38 = vld [vmem:[#allocation3_spill] sm:$0xff] }
 0x909   : > { %v8639_v59 = vpack.c.bf16 %v8617_v3, %v8616_v17  ;;  %v8641_v4 = vpack.c.bf16 %v8621_v41, %v8620_v18  ;;  %v8644_v20 = vpack.c.bf16 %v8627_v16, %v8626_v34  ;;  %v9154_v13 = vmul.f32 %v9122_v39, %v19891_v29  ;;  %v19899_v63 = vld [vmem:[#allocation111_spill] sm:$0xff]  ;;  %v19901_v37 = vld [vmem:[#allocation90_spill] sm:$0xff]  ;;  %v19903_v58 = vld [vmem:[#allocation112_spill] sm:$0xff] }
 0x90a   : > { %v8643_v48 = vpack.c.bf16 %v8625_v61, %v8624_v40  ;;  %v8628_v28 = vmul.f32 %v19885_v22, %v19892_v30  ;;  %v9153_v23 = vmul.f32 %v9121_v27, %v19893_v57  ;;  %v9155_v43 = vmul.f32 %v19895_v53, %v19894_v38  ;;  %v11997_v41 = vld [vmem:[%s18714_s20 + $0x10] sm:$0xf]  ;;  %v19902_v47 = vld [vmem:[#allocation10_spill] sm:$0xff]  ;;  %v19908_v40 = vld [vmem:[#allocation12_spill] sm:$0xff] }
 0x90b   : > { %v9156_v24 = vmul.f32 %v19897_v25, %v19896_v15  ;;  %v9158_v3 = vmul.f32 %v19899_v63, %v19898_v8  ;;  %v9157_v22 = vmul.f32 %v19901_v37, %v19900_v19  ;;  %v9159_v18 = vmul.f32 %v19903_v58, %v19902_v47  ;;  %v19906_v34 = vld [vmem:[#allocation11_spill] sm:$0xff]  ;;  %v19910_v27 = vld [vmem:[#allocation14_spill] sm:$0xff]  ;;  %v19915_v25 = vld [vmem:[#allocation16_spill] sm:$0xff] }
 0x90c   : > { %v8645_v10 = vpack.c.bf16 %v8629_v9, %v8628_v28  ;;  %v9185_v52 = vpack.c.bf16 %v9154_v13, %v9153_v23  ;;  %v19911_v13 = vld [vmem:[#allocation24_spill] sm:$0xff]  ;;  %v19912_v23 = vld [vmem:[#allocation13_spill] sm:$0xff]  ;;  %v19914_v53 = vld [vmem:[#allocation127_spill] sm:$0xff] }
 0x90d   : > { %v9186_v17 = vpack.c.bf16 %v9156_v24, %v9155_v43  ;;  %v9163_v28 = vmul.f32 %v19911_v13, %v19910_v27  ;;  %v9166_v43 = vmul.f32 %v19914_v53, %v19806_v0  ;;  %v19916_v24 = vld [vmem:[#allocation123_spill] sm:$0xff]  ;;  %v19919_v58 = vld [vmem:[#allocation134_spill] sm:$0xff]  ;;  %v19924_v13 = vld [vmem:[#allocation21_spill] sm:$0xff] }
 0x90e   : > { %13361 = vmatmul.mubr.msk.bf16.gmra.mrb[80].mxu1 %vm661_vm2, %v8639_v59  ;;  %v9578_v59 = vsel %vm1682_vm3, %v17950_v45, 0  ;;  %v19907_v45 = vld [vmem:[#allocation94_spill] sm:$0xff]  ;;  %v9165_v63 = vmul.f32 %v19916_v24, %v19915_v25 }
 0x90f   : > { %13364 = vmatprep.mubr.msk.bf16.mxu1 %vm661_vm2, %v8640_v42  ;;  %v9187_v42 = vpack.c.bf16 %v9158_v3, %v9157_v22  ;;  %v9162_v16 = vmul.f32 %v19907_v45, %v19906_v34  ;;  %v19917_v22 = vld [vmem:[#allocation128_spill] sm:$0xff]  ;;  %v10723_v54 = vld [vmem:[#allocation2 + $0x48] sm:$0xff] }
 0x910   : > { %v9191_v37 = vpack.c.bf16 %v9166_v43, %v9165_v63  ;;  %v19927_v43 = vld [vmem:[#allocation135_spill] sm:$0xff] }
 0x911   : > { %v9173_v24 = vmul.f32 %v19927_v43, %v19698_v31  ;;  %v19938_v43 = vld [vmem:[#allocation29_spill] sm:$0xff] }
 0x916   : > { %13365 = vmatmul.mubr.msk.bf16.gmra.mrb[84].mxu1 %vm661_vm2, %v8641_v4  ;;  %v19904_v4 = vld [vmem:[#allocation9_spill] sm:$0xff] }
 0x917   : > { %13368 = vmatprep.mubr.msk.bf16.mxu1 %vm661_vm2, %v8642_v2  ;;  %v19905_v2 = vld [vmem:[#allocation96_spill] sm:$0xff] }
 0x918   : > { %v9160_v61 = vmul.f32 %v19905_v2, %v19904_v4  ;;  %v19920_v2 = vld [vmem:[#allocation20_spill] sm:$0xff] }
 0x91a   : > { %v9188_v39 = vpack.c.bf16 %v9160_v61, %v9159_v18  ;;  %v9170_v18 = vmul.f32 %v19919_v58, %v19816_v62  ;;  %v19921_v61 = vld [vmem:[#allocation132_spill] sm:$0xff] }
 0x91b   : > { %v9169_v45 = vmul.f32 %v19921_v61, %v19920_v2  ;;  %v19933_v61 = vld [vmem:[#allocation148_spill] sm:$0xff] }
 0x91e   : > { %13369 = vmatmul.mubr.msk.bf16.gmra.mrb[88].mxu1 %vm661_vm2, %v8643_v48  ;;  %v19909_v48 = vld [vmem:[#allocation61_spill] sm:$0xff] }
 0x91f   : > { %13372 = vmatprep.mubr.msk.bf16.mxu1 %vm661_vm2, %v8644_v20  ;;  %v9161_v20 = vmul.f32 %v19909_v48, %v19908_v40  ;;  %v9193_v48 = vpack.c.bf16 %v9170_v18, %v9169_v45  ;;  %v19932_v18 = vld [vmem:[#allocation27_spill] sm:$0xff] }
 0x920   : > { %v9178_v45 = vmul.f32 %v19933_v61, %v19932_v18 }
 0x921   : > { %v9189_v9 = vpack.c.bf16 %v9162_v16, %v9161_v20  ;;  %v19922_v20 = vld [vmem:[#allocation22_spill] sm:$0xff] }
 0x926   : > { %13373 = vmatmul.mubr.msk.bf16.gmra.mrb[92].mxu1 %vm661_vm2, %v8645_v10  ;;  %v19913_v10 = vld [vmem:[#allocation122_spill] sm:$0xff] }
 0x927   : > { %13378 = vmatprep.mubr.msk.bf16.mxu1 %vm661_vm2, %v9185_v52  ;;  %v9164_v52 = vmul.f32 %v19913_v10, %v19912_v23 }
 0x929   : > { %v9190_v3 = vpack.c.bf16 %v9164_v52, %v9163_v28  ;;  %v19925_v28 = vld [vmem:[#allocation140_spill] sm:$0xff]  ;;  %v19926_v52 = vld [vmem:[#allocation141_spill] sm:$0xff] }
 0x92a   : > { %v9172_v10 = vmul.f32 %v19925_v28, %v19924_v13  ;;  %v9174_v53 = vmul.f32 %v19926_v52, %v19697_v21 }
 0x92e   : > { %13379 = vmatmul.mubr.msk.bf16.vlgmr.msra.gmra.mrb[64].mxu1 %vm661_vm2, %v9186_v17  ;;  %v9167_v17 = vmul.f32 %v19917_v22, %v19808_v49  ;;  %v19929_v22 = vld [vmem:[#allocation145_spill] sm:$0xff] }
 0x92f   : > { %13411 = vmatpush3.bf16.msra.mxu1 %v9578_v59  ;;  %13382 = vmatprep.mubr.msk.bf16.mxu1 %vm661_vm2, %v9187_v42  ;;  %v19918_v59 = vld [vmem:[#allocation133_spill] sm:$0xff] }
 0x930   : > { %14407 = vmatprep.subr.msk.bf16.mxu1 %vm1682_vm3, %v11997_v41  ;;  %v9168_v42 = vmul.f32 %v19918_v59, %v19810_v44  ;;  %v19930_v59 = vld [vmem:[#allocation25_spill] sm:$0xff] }
 0x932   : > { %v9192_v16 = vpack.c.bf16 %v9168_v42, %v9167_v17  ;;  %v19931_v42 = vld [vmem:[#allocation146_spill] sm:$0xff] }
 0x933   : > { %v9176_v58 = vmul.f32 %v19931_v42, %v19930_v59  ;;  %v19941_v42 = vld [vmem:[#allocation151_spill] sm:$0xff] }
 0x934   : > { %v9181_v61 = vmul.f32 %v19941_v42, %v19837_v14  ;;  %v19949_v14 = vld [vmem:[#allocation38_spill] sm:$0xff] }
 0x936   : > { %13383 = vmatmul.mubr.msk.bf16.gmra.mrb[68].mxu1 %vm661_vm2, %v9188_v39  ;;  %v19923_v39 = vld [vmem:[#allocation139_spill] sm:$0xff] }
 0x937   : > { %13386 = vmatprep.mubr.msk.bf16.mxu1 %vm661_vm2, %v9189_v9  ;;  %v9171_v9 = vmul.f32 %v19923_v39, %v19922_v20 }
 0x939   : > { %v9194_v63 = vpack.c.bf16 %v9172_v10, %v9171_v9  ;;  %v19936_v9 = vld [vmem:[#allocation30_spill] sm:$0xff]  ;;  %v19937_v10 = vld [vmem:[#allocation149_spill] sm:$0xff] }
 0x93e   : > { %13387 = vmatmul.mubr.msk.bf16.gmra.mrb[72].mxu1 %vm661_vm2, %v9190_v3  ;;  %v9195_v3 = vpack.c.bf16 %v9174_v53, %v9173_v24  ;;  %v9179_v53 = vmul.f32 %v19937_v10, %v19936_v9  ;;  %v19939_v24 = vld [vmem:[#allocation150_spill] sm:$0xff] }
 0x93f   : > { %13390 = vmatprep.mubr.msk.bf16.mxu1 %vm661_vm2, %v9191_v37  ;;  %v19928_v37 = vld [vmem:[#allocation26_spill] sm:$0xff] }
 0x940   : > { %v9175_v17 = vmul.f32 %v19929_v22, %v19928_v37 }
 0x942   : > { %v9196_v28 = vpack.c.bf16 %v9176_v58, %v9175_v17  ;;  %v19942_v17 = vld [vmem:[#allocation34_spill] sm:$0xff]  ;;  %v19943_v58 = vld [vmem:[#allocation156_spill] sm:$0xff] }
 0x946   : > { %13391 = vmatmul.mubr.msk.bf16.gmra.mrb[76].mxu1 %vm661_vm2, %v9192_v16  ;;  %v19934_v16 = vld [vmem:[#allocation28_spill] sm:$0xff] }
 0x947   : > { %13394 = vmatprep.mubr.msk.bf16.mxu1 %vm661_vm2, %v9193_v48  ;;  %v19935_v48 = vld [vmem:[#allocation147_spill] sm:$0xff] }
 0x948   : > { %v9177_v39 = vmul.f32 %v19935_v48, %v19934_v16 }
 0x94a   : > { %v9197_v52 = vpack.c.bf16 %v9178_v45, %v9177_v39  ;;  %v9183_v45 = vmul.f32 %v19943_v58, %v19942_v17  ;;  %v19944_v39 = vld [vmem:[#allocation33_spill] sm:$0xff]  ;;  %v12014_v58 = vld [vmem:[%s18714_s20 + $0x14] sm:$0xf] }
 0x94e   : > { %13395 = vmatmul.mubr.msk.bf16.gmra.mrb[80].mxu1 %vm661_vm2, %v9194_v63  ;;  %v9180_v63 = vmul.f32 %v19939_v24, %v19938_v43  ;;  %v19946_v24 = vld [vmem:[#allocation101_spill] sm:$0xff] }
 0x94f   : > { %13398 = vmatprep.mubr.msk.bf16.mxu1 %vm661_vm2, %v9195_v3  ;;  %v19940_v3 = vld [vmem:[#allocation155_spill] sm:$0xff] }
 0x950   : > { %v9182_v22 = vmul.f32 %v19940_v3, %v19839_v60  ;;  %v9198_v46 = vpack.c.bf16 %v9180_v63, %v9179_v53  ;;  %v19947_v60 = vld [vmem:[#allocation100_spill] sm:$0xff]  ;;  %v19950_v53 = vld [vmem:[#allocation50_spill] sm:$0xff] }
 0x951   : > { %v19948_v3 = vpack.c.bf16 %v19946_v24, %v19947_v60  ;;  %v9481_v63 = vmul.f32 %v19950_v53, %v19949_v14  ;;  %v19957_v24 = vld [vmem:[#allocation53_spill] sm:$0xff] }
 0x952   : > { %v9199_v48 = vpack.c.bf16 %v9182_v22, %v9181_v61  ;;  %v19952_v22 = vld [vmem:[#allocation73_spill] sm:$0xff] }
 0x956   : > { %13399 = vmatmul.mubr.msk.bf16.gmra.mrb[84].mxu1 %vm661_vm2, %v9196_v28  ;;  %v19945_v28 = vld [vmem:[#allocation157_spill] sm:$0xff] }
 0x957   : > { %13402 = vmatprep.mubr.msk.bf16.mxu1 %vm661_vm2, %v9197_v52  ;;  %v9184_v52 = vmul.f32 %v19945_v28, %v19944_v39  ;;  %v19954_v28 = vld [vmem:[#allocation116_spill] sm:$0xff] }
 0x959   : > { %v9200_v10 = vpack.c.bf16 %v9184_v52, %v9183_v45  ;;  %v19953_v45 = vld [vmem:[#allocation117_spill] sm:$0xff] }
 0x95a   : > { %v19955_v52 = vpack.c.bf16 %v19953_v45, %v19954_v28  ;;  %v19968_v28 = vld [vmem:[#allocation80_spill] sm:$0xff] }
 0x95e   : > { %13403 = vmatmul.mubr.msk.bf16.gmra.mrb[88].mxu1 %vm661_vm2, %v9198_v46  ;;  %v19951_v46 = vld [vmem:[#allocation37_spill] sm:$0xff] }
 0x95f   : > { %13406 = vmatprep.mubr.msk.bf16.mxu1 %vm661_vm2, %v9199_v48  ;;  %v9482_v42 = vmul.f32 %v19952_v22, %v19951_v46  ;;  %v9872_v48 = vsel %vm1682_vm3, %v11997_v41, 0  ;;  %v19959_v41 = vld [vmem:[#allocation68_spill] sm:$0xff]  ;;  %v19963_v46 = vld [vmem:[#allocation41_spill] sm:$0xff] }
 0x961   : > { %v9512_v61 = vpack.c.bf16 %v9482_v42, %v9481_v63  ;;  %v19962_v63 = vld [vmem:[#allocation43_spill] sm:$0xff] }
 0x962   : > { %v19964_v42 = vpack.c.bf16 %v19962_v63, %v19963_v46  ;;  %v19977_v46 = vld [vmem:[#allocation46_spill] sm:$0xff] }
 0x966   : > { %13407 = vmatmul.mubr.msk.bf16.gmra.mrb[92].mxu1 %vm661_vm2, %v9200_v10  ;;  %v19956_v10 = vld [vmem:[#allocation40_spill] sm:$0xff] }
 0x967   : > { %13412 = vmatprep.mubr.msk.bf16.mxu1 %vm661_vm2, %v19948_v3  ;;  %v19958_v60 = vpack.c.bf16 %v19956_v10, %v19957_v24  ;;  %v19960_v3 = vld [vmem:[#allocation62_spill] sm:$0xff]  ;;  %v19971_v24 = vld [vmem:[#allocation97_spill] sm:$0xff] }
 0x968   : > { %v19961_v14 = vpack.c.bf16 %v19959_v41, %v19960_v3  ;;  %v19974_v3 = vld [vmem:[#allocation98_spill] sm:$0xff] }
 0x96e   : > { %13413 = vmatmul.mubr.msk.bf16.vlgmr.msra.gmra.mrb[64].mxu1 %vm661_vm2, %v9512_v61  ;;  %v19965_v61 = vld [vmem:[#allocation69_spill] sm:$0xff] }
 0x96f   : > { %13445 = vmatpush3.bf16.msra.mxu1 %v9872_v48  ;;  %13416 = vmatprep.mubr.msk.bf16.mxu1 %vm661_vm2, %v19955_v52  ;;  %v19966_v48 = vld [vmem:[#allocation44_spill] sm:$0xff]  ;;  %v19969_v52 = vld [vmem:[#allocation70_spill] sm:$0xff] }
 0x970   : > { %14408 = vmatprep.subr.msk.bf16.mxu1 %vm1682_vm3, %v12014_v58  ;;  %v19967_v45 = vpack.c.bf16 %v19965_v61, %v19966_v48  ;;  %v19970_v10 = vpack.c.bf16 %v19968_v28, %v19969_v52  ;;  %v19980_v48 = vld [vmem:[#allocation74_spill] sm:$0xff] }
 0x971   : > { %v19983_v52 = vld [vmem:[#allocation54_spill] sm:$0xff] }
 0x976   : > { %13417 = vmatmul.mubr.msk.bf16.gmra.mrb[68].mxu1 %vm661_vm2, %v19958_v60  ;;  %v19972_v60 = vld [vmem:[#allocation89_spill] sm:$0xff] }
 0x977   : > { %13420 = vmatprep.mubr.msk.bf16.mxu1 %vm661_vm2, %v19961_v14  ;;  %v19973_v41 = vpack.c.bf16 %v19971_v24, %v19972_v60  ;;  %v19975_v14 = vld [vmem:[#allocation88_spill] sm:$0xff] }
 0x978   : > { %v19976_v63 = vpack.c.bf16 %v19974_v3, %v19975_v14  ;;  %v19986_v60 = vld [vmem:[#allocation72_spill] sm:$0xff]  ;;  %v19989_v14 = vld [vmem:[#allocation137_spill] sm:$0xff] }
 0x97e   : > { %13421 = vmatmul.mubr.msk.bf16.gmra.mrb[72].mxu1 %vm661_vm2, %v19964_v42  ;;  %v19978_v42 = vld [vmem:[#allocation77_spill] sm:$0xff] }
 0x97f   : > { %13424 = vmatprep.mubr.msk.bf16.mxu1 %vm661_vm2, %v19967_v45  ;;  %v19979_v61 = vpack.c.bf16 %v19977_v46, %v19978_v42  ;;  %v19981_v45 = vld [vmem:[#allocation85_spill] sm:$0xff]  ;;  %v19992_v42 = vld [vmem:[#allocation172_spill] sm:$0xff] }
 0x980   : > { %v19982_v28 = vpack.c.bf16 %v19980_v48, %v19981_v45  ;;  %v9510_v48 = vmul.f32 %v18078_v12, %v19890_v7  ;;  %v19996_v12 = vld [vmem:[#allocation113_spill] sm:$0xff] }
 0x986   : > { %13425 = vmatmul.mubr.msk.bf16.gmra.mrb[76].mxu1 %vm661_vm2, %v19970_v10  ;;  %v19984_v10 = vld [vmem:[#allocation49_spill] sm:$0xff] }
 0x987   : > { %13428 = vmatprep.mubr.msk.bf16.mxu1 %vm661_vm2, %v19973_v41  ;;  %v19985_v24 = vpack.c.bf16 %v19983_v52, %v19984_v10  ;;  %v19987_v41 = vld [vmem:[#allocation92_spill] sm:$0xff]  ;;  %v10198_v52 = vsel %vm1682_vm3, %v12014_v58, 0  ;;  %v19998_v58 = vld [vmem:[#allocation57_spill] sm:$0xff] }
 0x988   : > { %v19988_v3 = vpack.c.bf16 %v19986_v60, %v19987_v41  ;;  %v12031_v10 = vld [vmem:[%s18714_s20 + $0x18] sm:$0xf]  ;;  %v19995_v60 = vld [vmem:[#allocation109_spill] sm:$0xff]  ;;  %v19997_v41 = vld [vmem:[#allocation39_spill] sm:$0xff] }
 0x98e   : > { %13429 = vmatmul.mubr.msk.bf16.gmra.mrb[80].mxu1 %vm661_vm2, %v19976_v63  ;;  %v19990_v63 = vld [vmem:[#allocation136_spill] sm:$0xff] }
 0x98f   : > { %13432 = vmatprep.mubr.msk.bf16.mxu1 %vm661_vm2, %v19979_v61  ;;  %v19991_v46 = vpack.c.bf16 %v19989_v14, %v19990_v63  ;;  %v9509_v61 = vmul.f32 %v19992_v42, %v19892_v30  ;;  %v20000_v14 = vld [vmem:[#allocation42_spill] sm:$0xff]  ;;  %v20001_v63 = vld [vmem:[#allocation81_spill] sm:$0xff]  ;;  %v20003_v42 = vld [vmem:[#allocation108_spill] sm:$0xff] }
 0x991   : > { %v9526_v45 = vpack.c.bf16 %v9510_v48, %v9509_v61  ;;  %v20004_v61 = vld [vmem:[#allocation115_spill] sm:$0xff] }
 0x992   : > { %v20005_v48 = vld [vmem:[#allocation47_spill] sm:$0xff] }
 0x996   : > { %13433 = vmatmul.mubr.msk.bf16.gmra.mrb[84].mxu1 %vm661_vm2, %v19982_v28  ;;  %v19993_v28 = vld [vmem:[#allocation99_spill] sm:$0xff] }
 0x997   : > { %13436 = vmatprep.mubr.msk.bf16.mxu1 %vm661_vm2, %v19985_v24  ;;  %v19994_v24 = vld [vmem:[#allocation104_spill] sm:$0xff] }
 0x99e   : > { %13437 = vmatmul.mubr.msk.bf16.gmra.mrb[88].mxu1 %vm661_vm2, %v19988_v3  ;;  %v19999_v3 = vld [vmem:[#allocation65_spill] sm:$0xff] }
 0x99f   : > { %13440 = vmatprep.mubr.msk.bf16.mxu1 %vm661_vm2, %v19991_v46  ;;  %v20002_v46 = vld [vmem:[#allocation51_spill] sm:$0xff] }
 0x9a6   : > { %13441 = vmatmul.mubr.msk.bf16.gmra.mrb[92].mxu1 %vm661_vm2, %v9526_v45  ;;  %v20006_v45 = vld [vmem:[#allocation110_spill] sm:$0xff] }
 0x9a7   : > { %13446 = vmatprep.mubr.msk.bf16.mxu1 %vm661_vm2, %v19993_v28  ;;  %v20007_v28 = vld [vmem:[#allocation131_spill] sm:$0xff] }
 0x9ae   : > { %13447 = vmatmul.mubr.msk.bf16.vlgmr.msra.gmra.mrb[64].mxu1 %vm661_vm2, %v19994_v24  ;;  %v9803_v24 = vld [vmem:[#allocation2 + $0x108] sm:$0xff] }
 0x9af   : > { %13479 = vmatpush3.bf16.msra.mxu1 %v10198_v52  ;;  %13450 = vmatprep.mubr.msk.bf16.mxu1 %vm661_vm2, %v19995_v60  ;;  %v9804_v52 = vld [vmem:[#allocation2 + $0x110] sm:$0xff] }
 0x9b0   : > { %14409 = vmatprep.subr.msk.bf16.mxu1 %vm1682_vm3, %v12031_v10  ;;  %v18385_v60 = vpack.c.bf16 %v9804_v52, %v9803_v24  ;;  %v20018_v52 = vld [vmem:[#allocation124_spill] sm:$0xff]  ;;  %v20020_v24 = vld [vmem:[#allocation138_spill] sm:$0xff] }
 0x9b6   : > { %13451 = vmatmul.mubr.msk.bf16.gmra.mrb[68].mxu1 %vm661_vm2, %v19996_v12  ;;  %v20008_v12 = vld [vmem:[#allocation93_spill] sm:$0xff] }
 0x9b7   : > { %13454 = vmatprep.mubr.msk.bf16.mxu1 %vm661_vm2, %v19997_v41  ;;  %v20009_v41 = vld [vmem:[#allocation52_spill] sm:$0xff] }
 0x9be   : > { %13455 = vmatmul.mubr.msk.bf16.gmra.mrb[72].mxu1 %vm661_vm2, %v19998_v58  ;;  %v20010_v58 = vpack.c.bf16 %v20008_v12, %v20009_v41  ;;  %v20021_v12 = vld [vmem:[#allocation130_spill] sm:$0xff] }
 0x9bf   : > { %13458 = vmatprep.mubr.msk.bf16.mxu1 %vm661_vm2, %v19999_v3  ;;  %v10524_v3 = vsel %vm1682_vm3, %v12031_v10, 0  ;;  %v20022_v41 = vpack.c.bf16 %v20020_v24, %v20021_v12  ;;  %v20035_v12 = vld [vmem:[#allocation154_spill] sm:$0xff] }
 0x9c6   : > { %13459 = vmatmul.mubr.msk.bf16.gmra.mrb[76].mxu1 %vm661_vm2, %v20000_v14  ;;  %v12048_v14 = vld [vmem:[%s18714_s20 + $0x1c] sm:$0xf] }
 0x9c7   : > { %13462 = vmatprep.mubr.msk.bf16.mxu1 %vm661_vm2, %v20001_v63  ;;  %v20011_v63 = vld [vmem:[#allocation119_spill] sm:$0xff] }
 0x9ce   : > { %13463 = vmatmul.mubr.msk.bf16.gmra.mrb[80].mxu1 %vm661_vm2, %v20002_v46  ;;  %v20012_v46 = vld [vmem:[#allocation23_spill] sm:$0xff] }
 0x9cf   : > { %13466 = vmatprep.mubr.msk.bf16.mxu1 %vm661_vm2, %v20003_v42  ;;  %v20013_v42 = vpack.c.bf16 %v20011_v63, %v20012_v46  ;;  %v20024_v63 = vld [vmem:[#allocation142_spill] sm:$0xff]  ;;  %v20026_v46 = vld [vmem:[#allocation15_spill] sm:$0xff] }
 0x9d6   : > { %13467 = vmatmul.mubr.msk.bf16.gmra.mrb[84].mxu1 %vm661_vm2, %v20004_v61  ;;  %v20014_v61 = vld [vmem:[#allocation121_spill] sm:$0xff] }
 0x9d7   : > { %13470 = vmatprep.mubr.msk.bf16.mxu1 %vm661_vm2, %v20005_v48  ;;  %v20015_v48 = vld [vmem:[#allocation120_spill] sm:$0xff] }
 0x9de   : > { %13471 = vmatmul.mubr.msk.bf16.gmra.mrb[88].mxu1 %vm661_vm2, %v20006_v45  ;;  %v20016_v45 = vpack.c.bf16 %v20014_v61, %v20015_v48  ;;  %v20029_v48 = vld [vmem:[#allocation17_spill] sm:$0xff] }
 0x9df   : > { %13474 = vmatprep.mubr.msk.bf16.mxu1 %vm661_vm2, %v20007_v28  ;;  %v20017_v28 = vld [vmem:[#allocation125_spill] sm:$0xff] }
 0x9e0   : > { %v20019_v10 = vpack.c.bf16 %v20017_v28, %v20018_v52  ;;  %v20032_v52 = vld [vmem:[#allocation19_spill] sm:$0xff] }
 0x9e6   : > { %13475 = vmatmul.mubr.msk.bf16.gmra.mrb[92].mxu1 %vm661_vm2, %v18385_v60 }
 0x9e7   : > { %13480 = vmatprep.mubr.msk.bf16.mxu1 %vm661_vm2, %v20010_v58  ;;  %v20023_v58 = vld [vmem:[#allocation143_spill] sm:$0xff] }
 0x9ee   : > { %13481 = vmatmul.mubr.msk.bf16.vlgmr.msra.gmra.mrb[64].mxu1 %vm661_vm2, %v20013_v42  ;;  %v20027_v42 = vld [vmem:[#allocation144_spill] sm:$0xff] }
 0x9ef   : > { %13513 = vmatpush3.bf16.msra.mxu1 %v10524_v3  ;;  %13484 = vmatprep.mubr.msk.bf16.mxu1 %vm661_vm2, %v20016_v45  ;;  %v20025_v3 = vpack.c.bf16 %v20023_v58, %v20024_v63  ;;  %v20028_v61 = vpack.c.bf16 %v20026_v46, %v20027_v42  ;;  %v20030_v45 = vld [vmem:[#allocation18_spill] sm:$0xff]  ;;  %v20038_v63 = vld [vmem:[#allocation159_spill] sm:$0xff]  ;;  %v20041_v42 = vld [vmem:[#allocation161_spill] sm:$0xff] }
 0x9f0   : > { %14410 = vmatprep.subr.msk.bf16.mxu1 %vm1682_vm3, %v12048_v14  ;;  %v20031_v28 = vpack.c.bf16 %v20029_v48, %v20030_v45  ;;  %v20044_v45 = vld [vmem:[#allocation163_spill] sm:$0xff] }
 0x9f6   : > { %13485 = vmatmul.mubr.msk.bf16.gmra.mrb[68].mxu1 %vm661_vm2, %v20019_v10  ;;  %v20033_v10 = vld [vmem:[#allocation152_spill] sm:$0xff] }
 0x9f7   : > { %13488 = vmatprep.mubr.msk.bf16.mxu1 %vm661_vm2, %v20022_v41  ;;  %v20034_v24 = vpack.c.bf16 %v20032_v52, %v20033_v10  ;;  %v20036_v41 = vld [vmem:[#allocation153_spill] sm:$0xff] }
 0x9f8   : > { %v20037_v58 = vpack.c.bf16 %v20035_v12, %v20036_v41  ;;  %v20047_v10 = vld [vmem:[#allocation165_spill] sm:$0xff]  ;;  %v20050_v41 = vld [vmem:[#allocation31_spill] sm:$0xff] }
 0x9fe   : > { %13489 = vmatmul.mubr.msk.bf16.gmra.mrb[72].mxu1 %vm661_vm2, %v20025_v3  ;;  %v20039_v3 = vld [vmem:[#allocation158_spill] sm:$0xff] }
 0x9ff   : > { %13492 = vmatprep.mubr.msk.bf16.mxu1 %vm661_vm2, %v20028_v61  ;;  %v20040_v46 = vpack.c.bf16 %v20038_v63, %v20039_v3  ;;  %v20042_v61 = vld [vmem:[#allocation160_spill] sm:$0xff]  ;;  %v10129_v3 = vmul.f32 %v18145_v5, %v19942_v17  ;;  %v12065_v5 = vld [vmem:[%s18714_s20 + $0x20] sm:$0xf] }
 0xa00   : > { %v20043_v48 = vpack.c.bf16 %v20041_v42, %v20042_v61  ;;  %v20053_v42 = vld [vmem:[#allocation36_spill] sm:$0xff]  ;;  %v11144_v55 = vsel %vm1682_vm3, %v12065_v5, 0 }
 0xa01   : > { %v10425_v61 = vmul.f32 %v19950_v53, %v20053_v42  ;;  %v20058_v53 = vld [vmem:[#allocation168_spill] sm:$0xff] }
 0xa06   : > { %13493 = vmatmul.mubr.msk.bf16.gmra.mrb[76].mxu1 %vm661_vm2, %v20031_v28  ;;  %v20045_v28 = vld [vmem:[#allocation162_spill] sm:$0xff] }
 0xa07   : > { %13496 = vmatprep.mubr.msk.bf16.mxu1 %vm661_vm2, %v20034_v24  ;;  %v20046_v52 = vpack.c.bf16 %v20044_v45, %v20045_v28  ;;  %v20048_v24 = vld [vmem:[#allocation164_spill] sm:$0xff] }
 0xa08   : > { %v20049_v12 = vpack.c.bf16 %v20047_v10, %v20048_v24  ;;  %v10818_v10 = vsel %vm1682_vm3, %v12048_v14, 0  ;;  %v20055_v24 = vld [vmem:[#allocation166_spill] sm:$0xff] }
 0xa0e   : > { %13497 = vmatmul.mubr.msk.bf16.gmra.mrb[80].mxu1 %vm661_vm2, %v20037_v58  ;;  %v20051_v58 = vld [vmem:[#allocation32_spill] sm:$0xff] }
 0xa0f   : > { %13500 = vmatprep.mubr.msk.bf16.mxu1 %vm661_vm2, %v20040_v46  ;;  %v20052_v63 = vpack.c.bf16 %v20050_v41, %v20051_v58  ;;  %v10130_v46 = vmul.f32 %v18147_v50, %v19944_v39  ;;  %v20056_v50 = vld [vmem:[#allocation56_spill] sm:$0xff]  ;;  %v20061_v58 = vld [vmem:[#allocation169_spill] sm:$0xff] }
 0xa11   : > { %v10146_v28 = vpack.c.bf16 %v10130_v46, %v10129_v3  ;;  %v20064_v3 = vld [vmem:[#allocation170_spill] sm:$0xff]  ;;  %v20065_v46 = vld [vmem:[#allocation55_spill] sm:$0xff] }
 0xa12   : > { %v20066_v42 = vpack.c.bf16 %v20064_v3, %v20065_v46  ;;  %v20082_v3 = vld [vmem:[#allocation79_spill] sm:$0xff] }
 0xa13   : > { %v20083_v46 = vld [vmem:[#allocation107_spill] sm:$0xff] }
 0xa16   : > { %13501 = vmatmul.mubr.msk.bf16.gmra.mrb[84].mxu1 %vm661_vm2, %v20043_v48  ;;  %v20054_v48 = vld [vmem:[#allocation35_spill] sm:$0xff] }
 0xa17   : > { %13504 = vmatprep.mubr.msk.bf16.mxu1 %vm661_vm2, %v20046_v52  ;;  %v10426_v45 = vmul.f32 %v19952_v22, %v20054_v48  ;;  %v20059_v22 = vld [vmem:[#allocation167_spill] sm:$0xff]  ;;  %v20068_v48 = vld [vmem:[#allocation48_spill] sm:$0xff] }
 0xa18   : > { %v20060_v41 = vpack.c.bf16 %v20058_v53, %v20059_v22  ;;  %v20076_v53 = vld [vmem:[#allocation66_spill] sm:$0xff]  ;;  %v20077_v22 = vld [vmem:[#allocation67_spill] sm:$0xff] }
 0xa19   : > { %v10457_v52 = vpack.c.bf16 %v10426_v45, %v10425_v61  ;;  %v20067_v61 = vld [vmem:[#allocation63_spill] sm:$0xff] }
 0xa1a   : > { %v20069_v45 = vpack.c.bf16 %v20067_v61, %v20068_v48  ;;  %v20085_v61 = vpack.c.bf16 %v18104_v51, %v18100_v56  ;;  %v10423_v48 = vld [vmem:[#allocation2 + $0x117] sm:$0xff]  ;;  %v10719_v56 = vld [vmem:[#allocation2 + $0x28] sm:$0xff] }
 0xa1b   : > { %v10455_v35 = vmul.f32 %v10423_v48, %v19892_v30  ;;  %v10728_v30 = vld [vmem:[#allocation2 + $0x70] sm:$0xff] }
 0xa1e   : > { %13505 = vmatmul.mubr.msk.bf16.gmra.mrb[88].mxu1 %vm661_vm2, %v20049_v12  ;;  %v20057_v12 = vpack.c.bf16 %v20055_v24, %v20056_v50  ;;  %v20073_v24 = vld [vmem:[#allocation58_spill] sm:$0xff]  ;;  %v20074_v50 = vld [vmem:[#allocation59_spill] sm:$0xff] }
 0xa1f   : > { %13508 = vmatprep.mubr.msk.bf16.mxu1 %vm661_vm2, %v20052_v63  ;;  %v20062_v63 = vld [vmem:[#allocation60_spill] sm:$0xff] }
 0xa20   : > { %v20063_v14 = vpack.c.bf16 %v20061_v58, %v20062_v63  ;;  %v20079_v58 = vld [vmem:[#allocation75_spill] sm:$0xff]  ;;  %v20080_v63 = vld [vmem:[#allocation76_spill] sm:$0xff] }
 0xa26   : > { %13509 = vmatmul.mubr.msk.bf16.gmra.mrb[92].mxu1 %vm661_vm2, %v10146_v28  ;;  %v20070_v28 = vld [vmem:[#allocation171_spill] sm:$0xff] }
 0xa27   : > { %13514 = vmatprep.mubr.msk.bf16.mxu1 %vm661_vm2, %v10457_v52  ;;  %v20071_v52 = vld [vmem:[#allocation64_spill] sm:$0xff] }
 0xa2e   : > { %13515 = vmatmul.mubr.msk.bf16.vlgmr.msra.gmra.mrb[64].mxu1 %vm661_vm2, %v20057_v12  ;;  %v20075_v12 = vpack.c.bf16 %v20073_v24, %v20074_v50  ;;  %v10725_v50 = vld [vmem:[#allocation2 + $0x58] sm:$0xff] }
 0xa2f   : > { %13547 = vmatpush3.bf16.msra.mxu1 %v10818_v10  ;;  %13518 = vmatprep.mubr.msk.bf16.mxu1 %vm661_vm2, %v20060_v41  ;;  %v20072_v10 = vpack.c.bf16 %v20070_v28, %v20071_v52  ;;  %v20078_v41 = vpack.c.bf16 %v20076_v53, %v20077_v22  ;;  %v10424_v28 = vld [vmem:[#allocation2 + $0x11f] sm:$0xff]  ;;  %v10727_v53 = vld [vmem:[#allocation2 + $0x68] sm:$0xff] }
 0xa30   : > { %14411 = vmatprep.subr.msk.bf16.mxu1 %vm1682_vm3, %v12065_v5  ;;  %v10456_v26 = vmul.f32 %v10424_v28, %v19890_v7  ;;  %v10726_v7 = vld [vmem:[#allocation2 + $0x60] sm:$0xff]  ;;  %v10755_v22 = vpack.c.bf16 %v10728_v30, %v10727_v53  ;;  %v10729_v5 = vld [vmem:[#allocation2 + $0x78] sm:$0xff] }
 0xa31   : > { %v10750_v53 = vld [vmem:[#allocation2 + $0x120] sm:$0xff] }
 0xa32   : > { %v10472_v51 = vpack.c.bf16 %v10456_v26, %v10455_v35  ;;  %v10738_v35 = vld [vmem:[#allocation2 + $0xc0] sm:$0xff]  ;;  %v10740_v26 = vld [vmem:[#allocation2 + $0xd0] sm:$0xff] }
 0xa36   : > { %13519 = vmatmul.mubr.msk.bf16.gmra.mrb[68].mxu1 %vm661_vm2, %v20063_v14  ;;  %v20081_v14 = vpack.c.bf16 %v20079_v58, %v20080_v63  ;;  %v10732_v58 = vld [vmem:[#allocation2 + $0x90] sm:$0xff] }
 0xa37   : > { %13522 = vmatprep.mubr.msk.bf16.mxu1 %vm661_vm2, %v20066_v42  ;;  %v20084_v42 = vpack.c.bf16 %v20082_v3, %v20083_v46  ;;  %v10734_v46 = vld [vmem:[#allocation2 + $0xa0] sm:$0xff] }
 0xa3e   : > { %13523 = vmatmul.mubr.msk.bf16.gmra.mrb[72].mxu1 %vm661_vm2, %v20069_v45  ;;  %v20086_v45 = vpack.c.bf16 %v18114_v36, %v18110_v1  ;;  %v10722_v1 = vld [vmem:[#allocation2 + $0x40] sm:$0xff]  ;;  %v10724_v36 = vld [vmem:[#allocation2 + $0x50] sm:$0xff] }
 0xa3f   : > { %13526 = vmatprep.mubr.msk.bf16.mxu1 %vm661_vm2, %v20072_v10  ;;  %v10721_v10 = vld [vmem:[#allocation2 + $0x38] sm:$0xff] }
 0xa40   : > { %v10752_v24 = vpack.c.bf16 %v10722_v1, %v10721_v10  ;;  %v10742_v1 = vld [vmem:[#allocation2 + $0xe0] sm:$0xff]  ;;  %v10741_v10 = vld [vmem:[#allocation2 + $0xd8] sm:$0xff] }
 0xa46   : > { %13527 = vmatmul.mubr.msk.bf16.gmra.mrb[76].mxu1 %vm661_vm2, %v20075_v12  ;;  %v10754_v12 = vpack.c.bf16 %v10726_v7, %v10725_v50  ;;  %v10745_v7 = vld [vmem:[#allocation2 + $0xf8] sm:$0xff] }
 0xa47   : > { %13530 = vmatprep.mubr.msk.bf16.mxu1 %vm661_vm2, %v20078_v41  ;;  %v10730_v41 = vld [vmem:[#allocation2 + $0x80] sm:$0xff]  ;;  %v11014_v50 = vld [vmem:[#allocation2 + $0x31] sm:$0xff] }
 0xa48   : > { %v10756_v63 = vpack.c.bf16 %v10730_v41, %v10729_v5  ;;  %v11046_v41 = vmul.f32 %v11014_v50, %v19891_v29  ;;  %v11029_v50 = vld [vmem:[#allocation2 + $0xa9] sm:$0xff] }
 0xa4e   : > { %13531 = vmatmul.mubr.msk.bf16.gmra.mrb[80].mxu1 %vm661_vm2, %v20081_v14  ;;  %v10731_v14 = vld [vmem:[#allocation2 + $0x88] sm:$0xff] }
 0xa4f   : > { %13534 = vmatprep.mubr.msk.bf16.mxu1 %vm661_vm2, %v20084_v42  ;;  %v10757_v3 = vpack.c.bf16 %v10732_v58, %v10731_v14  ;;  %v10736_v42 = vld [vmem:[#allocation2 + $0xb0] sm:$0xff]  ;;  %v11015_v14 = vld [vmem:[#allocation2 + $0x39] sm:$0xff] }
 0xa56   : > { %13535 = vmatmul.mubr.msk.bf16.gmra.mrb[84].mxu1 %vm661_vm2, %v10468_v6  ;;  %v10720_v6 = vld [vmem:[#allocation2 + $0x30] sm:$0xff] }
 0xa57   : > { %13538 = vmatprep.mubr.msk.bf16.mxu1 %vm661_vm2, %v20085_v61  ;;  %v10751_v52 = vpack.c.bf16 %v10720_v6, %v10719_v56  ;;  %v10733_v61 = vld [vmem:[#allocation2 + $0x98] sm:$0xff]  ;;  %v10739_v56 = vld [vmem:[#allocation2 + $0xc8] sm:$0xff] }
 0xa58   : > { %v10758_v48 = vpack.c.bf16 %v10734_v46, %v10733_v61  ;;  %v10737_v6 = vld [vmem:[#allocation2 + $0xb8] sm:$0xff]  ;;  %v11017_v61 = vld [vmem:[#allocation2 + $0x49] sm:$0xff] }
 0xa59   : > { %v11018_v46 = vld [vmem:[#allocation2 + $0x51] sm:$0xff]  ;;  %v11049_v29 = vmul.f32 %v11017_v61, %v19900_v19 }
 0xa5e   : > { %13539 = vmatmul.mubr.msk.bf16.gmra.mrb[88].mxu1 %vm661_vm2, %v20086_v45  ;;  %v10735_v45 = vld [vmem:[#allocation2 + $0xa8] sm:$0xff] }
 0xa5f   : > { %13542 = vmatprep.mubr.msk.bf16.mxu1 %vm661_vm2, %v10471_v11  ;;  %v10753_v11 = vpack.c.bf16 %v10724_v36, %v10723_v54  ;;  %v10759_v28 = vpack.c.bf16 %v10736_v42, %v10735_v45  ;;  %v10744_v36 = vld [vmem:[#allocation2 + $0xf0] sm:$0xff]  ;;  %v11047_v42 = vmul.f32 %v11015_v14, %v19894_v38  ;;  %v11035_v14 = vld [vmem:[#allocation2 + $0xd9] sm:$0xff] }
 0xa66   : > { %13543 = vmatmul.mubr.msk.bf16.gmra.mrb[92].mxu1 %vm661_vm2, %v10472_v51  ;;  %v10760_v51 = vpack.c.bf16 %v10738_v35, %v10737_v6  ;;  %v11020_v35 = vld [vmem:[#allocation2 + $0x61] sm:$0xff] }
 0xa67   : > { %13548 = vmatprep.mubr.msk.bf16.mxu1 %vm661_vm2, %v10751_v52  ;;  %v10761_v52 = vpack.c.bf16 %v10740_v26, %v10739_v56  ;;  %v11022_v26 = vld [vmem:[#allocation2 + $0x71] sm:$0xff]  ;;  %v11052_v38 = vmul.f32 %v11020_v35, %v19904_v4 }
 0xa6e   : > { %13549 = vmatmul.mubr.msk.bf16.vlgmr.msra.gmra.mrb[64].mxu1 %vm661_vm2, %v10752_v24  ;;  %v10762_v24 = vpack.c.bf16 %v10742_v1, %v10741_v10  ;;  %v11024_v1 = vld [vmem:[#allocation2 + $0x81] sm:$0xff] }
 0xa6f   : > { %13581 = vmatpush3.bf16.msra.mxu1 %v11144_v55  ;;  %13552 = vmatprep.mubr.msk.bf16.mxu1 %vm661_vm2, %v10753_v11  ;;  %v10743_v55 = vld [vmem:[#allocation2 + $0xe8] sm:$0xff]  ;;  %v10746_v11 = vld [vmem:[#allocation2 + $0x100] sm:$0xff] }
 0xa70   : > { %v10763_v54 = vpack.c.bf16 %v10744_v36, %v10743_v55  ;;  %v10764_v30 = vpack.c.bf16 %v10746_v11, %v10745_v7  ;;  %v11026_v36 = vld [vmem:[#allocation2 + $0x91] sm:$0xff]  ;;  %v11028_v11 = vld [vmem:[#allocation2 + $0xa1] sm:$0xff] }
 0xa71   : > { %v11058_v4 = vmul.f32 %v11026_v36, %v19806_v0  ;;  %v11030_v7 = vld [vmem:[#allocation2 + $0xb1] sm:$0xff]  ;;  %v11061_v0 = vmul.f32 %v11029_v50, %v19920_v2 }
 0xa76   : > { %13553 = vmatmul.mubr.msk.bf16.gmra.mrb[68].mxu1 %vm661_vm2, %v10754_v12  ;;  %v10749_v12 = vld [vmem:[#allocation2 + $0x118] sm:$0xff] }
 0xa77   : > { %13556 = vmatprep.mubr.msk.bf16.mxu1 %vm661_vm2, %v10755_v22  ;;  %v11013_v22 = vld [vmem:[#allocation2 + $0x29] sm:$0xff]  ;;  %v10766_v58 = vpack.c.bf16 %v10750_v53, %v10749_v12  ;;  %v11031_v53 = vld [vmem:[#allocation2 + $0xb9] sm:$0xff] }
 0xa78   : > { %v11045_v5 = vmul.f32 %v11013_v22, %v19893_v57  ;;  %v11019_v57 = vld [vmem:[#allocation2 + $0x59] sm:$0xff]  ;;  %v11032_v22 = vld [vmem:[#allocation2 + $0xc1] sm:$0xff] }
 0xa79   : > { %v11051_v6 = vmul.f32 %v11019_v57, %v19902_v47  ;;  %v11056_v47 = vmul.f32 %v11024_v1, %v19912_v23  ;;  %v11062_v23 = vmul.f32 %v11030_v7, %v19816_v62  ;;  %v11043_v57 = vld [vmem:[#allocation2 + $0x119] sm:$0xff] }
 0xa7b   : > { %v11080_v56 = vpack.c.bf16 %v11052_v38, %v11051_v6 }
 0xa7e   : > { %13557 = vmatmul.mubr.msk.bf16.gmra.mrb[72].mxu1 %vm661_vm2, %v10756_v63  ;;  %v11077_v63 = vpack.c.bf16 %v11046_v41, %v11045_v5  ;;  %v11034_v41 = vld [vmem:[#allocation2 + $0xd1] sm:$0xff]  ;;  %v11033_v5 = vld [vmem:[#allocation2 + $0xc9] sm:$0xff] }
 0xa7f   : > { %13560 = vmatprep.mubr.msk.bf16.mxu1 %vm661_vm2, %v10757_v3  ;;  %v11016_v3 = vld [vmem:[#allocation2 + $0x41] sm:$0xff]  ;;  %v11065_v62 = vmul.f32 %v11033_v5, %v19698_v31 }
 0xa86   : > { %13561 = vmatmul.mubr.msk.bf16.gmra.mrb[76].mxu1 %vm661_vm2, %v10758_v48  ;;  %v11050_v48 = vmul.f32 %v11018_v46, %v19898_v8  ;;  %v11038_v46 = vld [vmem:[#allocation2 + $0xf1] sm:$0xff] }
 0xa87   : > { %13564 = vmatprep.mubr.msk.bf16.mxu1 %vm661_vm2, %v10759_v28 }
 0xa88   : > { %v11079_v28 = vpack.c.bf16 %v11050_v48, %v11049_v29  ;;  %v11039_v48 = vld [vmem:[#allocation2 + $0xf9] sm:$0xff]  ;;  %v11040_v29 = vld [vmem:[#allocation2 + $0x101] sm:$0xff] }
 0xa8e   : > { %13565 = vmatmul.mubr.msk.bf16.gmra.mrb[80].mxu1 %vm661_vm2, %v10760_v51  ;;  %v11021_v51 = vld [vmem:[#allocation2 + $0x69] sm:$0xff] }
 0xa8f   : > { %13568 = vmatprep.mubr.msk.bf16.mxu1 %vm661_vm2, %v10761_v52  ;;  %v11053_v8 = vmul.f32 %v11021_v51, %v19908_v40  ;;  %v11023_v52 = vld [vmem:[#allocation2 + $0x79] sm:$0xff] }
 0xa90   : > { %v11055_v10 = vmul.f32 %v11023_v52, %v19910_v27  ;;  %v11060_v27 = vmul.f32 %v11028_v11, %v19810_v44  ;;  %v11066_v44 = vmul.f32 %v11034_v41, %v19697_v21 }
 0xa92   : > { %v11082_v55 = vpack.c.bf16 %v11056_v47, %v11055_v10  ;;  %v11087_v2 = vpack.c.bf16 %v11066_v44, %v11065_v62 }
 0xa96   : > { %13569 = vmatmul.mubr.msk.bf16.gmra.mrb[84].mxu1 %vm661_vm2, %v10762_v24  ;;  %v11025_v24 = vld [vmem:[#allocation2 + $0x89] sm:$0xff] }
 0xa97   : > { %13572 = vmatprep.mubr.msk.bf16.mxu1 %vm661_vm2, %v10763_v54  ;;  %v11027_v54 = vld [vmem:[#allocation2 + $0x99] sm:$0xff] }
 0xa9e   : > { %13573 = vmatmul.mubr.msk.bf16.gmra.mrb[88].mxu1 %vm661_vm2, %v10764_v30  ;;  %v11059_v30 = vmul.f32 %v11027_v54, %v19808_v49  ;;  %v11064_v49 = vmul.f32 %v11032_v22, %v19924_v13  ;;  %v11070_v13 = vmul.f32 %v11038_v46, %v19932_v18  ;;  %v20087_v18 = vpack.c.bf16 %v18162_v32, %v18158_v33 }
 0xa9f   : > { %13576 = vmatprep.mubr.msk.bf16.mxu1 %vm661_vm2, %v18385_v60  ;;  %v11048_v60 = vmul.f32 %v11016_v3, %v19896_v15  ;;  %v11054_v15 = vmul.f32 %v11022_v26, %v19906_v34  ;;  %v11057_v34 = vmul.f32 %v11025_v24, %v19915_v25  ;;  %v11085_v25 = vpack.c.bf16 %v11062_v23, %v11061_v0  ;;  %v11036_v3 = vld [vmem:[#allocation2 + $0xe1] sm:$0xff] }
 0xaa0   : > { %v11084_v12 = vpack.c.bf16 %v11060_v27, %v11059_v30 }
 0xaa1   : > { %v11078_v45 = vpack.c.bf16 %v11048_v60, %v11047_v42  ;;  %v11081_v19 = vpack.c.bf16 %v11054_v15, %v11053_v8  ;;  %v11083_v40 = vpack.c.bf16 %v11058_v4, %v11057_v34  ;;  %v11067_v42 = vmul.f32 %v11035_v14, %v19928_v37  ;;  %v11037_v60 = vld [vmem:[#allocation2 + $0xe9] sm:$0xff] }
 0xaa2   : > { %v11069_v21 = vmul.f32 %v11037_v60, %v19934_v16  ;;  %v11075_v16 = vmul.f32 %v11043_v57, %v19942_v17 }
 0xaa4   : > { %v11089_v31 = vpack.c.bf16 %v11070_v13, %v11069_v21 }
 0xaa6   : > { %13577 = vmatmul.mubr.msk.bf16.gmra.mrb[92].mxu1 %vm661_vm2, %v10766_v58  ;;  %v11063_v58 = vmul.f32 %v11031_v53, %v19922_v20  ;;  %v11068_v20 = vmul.f32 %v11036_v3, %v19930_v59  ;;  %v11044_v59 = vld [vmem:[#allocation2 + $0x121] sm:$0xff] }
 0xaa7   : > { %13582 = vmatprep.mubr.msk.bf16.mxu1 %vm661_vm2, %v11077_v63  ;;  %v11076_v35 = vmul.f32 %v11044_v59, %v19944_v39 }
 0xaa8   : > { %v11086_v63 = vpack.c.bf16 %v11064_v49, %v11063_v58  ;;  %v11088_v61 = vpack.c.bf16 %v11068_v20, %v11067_v42 }
 0xaa9   : > { %v11092_v26 = vpack.c.bf16 %v11076_v35, %v11075_v16 }
 0xaae   : > { %13583 = vmatmul.mubr.msk.bf16.vlgmr.msra.gmra.mrb[64].mxu1 %vm661_vm2, %v11078_v45  ;;  %v11071_v45 = vmul.f32 %v11039_v48, %v19936_v9 }
 0xaaf   : > { %13586 = vmatprep.mubr.msk.bf16.mxu1 %vm661_vm2, %v11079_v28  ;;  %v11072_v28 = vmul.f32 %v11040_v29, %v19938_v43 }
 0xab1   : > { %v11090_v37 = vpack.c.bf16 %v11072_v28, %v11071_v45 }
 0xab6   : > { %13587 = vmatmul.mubr.msk.bf16.gmra.mrb[68].mxu1 %vm661_vm2, %v11080_v56 }
 0xab7   : > { %13590 = vmatprep.mubr.msk.bf16.mxu1 %vm661_vm2, %v11081_v19 }
 0xabe   : > { %13591 = vmatmul.mubr.msk.bf16.gmra.mrb[72].mxu1 %vm661_vm2, %v11082_v55 }
 0xabf   : > { %13594 = vmatprep.mubr.msk.bf16.mxu1 %vm661_vm2, %v11083_v40 }
 0xac6   : > { %13595 = vmatmul.mubr.msk.bf16.gmra.mrb[76].mxu1 %vm661_vm2, %v11084_v12 }
 0xac7   : > { %13598 = vmatprep.mubr.msk.bf16.mxu1 %vm661_vm2, %v11085_v25 }
 0xace   : > { %13599 = vmatmul.mubr.msk.bf16.gmra.mrb[80].mxu1 %vm661_vm2, %v11086_v63 }
 0xacf   : > { %13602 = vmatprep.mubr.msk.bf16.mxu1 %vm661_vm2, %v11087_v2 }
 0xad6   : > { %13603 = vmatmul.mubr.msk.bf16.gmra.mrb[84].mxu1 %vm661_vm2, %v11088_v61 }
 0xad7   : > { %13606 = vmatprep.mubr.msk.bf16.mxu1 %vm661_vm2, %v11089_v31 }
 0xade   : > { %13607 = vmatmul.mubr.msk.bf16.gmra.mrb[88].mxu1 %vm661_vm2, %v11090_v37 }
 0xadf   : > { %13610 = vmatprep.mubr.msk.bf16.mxu1 %vm661_vm2, %v20087_v18 }
 0xae6   : > { %13611 = vmatmul.mubr.msk.bf16.gmra.mrb[92].mxu1 %vm661_vm2, %v11092_v26 }
 0xb81   : > { %v13584_v9 = vpop.f32.mrb[64].mxu1 }
 0xb82   : > { %11375 = vrot.lane.b32.xlu0 %v13584_v9, %s14440_s24  ;;  %v11180_v43 = vpop.f32.mrb[65].mxu1 }
 0xb83   : > { %v13585_v6 = vpop.f32.mrb[66].mxu1 }
 0xb84   : > { %11377 = vrot.lane.b32.xlu1 %v13585_v6, %s14440_s24  ;;  %v11183_v38 = vpop.f32.mrb[67].mxu1 }
 0xb86   : > { %11371 = vrot.lane.b32.xlu0 %v11180_v43, %s14440_s24 }
 0xb88   : > { %11373 = vrot.lane.b32.xlu1 %v11183_v38, %s14440_s24 }
 0xb89   : > { %v13588_v33 = vpop.f32.mrb[68].mxu1 }
 0xb8a   : > { %11383 = vrot.lane.b32.xlu0 %v13588_v33, %s14440_s24  ;;  %v11196_v32 = vpop.f32.mrb[69].mxu1 }
 0xb8b   : > { %v13589_v17 = vpop.f32.mrb[70].mxu1 }
 0xb8c   : > { %11385 = vrot.lane.b32.xlu1 %v13589_v17, %s14440_s24  ;;  %v11199_v39 = vpop.f32.mrb[71].mxu1 }
 0xb8e   : > { %11379 = vrot.lane.b32.xlu0 %v11196_v32, %s14440_s24 }
 0xb90   : > { %11381 = vrot.lane.b32.xlu1 %v11199_v39, %s14440_s24 }
 0xb91   : > { %v13592_v51 = vpop.f32.mrb[72].mxu1 }
 0xb92   : > { %11391 = vrot.lane.b32.xlu0 %v13592_v51, %s14440_s24  ;;  %v11212_v15 = vpop.f32.mrb[73].mxu1 }
 0xb93   : > { %v13593_v8 = vpop.f32.mrb[74].mxu1 }
 0xb94   : > { %11393 = vrot.lane.b32.xlu1 %v13593_v8, %s14440_s24  ;;  %v11215_v56 = vpop.f32.mrb[75].mxu1 }
 0xb96   : > { %11387 = vrot.lane.b32.xlu0 %v11212_v15, %s14440_s24 }
 0xb98   : > { %11389 = vrot.lane.b32.xlu1 %v11215_v56, %s14440_s24 }
 0xb99   : > { %v13596_v19 = vpop.f32.mrb[76].mxu1 }
 0xb9a   : > { %11399 = vrot.lane.b32.xlu0 %v13596_v19, %s14440_s24  ;;  %v11228_v52 = vpop.f32.mrb[77].mxu1 }
 0xb9b   : > { %v13597_v1 = vpop.f32.mrb[78].mxu1 }
 0xb9c   : > { %11401 = vrot.lane.b32.xlu1 %v13597_v1, %s14440_s24  ;;  %v11231_v36 = vpop.f32.mrb[79].mxu1 }
 0xb9e   : > { %11395 = vrot.lane.b32.xlu0 %v11228_v52, %s14440_s24 }
 0xba0   : > { %11397 = vrot.lane.b32.xlu1 %v11231_v36, %s14440_s24 }
 0xba1   : > { %v13600_v10 = vpop.f32.mrb[80].mxu1 }
 0xba2   : > { %11407 = vrot.lane.b32.xlu0 %v13600_v10, %s14440_s24  ;;  %v11244_v47 = vpop.f32.mrb[81].mxu1 }
 0xba3   : > { %v13601_v24 = vpop.f32.mrb[82].mxu1 }
 0xba4   : > { %11409 = vrot.lane.b32.xlu1 %v13601_v24, %s14440_s24  ;;  %v11247_v4 = vpop.f32.mrb[83].mxu1 }
 0xba6   : > { %11403 = vrot.lane.b32.xlu0 %v11244_v47, %s14440_s24 }
 0xba8   : > { %11405 = vrot.lane.b32.xlu1 %v11247_v4, %s14440_s24 }
 0xba9   : > { %v13604_v34 = vpop.f32.mrb[84].mxu1 }
 0xbaa   : > { %11415 = vrot.lane.b32.xlu0 %v13604_v34, %s14440_s24  ;;  %v11260_v55 = vpop.f32.mrb[85].mxu1 }
 0xbab   : > { %v13605_v40 = vpop.f32.mrb[86].mxu1 }
 0xbac   : > { %11417 = vrot.lane.b32.xlu1 %v13605_v40, %s14440_s24  ;;  %v11263_v54 = vpop.f32.mrb[87].mxu1 }
 0xbae   : > { %11411 = vrot.lane.b32.xlu0 %v11260_v55, %s14440_s24 }
 0xbb0   : > { %11413 = vrot.lane.b32.xlu1 %v11263_v54, %s14440_s24 }
 0xbb1   : > { %v13608_v11 = vpop.f32.mrb[88].mxu1 }
 0xbb2   : > { %11423 = vrot.lane.b32.xlu0 %v13608_v11, %s14440_s24  ;;  %v11276_v7 = vpop.f32.mrb[89].mxu1 }
 0xbb3   : > { %v13609_v30 = vpop.f32.mrb[90].mxu1 }
 0xbb4   : > { %11425 = vrot.lane.b32.xlu1 %v13609_v30, %s14440_s24  ;;  %v11279_v27 = vpop.f32.mrb[91].mxu1 }
 0xbb6   : > { %11419 = vrot.lane.b32.xlu0 %v11276_v7, %s14440_s24 }
 0xbb8   : > { %11421 = vrot.lane.b32.xlu1 %v11279_v27, %s14440_s24 }
 0xbb9   : > { %v13612_v50 = vpop.f32.mrb[92].mxu1 }
 0xbba   : > { %v11292_v23 = vpop.f32.mrb[93].mxu1 }
 0xbbb   : > { %11427 = vrot.lane.b32.xlu0 %v11292_v23, %s14440_s24  ;;  %v13613_v0 = vpop.f32.mrb[94].mxu1 }
 0xbbc   : > { %v11295_v12 = vpop.f32.mrb[95].mxu1 }
 0xbbd   : > { %11429 = vrot.lane.b32.xlu1 %v11295_v12, %s14440_s24 }
 0xbbf   : > { %11431 = vrot.lane.b32.xlu0 %v13612_v50, %s14440_s24 }
 0xbc1   : > { %11433 = vrot.lane.b32.xlu1 %v13613_v0, %s14440_s24 }
 0xbf4   : > { %v11376_v25 = vpop.permute.xlu0 %11375 }
 0xbf5   : > { %11470 = vst.msk [vmem:[%s14582_s5 + $0x10] sm:$0xff] %vm11467_vm8, %v11376_v25 }
 0xbf6   : > { %v11378_v53 = vpop.permute.xlu1 %11377 }
 0xbf7   : > { %11471 = vst.msk [vmem:[%s14582_s5 + $0x18] sm:$0xff] %vm11467_vm8, %v11378_v53 }
 0xbf8   : > { %v11372_v22 = vpop.permute.xlu0 %11371 }
 0xbf9   : > { %11468 = vst.msk [vmem:[%s14582_s5] sm:$0xff] %vm11467_vm8, %v11372_v22 }
 0xbfa   : > { %v11374_v41 = vpop.permute.xlu1 %11373 }
 0xbfb   : > { %11469 = vst.msk [vmem:[%s14582_s5 + $0x8] sm:$0xff] %vm11467_vm8, %v11374_v41 }
 0xbfc   : > { %v11384_v58 = vpop.permute.xlu0 %11383 }
 0xbfd   : > { %11474 = vst.msk [vmem:[%s14582_s5 + $0x30] sm:$0xff] %vm11467_vm8, %v11384_v58 }
 0xbfe   : > { %v11386_v49 = vpop.permute.xlu1 %11385 }
 0xbff   : > { %11475 = vst.msk [vmem:[%s14582_s5 + $0x38] sm:$0xff] %vm11467_vm8, %v11386_v49 }
 0xc00   : > { %v11380_v5 = vpop.permute.xlu0 %11379 }
 0xc01   : > { %11472 = vst.msk [vmem:[%s14582_s5 + $0x20] sm:$0xff] %vm11467_vm8, %v11380_v5 }
 0xc02   : > { %v11382_v44 = vpop.permute.xlu1 %11381 }
 0xc03   : > { %11473 = vst.msk [vmem:[%s14582_s5 + $0x28] sm:$0xff] %vm11467_vm8, %v11382_v44 }
 0xc04   : > { %v11392_v62 = vpop.permute.xlu0 %11391 }
 0xc05   : > { %11478 = vst.msk [vmem:[%s14582_s5 + $0x50] sm:$0xff] %vm11467_vm8, %v11392_v62 }
 0xc06   : > { %v11394_v63 = vpop.permute.xlu1 %11393 }
 0xc07   : > { %11479 = vst.msk [vmem:[%s14582_s5 + $0x58] sm:$0xff] %vm11467_vm8, %v11394_v63 }
 0xc08   : > { %v11388_v2 = vpop.permute.xlu0 %11387 }
 0xc09   : > { %11476 = vst.msk [vmem:[%s14582_s5 + $0x40] sm:$0xff] %vm11467_vm8, %v11388_v2 }
 0xc0a   : > { %v11390_v14 = vpop.permute.xlu1 %11389 }
 0xc0b   : > { %11477 = vst.msk [vmem:[%s14582_s5 + $0x48] sm:$0xff] %vm11467_vm8, %v11390_v14 }
 0xc0c   : > { %v11400_v3 = vpop.permute.xlu0 %11399 }
 0xc0d   : > { %11482 = vst.msk [vmem:[%s14582_s5 + $0x70] sm:$0xff] %vm11467_vm8, %v11400_v3 }
 0xc0e   : > { %v11402_v46 = vpop.permute.xlu1 %11401 }
 0xc0f   : > { %11483 = vst.msk [vmem:[%s14582_s5 + $0x78] sm:$0xff] %vm11467_vm8, %v11402_v46 }
 0xc10   : > { %v11396_v42 = vpop.permute.xlu0 %11395 }
 0xc11   : > { %11480 = vst.msk [vmem:[%s14582_s5 + $0x60] sm:$0xff] %vm11467_vm8, %v11396_v42 }
 0xc12   : > { %v11398_v20 = vpop.permute.xlu1 %11397 }
 0xc13   : > { %11481 = vst.msk [vmem:[%s14582_s5 + $0x68] sm:$0xff] %vm11467_vm8, %v11398_v20 }
 0xc14   : > { %v11408_v60 = vpop.permute.xlu0 %11407 }
 0xc15   : > { %11486 = vst.msk [vmem:[%s14582_s5 + $0x90] sm:$0xff] %vm11467_vm8, %v11408_v60 }
 0xc16   : > { %v11410_v13 = vpop.permute.xlu1 %11409 }
 0xc17   : > { %11487 = vst.msk [vmem:[%s14582_s5 + $0x98] sm:$0xff] %vm11467_vm8, %v11410_v13 }
 0xc18   : > { %v11404_v21 = vpop.permute.xlu0 %11403 }
 0xc19   : > { %11484 = vst.msk [vmem:[%s14582_s5 + $0x80] sm:$0xff] %vm11467_vm8, %v11404_v21 }
 0xc1a   : > { %v11406_v61 = vpop.permute.xlu1 %11405 }
 0xc1b   : > { %11485 = vst.msk [vmem:[%s14582_s5 + $0x88] sm:$0xff] %vm11467_vm8, %v11406_v61 }
 0xc1c   : > { %v11416_v31 = vpop.permute.xlu0 %11415 }
 0xc1d   : > { %11490 = vst.msk [vmem:[%s14582_s5 + $0xb0] sm:$0xff] %vm11467_vm8, %v11416_v31 }
 0xc1e   : > { %v11418_v48 = vpop.permute.xlu1 %11417 }
 0xc1f   : > { %11491 = vst.msk [vmem:[%s14582_s5 + $0xb8] sm:$0xff] %vm11467_vm8, %v11418_v48 }
 0xc20   : > { %v11412_v29 = vpop.permute.xlu0 %11411 }
 0xc21   : > { %11488 = vst.msk [vmem:[%s14582_s5 + $0xa0] sm:$0xff] %vm11467_vm8, %v11412_v29 }
 0xc22   : > { %v11414_v45 = vpop.permute.xlu1 %11413 }
 0xc23   : > { %11489 = vst.msk [vmem:[%s14582_s5 + $0xa8] sm:$0xff] %vm11467_vm8, %v11414_v45 }
 0xc24   : > { %v11424_v28 = vpop.permute.xlu0 %11423 }
 0xc25   : > { %11494 = vst.msk [vmem:[%s14582_s5 + $0xd0] sm:$0xff] %vm11467_vm8, %v11424_v28 }
 0xc26   : > { %v11426_v37 = vpop.permute.xlu1 %11425 }
 0xc27   : > { %11495 = vst.msk [vmem:[%s14582_s5 + $0xd8] sm:$0xff] %vm11467_vm8, %v11426_v37 }
 0xc28   : > { %v11420_v57 = vpop.permute.xlu0 %11419 }
 0xc29   : > { %11492 = vst.msk [vmem:[%s14582_s5 + $0xc0] sm:$0xff] %vm11467_vm8, %v11420_v57 }
 0xc2a   : > { %v11422_v59 = vpop.permute.xlu1 %11421 }
 0xc2b   : > { %11493 = vst.msk [vmem:[%s14582_s5 + $0xc8] sm:$0xff] %vm11467_vm8, %v11422_v59 }
 0xc2d   : > { %v11428_v18 = vpop.permute.xlu0 %11427 }
 0xc2e   : > { %11496 = vst.msk [vmem:[%s14582_s5 + $0xe0] sm:$0xff] %vm11467_vm8, %v11428_v18 }
 0xc2f   : > { %v11430_v16 = vpop.permute.xlu1 %11429 }
 0xc30   : > { %11497 = vst.msk [vmem:[%s14582_s5 + $0xe8] sm:$0xff] %vm11467_vm8, %v11430_v16 }
 0xc31   : > { %v11432_v35 = vpop.permute.xlu0 %11431 }
 0xc32   : > { %11498 = vst.msk [vmem:[%s14582_s5 + $0xf0] sm:$0xff] %vm11467_vm8, %v11432_v35 }
 0xc33   : > { %v11434_v26 = vpop.permute.xlu1 %11433 }
 0xc34   : > { %11499 = vst.msk [vmem:[%s14582_s5 + $0xf8] sm:$0xff] %vm11467_vm8, %v11434_v26 }
 0xc35 PF: > { %s31_s2 = sadd.s32 1, %s14434_s2  }
 0xc36   : > { %p28_p4 = scmp.ge.s32.totalorder %s31_s2, 4  }
 0xc38   :  { %30 = sbr.rel (!%p28_p4) target bundleno = 7 (0x7), region = 158 }

</bundles_post_ra>
